<compile_context>
chip_gen: v5e
topology: v5e:2x2
jax: 0.10.0
libtpu: 0.0.40
codegen_flags: <defaults>
</compile_context>

<pallas_src>
import functools

import jax
import jax.numpy as jnp
import numpy as np
from jax.experimental import pallas as pl
from jax.experimental.pallas import tpu as pltpu


# ----------------------------------------------------------------------------
# pltpu.roll sign-convention probe (run once, outside jit), on the bf16 layout
# actually used in the kernel.  Falls back to a concatenate-based rotation
# (correct, just slower) if the hardware rotate is unavailable or surprising.
# ----------------------------------------------------------------------------
_HW_ROLL_CFG = None


def _probe_hw_roll():
    rows = 32
    x = jnp.broadcast_to(
        jnp.arange(rows, dtype=jnp.float32)[:, None], (rows, 256)
    ).astype(jnp.bfloat16)

    def kern(x_ref, o_ref):
        o_ref[...] = pltpu.roll(x_ref[...], 1, 0)

    try:
        out = pl.pallas_call(
            kern, out_shape=jax.ShapeDtypeStruct(x.shape, x.dtype)
        )(x)
        out = np.asarray(jax.block_until_ready(out)).astype(np.float32)
    except Exception:
        return False, 1
    xn = np.asarray(x).astype(np.float32)
    if np.array_equal(out, np.roll(xn, 1, axis=0)):
        return True, 1
    if np.array_equal(out, np.roll(xn, -1, axis=0)):
        return True, -1
    return False, 1


def _hw_roll_config():
    global _HW_ROLL_CFG
    if _HW_ROLL_CFG is None:
        _HW_ROLL_CFG = _probe_hw_roll()
    return _HW_ROLL_CFG


def _round_up(n, m):
    return (n + m - 1) // m * m


def _vmem_capacity_bytes():
    try:
        return int(pltpu.get_tpu_info().vmem_capacity_bytes)
    except Exception:
        return 64 << 20  # conservative (v7x per-TensorCore VMEM)


# ----------------------------------------------------------------------------
# Fused kernel: one grid step == Bt batch elements, all layers.
# ----------------------------------------------------------------------------
def _fused_cnn_kernel(
    x_ref,      # (Bt, S, Cin)       input block (x dtype)
    w1_ref,     # (K, Cin, 256)      bf16  conv1 (K=5) + conv2 (K=3) packed per tap
    b1_ref,     # (1, 256)           f32
    wseq_ref,   # (Lx, K, 256, 256)  bf16  seq-layer per-tap weights
    bseq_ref,   # (Lx, 1, 256)       f32
    o_ref,      # (Bt, S, 256)       output block
    xbuf_ref,   # (Bt*Sbuf, Cin)     bf16 scratch (zero-tail-padded input)
    a0_ref,     # (Bt*Sbuf, 256)     bf16 scratch (activation ping)
    a1_ref,     # (Bt*Sbuf, 256)     bf16 scratch (activation pong)
    *,
    num_seq_layers,
    pad,
    sbuf,
    use_hw_roll,
    hw_roll_sign,
):
    Bt, S, Cin = x_ref.shape
    C = o_ref.shape[2]
    K = w1_ref.shape[0]
    tail = sbuf - S            # >= pad zero rows per batch block

    def rotate_rows(v, shift):
        # Semantics of jnp.roll(v, shift, axis=0); XLU sublane rotate when available.
        n = v.shape[0]
        shift = shift % n
        if shift == 0:
            return v
        if use_hw_roll:
            hw_shift = shift if hw_roll_sign > 0 else (n - shift)
            return pltpu.roll(v, hw_shift, 0)
        return jnp.concatenate([v[n - shift:], v[:n - shift]], axis=0)

    # Stage the raw input into per-batch blocks of `sbuf` rows; rows [S, sbuf)
    # are zero so the circular row rotations below read correct "same"-padding
    # at BOTH sequence boundaries and never mix batch elements (tail >= pad).
    for b in range(Bt):
        xbuf_ref[pl.ds(b * sbuf, S), :] = x_ref[b].astype(jnp.bfloat16)
        xbuf_ref[pl.ds(b * sbuf + S, tail), :] = jnp.zeros((tail, Cin), jnp.bfloat16)

    def conv_layer(src_bf16, get_tap_w, bias):
        # y = relu( sum_k rotate(src, pad - k) @ W_k  + bias ), f32 accumulation.
        acc = None
        for k in range(K):                     # static unroll over taps
            xk = rotate_rows(src_bf16, pad - k)
            contrib = jnp.dot(xk, get_tap_w(k), preferred_element_type=jnp.float32)
            acc = contrib if acc is None else acc + contrib
        return jnp.maximum(acc + bias, 0.0)

    def store_hidden(dst_ref, y):
        dst_ref[...] = y.astype(jnp.bfloat16)
        # Re-zero only the tail rows (the next layer's rolls read them as padding).
        for b in range(Bt):
            dst_ref[pl.ds(b * sbuf + S, tail), :] = jnp.zeros((tail, C), jnp.bfloat16)

    def store_output(y):
        for b in range(Bt):
            o_ref[b] = y[b * sbuf:b * sbuf + S, :].astype(o_ref.dtype)

    # ---- layer 1: conv1 (K=5, Cin->128) & conv2 (K=3, Cin->128) fused -------
    y = conv_layer(xbuf_ref[...], lambda k: w1_ref[k], b1_ref[...])
    if num_seq_layers == 0:
        store_output(y)
        return
    store_hidden(a0_ref, y)

    # ---- seq layers: Conv1d(256 -> 256, K=5, pad=2) + bias + ReLU ------------
    bufs = (a0_ref, a1_ref)
    for l in range(num_seq_layers):            # static unroll (small layer count)
        src = bufs[l % 2]
        y = conv_layer(src[...], lambda k, l=l: wseq_ref[l, k], bseq_ref[l])
        if l == num_seq_layers - 1:
            store_output(y)                    # write straight to o_ref
        else:
            store_hidden(bufs[(l + 1) % 2], y)


# ----------------------------------------------------------------------------
# Wrapper
# ----------------------------------------------------------------------------
@functools.partial(
    jax.jit, static_argnames=("num_layer", "use_hw_roll", "hw_roll_sign")
)
def _forward_impl(x, params, num_layer, use_hw_roll, hw_roll_sign):
    B, S, Cin = x.shape
    C = 256
    K = 5                      # widest kernel; conv2 (K=3) lives in its centre taps
    PAD = K // 2
    Lm1 = num_layer - 1

    # -- pack layer-1 weights: conv1 & conv2 fused into (K, Cin, 256) per tap --
    w1_t = jnp.transpose(params["conv1_w"], (2, 1, 0))            # (5, Cin, 128)
    w2_t = jnp.transpose(params["conv2_w"], (2, 1, 0))            # (3, Cin, 128)
    w2_t = jnp.pad(w2_t, ((1, 1), (0, 0), (0, 0)))                # centre-align K=3
    w_l1 = jnp.concatenate([w1_t, w2_t], axis=-1).astype(jnp.bfloat16)   # (5, Cin, 256)
    b_l1 = jnp.concatenate([params["conv1_b"], params["conv2_b"]])
    b_l1 = b_l1.reshape(1, C).astype(jnp.float32)

    # -- seq-layer weights as per-tap (Cin, Cout) matrices (bf16) --------------
    if Lm1 > 0:
        w_seq = jnp.stack(
            [jnp.transpose(params[f"seq{i}_w"], (2, 1, 0)) for i in range(Lm1)]
        ).astype(jnp.bfloat16)                                    # (Lm1, 5, 256, 256)
        b_seq = jnp.stack(
            [params[f"seq{i}_b"].reshape(1, C) for i in range(Lm1)]
        ).astype(jnp.float32)                                     # (Lm1, 1, 256)
    else:  # tiny unused dummies to keep the pallas signature uniform
        w_seq = jnp.zeros((1, 1, 8, 128), jnp.bfloat16)
        b_seq = jnp.zeros((1, 1, 128), jnp.float32)

    # -- batch folding into the matmul M dimension ------------------------------
    Sbuf = _round_up(S + PAD, 16)              # per-block rows incl. zero tail
    Bt = max(1, min(B, max(1, 512 // Sbuf)))   # target M ~512 per matmul
    while B % Bt:                              # keep the batch grid exact
        Bt -= 1
    Mfold = Bt * Sbuf

    out_dtype = x.dtype
    out_isize = jnp.dtype(out_dtype).itemsize
    x_isize = jnp.dtype(x.dtype).itemsize

    # -- cost estimate & generation-aware VMEM budget ---------------------------
    flops = 2 * B * S * K * Cin * C + 2 * B * S * K * C * C * Lm1
    bytes_accessed = (
        x.size * x_isize + w_l1.size * 2 + b_l1.size * 4
        + w_seq.size * 2 + b_seq.size * 4 + B * S * C * out_isize
    )
    vmem_bytes = (
        2 * Bt * S * Cin * x_isize                        # input block, double-buffered
        + 2 * (w_l1.size * 2 + b_l1.size * 4 + w_seq.size * 2 + b_seq.size * 4)
        + 2 * Bt * S * C * out_isize                      # output block, double-buffered
        + Mfold * Cin * 2 + 2 * Mfold * C * 2             # bf16 scratch (xbuf, a0, a1)
        + 6 * Mfold * C * 4                               # live rolled copies + f32 partials
    )
    vmem_cap = _vmem_capacity_bytes()
    vmem_limit = min(int(vmem_bytes) + (16 << 20), int(0.9 * vmem_cap))
    vmem_limit = max(vmem_limit, 4 << 20)

    kernel = functools.partial(
        _fused_cnn_kernel,
        num_seq_layers=Lm1,
        pad=PAD,
        sbuf=Sbuf,
        use_hw_roll=use_hw_roll,
        hw_roll_sign=hw_roll_sign,
    )

    return pl.pallas_call(
        kernel,
        out_shape=jax.ShapeDtypeStruct((B, S, C), out_dtype),
        grid_spec=pltpu.PrefetchScalarGridSpec(
            num_scalar_prefetch=0,
            grid=(B // Bt,),
            in_specs=[
                pl.BlockSpec((Bt, S, Cin), lambda i: (i, 0, 0)),
                pl.BlockSpec(w_l1.shape, lambda i: (0, 0, 0)),
                pl.BlockSpec(b_l1.shape, lambda i: (0, 0)),
                pl.BlockSpec(w_seq.shape, lambda i: (0, 0, 0, 0)),
                pl.BlockSpec(b_seq.shape, lambda i: (0, 0, 0)),
            ],
            out_specs=pl.BlockSpec((Bt, S, C), lambda i: (i, 0, 0)),
            scratch_shapes=[
                pltpu.VMEM((Mfold, Cin), jnp.bfloat16),
                pltpu.VMEM((Mfold, C), jnp.bfloat16),
                pltpu.VMEM((Mfold, C), jnp.bfloat16),
            ],
        ),
        compiler_params=pltpu.CompilerParams(
            dimension_semantics=("parallel",),
            vmem_limit_bytes=int(vmem_limit),
        ),
        cost_estimate=pl.CostEstimate(
            flops=int(flops),
            transcendentals=0,
            bytes_accessed=int(bytes_accessed),
        ),
    )(x, w_l1, b_l1, w_seq, b_seq)


def multi_layer_cnn_forward(x, params, num_layer=4):
    """Forward pass of MultiLayerCNN.  x: (B, S, input_size) -> (B, S, 256)."""
    use_hw_roll, hw_roll_sign = _hw_roll_config()   # eager, cached, outside jit
    return _forward_impl(
        x, params, num_layer=num_layer,
        use_hw_roll=use_hw_roll, hw_roll_sign=hw_roll_sign,
    )


# ----------------------------------------------------------------------------
# Parameter init (PyTorch Conv1d-style shapes & bounds) and pure-JAX reference.
# ----------------------------------------------------------------------------
def init_params(key, input_size, num_layer=4, dtype=jnp.float32):
    params = {}

    def _conv_init(key, cout, cin, k):
        kw, kb = jax.random.split(key)
        bound = 1.0 / np.sqrt(cin * k)
        w = jax.random.uniform(kw, (cout, cin, k), dtype, -bound, bound)
        b = jax.random.uniform(kb, (cout,), dtype, -bound, bound)
        return w, b

    keys = jax.random.split(key, num_layer + 1)
    params["conv1_w"], params["conv1_b"] = _conv_init(keys[0], 128, input_size, 5)
    params["conv2_w"], params["conv2_b"] = _conv_init(keys[1], 128, input_size, 3)
    for i in range(num_layer - 1):
        params[f"seq{i}_w"], params[f"seq{i}_b"] = _conv_init(keys[2 + i], 256, 256, 5)
    return params


def _reference_forward(x, params, num_layer=4):
    def conv(x, w, b):
        w_t = jnp.transpose(w, (2, 1, 0))   # (K, Cin, Cout) -> 'WIO'
        y = jax.lax.conv_general_dilated(
            x, w_t, window_strides=(1,), padding="SAME",
            dimension_numbers=("NWC", "WIO", "NWC"))
        return jnp.maximum(y + b[None, None, :], 0.0)

    y = jnp.concatenate(
        [conv(x, params["conv1_w"], params["conv1_b"]),
         conv(x, params["conv2_w"], params["conv2_b"])], axis=-1)
    for i in range(num_layer - 1):
        y = conv(y, params[f"seq{i}_w"], params[f"seq{i}_b"])
    return y


if __name__ == "__main__":
    key = jax.random.PRNGKey(0)
    k_param, k_x = jax.random.split(key)

    batch, seq_len, input_size, num_layer = 2, 16, 32, 4
    params = init_params(k_param, input_size, num_layer)
    x = jax.random.normal(k_x, (batch, seq_len, input_size), jnp.float32)

    out = multi_layer_cnn_forward(x, params, num_layer=num_layer)
    out = jax.block_until_ready(out)
    assert out.shape == (batch, seq_len, 256), out.shape

    ref = jax.block_until_ready(_reference_forward(x, params, num_layer))
    # bf16 MXU operands (f32 accumulation) -> relaxed tolerance vs f32 reference.
    np.testing.assert_allclose(np.asarray(out), np.asarray(ref), rtol=2e-2, atol=2e-2)

    print("KERNEL_OK")
</pallas_src>

<mosaic_0001>
module attributes {stable_mosaic.version = 11 : i64} {
  func.func @kern(%arg0: memref<32x256xbf16, #tpu.memory_space<vmem>>, %arg1: memref<32x256xbf16, #tpu.memory_space<vmem>>) attributes {dimension_semantics = [], scalar_prefetch = 0 : i64, scratch_operands = 0 : i64, tpu.core_type = #tpu.core_type<tc>} {
    %c0 = arith.constant 0 : index
    %c0_0 = arith.constant 0 : index
    %0 = vector.load %arg0[%c0, %c0_0] : memref<32x256xbf16, #tpu.memory_space<vmem>>, vector<32x256xbf16>
    %c1_i32 = arith.constant 1 : i32
    %1 = tpu.dynamic_rotate %0 by %c1_i32 dim 0 : vector<32x256xbf16>, i32 -> vector<32x256xbf16>
    %c0_1 = arith.constant 0 : index
    %c0_2 = arith.constant 0 : index
    %2 = vector.load %arg1[%c0_1, %c0_2] : memref<32x256xbf16, #tpu.memory_space<vmem>>, vector<32x256xbf16>
    tpu.vector_store %arg1[%c0_1, %c0_2], %1 {strides = array<i32>} : memref<32x256xbf16, #tpu.memory_space<vmem>>, vector<32x256xbf16>,
    return
  }
}

module attributes {stable_mosaic.version = 11 : i64} {
  func.func @_fused_cnn_kernel(%arg0: i32, %arg1: memref<2x16x32xf32, #tpu.memory_space<vmem>>, %arg2: memref<5x32x256xbf16, #tpu.memory_space<vmem>>, %arg3: memref<1x256xf32, #tpu.memory_space<vmem>>, %arg4: memref<3x5x256x256xbf16, #tpu.memory_space<vmem>>, %arg5: memref<3x1x256xf32, #tpu.memory_space<vmem>>, %arg6: memref<2x16x256xf32, #tpu.memory_space<vmem>>, %arg7: memref<64x32xbf16, #tpu.memory_space<vmem>>, %arg8: memref<64x256xbf16, #tpu.memory_space<vmem>>, %arg9: memref<64x256xbf16, #tpu.memory_space<vmem>>) attributes {dimension_semantics = [#tpu.dimension_semantics<parallel>], iteration_bounds = array<i64: 1>, scalar_prefetch = 0 : i64, scratch_operands = 3 : i64, tpu.core_type = #tpu.core_type<tc>, window_params = [{transform_indices = @transform_0, window_bounds = array<i64: 2, 16, 32>}, {pipeline_mode = #tpu.pipeline_mode<synchronous>, transform_indices = @transform_1, window_bounds = array<i64: 5, 32, 256>}, {pipeline_mode = #tpu.pipeline_mode<synchronous>, transform_indices = @transform_2, window_bounds = array<i64: 1, 256>}, {pipeline_mode = #tpu.pipeline_mode<synchronous>, transform_indices = @transform_3, window_bounds = array<i64: 3, 5, 256, 256>}, {pipeline_mode = #tpu.pipeline_mode<synchronous>, transform_indices = @transform_4, window_bounds = array<i64: 3, 1, 256>}, {transform_indices = @transform_5, window_bounds = array<i64: 2, 16, 256>}]} {
    %c0 = arith.constant 0 : index
    %c0_0 = arith.constant 0 : index
    %c0_1 = arith.constant 0 : index
    %0 = vector.load %arg1[%c0, %c0_0, %c0_1] : memref<2x16x32xf32, #tpu.memory_space<vmem>>, vector<1x16x32xf32>
    %1 = vector.shape_cast %0 : vector<1x16x32xf32> to vector<16x32xf32>
    %2 = arith.truncf %1 : vector<16x32xf32> to vector<16x32xbf16>
    %c0_2 = arith.constant 0 : index
    %c0_3 = arith.constant 0 : index
    %3 = vector.load %arg7[%c0_2, %c0_3] : memref<64x32xbf16, #tpu.memory_space<vmem>>, vector<16x32xbf16>
    tpu.vector_store %arg7[%c0_2, %c0_3], %2 {strides = array<i32>} : memref<64x32xbf16, #tpu.memory_space<vmem>>, vector<16x32xbf16>,
    %cst = arith.constant 0.000000e+00 : bf16
    %4 = vector.broadcast %cst : bf16 to vector<16x32xbf16>
    %c16 = arith.constant 16 : index
    %c0_4 = arith.constant 0 : index
    %5 = vector.load %arg7[%c16, %c0_4] : memref<64x32xbf16, #tpu.memory_space<vmem>>, vector<16x32xbf16>
    tpu.vector_store %arg7[%c16, %c0_4], %4 {strides = array<i32>} : memref<64x32xbf16, #tpu.memory_space<vmem>>, vector<16x32xbf16>,
    %c1 = arith.constant 1 : index
    %c0_5 = arith.constant 0 : index
    %c0_6 = arith.constant 0 : index
    %6 = vector.load %arg1[%c1, %c0_5, %c0_6] : memref<2x16x32xf32, #tpu.memory_space<vmem>>, vector<1x16x32xf32>
    %7 = vector.shape_cast %6 : vector<1x16x32xf32> to vector<16x32xf32>
    %8 = arith.truncf %7 : vector<16x32xf32> to vector<16x32xbf16>
    %c32 = arith.constant 32 : index
    %c0_7 = arith.constant 0 : index
    %9 = vector.load %arg7[%c32, %c0_7] : memref<64x32xbf16, #tpu.memory_space<vmem>>, vector<16x32xbf16>
    tpu.vector_store %arg7[%c32, %c0_7], %8 {strides = array<i32>} : memref<64x32xbf16, #tpu.memory_space<vmem>>, vector<16x32xbf16>,
    %cst_8 = arith.constant 0.000000e+00 : bf16
    %10 = vector.broadcast %cst_8 : bf16 to vector<16x32xbf16>
    %c48 = arith.constant 48 : index
    %c0_9 = arith.constant 0 : index
    %11 = vector.load %arg7[%c48, %c0_9] : memref<64x32xbf16, #tpu.memory_space<vmem>>, vector<16x32xbf16>
    tpu.vector_store %arg7[%c48, %c0_9], %10 {strides = array<i32>} : memref<64x32xbf16, #tpu.memory_space<vmem>>, vector<16x32xbf16>,
    %c0_10 = arith.constant 0 : index
    %c0_11 = arith.constant 0 : index
    %12 = vector.load %arg7[%c0_10, %c0_11] : memref<64x32xbf16, #tpu.memory_space<vmem>>, vector<64x32xbf16>
    %c0_12 = arith.constant 0 : index
    %c0_13 = arith.constant 0 : index
    %13 = vector.load %arg3[%c0_12, %c0_13] : memref<1x256xf32, #tpu.memory_space<vmem>>, vector<1x256xf32>
    %14 = vector.extract_strided_slice %12 {offsets = [62, 0], sizes = [2, 32], strides = [1, 1]} : vector<64x32xbf16> to vector<2x32xbf16>
    %15 = vector.extract_strided_slice %12 {offsets = [0, 0], sizes = [62, 32], strides = [1, 1]} : vector<64x32xbf16> to vector<62x32xbf16>
    %16 = tpu.concatenate %14, %15 in 0 : vector<2x32xbf16>, vector<62x32xbf16> -> vector<64x32xbf16>
    %c0_14 = arith.constant 0 : index
    %c0_15 = arith.constant 0 : index
    %c0_16 = arith.constant 0 : index
    %17 = vector.load %arg2[%c0_14, %c0_15, %c0_16] : memref<5x32x256xbf16, #tpu.memory_space<vmem>>, vector<1x32x256xbf16>
    %18 = vector.shape_cast %17 : vector<1x32x256xbf16> to vector<32x256xbf16>
    %cst_17 = arith.constant dense<0.000000e+00> : vector<64x256xf32>
    %19 = tpu.matmul %16, %18, %cst_17 {dimension_numbers = #tpu.dot_dimension_numbers<[1], [0], [0], [1], [0, 0, 1, 1], [], []>} : vector<64x32xbf16>, vector<32x256xbf16>, vector<64x256xf32> -> vector<64x256xf32>
    %20 = vector.extract_strided_slice %12 {offsets = [63, 0], sizes = [1, 32], strides = [1, 1]} : vector<64x32xbf16> to vector<1x32xbf16>
    %21 = vector.extract_strided_slice %12 {offsets = [0, 0], sizes = [63, 32], strides = [1, 1]} : vector<64x32xbf16> to vector<63x32xbf16>
    %22 = tpu.concatenate %20, %21 in 0 : vector<1x32xbf16>, vector<63x32xbf16> -> vector<64x32xbf16>
    %c1_18 = arith.constant 1 : index
    %c0_19 = arith.constant 0 : index
    %c0_20 = arith.constant 0 : index
    %23 = vector.load %arg2[%c1_18, %c0_19, %c0_20] : memref<5x32x256xbf16, #tpu.memory_space<vmem>>, vector<1x32x256xbf16>
    %24 = vector.shape_cast %23 : vector<1x32x256xbf16> to vector<32x256xbf16>
    %cst_21 = arith.constant dense<0.000000e+00> : vector<64x256xf32>
    %25 = tpu.matmul %22, %24, %cst_21 {dimension_numbers = #tpu.dot_dimension_numbers<[1], [0], [0], [1], [0, 0, 1, 1], [], []>} : vector<64x32xbf16>, vector<32x256xbf16>, vector<64x256xf32> -> vector<64x256xf32>
    %26 = arith.addf %19, %25 : vector<64x256xf32>
    %c2 = arith.constant 2 : index
    %c0_22 = arith.constant 0 : index
    %c0_23 = arith.constant 0 : index
    %27 = vector.load %arg2[%c2, %c0_22, %c0_23] : memref<5x32x256xbf16, #tpu.memory_space<vmem>>, vector<1x32x256xbf16>
    %28 = vector.shape_cast %27 : vector<1x32x256xbf16> to vector<32x256xbf16>
    %cst_24 = arith.constant dense<0.000000e+00> : vector<64x256xf32>
    %29 = tpu.matmul %12, %28, %cst_24 {dimension_numbers = #tpu.dot_dimension_numbers<[1], [0], [0], [1], [0, 0, 1, 1], [], []>} : vector<64x32xbf16>, vector<32x256xbf16>, vector<64x256xf32> -> vector<64x256xf32>
    %30 = arith.addf %26, %29 : vector<64x256xf32>
    %31 = vector.extract_strided_slice %12 {offsets = [1, 0], sizes = [63, 32], strides = [1, 1]} : vector<64x32xbf16> to vector<63x32xbf16>
    %32 = vector.extract_strided_slice %12 {offsets = [0, 0], sizes = [1, 32], strides = [1, 1]} : vector<64x32xbf16> to vector<1x32xbf16>
    %33 = tpu.concatenate %31, %32 in 0 : vector<63x32xbf16>, vector<1x32xbf16> -> vector<64x32xbf16>
    %c3 = arith.constant 3 : index
    %c0_25 = arith.constant 0 : index
    %c0_26 = arith.constant 0 : index
    %34 = vector.load %arg2[%c3, %c0_25, %c0_26] : memref<5x32x256xbf16, #tpu.memory_space<vmem>>, vector<1x32x256xbf16>
    %35 = vector.shape_cast %34 : vector<1x32x256xbf16> to vector<32x256xbf16>
    %cst_27 = arith.constant dense<0.000000e+00> : vector<64x256xf32>
    %36 = tpu.matmul %33, %35, %cst_27 {dimension_numbers = #tpu.dot_dimension_numbers<[1], [0], [0], [1], [0, 0, 1, 1], [], []>} : vector<64x32xbf16>, vector<32x256xbf16>, vector<64x256xf32> -> vector<64x256xf32>
    %37 = arith.addf %30, %36 : vector<64x256xf32>
    %38 = vector.extract_strided_slice %12 {offsets = [2, 0], sizes = [62, 32], strides = [1, 1]} : vector<64x32xbf16> to vector<62x32xbf16>
    %39 = vector.extract_strided_slice %12 {offsets = [0, 0], sizes = [2, 32], strides = [1, 1]} : vector<64x32xbf16> to vector<2x32xbf16>
    %40 = tpu.concatenate %38, %39 in 0 : vector<62x32xbf16>, vector<2x32xbf16> -> vector<64x32xbf16>
    %c4 = arith.constant 4 : index
    %c0_28 = arith.constant 0 : index
    %c0_29 = arith.constant 0 : index
    %41 = vector.load %arg2[%c4, %c0_28, %c0_29] : memref<5x32x256xbf16, #tpu.memory_space<vmem>>, vector<1x32x256xbf16>
    %42 = vector.shape_cast %41 : vector<1x32x256xbf16> to vector<32x256xbf16>
    %cst_30 = arith.constant dense<0.000000e+00> : vector<64x256xf32>
    %43 = tpu.matmul %40, %42, %cst_30 {dimension_numbers = #tpu.dot_dimension_numbers<[1], [0], [0], [1], [0, 0, 1, 1], [], []>} : vector<64x32xbf16>, vector<32x256xbf16>, vector<64x256xf32> -> vector<64x256xf32>
    %44 = arith.addf %37, %43 : vector<64x256xf32>
    %45 = vector.broadcast %13 : vector<1x256xf32> to vector<64x256xf32>
    %46 = arith.addf %44, %45 : vector<64x256xf32>
    %cst_31 = arith.constant 0.000000e+00 : f32
    %47 = vector.broadcast %cst_31 : f32 to vector<64x256xf32>
    %48 = arith.maximumf %46, %47 : vector<64x256xf32>
    %49 = arith.truncf %48 : vector<64x256xf32> to vector<64x256xbf16>
    %c0_32 = arith.constant 0 : index
    %c0_33 = arith.constant 0 : index
    %50 = vector.load %arg8[%c0_32, %c0_33] : memref<64x256xbf16, #tpu.memory_space<vmem>>, vector<64x256xbf16>
    tpu.vector_store %arg8[%c0_32, %c0_33], %49 {strides = array<i32>} : memref<64x256xbf16, #tpu.memory_space<vmem>>, vector<64x256xbf16>,
    %cst_34 = arith.constant 0.000000e+00 : bf16
    %51 = vector.broadcast %cst_34 : bf16 to vector<16x256xbf16>
    %c16_35 = arith.constant 16 : index
    %c0_36 = arith.constant 0 : index
    %52 = vector.load %arg8[%c16_35, %c0_36] : memref<64x256xbf16, #tpu.memory_space<vmem>>, vector<16x256xbf16>
    tpu.vector_store %arg8[%c16_35, %c0_36], %51 {strides = array<i32>} : memref<64x256xbf16, #tpu.memory_space<vmem>>, vector<16x256xbf16>,
    %cst_37 = arith.constant 0.000000e+00 : bf16
    %53 = vector.broadcast %cst_37 : bf16 to vector<16x256xbf16>
    %c48_38 = arith.constant 48 : index
    %c0_39 = arith.constant 0 : index
    %54 = vector.load %arg8[%c48_38, %c0_39] : memref<64x256xbf16, #tpu.memory_space<vmem>>, vector<16x256xbf16>
    tpu.vector_store %arg8[%c48_38, %c0_39], %53 {strides = array<i32>} : memref<64x256xbf16, #tpu.memory_space<vmem>>, vector<16x256xbf16>,
    %c0_40 = arith.constant 0 : index
    %c0_41 = arith.constant 0 : index
    %55 = vector.load %arg8[%c0_40, %c0_41] : memref<64x256xbf16, #tpu.memory_space<vmem>>, vector<64x256xbf16>
    %c0_42 = arith.constant 0 : index
    %c0_43 = arith.constant 0 : index
    %c0_44 = arith.constant 0 : index
    %56 = vector.load %arg5[%c0_42, %c0_43, %c0_44] : memref<3x1x256xf32, #tpu.memory_space<vmem>>, vector<1x1x256xf32>
    %57 = vector.shape_cast %56 : vector<1x1x256xf32> to vector<1x256xf32>
    %58 = vector.extract_strided_slice %55 {offsets = [62, 0], sizes = [2, 256], strides = [1, 1]} : vector<64x256xbf16> to vector<2x256xbf16>
    %59 = vector.extract_strided_slice %55 {offsets = [0, 0], sizes = [62, 256], strides = [1, 1]} : vector<64x256xbf16> to vector<62x256xbf16>
    %60 = tpu.concatenate %58, %59 in 0 : vector<2x256xbf16>, vector<62x256xbf16> -> vector<64x256xbf16>
    %c0_45 = arith.constant 0 : index
    %c0_46 = arith.constant 0 : index
    %c0_47 = arith.constant 0 : index
    %c0_48 = arith.constant 0 : index
    %61 = vector.load %arg4[%c0_45, %c0_46, %c0_47, %c0_48] : memref<3x5x256x256xbf16, #tpu.memory_space<vmem>>, vector<1x1x256x256xbf16>
    %62 = vector.shape_cast %61 : vector<1x1x256x256xbf16> to vector<256x256xbf16>
    %cst_49 = arith.constant dense<0.000000e+00> : vector<64x256xf32>
    %63 = tpu.matmul %60, %62, %cst_49 {dimension_numbers = #tpu.dot_dimension_numbers<[1], [0], [0], [1], [0, 0, 1, 1], [], []>} : vector<64x256xbf16>, vector<256x256xbf16>, vector<64x256xf32> -> vector<64x256xf32>
    %64 = vector.extract_strided_slice %55 {offsets = [63, 0], sizes = [1, 256], strides = [1, 1]} : vector<64x256xbf16> to vector<1x256xbf16>
    %65 = vector.extract_strided_slice %55 {offsets = [0, 0], sizes = [63, 256], strides = [1, 1]} : vector<64x256xbf16> to vector<63x256xbf16>
    %66 = tpu.concatenate %64, %65 in 0 : vector<1x256xbf16>, vector<63x256xbf16> -> vector<64x256xbf16>
    %c0_50 = arith.constant 0 : index
    %c1_51 = arith.constant 1 : index
    %c0_52 = arith.constant 0 : index
    %c0_53 = arith.constant 0 : index
    %67 = vector.load %arg4[%c0_50, %c1_51, %c0_52, %c0_53] : memref<3x5x256x256xbf16, #tpu.memory_space<vmem>>, vector<1x1x256x256xbf16>
    %68 = vector.shape_cast %67 : vector<1x1x256x256xbf16> to vector<256x256xbf16>
    %cst_54 = arith.constant dense<0.000000e+00> : vector<64x256xf32>
    %69 = tpu.matmul %66, %68, %cst_54 {dimension_numbers = #tpu.dot_dimension_numbers<[1], [0], [0], [1], [0, 0, 1, 1], [], []>} : vector<64x256xbf16>, vector<256x256xbf16>, vector<64x256xf32> -> vector<64x256xf32>
    %70 = arith.addf %63, %69 : vector<64x256xf32>
    %c0_55 = arith.constant 0 : index
    %c2_56 = arith.constant 2 : index
    %c0_57 = arith.constant 0 : index
    %c0_58 = arith.constant 0 : index
    %71 = vector.load %arg4[%c0_55, %c2_56, %c0_57, %c0_58] : memref<3x5x256x256xbf16, #tpu.memory_space<vmem>>, vector<1x1x256x256xbf16>
    %72 = vector.shape_cast %71 : vector<1x1x256x256xbf16> to vector<256x256xbf16>
    %cst_59 = arith.constant dense<0.000000e+00> : vector<64x256xf32>
    %73 = tpu.matmul %55, %72, %cst_59 {dimension_numbers = #tpu.dot_dimension_numbers<[1], [0], [0], [1], [0, 0, 1, 1], [], []>} : vector<64x256xbf16>, vector<256x256xbf16>, vector<64x256xf32> -> vector<64x256xf32>
    %74 = arith.addf %70, %73 : vector<64x256xf32>
    %75 = vector.extract_strided_slice %55 {offsets = [1, 0], sizes = [63, 256], strides = [1, 1]} : vector<64x256xbf16> to vector<63x256xbf16>
    %76 = vector.extract_strided_slice %55 {offsets = [0, 0], sizes = [1, 256], strides = [1, 1]} : vector<64x256xbf16> to vector<1x256xbf16>
    %77 = tpu.concatenate %75, %76 in 0 : vector<63x256xbf16>, vector<1x256xbf16> -> vector<64x256xbf16>
    %c0_60 = arith.constant 0 : index
    %c3_61 = arith.constant 3 : index
    %c0_62 = arith.constant 0 : index
    %c0_63 = arith.constant 0 : index
    %78 = vector.load %arg4[%c0_60, %c3_61, %c0_62, %c0_63] : memref<3x5x256x256xbf16, #tpu.memory_space<vmem>>, vector<1x1x256x256xbf16>
    %79 = vector.shape_cast %78 : vector<1x1x256x256xbf16> to vector<256x256xbf16>
    %cst_64 = arith.constant dense<0.000000e+00> : vector<64x256xf32>
    %80 = tpu.matmul %77, %79, %cst_64 {dimension_numbers = #tpu.dot_dimension_numbers<[1], [0], [0], [1], [0, 0, 1, 1], [], []>} : vector<64x256xbf16>, vector<256x256xbf16>, vector<64x256xf32> -> vector<64x256xf32>
    %81 = arith.addf %74, %80 : vector<64x256xf32>
    %82 = vector.extract_strided_slice %55 {offsets = [2, 0], sizes = [62, 256], strides = [1, 1]} : vector<64x256xbf16> to vector<62x256xbf16>
    %83 = vector.extract_strided_slice %55 {offsets = [0, 0], sizes = [2, 256], strides = [1, 1]} : vector<64x256xbf16> to vector<2x256xbf16>
    %84 = tpu.concatenate %82, %83 in 0 : vector<62x256xbf16>, vector<2x256xbf16> -> vector<64x256xbf16>
    %c0_65 = arith.constant 0 : index
    %c4_66 = arith.constant 4 : index
    %c0_67 = arith.constant 0 : index
    %c0_68 = arith.constant 0 : index
    %85 = vector.load %arg4[%c0_65, %c4_66, %c0_67, %c0_68] : memref<3x5x256x256xbf16, #tpu.memory_space<vmem>>, vector<1x1x256x256xbf16>
    %86 = vector.shape_cast %85 : vector<1x1x256x256xbf16> to vector<256x256xbf16>
    %cst_69 = arith.constant dense<0.000000e+00> : vector<64x256xf32>
    %87 = tpu.matmul %84, %86, %cst_69 {dimension_numbers = #tpu.dot_dimension_numbers<[1], [0], [0], [1], [0, 0, 1, 1], [], []>} : vector<64x256xbf16>, vector<256x256xbf16>, vector<64x256xf32> -> vector<64x256xf32>
    %88 = arith.addf %81, %87 : vector<64x256xf32>
    %89 = vector.broadcast %57 : vector<1x256xf32> to vector<64x256xf32>
    %90 = arith.addf %88, %89 : vector<64x256xf32>
    %cst_70 = arith.constant 0.000000e+00 : f32
    %91 = vector.broadcast %cst_70 : f32 to vector<64x256xf32>
    %92 = arith.maximumf %90, %91 : vector<64x256xf32>
    %93 = arith.truncf %92 : vector<64x256xf32> to vector<64x256xbf16>
    %c0_71 = arith.constant 0 : index
    %c0_72 = arith.constant 0 : index
    %94 = vector.load %arg9[%c0_71, %c0_72] : memref<64x256xbf16, #tpu.memory_space<vmem>>, vector<64x256xbf16>
    tpu.vector_store %arg9[%c0_71, %c0_72], %93 {strides = array<i32>} : memref<64x256xbf16, #tpu.memory_space<vmem>>, vector<64x256xbf16>,
    %cst_73 = arith.constant 0.000000e+00 : bf16
    %95 = vector.broadcast %cst_73 : bf16 to vector<16x256xbf16>
    %c16_74 = arith.constant 16 : index
    %c0_75 = arith.constant 0 : index
    %96 = vector.load %arg9[%c16_74, %c0_75] : memref<64x256xbf16, #tpu.memory_space<vmem>>, vector<16x256xbf16>
    tpu.vector_store %arg9[%c16_74, %c0_75], %95 {strides = array<i32>} : memref<64x256xbf16, #tpu.memory_space<vmem>>, vector<16x256xbf16>,
    %cst_76 = arith.constant 0.000000e+00 : bf16
    %97 = vector.broadcast %cst_76 : bf16 to vector<16x256xbf16>
    %c48_77 = arith.constant 48 : index
    %c0_78 = arith.constant 0 : index
    %98 = vector.load %arg9[%c48_77, %c0_78] : memref<64x256xbf16, #tpu.memory_space<vmem>>, vector<16x256xbf16>
    tpu.vector_store %arg9[%c48_77, %c0_78], %97 {strides = array<i32>} : memref<64x256xbf16, #tpu.memory_space<vmem>>, vector<16x256xbf16>,
    %c0_79 = arith.constant 0 : index
    %c0_80 = arith.constant 0 : index
    %99 = vector.load %arg9[%c0_79, %c0_80] : memref<64x256xbf16, #tpu.memory_space<vmem>>, vector<64x256xbf16>
    %c1_81 = arith.constant 1 : index
    %c0_82 = arith.constant 0 : index
    %c0_83 = arith.constant 0 : index
    %100 = vector.load %arg5[%c1_81, %c0_82, %c0_83] : memref<3x1x256xf32, #tpu.memory_space<vmem>>, vector<1x1x256xf32>
    %101 = vector.shape_cast %100 : vector<1x1x256xf32> to vector<1x256xf32>
    %102 = vector.extract_strided_slice %99 {offsets = [62, 0], sizes = [2, 256], strides = [1, 1]} : vector<64x256xbf16> to vector<2x256xbf16>
    %103 = vector.extract_strided_slice %99 {offsets = [0, 0], sizes = [62, 256], strides = [1, 1]} : vector<64x256xbf16> to vector<62x256xbf16>
    %104 = tpu.concatenate %102, %103 in 0 : vector<2x256xbf16>, vector<62x256xbf16> -> vector<64x256xbf16>
    %c1_84 = arith.constant 1 : index
    %c0_85 = arith.constant 0 : index
    %c0_86 = arith.constant 0 : index
    %c0_87 = arith.constant 0 : index
    %105 = vector.load %arg4[%c1_84, %c0_85, %c0_86, %c0_87] : memref<3x5x256x256xbf16, #tpu.memory_space<vmem>>, vector<1x1x256x256xbf16>
    %106 = vector.shape_cast %105 : vector<1x1x256x256xbf16> to vector<256x256xbf16>
    %cst_88 = arith.constant dense<0.000000e+00> : vector<64x256xf32>
    %107 = tpu.matmul %104, %106, %cst_88 {dimension_numbers = #tpu.dot_dimension_numbers<[1], [0], [0], [1], [0, 0, 1, 1], [], []>} : vector<64x256xbf16>, vector<256x256xbf16>, vector<64x256xf32> -> vector<64x256xf32>
    %108 = vector.extract_strided_slice %99 {offsets = [63, 0], sizes = [1, 256], strides = [1, 1]} : vector<64x256xbf16> to vector<1x256xbf16>
    %109 = vector.extract_strided_slice %99 {offsets = [0, 0], sizes = [63, 256], strides = [1, 1]} : vector<64x256xbf16> to vector<63x256xbf16>
    %110 = tpu.concatenate %108, %109 in 0 : vector<1x256xbf16>, vector<63x256xbf16> -> vector<64x256xbf16>
    %c1_89 = arith.constant 1 : index
    %c1_90 = arith.constant 1 : index
    %c0_91 = arith.constant 0 : index
    %c0_92 = arith.constant 0 : index
    %111 = vector.load %arg4[%c1_89, %c1_90, %c0_91, %c0_92] : memref<3x5x256x256xbf16, #tpu.memory_space<vmem>>, vector<1x1x256x256xbf16>
    %112 = vector.shape_cast %111 : vector<1x1x256x256xbf16> to vector<256x256xbf16>
    %cst_93 = arith.constant dense<0.000000e+00> : vector<64x256xf32>
    %113 = tpu.matmul %110, %112, %cst_93 {dimension_numbers = #tpu.dot_dimension_numbers<[1], [0], [0], [1], [0, 0, 1, 1], [], []>} : vector<64x256xbf16>, vector<256x256xbf16>, vector<64x256xf32> -> vector<64x256xf32>
    %114 = arith.addf %107, %113 : vector<64x256xf32>
    %c1_94 = arith.constant 1 : index
    %c2_95 = arith.constant 2 : index
    %c0_96 = arith.constant 0 : index
    %c0_97 = arith.constant 0 : index
    %115 = vector.load %arg4[%c1_94, %c2_95, %c0_96, %c0_97] : memref<3x5x256x256xbf16, #tpu.memory_space<vmem>>, vector<1x1x256x256xbf16>
    %116 = vector.shape_cast %115 : vector<1x1x256x256xbf16> to vector<256x256xbf16>
    %cst_98 = arith.constant dense<0.000000e+00> : vector<64x256xf32>
    %117 = tpu.matmul %99, %116, %cst_98 {dimension_numbers = #tpu.dot_dimension_numbers<[1], [0], [0], [1], [0, 0, 1, 1], [], []>} : vector<64x256xbf16>, vector<256x256xbf16>, vector<64x256xf32> -> vector<64x256xf32>
    %118 = arith.addf %114, %117 : vector<64x256xf32>
    %119 = vector.extract_strided_slice %99 {offsets = [1, 0], sizes = [63, 256], strides = [1, 1]} : vector<64x256xbf16> to vector<63x256xbf16>
    %120 = vector.extract_strided_slice %99 {offsets = [0, 0], sizes = [1, 256], strides = [1, 1]} : vector<64x256xbf16> to vector<1x256xbf16>
    %121 = tpu.concatenate %119, %120 in 0 : vector<63x256xbf16>, vector<1x256xbf16> -> vector<64x256xbf16>
    %c1_99 = arith.constant 1 : index
    %c3_100 = arith.constant 3 : index
    %c0_101 = arith.constant 0 : index
    %c0_102 = arith.constant 0 : index
    %122 = vector.load %arg4[%c1_99, %c3_100, %c0_101, %c0_102] : memref<3x5x256x256xbf16, #tpu.memory_space<vmem>>, vector<1x1x256x256xbf16>
    %123 = vector.shape_cast %122 : vector<1x1x256x256xbf16> to vector<256x256xbf16>
    %cst_103 = arith.constant dense<0.000000e+00> : vector<64x256xf32>
    %124 = tpu.matmul %121, %123, %cst_103 {dimension_numbers = #tpu.dot_dimension_numbers<[1], [0], [0], [1], [0, 0, 1, 1], [], []>} : vector<64x256xbf16>, vector<256x256xbf16>, vector<64x256xf32> -> vector<64x256xf32>
    %125 = arith.addf %118, %124 : vector<64x256xf32>
    %126 = vector.extract_strided_slice %99 {offsets = [2, 0], sizes = [62, 256], strides = [1, 1]} : vector<64x256xbf16> to vector<62x256xbf16>
    %127 = vector.extract_strided_slice %99 {offsets = [0, 0], sizes = [2, 256], strides = [1, 1]} : vector<64x256xbf16> to vector<2x256xbf16>
    %128 = tpu.concatenate %126, %127 in 0 : vector<62x256xbf16>, vector<2x256xbf16> -> vector<64x256xbf16>
    %c1_104 = arith.constant 1 : index
    %c4_105 = arith.constant 4 : index
    %c0_106 = arith.constant 0 : index
    %c0_107 = arith.constant 0 : index
    %129 = vector.load %arg4[%c1_104, %c4_105, %c0_106, %c0_107] : memref<3x5x256x256xbf16, #tpu.memory_space<vmem>>, vector<1x1x256x256xbf16>
    %130 = vector.shape_cast %129 : vector<1x1x256x256xbf16> to vector<256x256xbf16>
    %cst_108 = arith.constant dense<0.000000e+00> : vector<64x256xf32>
    %131 = tpu.matmul %128, %130, %cst_108 {dimension_numbers = #tpu.dot_dimension_numbers<[1], [0], [0], [1], [0, 0, 1, 1], [], []>} : vector<64x256xbf16>, vector<256x256xbf16>, vector<64x256xf32> -> vector<64x256xf32>
    %132 = arith.addf %125, %131 : vector<64x256xf32>
    %133 = vector.broadcast %101 : vector<1x256xf32> to vector<64x256xf32>
    %134 = arith.addf %132, %133 : vector<64x256xf32>
    %cst_109 = arith.constant 0.000000e+00 : f32
    %135 = vector.broadcast %cst_109 : f32 to vector<64x256xf32>
    %136 = arith.maximumf %134, %135 : vector<64x256xf32>
    %137 = arith.truncf %136 : vector<64x256xf32> to vector<64x256xbf16>
    %c0_110 = arith.constant 0 : index
    %c0_111 = arith.constant 0 : index
    %138 = vector.load %arg8[%c0_110, %c0_111] : memref<64x256xbf16, #tpu.memory_space<vmem>>, vector<64x256xbf16>
    tpu.vector_store %arg8[%c0_110, %c0_111], %137 {strides = array<i32>} : memref<64x256xbf16, #tpu.memory_space<vmem>>, vector<64x256xbf16>,
    %cst_112 = arith.constant 0.000000e+00 : bf16
    %139 = vector.broadcast %cst_112 : bf16 to vector<16x256xbf16>
    %c16_113 = arith.constant 16 : index
    %c0_114 = arith.constant 0 : index
    %140 = vector.load %arg8[%c16_113, %c0_114] : memref<64x256xbf16, #tpu.memory_space<vmem>>, vector<16x256xbf16>
    tpu.vector_store %arg8[%c16_113, %c0_114], %139 {strides = array<i32>} : memref<64x256xbf16, #tpu.memory_space<vmem>>, vector<16x256xbf16>,
    %cst_115 = arith.constant 0.000000e+00 : bf16
    %141 = vector.broadcast %cst_115 : bf16 to vector<16x256xbf16>
    %c48_116 = arith.constant 48 : index
    %c0_117 = arith.constant 0 : index
    %142 = vector.load %arg8[%c48_116, %c0_117] : memref<64x256xbf16, #tpu.memory_space<vmem>>, vector<16x256xbf16>
    tpu.vector_store %arg8[%c48_116, %c0_117], %141 {strides = array<i32>} : memref<64x256xbf16, #tpu.memory_space<vmem>>, vector<16x256xbf16>,
    %c0_118 = arith.constant 0 : index
    %c0_119 = arith.constant 0 : index
    %143 = vector.load %arg8[%c0_118, %c0_119] : memref<64x256xbf16, #tpu.memory_space<vmem>>, vector<64x256xbf16>
    %c2_120 = arith.constant 2 : index
    %c0_121 = arith.constant 0 : index
    %c0_122 = arith.constant 0 : index
    %144 = vector.load %arg5[%c2_120, %c0_121, %c0_122] : memref<3x1x256xf32, #tpu.memory_space<vmem>>, vector<1x1x256xf32>
    %145 = vector.shape_cast %144 : vector<1x1x256xf32> to vector<1x256xf32>
    %146 = vector.extract_strided_slice %143 {offsets = [62, 0], sizes = [2, 256], strides = [1, 1]} : vector<64x256xbf16> to vector<2x256xbf16>
    %147 = vector.extract_strided_slice %143 {offsets = [0, 0], sizes = [62, 256], strides = [1, 1]} : vector<64x256xbf16> to vector<62x256xbf16>
    %148 = tpu.concatenate %146, %147 in 0 : vector<2x256xbf16>, vector<62x256xbf16> -> vector<64x256xbf16>
    %c2_123 = arith.constant 2 : index
    %c0_124 = arith.constant 0 : index
    %c0_125 = arith.constant 0 : index
    %c0_126 = arith.constant 0 : index
    %149 = vector.load %arg4[%c2_123, %c0_124, %c0_125, %c0_126] : memref<3x5x256x256xbf16, #tpu.memory_space<vmem>>, vector<1x1x256x256xbf16>
    %150 = vector.shape_cast %149 : vector<1x1x256x256xbf16> to vector<256x256xbf16>
    %cst_127 = arith.constant dense<0.000000e+00> : vector<64x256xf32>
    %151 = tpu.matmul %148, %150, %cst_127 {dimension_numbers = #tpu.dot_dimension_numbers<[1], [0], [0], [1], [0, 0, 1, 1], [], []>} : vector<64x256xbf16>, vector<256x256xbf16>, vector<64x256xf32> -> vector<64x256xf32>
    %152 = vector.extract_strided_slice %143 {offsets = [63, 0], sizes = [1, 256], strides = [1, 1]} : vector<64x256xbf16> to vector<1x256xbf16>
    %153 = vector.extract_strided_slice %143 {offsets = [0, 0], sizes = [63, 256], strides = [1, 1]} : vector<64x256xbf16> to vector<63x256xbf16>
    %154 = tpu.concatenate %152, %153 in 0 : vector<1x256xbf16>, vector<63x256xbf16> -> vector<64x256xbf16>
    %c2_128 = arith.constant 2 : index
    %c1_129 = arith.constant 1 : index
    %c0_130 = arith.constant 0 : index
    %c0_131 = arith.constant 0 : index
    %155 = vector.load %arg4[%c2_128, %c1_129, %c0_130, %c0_131] : memref<3x5x256x256xbf16, #tpu.memory_space<vmem>>, vector<1x1x256x256xbf16>
    %156 = vector.shape_cast %155 : vector<1x1x256x256xbf16> to vector<256x256xbf16>
    %cst_132 = arith.constant dense<0.000000e+00> : vector<64x256xf32>
    %157 = tpu.matmul %154, %156, %cst_132 {dimension_numbers = #tpu.dot_dimension_numbers<[1], [0], [0], [1], [0, 0, 1, 1], [], []>} : vector<64x256xbf16>, vector<256x256xbf16>, vector<64x256xf32> -> vector<64x256xf32>
    %158 = arith.addf %151, %157 : vector<64x256xf32>
    %c2_133 = arith.constant 2 : index
    %c2_134 = arith.constant 2 : index
    %c0_135 = arith.constant 0 : index
    %c0_136 = arith.constant 0 : index
    %159 = vector.load %arg4[%c2_133, %c2_134, %c0_135, %c0_136] : memref<3x5x256x256xbf16, #tpu.memory_space<vmem>>, vector<1x1x256x256xbf16>
    %160 = vector.shape_cast %159 : vector<1x1x256x256xbf16> to vector<256x256xbf16>
    %cst_137 = arith.constant dense<0.000000e+00> : vector<64x256xf32>
    %161 = tpu.matmul %143, %160, %cst_137 {dimension_numbers = #tpu.dot_dimension_numbers<[1], [0], [0], [1], [0, 0, 1, 1], [], []>} : vector<64x256xbf16>, vector<256x256xbf16>, vector<64x256xf32> -> vector<64x256xf32>
    %162 = arith.addf %158, %161 : vector<64x256xf32>
    %163 = vector.extract_strided_slice %143 {offsets = [1, 0], sizes = [63, 256], strides = [1, 1]} : vector<64x256xbf16> to vector<63x256xbf16>
    %164 = vector.extract_strided_slice %143 {offsets = [0, 0], sizes = [1, 256], strides = [1, 1]} : vector<64x256xbf16> to vector<1x256xbf16>
    %165 = tpu.concatenate %163, %164 in 0 : vector<63x256xbf16>, vector<1x256xbf16> -> vector<64x256xbf16>
    %c2_138 = arith.constant 2 : index
    %c3_139 = arith.constant 3 : index
    %c0_140 = arith.constant 0 : index
    %c0_141 = arith.constant 0 : index
    %166 = vector.load %arg4[%c2_138, %c3_139, %c0_140, %c0_141] : memref<3x5x256x256xbf16, #tpu.memory_space<vmem>>, vector<1x1x256x256xbf16>
    %167 = vector.shape_cast %166 : vector<1x1x256x256xbf16> to vector<256x256xbf16>
    %cst_142 = arith.constant dense<0.000000e+00> : vector<64x256xf32>
    %168 = tpu.matmul %165, %167, %cst_142 {dimension_numbers = #tpu.dot_dimension_numbers<[1], [0], [0], [1], [0, 0, 1, 1], [], []>} : vector<64x256xbf16>, vector<256x256xbf16>, vector<64x256xf32> -> vector<64x256xf32>
    %169 = arith.addf %162, %168 : vector<64x256xf32>
    %170 = vector.extract_strided_slice %143 {offsets = [2, 0], sizes = [62, 256], strides = [1, 1]} : vector<64x256xbf16> to vector<62x256xbf16>
    %171 = vector.extract_strided_slice %143 {offsets = [0, 0], sizes = [2, 256], strides = [1, 1]} : vector<64x256xbf16> to vector<2x256xbf16>
    %172 = tpu.concatenate %170, %171 in 0 : vector<62x256xbf16>, vector<2x256xbf16> -> vector<64x256xbf16>
    %c2_143 = arith.constant 2 : index
    %c4_144 = arith.constant 4 : index
    %c0_145 = arith.constant 0 : index
    %c0_146 = arith.constant 0 : index
    %173 = vector.load %arg4[%c2_143, %c4_144, %c0_145, %c0_146] : memref<3x5x256x256xbf16, #tpu.memory_space<vmem>>, vector<1x1x256x256xbf16>
    %174 = vector.shape_cast %173 : vector<1x1x256x256xbf16> to vector<256x256xbf16>
    %cst_147 = arith.constant dense<0.000000e+00> : vector<64x256xf32>
    %175 = tpu.matmul %172, %174, %cst_147 {dimension_numbers = #tpu.dot_dimension_numbers<[1], [0], [0], [1], [0, 0, 1, 1], [], []>} : vector<64x256xbf16>, vector<256x256xbf16>, vector<64x256xf32> -> vector<64x256xf32>
    %176 = arith.addf %169, %175 : vector<64x256xf32>
    %177 = vector.broadcast %145 : vector<1x256xf32> to vector<64x256xf32>
    %178 = arith.addf %176, %177 : vector<64x256xf32>
    %cst_148 = arith.constant 0.000000e+00 : f32
    %179 = vector.broadcast %cst_148 : f32 to vector<64x256xf32>
    %180 = arith.maximumf %178, %179 : vector<64x256xf32>
    %181 = vector.extract_strided_slice %180 {offsets = [0, 0], sizes = [16, 256], strides = [1, 1]} : vector<64x256xf32> to vector<16x256xf32>
    %c0_149 = arith.constant 0 : index
    %c0_150 = arith.constant 0 : index
    %c0_151 = arith.constant 0 : index
    %182 = vector.load %arg6[%c0_149, %c0_150, %c0_151] : memref<2x16x256xf32, #tpu.memory_space<vmem>>, vector<1x16x256xf32>
    %183 = vector.shape_cast %182 : vector<1x16x256xf32> to vector<16x256xf32>
    %184 = vector.shape_cast %181 : vector<16x256xf32> to vector<1x16x256xf32>
    tpu.vector_store %arg6[%c0_149, %c0_150, %c0_151], %184 {strides = array<i32>} : memref<2x16x256xf32, #tpu.memory_space<vmem>>, vector<1x16x256xf32>,
    %185 = vector.extract_strided_slice %180 {offsets = [32, 0], sizes = [16, 256], strides = [1, 1]} : vector<64x256xf32> to vector<16x256xf32>
    %c1_152 = arith.constant 1 : index
    %c0_153 = arith.constant 0 : index
    %c0_154 = arith.constant 0 : index
    %186 = vector.load %arg6[%c1_152, %c0_153, %c0_154] : memref<2x16x256xf32, #tpu.memory_space<vmem>>, vector<1x16x256xf32>
    %187 = vector.shape_cast %186 : vector<1x16x256xf32> to vector<16x256xf32>
    %188 = vector.shape_cast %185 : vector<16x256xf32> to vector<1x16x256xf32>
    tpu.vector_store %arg6[%c1_152, %c0_153, %c0_154], %188 {strides = array<i32>} : memref<2x16x256xf32, #tpu.memory_space<vmem>>, vector<1x16x256xf32>,
    return
  }
  func.func @transform_0(%arg0: i32) -> (i32, i32, i32) {
    %c0_i32 = arith.constant 0 : i32
    %c0_i32_0 = arith.constant 0 : i32
    %c0_i32_1 = arith.constant 0 : i32
    return %arg0, %c0_i32, %c0_i32_0 : i32, i32, i32
  }
  func.func @transform_1(%arg0: i32) -> (i32, i32, i32) {
    %c0_i32 = arith.constant 0 : i32
    %c0_i32_0 = arith.constant 0 : i32
    %c0_i32_1 = arith.constant 0 : i32
    %c0_i32_2 = arith.constant 0 : i32
    return %c0_i32, %c0_i32_0, %c0_i32_1 : i32, i32, i32
  }
  func.func @transform_2(%arg0: i32) -> (i32, i32) {
    %c0_i32 = arith.constant 0 : i32
    %c0_i32_0 = arith.constant 0 : i32
    %c0_i32_1 = arith.constant 0 : i32
    return %c0_i32, %c0_i32_0 : i32, i32
  }
  func.func @transform_3(%arg0: i32) -> (i32, i32, i32, i32) {
    %c0_i32 = arith.constant 0 : i32
    %c0_i32_0 = arith.constant 0 : i32
    %c0_i32_1 = arith.constant 0 : i32
    %c0_i32_2 = arith.constant 0 : i32
    %c0_i32_3 = arith.constant 0 : i32
    return %c0_i32, %c0_i32_0, %c0_i32_1, %c0_i32_2 : i32, i32, i32, i32
  }
  func.func @transform_4(%arg0: i32) -> (i32, i32, i32) {
    %c0_i32 = arith.constant 0 : i32
    %c0_i32_0 = arith.constant 0 : i32
    %c0_i32_1 = arith.constant 0 : i32
    %c0_i32_2 = arith.constant 0 : i32
    return %c0_i32, %c0_i32_0, %c0_i32_1 : i32, i32, i32
  }
  func.func @transform_5(%arg0: i32) -> (i32, i32, i32) {
    %c0_i32 = arith.constant 0 : i32
    %c0_i32_0 = arith.constant 0 : i32
    %c0_i32_1 = arith.constant 0 : i32
    return %arg0, %c0_i32, %c0_i32_0 : i32, i32, i32
  }
}

</mosaic_0001>

<bundles_post_ra>
// kernel: _forward_impl.1
= control target key start
LH: loop header
LB: loop body
LE: loop exit
PB: predicated region body
PF: predicated region fallthrough
CT: control target
= control target key end

     0   :  { %vm26_vm0 = vcmask 257024   ;;  %v9404_v17 = vmov 0   ;;  %s13744_s0 = inlined_call_operand.vmem [shape: f32[2,16,32], index: 0, kind: input, shape index: {}]   ;;  %s13745_s1 = inlined_call_operand.vmem [shape: bf16[5,32,256], index: 1, kind: input, shape index: {}]   ;;  %s13746_s2 = inlined_call_operand.vmem [shape: f32[1,256], index: 2, kind: input, shape index: {}]   ;;  %s13747_s3 = inlined_call_operand.vmem [shape: bf16[3,5,256,256], index: 3, kind: input, shape index: {}]   ;;  %s13748_s4 = inlined_call_operand.vmem [shape: f32[3,1,256], index: 4, kind: input, shape index: {}]   ;;  %s13749_s5 = inlined_call_operand.hbm [shape: f32[2,16,256], index: 5, kind: output, shape index: {}]  }
   0x1   :  { %v6305_v0 = vld [vmem:[%s13745_s1 + $0x30] sm:$0xf]  ;;  %v8854_v1 = vld [vmem:[%s13745_s1 + $0x34] sm:$0xf0]  ;;  %v8853_v2 = vld [vmem:[%s13745_s1 + $0x34] sm:$0xf] }
   0x2   :  { %v6306_v3 = vor.u32 %v8854_v1, %v6305_v0  ;;  %v6307_v4 = vld [vmem:[%s13745_s1 + $0x38] sm:$0xf0]  ;;  %v6297_v5 = vld [vmem:[%s13745_s1 + $0x20] sm:$0xf]  ;;  %v8852_v6 = vld [vmem:[%s13745_s1 + $0x24] sm:$0xf0] }
   0x3   :  { %v6310_v7 = vor.u32 %v8853_v2, %v6307_v4  ;;  %v8851_v8 = vld [vmem:[%s13745_s1 + $0x24] sm:$0xf]  ;;  %v6299_v9 = vld [vmem:[%s13745_s1 + $0x28] sm:$0xf0]  ;;  %v6298_v11 = vor.u32 %v8852_v6, %v6297_v5  ;;  %v6281_v14 = vld [vmem:[%s13744_s0 + $0x10] sm:$0xff] }
   0x4   :  { %v22_v10 = vld [vmem:[%s13744_s0] sm:$0xff]  ;;  %171 = vmatpush.bf16.msra.mxu0 %v6306_v3  ;;  %9368 = vmatpush.bf16.msra.mxu2 %v6306_v3  ;;  %v23_v12 = vld [vmem:[%s13744_s0 + $0x8] sm:$0xff]  ;;  %v6302_v15 = vor.u32 %v8851_v8, %v6299_v9  ;;  %38 = vst.msk [vmem:[#allocation2 + $0x18] sm:$0xf] %vm26_vm0, %v9404_v17  ;;  %v6282_v18 = vld [vmem:[%s13744_s0 + $0x18] sm:$0xff]  ;;  %v34_v21 = vpack.c.bf16 %v6281_v14, %v6281_v14 }
   0x5   :  { %v24_v13 = vpack.c.bf16 %v22_v10, %v22_v10  ;;  %200 = vmatpush.bf16.msra.mxu1 %v6310_v7  ;;  %9370 = vmatpush.bf16.msra.mxu3 %v6310_v7  ;;  %v25_v16 = vpack.c.bf16 %v23_v12, %v23_v12  ;;  %v6329_v19 = vld [vmem:[%s13745_s1 + $0x10] sm:$0xf]  ;;  %v8850_v20 = vld [vmem:[%s13745_s1 + $0x14] sm:$0xf0]  ;;  %v8849_v23 = vld [vmem:[%s13745_s1 + $0x14] sm:$0xf]  ;;  %v35_v25 = vpack.c.bf16 %v6282_v18, %v6282_v18 }
   0x6   :  { %v6330_v22 = vor.u32 %v8850_v20, %v6329_v19  ;;  %v6331_v24 = vld [vmem:[%s13745_s1 + $0x18] sm:$0xf0]  ;;  %39 = vst.msk [vmem:[#allocation2 + $0x1c] sm:$0xf] %vm26_vm0, %v9404_v17  ;;  %v6357_v27 = vld [vmem:[%s13745_s1 + $0x50] sm:$0xf] }
   0x7   :  { %27 = vst.msk [vmem:[#allocation2] sm:$0xf] %vm26_vm0, %v24_v13  ;;  %v6334_v26 = vor.u32 %v8849_v23, %v6331_v24  ;;  %v8858_v28 = vld [vmem:[%s13745_s1 + $0x54] sm:$0xf0]  ;;  %v8857_v30 = vld [vmem:[%s13745_s1 + $0x54] sm:$0xf] }
   0x8   :  { %28 = vst.msk [vmem:[#allocation2 + $0x4] sm:$0xf] %vm26_vm0, %v25_v16  ;;  %172 = vmatpush.bf16.msra.mxu0 %v6298_v11  ;;  %9369 = vmatpush.bf16.msra.mxu2 %v6298_v11  ;;  %v6358_v29 = vor.u32 %v8858_v28, %v6357_v27  ;;  %v6359_v31 = vld [vmem:[%s13745_s1 + $0x58] sm:$0xf0] }
   0x9   :  { %201 = vmatpush.bf16.msra.mxu1 %v6302_v15  ;;  %9371 = vmatpush.bf16.msra.mxu3 %v6302_v15  ;;  %29 = vst.msk [vmem:[#allocation2 + $0x8] sm:$0xf] %vm26_vm0, %v9404_v17  ;;  %v6362_v32 = vor.u32 %v8857_v30, %v6359_v31 }
   0xa   :  { %30 = vst.msk [vmem:[#allocation2 + $0xc] sm:$0xf] %vm26_vm0, %v9404_v17 }
   0xc   :  { %260 = vmatpush.bf16.msrb.mxu2 %v6330_v22 }
   0xd   :  { %289 = vmatpush.bf16.msrb.mxu3 %v6334_v26 }
   0xe   :  { %10 = vsyncpa [#allocation6], 0  ;;  %36 = vst.msk [vmem:[#allocation2 + $0x10] sm:$0xf] %vm26_vm0, %v34_v21  ;;  %351 = vmatpush.bf16.msrb.mxu0 %v6358_v29  ;;  %380 = vmatpush.bf16.msrb.mxu1 %v6362_v32  ;;  %v6321_v33 = vld [vmem:[%s13745_s1] sm:$0xf] }
   0xf   :  { %37 = vst.msk [vmem:[#allocation2 + $0x14] sm:$0xf] %vm26_vm0, %v35_v25  ;;  %v8848_v34 = vld [vmem:[%s13745_s1 + $0x4] sm:$0xf0]  ;;  %v8847_v36 = vld [vmem:[%s13745_s1 + $0x4] sm:$0xf] }
  0x10   :  { %v6322_v35 = vor.u32 %v8848_v34, %v6321_v33  ;;  %v6323_v37 = vld [vmem:[%s13745_s1 + $0x8] sm:$0xf0]  ;;  %v6349_v38 = vld [vmem:[%s13745_s1 + $0x40] sm:$0xf]  ;;  %v8856_v41 = vld [vmem:[%s13745_s1 + $0x44] sm:$0xf0] }
  0x11   :  { %v9525_v39 = vld [vmem:[#allocation2] sm:$0xff]   ;;  %v6326_v40 = vor.u32 %v8847_v36, %v6323_v37  ;;  %728 = vst [vmem:[#allocation3 + $0x10] sm:$0xff] %v9404_v17  ;;  %v9534_v43 = vld [vmem:[#allocation2 + $0x18] sm:$0xff]   ;;  %v6350_v45 = vor.u32 %v8856_v41, %v6349_v38  ;;  %v6351_v46 = vld [vmem:[%s13745_s1 + $0x48] sm:$0xf0]  ;;  %vm71_vm1 = vcmask 1040384  }
  0x12   :  { %v8855_v42 = vld [vmem:[%s13745_s1 + $0x44] sm:$0xf]  ;;  %v94_v44 = vshrl.u32 %v9525_v39, 16  ;;  %261 = vmatpush.bf16.msrb.mxu2 %v6322_v35  ;;  %v9366_v47 = vunpack.c.h.b16 %v9534_v43  ;;  %v97_v48 = vshll.u32 %v9525_v39, 16  ;;  %729 = vst [vmem:[#allocation3 + $0x18] sm:$0xff] %v9404_v17  ;;  %v9545_v51 = vld [vmem:[#allocation2 + $0x8] sm:$0xff] }
  0x13   :  { %290 = vmatpush.bf16.msrb.mxu3 %v6326_v40  ;;  %v6354_v49 = vor.u32 %v8855_v42, %v6351_v46  ;;  %352 = vmatpush.bf16.msrb.mxu0 %v6350_v45  ;;  %2614 = vst [vmem:[#allocation4 + $0x10] sm:$0xff] %v9404_v17  ;;  %vm92_vm2 = vsmask.f32 256  ;;  %v101_v54 = vshrl.u32 %v9545_v51, 16  ;;  %vm152_vm4 = vcmask 261120   ;;  %s6269_s29 = sshll.u32 %s13749_s5, 4  ;;  %s6270_s29 = int_to_ptr.hbm [resolvable:$true] %s6269_s29 }
  0x14   :  { %v96_v50 = vrot.slane %v94_v44, 7  ;;  %v51_v52 = vpack.c.b16 %v9366_v47, %v9366_v47  ;;  %2615 = vst [vmem:[#allocation4 + $0x18] sm:$0xff] %v9404_v17  ;;  %vm9556_vm3 = vmand %vm71_vm1, %vm92_vm2  ;;  %v117_v2 = vshrl.u32 %v9534_v43, 16  ;;  %v6385_v3 = vld [vmem:[%s13745_s1 + $0x70] sm:$0xf]  ;;  %v104_v10 = vshll.u32 %v9545_v51, 16 }
  0x15   :  { %381 = vmatpush.bf16.msrb.mxu1 %v6354_v49  ;;  %v103_v61 = vrot.slane %v101_v54, 7  ;;  %v8862_v4 = vld [vmem:[%s13745_s1 + $0x74] sm:$0xf0]  ;;  %v8861_v5 = vld [vmem:[%s13745_s1 + $0x74] sm:$0xf]  ;;  %v120_v18 = vshll.u32 %v9534_v43, 16 }
  0x16   :  { %v9549_v53 = vld [vmem:[#allocation2 + $0x10] sm:$0xff]  ;;  %v88_v55 = vshrl.u32 %v51_v52, 16  ;;  %v99_v56 = vor.u32 %v97_v48, %v96_v50  ;;  %v6386_v6 = vor.u32 %v8862_v4, %v6385_v3  ;;  %v6387_v7 = vld [vmem:[%s13745_s1 + $0x78] sm:$0xf0]  ;;  %v8866_v9 = vld [vmem:[%s13745_s1 + $0x94] sm:$0xf0] }
  0x17   :  { %v109_v58 = vshrl.u32 %v9549_v53, 16  ;;  %v112_v59 = vshll.u32 %v9549_v53, 16  ;;  %v6413_v8 = vld [vmem:[%s13745_s1 + $0x90] sm:$0xf]  ;;  %v6390_v11 = vor.u32 %v8861_v5, %v6387_v7  ;;  %v8865_v13 = vld [vmem:[%s13745_s1 + $0x94] sm:$0xf]  ;;  %v106_v19 = vor.u32 %v104_v10, %v103_v61 }
  0x18   :  { %v90_v60 = vrot.slane %v88_v55, 3  ;;  %v6414_v12 = vor.u32 %v8866_v9, %v6413_v8  ;;  %v6415_v14 = vld [vmem:[%s13745_s1 + $0x98] sm:$0xf0]  ;;  %v119_v16 = vrot.slane %v117_v2, 7  ;;  %v52_v23 = vrot.slane %v51_v52, 3  ;;  %s9406_s30 = smov 256  }
  0x19   :  { %v111_v62 = vrot.slane %v109_v58, 7  ;;  %v6418_v15 = vor.u32 %v8865_v13, %v6415_v14  ;;  %v107_v21 = vsel %vm92_vm2, %v96_v50, %v106_v19  ;;  %v72_v24 = vrot.slane %v9525_v39, 7  ;;  %v6377_v26 = vld [vmem:[%s13745_s1 + $0x60] sm:$0xf]  ;;  %v8860_v27 = vld [vmem:[%s13745_s1 + $0x64] sm:$0xf0] }
  0x1a   :  { %v126_v63 = vsel %vm9556_vm3, %v90_v60, %v99_v56  ;;  %v122_v20 = vor.u32 %v120_v18, %v119_v16  ;;  %v8859_v28 = vld [vmem:[%s13745_s1 + $0x64] sm:$0xf]  ;;  %v6378_v29 = vor.u32 %v8860_v27, %v6377_v26  ;;  %v6379_v30 = vld [vmem:[%s13745_s1 + $0x68] sm:$0xf0]  ;;  %v6405_v31 = vld [vmem:[%s13745_s1 + $0x80] sm:$0xf]  ;;  %v9361_v5 = vunpack.c.l.b16 %v9525_v39 }
  0x1b   :  { %6311 = vmatmul.msk.bf16.vlgmr.msra.gmra.mxu0 %vm152_vm4, %v126_v63  ;;  %v114_v0 = vor.u32 %v112_v59, %v111_v62  ;;  %6315 = vmatmul.msk.bf16.vlgmr.msra.gmra.mxu1 %vm152_vm4, %v126_v63  ;;  %v82_v25 = vsel %vm71_vm1, %v52_v23, %v72_v24  ;;  %v8864_v32 = vld [vmem:[%s13745_s1 + $0x84] sm:$0xf0]  ;;  %v6382_v33 = vor.u32 %v8859_v28, %v6379_v30  ;;  %v8863_v35 = vld [vmem:[%s13745_s1 + $0x84] sm:$0xf]  ;;  %v6407_v36 = vld [vmem:[%s13745_s1 + $0x88] sm:$0xf0] }
  0x1c   :  { %607 = vmatpush.bf16.msra.mxu0 %v6414_v12  ;;  %636 = vmatpush.bf16.msra.mxu1 %v6418_v15  ;;  %v123_v22 = vsel %vm92_vm2, %v111_v62, %v122_v20  ;;  %v6406_v34 = vor.u32 %v8864_v32, %v6405_v31  ;;  %v6410_v37 = vor.u32 %v8863_v35, %v6407_v36  ;;  %v73_v38 = vrot.slane %v9545_v51, 7  ;;  %v9201_v14 = vld [vmem:[%s13747_s3 + $0xa14] sm:$0xf]  ;;  %s9407_s6 = smov 16  }
  0x1d   :  { %v115_v1 = vsel %vm92_vm2, %v103_v61, %v114_v0  ;;  %v420_v40 = vrot.slane %v97_v48, 1  ;;  %vm419_vm5 = vsmask.f32 7424  ;;  %v422_v45 = vrot.slane %v104_v10, 1 }
  0x1e   :  { %6313 = vmatmul.msk.bf16.vlgmr.msra.gmra.mxu2 %vm152_vm4, %v115_v1  ;;  %6317 = vmatmul.msk.bf16.vlgmr.msra.gmra.mxu3 %vm152_vm4, %v115_v1  ;;  %v74_v41 = vsel %vm71_vm1, %v72_v24, %v73_v38  ;;  %v75_v47 = vrot.slane %v9549_v53, 7  ;;  %v77_v49 = vrot.slane %v9534_v43, 7  ;;  %v553_v50 = vrot.slane %v9525_v39, 1 }
  0x1f   :  { %484 = vmatpush.bf16.msra.mxu2 %v6386_v6  ;;  %513 = vmatpush.bf16.msra.mxu3 %v6390_v11  ;;  %v421_v42 = vor.u32 %v420_v40, %v94_v44  ;;  %v554_v52 = vrot.slane %v9545_v51, 1  ;;  %vm552_vm6 = vcmask 1046528   ;;  %v556_v56 = vrot.slane %v9549_v53, 1 }
  0x20   :  { %608 = vmatpush.bf16.msra.mxu0 %v6406_v34  ;;  %637 = vmatpush.bf16.msra.mxu1 %v6410_v37  ;;  %v76_v48 = vsel %vm71_vm1, %v73_v38, %v75_v47  ;;  %v78_v44 = vsel %vm71_vm1, %v75_v47, %v77_v49  ;;  %v424_v60 = vor.u32 %v422_v45, %v101_v54  ;;  %v425_v61 = vrot.slane %v112_v59, 1  ;;  %v6533_v49 = vld [vmem:[%s13747_s3 + $0x170] sm:$0xf] }
  0x21   :  { %v423_v46 = vsel %vm419_vm5, %v421_v42, %v422_v45  ;;  %v555_v55 = vsel %vm552_vm6, %v553_v50, %v554_v52  ;;  %v557_v62 = vsel %vm552_vm6, %v554_v52, %v556_v56  ;;  %v558_v0 = vrot.slane %v9534_v43, 1  ;;  %v6597_v50 = vld [vmem:[%s13747_s3 + $0x1f0] sm:$0xf] }
  0x22   :  { %v426_v63 = vsel %vm419_vm5, %v424_v60, %v425_v61  ;;  %v428_v54 = vrot.slane %v120_v18, 1  ;;  %vm438_vm7 = vcmask 1047552   ;;  %v6535_v60 = vld [vmem:[%s13747_s3 + $0x178] sm:$0xf0] }
  0x23   :  { %485 = vmatpush.bf16.msra.mxu2 %v6378_v29  ;;  %514 = vmatpush.bf16.msra.mxu3 %v6382_v33  ;;  %v559_v3 = vsel %vm552_vm6, %v556_v56, %v558_v0  ;;  %vm9714_vm8 = vmand %vm438_vm7, %vm419_vm5  ;;  %v8917_v56 = vld [vmem:[%s13747_s3 + $0x174] sm:$0xf] }
  0x24   :  { %v430_v11 = vor.u32 %v428_v54, %v117_v2 }
  0x2b   :  { %6312 = vmatmul.msk.bf16.gmra.mxu0 %vm152_vm4, %v107_v21  ;;  %6316 = vmatmul.msk.bf16.gmra.mxu1 %vm152_vm4, %v107_v21 }
  0x2e   :  { %6314 = vmatmul.msk.bf16.gmra.mxu2 %vm152_vm4, %v123_v22  ;;  %6318 = vmatmul.msk.bf16.gmra.mxu3 %vm152_vm4, %v123_v22 }
  0x3b   :  { %6363 = vmatmul.msk.bf16.vlgmr.msrb.gmra.mxu0 %vm152_vm4, %v9525_v39  ;;  %6367 = vmatmul.msk.bf16.vlgmr.msrb.gmra.mxu1 %vm152_vm4, %v9525_v39 }
  0x3e   :  { %6335 = vmatmul.msk.bf16.vlgmr.msrb.gmra.mxu2 %vm152_vm4, %v82_v25  ;;  %6339 = vmatmul.msk.bf16.vlgmr.msrb.gmra.mxu3 %vm152_vm4, %v82_v25 }
  0x4b   :  { %6364 = vmatmul.msk.bf16.gmra.mxu0 %vm152_vm4, %v9545_v51  ;;  %6368 = vmatmul.msk.bf16.gmra.mxu1 %vm152_vm4, %v9545_v51  ;;  %v427_v51 = vor.u32 %v425_v61, %v109_v58 }
  0x4d   :  { %v429_v4 = vsel %vm419_vm5, %v427_v51, %v428_v54 }
  0x4e   :  { %6336 = vmatmul.msk.bf16.gmra.mxu2 %vm152_vm4, %v74_v41  ;;  %6340 = vmatmul.msk.bf16.gmra.mxu3 %vm152_vm4, %v74_v41 }
  0x5b   :  { %6365 = vmatmul.msk.bf16.gmra.mxu0 %vm152_vm4, %v9549_v53  ;;  %6369 = vmatmul.msk.bf16.gmra.mxu1 %vm152_vm4, %v9549_v53  ;;  %v432_v53 = vpack.c.b16 %v9361_v5, %v9361_v5  ;;  %v8916_v5 = vld [vmem:[%s13747_s3 + $0x164] sm:$0xf0] }
  0x5d   :  { %v434_v9 = vshll.u32 %v432_v53, 16  ;;  %v560_v10 = vrot.slane %v432_v53, 1  ;;  %v6589_v53 = vld [vmem:[%s13747_s3 + $0x1e0] sm:$0xf] }
  0x5e   :  { %6337 = vmatmul.msk.bf16.gmra.mxu2 %vm152_vm4, %v76_v48  ;;  %6341 = vmatmul.msk.bf16.gmra.mxu3 %vm152_vm4, %v76_v48 }
  0x5f   :  { %v436_v39 = vrot.slane %v434_v9, 1  ;;  %v564_v15 = vsel %vm552_vm6, %v558_v0, %v560_v10  ;;  %v6599_v0 = vld [vmem:[%s13747_s3 + $0x1f8] sm:$0xf0] }
  0x61   :  { %v440_v19 = vsel %vm9714_vm8, %v430_v11, %v436_v39  ;;  %v8932_v39 = vld [vmem:[%s13747_s3 + $0x1e4] sm:$0xf0] }
  0x6b   :  { %6366 = vmatmul.msk.bf16.gmra.mxu0 %vm152_vm4, %v9534_v43  ;;  %6370 = vmatmul.msk.bf16.gmra.mxu1 %vm152_vm4, %v9534_v43 }
  0x6e   :  { %6338 = vmatmul.msk.bf16.gmra.mxu2 %vm152_vm4, %v78_v44  ;;  %6342 = vmatmul.msk.bf16.gmra.mxu3 %vm152_vm4, %v78_v44  ;;  %v8918_v44 = vld [vmem:[%s13747_s3 + $0x174] sm:$0xf0] }
  0x6f   :  { %v6534_v52 = vor.u32 %v8918_v44, %v6533_v49  ;;  %v8928_v44 = vld [vmem:[%s13747_s3 + $0x1c4] sm:$0xf0] }
  0x71   :  { %1112 = vmatpush.bf16.msrb.mxu2 %v6534_v52  ;;  %v6511_v52 = vld [vmem:[%s13747_s3 + $0x148] sm:$0xf0] }
  0x7b   :  { %6419 = vmatmul.msk.bf16.vlgmr.msra.gmra.mxu0 %vm152_vm4, %v555_v55  ;;  %6423 = vmatmul.msk.bf16.vlgmr.msra.gmra.mxu1 %vm152_vm4, %v555_v55  ;;  %v8934_v55 = vld [vmem:[%s13747_s3 + $0x1f4] sm:$0xf0] }
  0x7c   :  { %v6598_v61 = vor.u32 %v8934_v55, %v6597_v50  ;;  %v8911_v50 = vld [vmem:[%s13747_s3 + $0x144] sm:$0xf] }
  0x7e   :  { %6391 = vmatmul.msk.bf16.vlgmr.msra.gmra.mxu2 %vm152_vm4, %v423_v46  ;;  %6395 = vmatmul.msk.bf16.vlgmr.msra.gmra.mxu3 %vm152_vm4, %v423_v46 }
  0x7f   :  { %1141 = vmatpush.bf16.msrb.mxu3 %v6598_v61  ;;  %v6575_v61 = vld [vmem:[%s13747_s3 + $0x1c8] sm:$0xf0] }
  0x8b   :  { %6420 = vmatmul.msk.bf16.gmra.mxu0 %vm152_vm4, %v557_v62  ;;  %6424 = vmatmul.msk.bf16.gmra.mxu1 %vm152_vm4, %v557_v62  ;;  %v6538_v62 = vor.u32 %v8917_v56, %v6535_v60  ;;  %v6514_v56 = vor.u32 %v8911_v50, %v6511_v52  ;;  %v8927_v60 = vld [vmem:[%s13747_s3 + $0x1c4] sm:$0xf]  ;;  %v8922_v50 = vld [vmem:[%s13747_s3 + $0x194] sm:$0xf0]  ;;  %v8905_v52 = vld [vmem:[%s13747_s3 + $0x114] sm:$0xf] }
  0x8d   :  { %1170 = vmatpush.bf16.msrb.mxu0 %v6538_v62  ;;  %v6578_v62 = vor.u32 %v8927_v60, %v6575_v61  ;;  %v8921_v61 = vld [vmem:[%s13747_s3 + $0x194] sm:$0xf] }
  0x8e   :  { %6392 = vmatmul.msk.bf16.gmra.mxu2 %vm152_vm4, %v426_v63  ;;  %6396 = vmatmul.msk.bf16.gmra.mxu3 %vm152_vm4, %v426_v63  ;;  %v8933_v63 = vld [vmem:[%s13747_s3 + $0x1f4] sm:$0xf] }
  0x98   :  { %v174_v59 = vpop.f32.mrf.mxu0  ;;  %v203_v1 = vpop.f32.mrf.mxu1 }
  0x9b   :  { %6421 = vmatmul.msk.bf16.gmra.mxu0 %vm152_vm4, %v559_v3  ;;  %6425 = vmatmul.msk.bf16.gmra.mxu1 %vm152_vm4, %v559_v3 }
  0x9e   :  { %6393 = vmatmul.msk.bf16.gmra.mxu2 %vm152_vm4, %v429_v4  ;;  %6397 = vmatmul.msk.bf16.gmra.mxu3 %vm152_vm4, %v429_v4  ;;  %v6525_v4 = vld [vmem:[%s13747_s3 + $0x160] sm:$0xf] }
  0x9f   :  { %v6526_v11 = vor.u32 %v8916_v5, %v6525_v4  ;;  %v8909_v4 = vld [vmem:[%s13747_s3 + $0x134] sm:$0xf]  ;;  %v6503_v5 = vld [vmem:[%s13747_s3 + $0x138] sm:$0xf0] }
  0xa0   :  { %v9703_v58 = vpop.f32.mrf.mxu0  ;;  %v9705_v6 = vpop.f32.mrf.mxu1 }
  0xa1   :  { %v9707_v7 = vpop.f32.mrf.mxu2  ;;  %v9709_v8 = vpop.f32.mrf.mxu3  ;;  %1113 = vmatpush.bf16.msrb.mxu2 %v6526_v11  ;;  %v6567_v11 = vld [vmem:[%s13747_s3 + $0x1b8] sm:$0xf0] }
  0xa8   :  { %v179_v12 = vpop.f32.mrf.mxu0  ;;  %v208_v13 = vpop.f32.mrf.mxu1 }
  0xa9   :  { %v9719_v16 = vpop.f32.mrf.mxu2  ;;  %v9721_v18 = vpop.f32.mrf.mxu3  ;;  %v8915_v12 = vld [vmem:[%s13747_s3 + $0x164] sm:$0xf]  ;;  %v6527_v13 = vld [vmem:[%s13747_s3 + $0x168] sm:$0xf0] }
  0xab   :  { %6422 = vmatmul.msk.bf16.gmra.mxu0 %vm152_vm4, %v564_v15  ;;  %6426 = vmatmul.msk.bf16.gmra.mxu1 %vm152_vm4, %v564_v15  ;;  %v6590_v15 = vor.u32 %v8932_v39, %v6589_v53 }
  0xad   :  { %1142 = vmatpush.bf16.msrb.mxu3 %v6590_v15  ;;  %v742_v15 = vunpack.c.l.b16 %v9404_v17 }
  0xae   :  { %6394 = vmatmul.msk.bf16.gmra.mxu2 %vm152_vm4, %v440_v19  ;;  %6398 = vmatmul.msk.bf16.gmra.mxu3 %vm152_vm4, %v440_v19  ;;  %v6530_v19 = vor.u32 %v8915_v12, %v6527_v13 }
  0xb0   :  { %v181_v43 = vpop.f32.mrf.mxu0  ;;  %v210_v2 = vpop.f32.mrf.mxu1  ;;  %1171 = vmatpush.bf16.msrb.mxu0 %v6530_v19  ;;  %v743_v19 = vunpack.c.h.b16 %v9404_v17 }
  0xb1   :  { %v189_v20 = vpop.f32.mrf.mxu2  ;;  %v218_v21 = vpop.f32.mrf.mxu3 }
  0xb2   :  { %v6517_v21 = vld [vmem:[%s13747_s3 + $0x150] sm:$0xf] }
  0xb8   :  { %v354_v22 = vpop.f32.mrf.mxu0  ;;  %v383_v23 = vpop.f32.mrf.mxu1 }
  0xb9   :  { %v191_v24 = vpop.f32.mrf.mxu2  ;;  %v220_v25 = vpop.f32.mrf.mxu3 }
  0xba   :  { %v8930_v25 = vld [vmem:[%s13747_s3 + $0x1d4] sm:$0xf0] }
  0xc0   :  { %v9729_v26 = vpop.f32.mrf.mxu0  ;;  %v9731_v27 = vpop.f32.mrf.mxu1 }
  0xc1   :  { %v263_v28 = vpop.f32.mrf.mxu2  ;;  %v292_v29 = vpop.f32.mrf.mxu3 }
  0xc2   :  { %v264_v30 = vadd.f32 %v263_v28, %v174_v59  ;;  %v293_v31 = vadd.f32 %v292_v29, %v203_v1  ;;  %v6602_v59 = vor.u32 %v8933_v63, %v6599_v0  ;;  %v8913_v28 = vld [vmem:[%s13747_s3 + $0x154] sm:$0xf]  ;;  %v6519_v29 = vld [vmem:[%s13747_s3 + $0x158] sm:$0xf0]  ;;  %v6501_v63 = vld [vmem:[%s13747_s3 + $0x130] sm:$0xf] }
  0xc3   :  { %v8910_v0 = vld [vmem:[%s13747_s3 + $0x134] sm:$0xf0] }
  0xc4   :  { %v9733_v32 = vadd.f32 %v354_v22, %v264_v30  ;;  %v9735_v33 = vadd.f32 %v383_v23, %v293_v31  ;;  %1199 = vmatpush.bf16.msrb.mxu1 %v6602_v59  ;;  %v8914_v22 = vld [vmem:[%s13747_s3 + $0x154] sm:$0xf0]  ;;  %v6581_v23 = vld [vmem:[%s13747_s3 + $0x1d0] sm:$0xf]  ;;  %v6522_v31 = vor.u32 %v8913_v28, %v6519_v29  ;;  %v6495_v28 = vld [vmem:[%s13747_s3 + $0x128] sm:$0xf0] }
  0xc5   :  { %v6518_v24 = vor.u32 %v8914_v22, %v6517_v21  ;;  %v6582_v30 = vor.u32 %v8930_v25, %v6581_v23  ;;  %v6565_v59 = vld [vmem:[%s13747_s3 + $0x1b0] sm:$0xf]  ;;  %v8908_v21 = vld [vmem:[%s13747_s3 + $0x124] sm:$0xf0]  ;;  %v6557_v22 = vld [vmem:[%s13747_s3 + $0x1a0] sm:$0xf] }
  0xc6   :  { %1172 = vmatpush.bf16.msrb.mxu0 %v6522_v31  ;;  %v8907_v25 = vld [vmem:[%s13747_s3 + $0x124] sm:$0xf] }
  0xc7   :  { %1114 = vmatpush.bf16.msrb.mxu2 %v6518_v24  ;;  %1143 = vmatpush.bf16.msrb.mxu3 %v6582_v30  ;;  %v8924_v24 = vld [vmem:[%s13747_s3 + $0x1a4] sm:$0xf0]  ;;  %v6498_v30 = vor.u32 %v8907_v25, %v6495_v28  ;;  %v8923_v31 = vld [vmem:[%s13747_s3 + $0x1a4] sm:$0xf]  ;;  %v48_v25 = vld [vmem:[%s13746_s2] sm:$0x3] }
  0xc8   :  { %v359_v34 = vpop.f32.mrf.mxu0  ;;  %v388_v35 = vpop.f32.mrf.mxu1  ;;  %v6558_v29 = vor.u32 %v8924_v24, %v6557_v22 }
  0xc9   :  { %v9737_v36 = vpop.f32.mrf.mxu2  ;;  %v9739_v37 = vpop.f32.mrf.mxu3  ;;  %v8929_v34 = vld [vmem:[%s13747_s3 + $0x1d4] sm:$0xf]  ;;  %v6583_v35 = vld [vmem:[%s13747_s3 + $0x1d8] sm:$0xf0] }
  0xca   :  { %1173 = vmatpush.bf16.msrb.mxu0 %v6514_v56 }
  0xd0   :  { %v361_v38 = vpop.f32.mrf.mxu0  ;;  %v390_v40 = vpop.f32.mrf.mxu1 }
  0xd1   :  { %v268_v41 = vpop.f32.mrf.mxu2  ;;  %v297_v42 = vpop.f32.mrf.mxu3 }
  0xd2   :  { %v6586_v41 = vor.u32 %v8929_v34, %v6583_v35  ;;  %v6559_v34 = vld [vmem:[%s13747_s3 + $0x1a8] sm:$0xf0] }
  0xd3   :  { %v6562_v35 = vor.u32 %v8923_v31, %v6559_v34 }
  0xd8   :  { %v364_v45 = vpop.f32.mrf.mxu0  ;;  %v393_v46 = vpop.f32.mrf.mxu1 }
  0xd9   :  { %v270_v47 = vpop.f32.mrf.mxu2  ;;  %v299_v48 = vpop.f32.mrf.mxu3 }
  0xda   :  { %v8912_v47 = vld [vmem:[%s13747_s3 + $0x144] sm:$0xf0]  ;;  %v6573_v48 = vld [vmem:[%s13747_s3 + $0x1c0] sm:$0xf] }
  0xdb   :  { %v6574_v55 = vor.u32 %v8928_v44, %v6573_v48  ;;  %v8906_v48 = vld [vmem:[%s13747_s3 + $0x114] sm:$0xf0] }
  0xdd   :  { %1144 = vmatpush.bf16.msrb.mxu3 %v6574_v55  ;;  %v6487_v55 = vld [vmem:[%s13747_s3 + $0x118] sm:$0xf0] }
  0xde   :  { %v6490_v60 = vor.u32 %v8905_v52, %v6487_v55  ;;  %v266_v52 = vadd.f32 %v9737_v36, %v9703_v58  ;;  %v295_v55 = vadd.f32 %v9739_v37, %v9705_v6 }
  0xe0   :  { %v9765_v51 = vpop.f32.mrf.mxu0  ;;  %v9767_v54 = vpop.f32.mrf.mxu1 }
  0xe1   :  { %v273_v1 = vpop.f32.mrf.mxu2  ;;  %v302_v3 = vpop.f32.mrf.mxu3 }
  0xe2   :  { %v274_v9 = vadd.f32 %v273_v1, %v9707_v7  ;;  %v303_v10 = vadd.f32 %v302_v3, %v9709_v8  ;;  %v8931_v7 = vld [vmem:[%s13747_s3 + $0x1e4] sm:$0xf]  ;;  %v6591_v8 = vld [vmem:[%s13747_s3 + $0x1e8] sm:$0xf0]  ;;  %v6502_v1 = vor.u32 %v8910_v0, %v6501_v63  ;;  %v8926_v3 = vld [vmem:[%s13747_s3 + $0x1b4] sm:$0xf0] }
  0xe3   :  { %v6594_v20 = vor.u32 %v8931_v7, %v6591_v8  ;;  %v6566_v53 = vor.u32 %v8926_v3, %v6565_v59 }
  0xe4   :  { %v9795_v43 = vadd.f32 %v364_v45, %v274_v9  ;;  %v9797_v2 = vadd.f32 %v393_v46, %v303_v10  ;;  %v6509_v46 = vld [vmem:[%s13747_s3 + $0x140] sm:$0xf]  ;;  %v6506_v9 = vor.u32 %v8909_v4, %v6503_v5  ;;  %v8925_v10 = vld [vmem:[%s13747_s3 + $0x1b4] sm:$0xf] }
  0xe5   :  { %1200 = vmatpush.bf16.msrb.mxu1 %v6594_v20  ;;  %v6510_v49 = vor.u32 %v8912_v47, %v6509_v46  ;;  %v6570_v13 = vor.u32 %v8925_v10, %v6567_v11  ;;  %1145 = vmatpush.bf16.msrb.mxu3 %v6566_v53  ;;  %v6493_v20 = vld [vmem:[%s13747_s3 + $0x120] sm:$0xf]  ;;  %v9907_v46 = vld [vmem:[#allocation3 + $0x14] sm:$0xf]  ;;  %v6485_v47 = vld [vmem:[%s13747_s3 + $0x110] sm:$0xf] }
  0xe6   :  { %1174 = vmatpush.bf16.msrb.mxu0 %v6506_v9  ;;  %v6494_v23 = vor.u32 %v8908_v21, %v6493_v20  ;;  %v6486_v44 = vor.u32 %v8906_v48, %v6485_v47  ;;  %v6477_v53 = vld [vmem:[%s13747_s3 + $0x100] sm:$0xf]  ;;  %v8904_v9 = vld [vmem:[%s13747_s3 + $0x104] sm:$0xf0]  ;;  %v9945_v11 = vld [vmem:[#allocation3 + $0x14] sm:$0xf0] }
  0xe7   :  { %1115 = vmatpush.bf16.msrb.mxu2 %v6510_v49  ;;  %v6549_v49 = vld [vmem:[%s13747_s3 + $0x190] sm:$0xf]  ;;  %v6541_v10 = vld [vmem:[%s13747_s3 + $0x180] sm:$0xf]  ;;  %v6543_v20 = vld [vmem:[%s13747_s3 + $0x188] sm:$0xf0] }
  0xe8   :  { %v369_v38 = vpop.f32.mrf.mxu0  ;;  %v398_v40 = vpop.f32.mrf.mxu1  ;;  %v6550_v56 = vor.u32 %v8922_v50, %v6549_v49  ;;  %v6431_v21 = vld [vmem:[#allocation3 + $0x18] sm:$0xf0]  ;;  %v9985_v49 = vperm.slane %v48_v25, 0  ;;  %v9988_v50 = vperm.slane %v48_v25, 1 }
  0xe9   :  { %v9823_v42 = vpop.f32.mrf.mxu2  ;;  %v9825_v45 = vpop.f32.mrf.mxu3  ;;  %1201 = vmatpush.bf16.msrb.mxu1 %v6586_v41  ;;  %v9901_v38 = vpack.c.b16 %v742_v15, %v742_v15  ;;  %v9903_v40 = vpack.c.b16 %v743_v19, %v743_v19  ;;  %v9905_v41 = vld [vmem:[#allocation3 + $0x10] sm:$0xf]  ;;  %1146 = vmatpush.bf16.msrb.mxu3 %v6558_v29  ;;  %v6479_v15 = vld [vmem:[%s13747_s3 + $0x108] sm:$0xf0]  ;;  %4503 = vst [vmem:[#allocation3 + $0x18] sm:$0xff] %v9404_v17 }
  0xea   :  { %1175 = vmatpush.bf16.msrb.mxu0 %v6498_v30  ;;  %4502 = vst [vmem:[#allocation3 + $0x10] sm:$0xff] %v9404_v17 }
  0xeb   :  { %1116 = vmatpush.bf16.msrb.mxu2 %v6502_v1  ;;  %v897_v1 = vshll.u32 %v9901_v38, 16  ;;  %v905_v3 = vshll.u32 %v9903_v40, 16  ;;  %v9967_v24 = vshrl.u32 %v9903_v40, 16 }
  0xed   :  { %1202 = vmatpush.bf16.msrb.mxu1 %v6578_v62  ;;  %v6551_v62 = vld [vmem:[%s13747_s3 + $0x198] sm:$0xf0]  ;;  %1147 = vmatpush.bf16.msrb.mxu3 %v6550_v56  ;;  %v9974_v28 = vrot.slane %v897_v1, 1  ;;  %v9978_v17 = vrot.slane %v905_v3, 1 }
  0xee   :  { %v6554_v59 = vor.u32 %v8921_v61, %v6551_v62  ;;  %1176 = vmatpush.bf16.msrb.mxu0 %v6490_v60 }
  0xef   :  { %1117 = vmatpush.bf16.msrb.mxu2 %v6494_v23  ;;  %v9964_v23 = vshrl.u32 %v9901_v38, 16  ;;  %v1858_v47 = vor.u32 %v9978_v17, %v9967_v24 }
  0xf0   :  { %v371_v39 = vpop.f32.mrf.mxu0  ;;  %v400_v12 = vpop.f32.mrf.mxu1 }
  0xf1   :  { %v278_v7 = vpop.f32.mrf.mxu2  ;;  %v307_v8 = vpop.f32.mrf.mxu3  ;;  %1203 = vmatpush.bf16.msrb.mxu1 %v6570_v13  ;;  %v6478_v39 = vor.u32 %v8904_v9, %v6477_v53  ;;  %v8920_v12 = vld [vmem:[%s13747_s3 + $0x184] sm:$0xf0]  ;;  %v8903_v13 = vld [vmem:[%s13747_s3 + $0x104] sm:$0xf] }
  0xf2   :  { %v6542_v19 = vor.u32 %v8920_v12, %v6541_v10  ;;  %v6482_v7 = vor.u32 %v8903_v13, %v6479_v15  ;;  %v8919_v8 = vld [vmem:[%s13747_s3 + $0x184] sm:$0xf] }
  0xf3   :  { %1118 = vmatpush.bf16.msrb.mxu2 %v6486_v44  ;;  %v6546_v22 = vor.u32 %v8919_v8, %v6543_v20 }
  0xf4   :  { %1148 = vmatpush.bf16.msrb.mxu3 %v6542_v19  ;;  %1177 = vmatpush.bf16.msrb.mxu0 %v6482_v7 }
  0xf5   :  { %1204 = vmatpush.bf16.msrb.mxu1 %v6562_v35  ;;  %v1857_v35 = vor.u32 %v9974_v28, %v9964_v23 }
  0xf7   :  { %1119 = vmatpush.bf16.msrb.mxu2 %v6478_v39 }
  0xf8   :  { %v610_v63 = vpop.f32.mrf.mxu0  ;;  %v639_v0 = vpop.f32.mrf.mxu1 }
  0xf9   :  { %v280_v4 = vpop.f32.mrf.mxu2  ;;  %v309_v5 = vpop.f32.mrf.mxu3  ;;  %1205 = vmatpush.bf16.msrb.mxu1 %v6554_v59 }
  0xfa   :  { %v405_v4 = vadd.f32 %v9729_v26, %v266_v52 }
  0xfd   :  { %1206 = vmatpush.bf16.msrb.mxu1 %v6546_v22 }
 0x100   :  { %v612_v29 = vpop.f32.mrf.mxu0  ;;  %v641_v30 = vpop.f32.mrf.mxu1 }
 0x101   :  { %v487_v31 = vpop.f32.mrf.mxu2  ;;  %v516_v34 = vpop.f32.mrf.mxu3 }
 0x102   :  { %v536_v48 = vadd.f32 %v487_v31, %v9733_v32  ;;  %v537_v44 = vadd.f32 %v516_v34, %v9735_v33  ;;  %v406_v33 = vadd.f32 %v9731_v27, %v295_v55  ;;  %v10008_v31 = vor.u32 %v9945_v11, %v9905_v41 }
 0x104   :  { %v659_v56 = vadd.f32 %v610_v63, %v536_v48  ;;  %v660_v60 = vadd.f32 %v639_v0, %v537_v44  ;;  %v10011_v44 = vor.u32 %v9907_v46, %v6431_v21  ;;  %v862_v21 = vshrl.u32 %v10008_v31, 16 }
 0x106   :  { %v680_v61 = vadd.f32 %v9985_v49, %v659_v56  ;;  %v681_v62 = vadd.f32 %v9988_v50, %v660_v60  ;;  %v873_v41 = vshll.u32 %v10011_v44, 16 }
 0x108   :  { %v696_v59 = vmax.f32 %v680_v61, 0.0  ;;  %v697_v32 = vmax.f32 %v681_v62, 0.0  ;;  %v615_v5 = vpop.f32.mrf.mxu0  ;;  %v644_v53 = vpop.f32.mrf.mxu1  ;;  %v865_v61 = vshll.u32 %v10008_v31, 16  ;;  %v840_v62 = vrot.slane %v9964_v23, 3 }
 0x109   :  { %v489_v9 = vpop.f32.mrf.mxu2  ;;  %v518_v10 = vpop.f32.mrf.mxu3 }
 0x10a   :  { %v712_v58 = vpack.c.bf16 %v697_v32, %v696_v59  ;;  %v538_v36 = vadd.f32 %v489_v9, %v405_v4  ;;  %v539_v39 = vadd.f32 %v518_v10, %v406_v33  ;;  %v844_v59 = vrot.slane %v9967_v24, 3 }
 0x10b   :  { %v10037_v32 = vrot.slane %v873_v41, 1 }
 0x10c   :  { %v661_v6 = vadd.f32 %v612_v29, %v538_v36  ;;  %v662_v37 = vadd.f32 %v641_v30, %v539_v39  ;;  %v755_v63 = vunpack.c.l.b16 %v712_v58  ;;  %v756_v0 = vunpack.c.h.b16 %v712_v58  ;;  %v6661_v39 = vld [vmem:[%s13747_s3 + $0x70] sm:$0xf] }
 0x10e   :  { %v682_v12 = vadd.f32 %v9985_v49, %v661_v6  ;;  %v683_v13 = vadd.f32 %v9988_v50, %v662_v37  ;;  %v10000_v15 = vpack.c.b16 %v755_v63, %v755_v63  ;;  %v10002_v26 = vpack.c.b16 %v756_v0, %v756_v0  ;;  %v8886_v6 = vld [vmem:[%s13747_s3 + $0x74] sm:$0xf0]  ;;  %v6725_v37 = vld [vmem:[%s13747_s3 + $0xf0] sm:$0xf] }
 0x110   :  { %v698_v27 = vmax.f32 %v682_v12, 0.0  ;;  %v699_v19 = vmax.f32 %v683_v13, 0.0  ;;  %v617_v7 = vpop.f32.mrf.mxu0  ;;  %v646_v8 = vpop.f32.mrf.mxu1  ;;  %v1870_v20 = vshll.u32 %v10000_v15, 16  ;;  %v1874_v22 = vshll.u32 %v10002_v26, 16 }
 0x111   :  { %v492_v25 = vpop.f32.mrf.mxu2  ;;  %v521_v29 = vpop.f32.mrf.mxu3  ;;  %v8885_v8 = vld [vmem:[%s13747_s3 + $0x74] sm:$0xf] }
 0x112   :  { %v713_v30 = vpack.c.bf16 %v699_v19, %v698_v27  ;;  %v1872_v34 = vrot.slane %v1870_v20, 1  ;;  %v1876_v48 = vrot.slane %v1874_v22, 1  ;;  %v8902_v27 = vld [vmem:[%s13747_s3 + $0xf4] sm:$0xf0]  ;;  %v6662_v19 = vor.u32 %v8886_v6, %v6661_v39  ;;  %v6663_v20 = vld [vmem:[%s13747_s3 + $0x78] sm:$0xf0] }
 0x113   :  { %v6726_v7 = vor.u32 %v8902_v27, %v6725_v37  ;;  %v8901_v22 = vld [vmem:[%s13747_s3 + $0xf4] sm:$0xf]  ;;  %v6655_v27 = vld [vmem:[%s13747_s3 + $0x68] sm:$0xf0] }
 0x114   :  { %v757_v52 = vunpack.c.l.b16 %v713_v30  ;;  %v758_v55 = vunpack.c.h.b16 %v713_v30  ;;  %v10015_v56 = vsel %vm9714_vm8, %v1857_v35, %v1872_v34  ;;  %v10019_v60 = vsel %vm9714_vm8, %v1858_v47, %v1876_v48  ;;  %v6727_v34 = vld [vmem:[%s13747_s3 + $0xf8] sm:$0xf0]  ;;  %v6653_v48 = vld [vmem:[%s13747_s3 + $0x60] sm:$0xf]  ;;  %1388 = vmatpush.bf16.msra.mxu2 %v6662_v19  ;;  %v8899_v19 = vld [vmem:[%s13747_s3 + $0xe4] sm:$0xf] }
 0x115   :  { %v10032_v35 = vrot.slane %v865_v61, 1  ;;  %v870_v47 = vshrl.u32 %v10011_v44, 16  ;;  %v6666_v30 = vor.u32 %v8885_v8, %v6663_v20  ;;  %1417 = vmatpush.bf16.msra.mxu3 %v6726_v7  ;;  %v6719_v7 = vld [vmem:[%s13747_s3 + $0xe8] sm:$0xf0]  ;;  %v8882_v20 = vld [vmem:[%s13747_s3 + $0x54] sm:$0xf0] }
 0x116   :  { %v10023_v11 = vpack.c.b16 %v757_v52, %v755_v63  ;;  %v10026_v46 = vpack.c.b16 %v758_v55, %v756_v0  ;;  %v8884_v52 = vld [vmem:[%s13747_s3 + $0x64] sm:$0xf0]  ;;  %v6730_v55 = vor.u32 %v8901_v22, %v6727_v34  ;;  %v6709_v22 = vld [vmem:[%s13747_s3 + $0xd0] sm:$0xf]  ;;  %v8881_v34 = vld [vmem:[%s13747_s3 + $0x54] sm:$0xf] }
 0x117   :  { %1446 = vmatpush.bf16.msra.mxu0 %v6666_v30 }
 0x118   :  { %v10039_v4 = vpop.f32.mrf.mxu0  ;;  %v10041_v33 = vpop.f32.mrf.mxu1  ;;  %v848_v5 = vshrl.u32 %v10023_v11, 16  ;;  %v851_v53 = vshll.u32 %v10023_v11, 16  ;;  %v855_v9 = vshrl.u32 %v10026_v46, 16  ;;  %v858_v10 = vshll.u32 %v10026_v46, 16  ;;  %1475 = vmatpush.bf16.msra.mxu1 %v6730_v55 }
 0x119   :  { %v494_v58 = vpop.f32.mrf.mxu2  ;;  %v523_v36 = vpop.f32.mrf.mxu3 }
 0x11a   :  { %v10056_v63 = vrot.slane %v848_v5, 7  ;;  %v1837_v0 = vrot.slane %v851_v53, 1  ;;  %v10058_v12 = vrot.slane %v855_v9, 7  ;;  %v1841_v13 = vrot.slane %v858_v10, 1  ;;  %v8883_v36 = vld [vmem:[%s13747_s3 + $0x64] sm:$0xf] }
 0x11b   :  { %v6654_v58 = vor.u32 %v8884_v52, %v6653_v48  ;;  %v6647_v48 = vld [vmem:[%s13747_s3 + $0x58] sm:$0xf0] }
 0x11c   :  { %v853_v25 = vor.u32 %v851_v53, %v10056_v63  ;;  %v860_v29 = vor.u32 %v858_v10, %v10058_v12  ;;  %v6717_v53 = vld [vmem:[%s13747_s3 + $0xe0] sm:$0xf]  ;;  %v8900_v10 = vld [vmem:[%s13747_s3 + $0xe4] sm:$0xf0]  ;;  %v1838_v8 = vor.u32 %v1837_v0, %v848_v5  ;;  %v6722_v5 = vor.u32 %v8899_v19, %v6719_v7  ;;  %v8898_v0 = vld [vmem:[%s13747_s3 + $0xd4] sm:$0xf0] }
 0x11d   :  { %v6718_v37 = vor.u32 %v8900_v10, %v6717_v53  ;;  %1389 = vmatpush.bf16.msra.mxu2 %v6654_v58  ;;  %v6710_v10 = vor.u32 %v8898_v0, %v6709_v22  ;;  %v6650_v19 = vor.u32 %v8881_v34, %v6647_v48  ;;  %v8880_v7 = vld [vmem:[%s13747_s3 + $0x44] sm:$0xf0]  ;;  %v8895_v0 = vld [vmem:[%s13747_s3 + $0xc4] sm:$0xf]  ;;  %v6703_v34 = vld [vmem:[%s13747_s3 + $0xc8] sm:$0xf0] }
 0x11e   :  { %v917_v39 = vsel %vm9556_vm3, %v840_v62, %v853_v25  ;;  %v918_v6 = vsel %vm9556_vm3, %v844_v59, %v860_v29  ;;  %v6658_v62 = vor.u32 %v8883_v36, %v6655_v27  ;;  %v6645_v59 = vld [vmem:[%s13747_s3 + $0x50] sm:$0xf]  ;;  %v1842_v25 = vor.u32 %v1841_v13, %v855_v9  ;;  %v8897_v36 = vld [vmem:[%s13747_s3 + $0xd4] sm:$0xf]  ;;  %1476 = vmatpush.bf16.msra.mxu1 %v6722_v5 }
 0x11f   :  { %1120 = vmatmul.bf16.vlgmr.msrb.gmra.mxu2 %v917_v39  ;;  %1149 = vmatmul.bf16.vlgmr.msrb.gmra.mxu3 %v918_v6  ;;  %v10129_v9 = vsel %vm419_vm5, %v1838_v8, %v10032_v35  ;;  %v6646_v53 = vor.u32 %v8882_v20, %v6645_v59  ;;  %v6701_v8 = vld [vmem:[%s13747_s3 + $0xc0] sm:$0xf]  ;;  %v8896_v59 = vld [vmem:[%s13747_s3 + $0xc4] sm:$0xf0]  ;;  %v6639_v20 = vld [vmem:[%s13747_s3 + $0x48] sm:$0xf0] }
 0x120   :  { %v10114_v29 = vpop.f32.mrf.mxu0  ;;  %v10116_v30 = vpop.f32.mrf.mxu1  ;;  %1178 = vmatmul.bf16.vlgmr.msrb.gmra.mxu0 %v917_v39  ;;  %1207 = vmatmul.bf16.vlgmr.msrb.gmra.mxu1 %v918_v6  ;;  %v6711_v39 = vld [vmem:[%s13747_s3 + $0xd8] sm:$0xf0]  ;;  %v6637_v6 = vld [vmem:[%s13747_s3 + $0x40] sm:$0xf]  ;;  %v10142_v27 = vsel %vm419_vm5, %v1842_v25, %v10037_v32  ;;  %v6629_v5 = vld [vmem:[%s13747_s3 + $0x30] sm:$0xf] }
 0x121   :  { %v497_v13 = vpop.f32.mrf.mxu2  ;;  %v526_v52 = vpop.f32.mrf.mxu3  ;;  %1418 = vmatpush.bf16.msra.mxu3 %v6718_v37  ;;  %1447 = vmatpush.bf16.msra.mxu0 %v6658_v62  ;;  %v10161_v37 = vrot.slane %v862_v21, 7  ;;  %v8879_v62 = vld [vmem:[%s13747_s3 + $0x44] sm:$0xf] }
 0x122   :  { %v544_v55 = vadd.f32 %v497_v13, %v9795_v43  ;;  %v545_v58 = vadd.f32 %v526_v52, %v9797_v2  ;;  %v276_v43 = vadd.f32 %v9823_v42, %v9719_v16  ;;  %v305_v2 = vadd.f32 %v9825_v45, %v9721_v18  ;;  %1390 = vmatpush.bf16.msra.mxu2 %v6646_v53  ;;  %v8878_v13 = vld [vmem:[%s13747_s3 + $0x34] sm:$0xf0]  ;;  %v6693_v52 = vld [vmem:[%s13747_s3 + $0xb0] sm:$0xf] }
 0x123   :  { %v10173_v16 = vrot.slane %v870_v47, 7  ;;  %v6714_v18 = vor.u32 %v8897_v36, %v6711_v39  ;;  %v6638_v42 = vor.u32 %v8880_v7, %v6637_v6  ;;  %v6702_v45 = vor.u32 %v8896_v59, %v6701_v8  ;;  %v8894_v39 = vld [vmem:[%s13747_s3 + $0xb4] sm:$0xf0]  ;;  %v8877_v6 = vld [vmem:[%s13747_s3 + $0x34] sm:$0xf] }
 0x124   :  { %v667_v22 = vadd.f32 %v10039_v4, %v544_v55  ;;  %v668_v25 = vadd.f32 %v10041_v33, %v545_v58  ;;  %v6642_v48 = vor.u32 %v8879_v62, %v6639_v20  ;;  %v413_v53 = vadd.f32 %v9765_v51, %v276_v43  ;;  %v6631_v55 = vld [vmem:[%s13747_s3 + $0x38] sm:$0xf0]  ;;  %v8893_v20 = vld [vmem:[%s13747_s3 + $0xb4] sm:$0xf] }
 0x125   :  { %1419 = vmatpush.bf16.msra.mxu3 %v6710_v10  ;;  %1448 = vmatpush.bf16.msra.mxu0 %v6650_v19  ;;  %v414_v36 = vadd.f32 %v9767_v54, %v305_v2  ;;  %v867_v10 = vor.u32 %v865_v61, %v10161_v37  ;;  %v875_v61 = vor.u32 %v873_v41, %v10173_v16  ;;  %v6621_v41 = vld [vmem:[%s13747_s3 + $0x20] sm:$0xf] }
 0x126   :  { %v688_v4 = vadd.f32 %v9985_v49, %v667_v22  ;;  %v689_v33 = vadd.f32 %v9988_v50, %v668_v25  ;;  %v6706_v7 = vor.u32 %v8895_v0, %v6703_v34  ;;  %1477 = vmatpush.bf16.msra.mxu1 %v6714_v18  ;;  %1391 = vmatpush.bf16.msra.mxu2 %v6638_v42  ;;  %v6695_v22 = vld [vmem:[%s13747_s3 + $0xb8] sm:$0xf0]  ;;  %v8876_v18 = vld [vmem:[%s13747_s3 + $0x24] sm:$0xf0]  ;;  %v6685_v42 = vld [vmem:[%s13747_s3 + $0xa0] sm:$0xf] }
 0x127   :  { %v6630_v43 = vor.u32 %v8878_v13, %v6629_v5  ;;  %v6694_v2 = vor.u32 %v8894_v39, %v6693_v52  ;;  %v6634_v62 = vor.u32 %v8877_v6, %v6631_v55  ;;  %v868_v13 = vsel %vm92_vm2, %v10056_v63, %v867_v10  ;;  %v6687_v63 = vld [vmem:[%s13747_s3 + $0xa8] sm:$0xf0] }
 0x128   :  { %v704_v58 = vmax.f32 %v688_v4, 0.0  ;;  %v705_v51 = vmax.f32 %v689_v33, 0.0  ;;  %v625_v19 = vpop.f32.mrf.mxu0  ;;  %v654_v54 = vpop.f32.mrf.mxu1  ;;  %v8892_v4 = vld [vmem:[%s13747_s3 + $0xa4] sm:$0xf0]  ;;  %v8875_v33 = vld [vmem:[%s13747_s3 + $0x24] sm:$0xf]  ;;  %v876_v52 = vsel %vm92_vm2, %v10058_v12, %v875_v61  ;;  %v10250_v12 = vor.u32 %v10032_v35, %v862_v21 }
 0x129   :  { %v499_v8 = vpop.f32.mrf.mxu2  ;;  %v528_v59 = vpop.f32.mrf.mxu3  ;;  %1420 = vmatpush.bf16.msra.mxu3 %v6702_v45  ;;  %1449 = vmatpush.bf16.msra.mxu0 %v6642_v48  ;;  %v6623_v45 = vld [vmem:[%s13747_s3 + $0x28] sm:$0xf0]  ;;  %v6686_v39 = vor.u32 %v8892_v4, %v6685_v42  ;;  %v6613_v21 = vld [vmem:[%s13747_s3 + $0x10] sm:$0xf]  ;;  %v8874_v35 = vld [vmem:[%s13747_s3 + $0x14] sm:$0xf0] }
 0x12a   :  { %v716_v25 = vpack.c.bf16 %v705_v51, %v704_v58  ;;  %v546_v0 = vadd.f32 %v499_v8, %v413_v53  ;;  %v547_v34 = vadd.f32 %v528_v59, %v414_v36  ;;  %1478 = vmatpush.bf16.msra.mxu1 %v6706_v7  ;;  %1392 = vmatpush.bf16.msra.mxu2 %v6630_v43  ;;  %v8890_v8 = vld [vmem:[%s13747_s3 + $0x94] sm:$0xf0]  ;;  %v8873_v59 = vld [vmem:[%s13747_s3 + $0x14] sm:$0xf]  ;;  %v6615_v43 = vld [vmem:[%s13747_s3 + $0x18] sm:$0xf0] }
 0x12b   :  { %v6698_v53 = vor.u32 %v8893_v20, %v6695_v22  ;;  %v6622_v36 = vor.u32 %v8876_v18, %v6621_v41  ;;  %v8889_v20 = vld [vmem:[%s13747_s3 + $0x94] sm:$0xf]  ;;  %v6679_v22 = vld [vmem:[%s13747_s3 + $0x98] sm:$0xf0]  ;;  %v6605_v41 = vld [vmem:[%s13747_s3] sm:$0xf] }
 0x12c   :  { %724 = vst [vmem:[#allocation3 + $0x20] sm:$0xff] %v716_v25  ;;  %v669_v48 = vadd.f32 %v10114_v29, %v546_v0  ;;  %v670_v5 = vadd.f32 %v10116_v30, %v547_v34  ;;  %v6626_v29 = vor.u32 %v8875_v33, %v6623_v45  ;;  %v8891_v30 = vld [vmem:[%s13747_s3 + $0xa4] sm:$0xf]  ;;  %v6682_v42 = vor.u32 %v8889_v20, %v6679_v22  ;;  %v8872_v4 = vld [vmem:[%s13747_s3 + $0x4] sm:$0xf0] }
 0x12d   :  { %1421 = vmatpush.bf16.msra.mxu3 %v6694_v2  ;;  %1450 = vmatpush.bf16.msra.mxu0 %v6634_v62  ;;  %v6690_v61 = vor.u32 %v8891_v30, %v6687_v63  ;;  %v6618_v62 = vor.u32 %v8873_v59, %v6615_v43  ;;  %v6669_v33 = vld [vmem:[%s13747_s3 + $0x80] sm:$0xf]  ;;  %v8888_v45 = vld [vmem:[%s13747_s3 + $0x84] sm:$0xf0]  ;;  %v8949_v20 = vld [vmem:[%s13747_s3 + $0x274] sm:$0xf] }
 0x12e   :  { %v690_v6 = vadd.f32 %v9985_v49, %v669_v48  ;;  %v691_v55 = vadd.f32 %v9988_v50, %v670_v5  ;;  %v10255_v49 = vor.u32 %v10037_v32, %v870_v47  ;;  %1479 = vmatpush.bf16.msra.mxu1 %v6698_v53  ;;  %1393 = vmatpush.bf16.msra.mxu2 %v6622_v36  ;;  %v6677_v47 = vld [vmem:[%s13747_s3 + $0x90] sm:$0xf]  ;;  %v8887_v53 = vld [vmem:[%s13747_s3 + $0x84] sm:$0xf]  ;;  %v6823_v22 = vld [vmem:[%s13747_s3 + $0x278] sm:$0xf0] }
 0x12f   :  { %1125 = vmatmul.bf16.gmra.mxu2 %v868_v13  ;;  %1154 = vmatmul.bf16.gmra.mxu3 %v876_v52  ;;  %v6614_v32 = vor.u32 %v8874_v35, %v6613_v21  ;;  %v6678_v2 = vor.u32 %v8890_v8, %v6677_v47  ;;  %v6606_v48 = vor.u32 %v8872_v4, %v6605_v41  ;;  %v8948_v4 = vld [vmem:[%s13747_s3 + $0x264] sm:$0xf0] }
 0x130   :  { %v706_v50 = vmax.f32 %v690_v6, 0.0  ;;  %v707_v10 = vmax.f32 %v691_v55, 0.0  ;;  %v627_v58 = vpop.f32.mrf.mxu0  ;;  %v656_v51 = vpop.f32.mrf.mxu1  ;;  %1183 = vmatmul.bf16.gmra.mxu0 %v868_v13  ;;  %1212 = vmatmul.bf16.gmra.mxu1 %v876_v52  ;;  %v6670_v5 = vor.u32 %v8888_v45, %v6669_v33  ;;  %v8871_v13 = vld [vmem:[%s13747_s3 + $0x4] sm:$0xf]  ;;  %v6607_v52 = vld [vmem:[%s13747_s3 + $0x8] sm:$0xf0] }
 0x131   :  { %v502_v19 = vpop.f32.mrf.mxu2  ;;  %v531_v54 = vpop.f32.mrf.mxu3  ;;  %1422 = vmatpush.bf16.msra.mxu3 %v6686_v39  ;;  %1451 = vmatpush.bf16.msra.mxu0 %v6626_v29  ;;  %v6610_v6 = vor.u32 %v8871_v13, %v6607_v52  ;;  %v6671_v55 = vld [vmem:[%s13747_s3 + $0x88] sm:$0xf0]  ;;  %v6877_v33 = vld [vmem:[%s13747_s3 + $0x2e0] sm:$0xf]  ;;  %v8964_v45 = vld [vmem:[%s13747_s3 + $0x2e4] sm:$0xf0] }
 0x132   :  { %v717_v7 = vpack.c.bf16 %v707_v10, %v706_v50  ;;  %1480 = vmatpush.bf16.msra.mxu1 %v6690_v61  ;;  %1394 = vmatpush.bf16.msra.mxu2 %v6614_v32  ;;  %v6674_v63 = vor.u32 %v8887_v53, %v6671_v55  ;;  %v8947_v13 = vld [vmem:[%s13747_s3 + $0x264] sm:$0xf]  ;;  %v6815_v52 = vld [vmem:[%s13747_s3 + $0x268] sm:$0xf0]  ;;  %v904_v55 = vrot.slane %v9967_v24, 7 }
 0x133   :  { %v6437_v34 = vld [vmem:[#allocation3 + $0x20] sm:$0xf]  ;;  %v8869_v18 = vld [vmem:[#allocation3 + $0x24] sm:$0xf]  ;;  %v8946_v24 = vld [vmem:[%s13747_s3 + $0x254] sm:$0xf0] }
 0x134   :  { %725 = vst [vmem:[#allocation3 + $0x28] sm:$0xff] %v717_v7  ;;  %v8963_v53 = vld [vmem:[%s13747_s3 + $0x2e4] sm:$0xf] }
 0x135   :  { %1423 = vmatpush.bf16.msra.mxu3 %v6678_v2  ;;  %1452 = vmatpush.bf16.msra.mxu0 %v6618_v62 }
 0x136   :  { %1481 = vmatpush.bf16.msra.mxu1 %v6682_v42  ;;  %1395 = vmatpush.bf16.msra.mxu2 %v6606_v48 }
 0x139   :  { %v504_v25 = vpop.f32.mrf.mxu2  ;;  %v533_v0 = vpop.f32.mrf.mxu3  ;;  %1424 = vmatpush.bf16.msra.mxu3 %v6670_v5  ;;  %1453 = vmatpush.bf16.msra.mxu0 %v6610_v6  ;;  %v6878_v5 = vor.u32 %v8964_v45, %v6877_v33  ;;  %v896_v6 = vrot.slane %v9964_v23, 7  ;;  %v6805_v23 = vld [vmem:[%s13747_s3 + $0x250] sm:$0xf] }
 0x13a   :  { %1482 = vmatpush.bf16.msra.mxu1 %v6674_v63  ;;  %v6826_v25 = vor.u32 %v8949_v20, %v6823_v22  ;;  %v8965_v0 = vld [vmem:[%s13747_s3 + $0x2f4] sm:$0xf]  ;;  %v6799_v20 = vld [vmem:[%s13747_s3 + $0x248] sm:$0xf0]  ;;  %v8959_v22 = vld [vmem:[%s13747_s3 + $0x2c4] sm:$0xf] }
 0x13b   :  { %v8870_v36 = vld [vmem:[#allocation3 + $0x24] sm:$0xf0]  ;;  %v6439_v39 = vld [vmem:[#allocation3 + $0x28] sm:$0xf0] }
 0x13c   :  { %v10305_v29 = vor.u32 %v8870_v36, %v6437_v34  ;;  %v10307_v30 = vor.u32 %v8869_v18, %v6439_v39  ;;  %v6887_v34 = vld [vmem:[%s13747_s3 + $0x2f8] sm:$0xf0]  ;;  %v6813_v18 = vld [vmem:[%s13747_s3 + $0x260] sm:$0xf]  ;;  %v6818_v36 = vor.u32 %v8947_v13, %v6815_v52  ;;  %v6879_v39 = vld [vmem:[%s13747_s3 + $0x2e8] sm:$0xf0] }
 0x13d   :  { %v6890_v42 = vor.u32 %v8965_v0, %v6887_v34  ;;  %1763 = vmatpush.bf16.msrb.mxu0 %v6826_v25  ;;  %v6814_v48 = vor.u32 %v8948_v4, %v6813_v18  ;;  %v6882_v63 = vor.u32 %v8963_v53, %v6879_v39  ;;  %v6863_v25 = vld [vmem:[%s13747_s3 + $0x2c8] sm:$0xf0]  ;;  %v746_v34 = vrot.slane %v9901_v38, 3  ;;  %v6853_v13 = vld [vmem:[%s13747_s3 + $0x2b0] sm:$0xf] }
 0x13e   :  { %v878_v50 = vshrl.u32 %v10305_v29, 16  ;;  %v881_v10 = vshll.u32 %v10305_v29, 16  ;;  %v886_v58 = vshrl.u32 %v10307_v30, 16  ;;  %v889_v51 = vshll.u32 %v10307_v30, 16  ;;  %v8958_v53 = vld [vmem:[%s13747_s3 + $0x2b4] sm:$0xf0] }
 0x13f   :  { %1792 = vmatpush.bf16.msrb.mxu1 %v6890_v42  ;;  %v6866_v0 = vor.u32 %v8959_v22, %v6863_v25  ;;  %v777_v18 = vrot.slane %v10023_v11, 7  ;;  %v747_v42 = vrot.slane %v9903_v40, 3  ;;  %v778_v4 = vrot.slane %v10026_v46, 7  ;;  %v6791_v39 = vld [vmem:[%s13747_s3 + $0x238] sm:$0xf0] }
 0x140   :  { %v880_v19 = vrot.slane %v878_v50, 7  ;;  %v888_v54 = vrot.slane %v886_v58, 7  ;;  %v1846_v61 = vrot.slane %v881_v10, 1  ;;  %v1849_v7 = vrot.slane %v889_v51, 1  ;;  %v6775_v22 = vld [vmem:[%s13747_s3 + $0x218] sm:$0xf0] }
 0x141   :  { %1764 = vmatpush.bf16.msrb.mxu0 %v6818_v36  ;;  %v799_v33 = vsel %vm71_vm1, %v746_v34, %v777_v18  ;;  %v803_v45 = vsel %vm71_vm1, %v747_v42, %v778_v4  ;;  %v8941_v36 = vld [vmem:[%s13747_s3 + $0x234] sm:$0xf]  ;;  %v6839_v34 = vld [vmem:[%s13747_s3 + $0x298] sm:$0xf0] }
 0x142   :  { %v883_v21 = vor.u32 %v881_v10, %v880_v19  ;;  %v891_v35 = vor.u32 %v889_v51, %v888_v54  ;;  %v10315_v47 = vsel %vm419_vm5, %v10250_v12, %v1846_v61  ;;  %v10319_v32 = vsel %vm419_vm5, %v10255_v49, %v1849_v7  ;;  %v6821_v49 = vld [vmem:[%s13747_s3 + $0x270] sm:$0xf] }
 0x143   :  { %v1851_v8 = vor.u32 %v1846_v61, %v878_v50  ;;  %v1854_v59 = vor.u32 %v1849_v7, %v886_v58  ;;  %1793 = vmatpush.bf16.msrb.mxu1 %v6882_v63  ;;  %v899_v50 = vor.u32 %v897_v1, %v896_v6  ;;  %v907_v10 = vor.u32 %v905_v3, %v904_v55  ;;  %v6869_v1 = vld [vmem:[%s13747_s3 + $0x2d0] sm:$0xf]  ;;  %v6807_v61 = vld [vmem:[%s13747_s3 + $0x258] sm:$0xf0]  ;;  %v8957_v63 = vld [vmem:[%s13747_s3 + $0x2b4] sm:$0xf] }
 0x144   :  { %v884_v43 = vsel %vm92_vm2, %v10161_v37, %v883_v21  ;;  %v892_v2 = vsel %vm92_vm2, %v10173_v16, %v891_v35  ;;  %v8950_v37 = vld [vmem:[%s13747_s3 + $0x274] sm:$0xf0]  ;;  %v6885_v16 = vld [vmem:[%s13747_s3 + $0x2f0] sm:$0xf]  ;;  %v6806_v3 = vor.u32 %v8946_v24, %v6805_v23  ;;  %v8961_v35 = vld [vmem:[%s13747_s3 + $0x2d4] sm:$0xf]  ;;  %v6854_v6 = vor.u32 %v8958_v53, %v6853_v13 }
 0x145   :  { %1130 = vmatmul.bf16.gmra.mxu2 %v884_v43  ;;  %1159 = vmatmul.bf16.gmra.mxu3 %v892_v2  ;;  %v10327_v62 = vsel %vm419_vm5, %v1851_v8, %v9974_v28  ;;  %v10331_v12 = vsel %vm419_vm5, %v1854_v59, %v9978_v17  ;;  %v6822_v28 = vor.u32 %v8950_v37, %v6821_v49  ;;  %v8966_v17 = vld [vmem:[%s13747_s3 + $0x2f4] sm:$0xf0]  ;;  %v6871_v8 = vld [vmem:[%s13747_s3 + $0x2d8] sm:$0xf0]  ;;  %v6797_v59 = vld [vmem:[%s13747_s3 + $0x240] sm:$0xf] }
 0x146   :  { %1188 = vmatmul.bf16.gmra.mxu0 %v884_v43  ;;  %1217 = vmatmul.bf16.gmra.mxu1 %v892_v2  ;;  %v6886_v41 = vor.u32 %v8966_v17, %v6885_v16  ;;  %v900_v58 = vsel %vm92_vm2, %v880_v19, %v899_v50  ;;  %v908_v51 = vsel %vm92_vm2, %v888_v54, %v907_v10  ;;  %v8962_v19 = vld [vmem:[%s13747_s3 + $0x2d4] sm:$0xf0]  ;;  %v8945_v54 = vld [vmem:[%s13747_s3 + $0x254] sm:$0xf]  ;;  %v8944_v2 = vld [vmem:[%s13747_s3 + $0x244] sm:$0xf0] }
 0x147   :  { %1705 = vmatpush.bf16.msrb.mxu2 %v6822_v28  ;;  %v6870_v7 = vor.u32 %v8962_v19, %v6869_v1  ;;  %v6810_v21 = vor.u32 %v8945_v54, %v6807_v61  ;;  %v6874_v43 = vor.u32 %v8961_v35, %v6871_v8  ;;  %v6861_v49 = vld [vmem:[%s13747_s3 + $0x2c0] sm:$0xf]  ;;  %v8960_v37 = vld [vmem:[%s13747_s3 + $0x2c4] sm:$0xf0]  ;;  %v6798_v16 = vor.u32 %v8944_v2, %v6797_v59  ;;  %v8943_v17 = vld [vmem:[%s13747_s3 + $0x244] sm:$0xf] }
 0x148   :  { %1734 = vmatpush.bf16.msrb.mxu3 %v6886_v41  ;;  %v6862_v28 = vor.u32 %v8960_v37, %v6861_v49  ;;  %v6802_v41 = vor.u32 %v8943_v17, %v6799_v20  ;;  %v6794_v55 = vor.u32 %v8941_v36, %v6791_v39  ;;  %v6855_v50 = vld [vmem:[%s13747_s3 + $0x2b8] sm:$0xf0]  ;;  %v6781_v10 = vld [vmem:[%s13747_s3 + $0x220] sm:$0xf]  ;;  %v8956_v24 = vld [vmem:[%s13747_s3 + $0x2a4] sm:$0xf0] }
 0x149   :  { %1765 = vmatpush.bf16.msrb.mxu0 %v6810_v21  ;;  %1794 = vmatpush.bf16.msrb.mxu1 %v6874_v43  ;;  %v6845_v23 = vld [vmem:[%s13747_s3 + $0x2a0] sm:$0xf]  ;;  %v8939_v19 = vld [vmem:[%s13747_s3 + $0x224] sm:$0xf]  ;;  %v6783_v54 = vld [vmem:[%s13747_s3 + $0x228] sm:$0xf0] }
 0x14a   :  { %v8955_v61 = vld [vmem:[%s13747_s3 + $0x2a4] sm:$0xf]  ;;  %v6847_v21 = vld [vmem:[%s13747_s3 + $0x2a8] sm:$0xf0]  ;;  %v779_v8 = vrot.slane %v10008_v31, 7  ;;  %v781_v59 = vrot.slane %v10011_v44, 7 }
 0x14b   :  { %1706 = vmatpush.bf16.msrb.mxu2 %v6814_v48  ;;  %v6789_v48 = vld [vmem:[%s13747_s3 + $0x230] sm:$0xf]  ;;  %v6850_v35 = vor.u32 %v8955_v61, %v6847_v21  ;;  %v8938_v37 = vld [vmem:[%s13747_s3 + $0x214] sm:$0xf0]  ;;  %v8937_v20 = vld [vmem:[%s13747_s3 + $0x214] sm:$0xf] }
 0x14c   :  { %1735 = vmatpush.bf16.msrb.mxu3 %v6878_v5  ;;  %v8942_v5 = vld [vmem:[%s13747_s3 + $0x234] sm:$0xf0]  ;;  %v780_v43 = vsel %vm71_vm1, %v777_v18, %v779_v8  ;;  %v782_v2 = vsel %vm71_vm1, %v778_v4, %v781_v59  ;;  %v6773_v49 = vld [vmem:[%s13747_s3 + $0x210] sm:$0xf]  ;;  %v6778_v25 = vor.u32 %v8937_v20, %v6775_v22  ;;  %v6765_v18 = vld [vmem:[%s13747_s3 + $0x200] sm:$0xf] }
 0x14d   :  { %1766 = vmatpush.bf16.msrb.mxu0 %v6802_v41  ;;  %1795 = vmatpush.bf16.msrb.mxu1 %v6866_v0  ;;  %v6790_v52 = vor.u32 %v8942_v5, %v6789_v48  ;;  %v8954_v17 = vld [vmem:[%s13747_s3 + $0x294] sm:$0xf0]  ;;  %v8953_v0 = vld [vmem:[%s13747_s3 + $0x294] sm:$0xf]  ;;  %v8936_v4 = vld [vmem:[%s13747_s3 + $0x204] sm:$0xf0] }
 0x14e   :  { %v6842_v42 = vor.u32 %v8953_v0, %v6839_v34  ;;  %v6766_v48 = vor.u32 %v8936_v4, %v6765_v18  ;;  %v8935_v13 = vld [vmem:[%s13747_s3 + $0x204] sm:$0xf]  ;;  %v6831_v39 = vld [vmem:[%s13747_s3 + $0x288] sm:$0xf0]  ;;  %v7047_v21 = vld [vmem:[%s13747_s3 + $0x3f8] sm:$0xf0] }
 0x14f   :  { %1707 = vmatpush.bf16.msrb.mxu2 %v6806_v3  ;;  %v6846_v3 = vor.u32 %v8956_v24, %v6845_v23  ;;  %v8951_v53 = vld [vmem:[%s13747_s3 + $0x284] sm:$0xf]  ;;  %v7045_v23 = vld [vmem:[%s13747_s3 + $0x3f0] sm:$0xf]  ;;  %v7039_v22 = vld [vmem:[%s13747_s3 + $0x3e8] sm:$0xf0] }
 0x150   :  { %1736 = vmatpush.bf16.msrb.mxu3 %v6870_v7  ;;  %v6786_v7 = vor.u32 %v8939_v19, %v6783_v54  ;;  %v6983_v19 = vld [vmem:[%s13747_s3 + $0x378] sm:$0xf0]  ;;  %v789_v0 = vrot.slane %v9903_v40, 7  ;;  %v8978_v4 = vld [vmem:[%s13747_s3 + $0x354] sm:$0xf0] }
 0x151   :  { %1767 = vmatpush.bf16.msrb.mxu0 %v6794_v55  ;;  %v785_v55 = vrot.slane %v10307_v30, 7 }
 0x153   :  { %1708 = vmatpush.bf16.msrb.mxu2 %v6798_v16  ;;  %v6837_v16 = vld [vmem:[%s13747_s3 + $0x290] sm:$0xf]  ;;  %v790_v18 = vsel %vm71_vm1, %v785_v55, %v789_v0 }
 0x154   :  { %1737 = vmatpush.bf16.msrb.mxu3 %v6862_v28  ;;  %v6774_v28 = vor.u32 %v8938_v37, %v6773_v49  ;;  %v6838_v41 = vor.u32 %v8954_v17, %v6837_v16  ;;  %v8979_v16 = vld [vmem:[%s13747_s3 + $0x364] sm:$0xf] }
 0x155   :  { %1135 = vmatmul.bf16.gmra.mxu2 %v900_v58  ;;  %1164 = vmatmul.bf16.gmra.mxu3 %v908_v51  ;;  %v8995_v17 = vld [vmem:[%s13747_s3 + $0x3e4] sm:$0xf] }
 0x156   :  { %1193 = vmatmul.bf16.gmra.mxu0 %v900_v58  ;;  %1222 = vmatmul.bf16.gmra.mxu1 %v908_v51  ;;  %v6858_v58 = vor.u32 %v8957_v63, %v6855_v50  ;;  %v8940_v51 = vld [vmem:[%s13747_s3 + $0x224] sm:$0xf0]  ;;  %v6834_v63 = vor.u32 %v8951_v53, %v6831_v39  ;;  %v7031_v39 = vld [vmem:[%s13747_s3 + $0x3d8] sm:$0xf0] }
 0x157   :  { %1709 = vmatpush.bf16.msrb.mxu2 %v6790_v52  ;;  %v6782_v1 = vor.u32 %v8940_v51, %v6781_v10  ;;  %1768 = vmatpush.bf16.msrb.mxu0 %v6786_v7  ;;  %v6767_v52 = vld [vmem:[%s13747_s3 + $0x208] sm:$0xf0]  ;;  %v786_v10 = vsel %vm71_vm1, %v781_v59, %v785_v55  ;;  %v8982_v51 = vld [vmem:[%s13747_s3 + $0x374] sm:$0xf0]  ;;  %v8997_v7 = vld [vmem:[%s13747_s3 + $0x3f4] sm:$0xf] }
 0x158   :  { %1738 = vmatpush.bf16.msrb.mxu3 %v6854_v6  ;;  %1796 = vmatpush.bf16.msrb.mxu1 %v6858_v58  ;;  %v6770_v36 = vor.u32 %v8935_v13, %v6767_v52  ;;  %v783_v6 = vrot.slane %v10305_v29, 7  ;;  %v6981_v58 = vld [vmem:[%s13747_s3 + $0x370] sm:$0xf]  ;;  %v8980_v59 = vld [vmem:[%s13747_s3 + $0x364] sm:$0xf0] }
 0x159   :  { %v6982_v24 = vor.u32 %v8982_v51, %v6981_v58  ;;  %v6967_v13 = vld [vmem:[%s13747_s3 + $0x358] sm:$0xf0] }
 0x15a   :  { %v784_v50 = vsel %vm71_vm1, %v779_v8, %v783_v6  ;;  %v7050_v8 = vor.u32 %v8997_v7, %v7047_v21  ;;  %v6959_v7 = vld [vmem:[%s13747_s3 + $0x348] sm:$0xf0]  ;;  %v8991_v21 = vld [vmem:[%s13747_s3 + $0x3c4] sm:$0xf] }
 0x15b   :  { %1710 = vmatpush.bf16.msrb.mxu2 %v6782_v1  ;;  %1769 = vmatpush.bf16.msrb.mxu0 %v6778_v25  ;;  %v8998_v1 = vld [vmem:[%s13747_s3 + $0x3f4] sm:$0xf0]  ;;  %v787_v25 = vrot.slane %v9901_v38, 7 }
 0x15c   :  { %1739 = vmatpush.bf16.msrb.mxu3 %v6846_v3  ;;  %1797 = vmatpush.bf16.msrb.mxu1 %v6850_v35  ;;  %v8981_v3 = vld [vmem:[%s13747_s3 + $0x374] sm:$0xf]  ;;  %v7046_v54 = vor.u32 %v8998_v1, %v7045_v23  ;;  %v6973_v35 = vld [vmem:[%s13747_s3 + $0x360] sm:$0xf] }
 0x15d   :  { %v6986_v61 = vor.u32 %v8981_v3, %v6983_v19  ;;  %v6974_v49 = vor.u32 %v8980_v59, %v6973_v35  ;;  %v788_v34 = vsel %vm71_vm1, %v783_v6, %v787_v25  ;;  %v6957_v6 = vld [vmem:[%s13747_s3 + $0x340] sm:$0xf] }
 0x15f   :  { %1711 = vmatpush.bf16.msrb.mxu2 %v6774_v28  ;;  %1770 = vmatpush.bf16.msrb.mxu0 %v6770_v36  ;;  %v6975_v28 = vld [vmem:[%s13747_s3 + $0x368] sm:$0xf0]  ;;  %v8993_v36 = vld [vmem:[%s13747_s3 + $0x3d4] sm:$0xf] }
 0x160   :  { %1740 = vmatpush.bf16.msrb.mxu3 %v6838_v41  ;;  %1798 = vmatpush.bf16.msrb.mxu1 %v6842_v42  ;;  %v6978_v20 = vor.u32 %v8979_v16, %v6975_v28  ;;  %v7042_v41 = vor.u32 %v8995_v17, %v7039_v22  ;;  %v6965_v42 = vld [vmem:[%s13747_s3 + $0x350] sm:$0xf]  ;;  %v7034_v55 = vor.u32 %v8993_v36, %v7031_v39  ;;  %v8974_v16 = vld [vmem:[%s13747_s3 + $0x334] sm:$0xf0]  ;;  %v7005_v36 = vld [vmem:[%s13747_s3 + $0x3a0] sm:$0xf] }
 0x161   :  { %v7013_v28 = vld [vmem:[%s13747_s3 + $0x3b0] sm:$0xf]  ;;  %v8988_v39 = vld [vmem:[%s13747_s3 + $0x3a4] sm:$0xf0] }
 0x163   :  { %1712 = vmatpush.bf16.msrb.mxu2 %v6766_v48  ;;  %v8994_v48 = vld [vmem:[%s13747_s3 + $0x3d4] sm:$0xf0] }
 0x164   :  { %1799 = vmatpush.bf16.msrb.mxu1 %v6834_v63  ;;  %v8976_v63 = vld [vmem:[%s13747_s3 + $0x344] sm:$0xf0] }
 0x165   :  { %1396 = vmatmul.bf16.vlgmr.msra.gmra.mxu2 %v799_v33  ;;  %1425 = vmatmul.bf16.vlgmr.msra.gmra.mxu3 %v803_v45  ;;  %v6958_v58 = vor.u32 %v8976_v63, %v6957_v6  ;;  %v7006_v6 = vor.u32 %v8988_v39, %v7005_v36  ;;  %v6991_v36 = vld [vmem:[%s13747_s3 + $0x388] sm:$0xf0]  ;;  %v7141_v39 = vld [vmem:[%s13747_s3 + $0x470] sm:$0xf] }
 0x166   :  { %1454 = vmatmul.bf16.vlgmr.msra.gmra.mxu0 %v799_v33  ;;  %1483 = vmatmul.bf16.vlgmr.msra.gmra.mxu1 %v803_v45  ;;  %v6829_v33 = vld [vmem:[%s13747_s3 + $0x280] sm:$0xf]  ;;  %v8952_v45 = vld [vmem:[%s13747_s3 + $0x284] sm:$0xf0] }
 0x167   :  { %v6830_v5 = vor.u32 %v8952_v45, %v6829_v33  ;;  %2074 = vmatpush.bf16.msra.mxu2 %v6982_v24  ;;  %2132 = vmatpush.bf16.msra.mxu0 %v6986_v61  ;;  %v7029_v33 = vld [vmem:[%s13747_s3 + $0x3d0] sm:$0xf]  ;;  %v6966_v45 = vor.u32 %v8978_v4, %v6965_v42  ;;  %v8975_v61 = vld [vmem:[%s13747_s3 + $0x344] sm:$0xf]  ;;  %v8989_v42 = vld [vmem:[%s13747_s3 + $0x3b4] sm:$0xf] }
 0x168   :  { %2161 = vmatpush.bf16.msra.mxu1 %v7050_v8  ;;  %v7030_v52 = vor.u32 %v8994_v48, %v7029_v33  ;;  %v6962_v59 = vor.u32 %v8975_v61, %v6959_v7  ;;  %v7015_v48 = vld [vmem:[%s13747_s3 + $0x3b8] sm:$0xf0]  ;;  %v6933_v61 = vld [vmem:[%s13747_s3 + $0x310] sm:$0xf]  ;;  %v8970_v7 = vld [vmem:[%s13747_s3 + $0x314] sm:$0xf0] }
 0x169   :  { %1741 = vmatpush.bf16.msrb.mxu3 %v6830_v5  ;;  %v8977_v5 = vld [vmem:[%s13747_s3 + $0x354] sm:$0xf] }
 0x16a   :  { %v6970_v53 = vor.u32 %v8977_v5, %v6967_v13  ;;  %v6941_v5 = vld [vmem:[%s13747_s3 + $0x320] sm:$0xf]  ;;  %v8972_v13 = vld [vmem:[%s13747_s3 + $0x324] sm:$0xf0] }
 0x16b   :  { %2075 = vmatpush.bf16.msra.mxu2 %v6974_v49  ;;  %2133 = vmatpush.bf16.msra.mxu0 %v6978_v20  ;;  %v8990_v20 = vld [vmem:[%s13747_s3 + $0x3b4] sm:$0xf0] }
 0x16c   :  { %2162 = vmatpush.bf16.msra.mxu1 %v7042_v41  ;;  %v7014_v22 = vor.u32 %v8990_v20, %v7013_v28  ;;  %v8985_v28 = vld [vmem:[%s13747_s3 + $0x394] sm:$0xf]  ;;  %v6999_v20 = vld [vmem:[%s13747_s3 + $0x398] sm:$0xf0] }
 0x16d   :  { %2103 = vmatpush.bf16.msra.mxu3 %v7046_v54 }
 0x16f   :  { %2076 = vmatpush.bf16.msra.mxu2 %v6966_v45  ;;  %2134 = vmatpush.bf16.msra.mxu0 %v6970_v53  ;;  %v6942_v53 = vor.u32 %v8972_v13, %v6941_v5  ;;  %v8967_v5 = vld [vmem:[%s13747_s3 + $0x304] sm:$0xf]  ;;  %v6927_v13 = vld [vmem:[%s13747_s3 + $0x308] sm:$0xf0] }
 0x170   :  { %2163 = vmatpush.bf16.msra.mxu1 %v7034_v55 }
 0x173   :  { %2077 = vmatpush.bf16.msra.mxu2 %v6958_v58  ;;  %2135 = vmatpush.bf16.msra.mxu0 %v6962_v59  ;;  %v8987_v58 = vld [vmem:[%s13747_s3 + $0x3a4] sm:$0xf] }
 0x175   :  { %1401 = vmatmul.bf16.gmra.mxu2 %v780_v43  ;;  %1430 = vmatmul.bf16.gmra.mxu3 %v782_v2 }
 0x176   :  { %1459 = vmatmul.bf16.gmra.mxu0 %v780_v43  ;;  %1488 = vmatmul.bf16.gmra.mxu1 %v782_v2  ;;  %v7037_v43 = vld [vmem:[%s13747_s3 + $0x3e0] sm:$0xf]  ;;  %v8996_v2 = vld [vmem:[%s13747_s3 + $0x3e4] sm:$0xf0] }
 0x177   :  { %v7038_v37 = vor.u32 %v8996_v2, %v7037_v43  ;;  %v7023_v43 = vld [vmem:[%s13747_s3 + $0x3c8] sm:$0xf0] }
 0x178   :  { %v7026_v49 = vor.u32 %v8991_v21, %v7023_v43  ;;  %v6997_v21 = vld [vmem:[%s13747_s3 + $0x390] sm:$0xf] }
 0x179   :  { %2104 = vmatpush.bf16.msra.mxu3 %v7038_v37  ;;  %v6949_v37 = vld [vmem:[%s13747_s3 + $0x330] sm:$0xf] }
 0x17a   :  { %v6950_v17 = vor.u32 %v8974_v16, %v6949_v37  ;;  %2164 = vmatpush.bf16.msra.mxu1 %v7026_v49  ;;  %v8969_v37 = vld [vmem:[%s13747_s3 + $0x314] sm:$0xf]  ;;  %v6935_v16 = vld [vmem:[%s13747_s3 + $0x318] sm:$0xf0] }
 0x17c   :  { %2078 = vmatpush.bf16.msra.mxu2 %v6950_v17  ;;  %v6938_v17 = vor.u32 %v8969_v37, %v6935_v16 }
 0x17d   :  { %2105 = vmatpush.bf16.msra.mxu3 %v7030_v52  ;;  %v7018_v52 = vor.u32 %v8989_v42, %v7015_v48  ;;  %v8984_v42 = vld [vmem:[%s13747_s3 + $0x384] sm:$0xf0] }
 0x17f   :  { %2165 = vmatpush.bf16.msra.mxu1 %v7018_v52  ;;  %v8983_v52 = vld [vmem:[%s13747_s3 + $0x384] sm:$0xf] }
 0x180   :  { %2079 = vmatpush.bf16.msra.mxu2 %v6942_v53  ;;  %v6930_v53 = vor.u32 %v8967_v5, %v6927_v13  ;;  %v7199_v5 = vld [vmem:[%s13747_s3 + $0x4e8] sm:$0xf0] }
 0x185   :  { %1406 = vmatmul.bf16.gmra.mxu2 %v784_v50  ;;  %1435 = vmatmul.bf16.gmra.mxu3 %v786_v10 }
 0x186   :  { %1464 = vmatmul.bf16.gmra.mxu0 %v784_v50  ;;  %1493 = vmatmul.bf16.gmra.mxu1 %v786_v10  ;;  %v7021_v50 = vld [vmem:[%s13747_s3 + $0x3c0] sm:$0xf]  ;;  %v8992_v10 = vld [vmem:[%s13747_s3 + $0x3c4] sm:$0xf0] }
 0x187   :  { %v7022_v51 = vor.u32 %v8992_v10, %v7021_v50  ;;  %v8971_v50 = vld [vmem:[%s13747_s3 + $0x324] sm:$0xf]  ;;  %v6943_v10 = vld [vmem:[%s13747_s3 + $0x328] sm:$0xf0] }
 0x189   :  { %2106 = vmatpush.bf16.msra.mxu3 %v7022_v51  ;;  %v6946_v51 = vor.u32 %v8971_v50, %v6943_v10  ;;  %v6994_v50 = vor.u32 %v8983_v52, %v6991_v36  ;;  %v7125_v52 = vld [vmem:[%s13747_s3 + $0x450] sm:$0xf] }
 0x18a   :  { %v7189_v36 = vld [vmem:[%s13747_s3 + $0x4d0] sm:$0xf] }
 0x18d   :  { %2107 = vmatpush.bf16.msra.mxu3 %v7014_v22  ;;  %v6925_v22 = vld [vmem:[%s13747_s3 + $0x300] sm:$0xf] }
 0x191   :  { %2108 = vmatpush.bf16.msra.mxu3 %v7006_v6  ;;  %v9014_v6 = vld [vmem:[%s13747_s3 + $0x474] sm:$0xf0] }
 0x192   :  { %v7142_v10 = vor.u32 %v9014_v6, %v7141_v39  ;;  %v9026_v6 = vld [vmem:[%s13747_s3 + $0x4d4] sm:$0xf0] }
 0x195   :  { %1411 = vmatmul.bf16.gmra.mxu2 %v788_v34  ;;  %1440 = vmatmul.bf16.gmra.mxu3 %v790_v18 }
 0x196   :  { %1469 = vmatmul.bf16.gmra.mxu0 %v788_v34  ;;  %1498 = vmatmul.bf16.gmra.mxu1 %v790_v18  ;;  %v8973_v34 = vld [vmem:[%s13747_s3 + $0x334] sm:$0xf]  ;;  %v6951_v18 = vld [vmem:[%s13747_s3 + $0x338] sm:$0xf0] }
 0x197   :  { %v6954_v45 = vor.u32 %v8973_v34, %v6951_v18  ;;  %v6989_v18 = vld [vmem:[%s13747_s3 + $0x380] sm:$0xf] }
 0x199   :  { %2136 = vmatpush.bf16.msra.mxu0 %v6954_v45 }
 0x19d   :  { %v1179_v23 = vpop.f32.mrf.mxu0  ;;  %v1208_v24 = vpop.f32.mrf.mxu1  ;;  %2137 = vmatpush.bf16.msra.mxu0 %v6946_v51  ;;  %v9030_v51 = vld [vmem:[%s13747_s3 + $0x4f4] sm:$0xf0] }
 0x19e   :  { %v10635_v1 = vadd.f32 %v1208_v24, %v1179_v23  ;;  %v7007_v23 = vld [vmem:[%s13747_s3 + $0x3a8] sm:$0xf0] }
 0x1a1   :  { %2138 = vmatpush.bf16.msra.mxu0 %v6938_v17 }
 0x1a2   :  { %v1121_v3 = vpop.f32.mrf.mxu2  ;;  %v1150_v19 = vpop.f32.mrf.mxu3 }
 0x1a3   :  { %v10637_v54 = vadd.f32 %v1150_v19, %v1121_v3  ;;  %v7010_v19 = vor.u32 %v8987_v58, %v7007_v23  ;;  %v7205_v58 = vld [vmem:[%s13747_s3 + $0x4f0] sm:$0xf] }
 0x1a5   :  { %1713 = vmatmul.bf16.vlgmr.msrb.gmra.mxu2 %v10023_v11  ;;  %1742 = vmatmul.bf16.vlgmr.msrb.gmra.mxu3 %v10026_v46  ;;  %v1181_v35 = vpop.f32.mrf.mxu0  ;;  %v1210_v8 = vpop.f32.mrf.mxu1 }
 0x1a6   :  { %1771 = vmatmul.bf16.vlgmr.msrb.gmra.mxu0 %v10023_v11  ;;  %1800 = vmatmul.bf16.vlgmr.msrb.gmra.mxu1 %v10026_v46  ;;  %v10655_v2 = vadd.f32 %v1210_v8, %v1181_v35  ;;  %v6934_v35 = vor.u32 %v8970_v7, %v6933_v61  ;;  %v8986_v8 = vld [vmem:[%s13747_s3 + $0x394] sm:$0xf0]  ;;  %v9013_v7 = vld [vmem:[%s13747_s3 + $0x474] sm:$0xf] }
 0x1a7   :  { %2166 = vmatpush.bf16.msra.mxu1 %v7010_v19  ;;  %v6998_v59 = vor.u32 %v8986_v8, %v6997_v21  ;;  %2139 = vmatpush.bf16.msra.mxu0 %v6930_v53  ;;  %v7143_v21 = vld [vmem:[%s13747_s3 + $0x478] sm:$0xf0]  ;;  %v9010_v53 = vld [vmem:[%s13747_s3 + $0x454] sm:$0xf0] }
 0x1a8   :  { %2080 = vmatpush.bf16.msra.mxu2 %v6934_v35  ;;  %v9029_v35 = vld [vmem:[%s13747_s3 + $0x4f4] sm:$0xf]  ;;  %v7146_v8 = vor.u32 %v9013_v7, %v7143_v21  ;;  %v7126_v39 = vor.u32 %v9010_v53, %v7125_v52  ;;  %v7191_v7 = vld [vmem:[%s13747_s3 + $0x4d8] sm:$0xf0]  ;;  %v7117_v21 = vld [vmem:[%s13747_s3 + $0x440] sm:$0xf] }
 0x1a9   :  { %2109 = vmatpush.bf16.msra.mxu3 %v6998_v59  ;;  %v7207_v59 = vld [vmem:[%s13747_s3 + $0x4f8] sm:$0xf0]  ;;  %v7173_v52 = vld [vmem:[%s13747_s3 + $0x4b0] sm:$0xf]  ;;  %v9022_v53 = vld [vmem:[%s13747_s3 + $0x4b4] sm:$0xf0] }
 0x1aa   :  { %v1123_v41 = vpop.f32.mrf.mxu2  ;;  %v1152_v25 = vpop.f32.mrf.mxu3 }
 0x1ab   :  { %v10669_v0 = vadd.f32 %v1152_v25, %v1123_v41  ;;  %v8968_v41 = vld [vmem:[%s13747_s3 + $0x304] sm:$0xf0]  ;;  %v7002_v25 = vor.u32 %v8985_v28, %v6999_v20  ;;  %v7210_v28 = vor.u32 %v9029_v35, %v7207_v59  ;;  %v7197_v20 = vld [vmem:[%s13747_s3 + $0x4e0] sm:$0xf]  ;;  %2487 = vmatpush.bf16.msrb.mxu0 %v7146_v8 }
 0x1ac   :  { %v6926_v34 = vor.u32 %v8968_v41, %v6925_v22  ;;  %v9028_v22 = vld [vmem:[%s13747_s3 + $0x4e4] sm:$0xf0] }
 0x1ad   :  { %v1184_v4 = vpop.f32.mrf.mxu0  ;;  %v1213_v33 = vpop.f32.mrf.mxu1  ;;  %2167 = vmatpush.bf16.msra.mxu1 %v7002_v25  ;;  %v7198_v25 = vor.u32 %v9028_v22, %v7197_v20  ;;  %v9008_v35 = vld [vmem:[%s13747_s3 + $0x444] sm:$0xf0] }
 0x1ae   :  { %v6990_v4 = vor.u32 %v8984_v42, %v6989_v18  ;;  %2081 = vmatpush.bf16.msra.mxu2 %v6926_v34  ;;  %v9011_v42 = vld [vmem:[%s13747_s3 + $0x464] sm:$0xf]  ;;  %v7118_v59 = vor.u32 %v9008_v35, %v7117_v21 }
 0x1b0   :  { %2110 = vmatpush.bf16.msra.mxu3 %v6990_v4  ;;  %v7135_v4 = vld [vmem:[%s13747_s3 + $0x468] sm:$0xf0] }
 0x1b1   :  { %2168 = vmatpush.bf16.msra.mxu1 %v6994_v50  ;;  %v7190_v50 = vor.u32 %v9026_v6, %v7189_v36 }
 0x1b2   :  { %v1126_v55 = vpop.f32.mrf.mxu2  ;;  %v1155_v63 = vpop.f32.mrf.mxu3  ;;  %2429 = vmatpush.bf16.msrb.mxu2 %v7142_v10 }
 0x1b5   :  { %1718 = vmatmul.bf16.gmra.mxu2 %v10008_v31  ;;  %1747 = vmatmul.bf16.gmra.mxu3 %v10011_v44  ;;  %v1186_v24 = vpop.f32.mrf.mxu0  ;;  %v1215_v3 = vpop.f32.mrf.mxu1 }
 0x1b6   :  { %1776 = vmatmul.bf16.gmra.mxu0 %v10008_v31  ;;  %1805 = vmatmul.bf16.gmra.mxu1 %v10011_v44  ;;  %v7206_v24 = vor.u32 %v9030_v51, %v7205_v58  ;;  %v9009_v51 = vld [vmem:[%s13747_s3 + $0x454] sm:$0xf] }
 0x1b7   :  { %2516 = vmatpush.bf16.msrb.mxu1 %v7210_v28 }
 0x1b8   :  { %2458 = vmatpush.bf16.msrb.mxu3 %v7206_v24  ;;  %v7127_v24 = vld [vmem:[%s13747_s3 + $0x458] sm:$0xf0] }
 0x1ba   :  { %v1128_v43 = vpop.f32.mrf.mxu2  ;;  %v1157_v49 = vpop.f32.mrf.mxu3 }
 0x1bb   :  { %v7133_v43 = vld [vmem:[%s13747_s3 + $0x460] sm:$0xf]  ;;  %v9012_v49 = vld [vmem:[%s13747_s3 + $0x464] sm:$0xf0] }
 0x1bc   :  { %v7134_v17 = vor.u32 %v9012_v49, %v7133_v43  ;;  %2459 = vmatpush.bf16.msrb.mxu3 %v7198_v25  ;;  %v7181_v43 = vld [vmem:[%s13747_s3 + $0x4c0] sm:$0xf]  ;;  %v9024_v49 = vld [vmem:[%s13747_s3 + $0x4c4] sm:$0xf0] }
 0x1be   :  { %2430 = vmatpush.bf16.msrb.mxu2 %v7134_v17 }
 0x1c0   :  { %2460 = vmatpush.bf16.msrb.mxu3 %v7190_v50 }
 0x1c2   :  { %2431 = vmatpush.bf16.msrb.mxu2 %v7126_v39  ;;  %v7174_v39 = vor.u32 %v9022_v53, %v7173_v52  ;;  %v9001_v52 = vld [vmem:[%s13747_s3 + $0x414] sm:$0xf]  ;;  %v7095_v53 = vld [vmem:[%s13747_s3 + $0x418] sm:$0xf0] }
 0x1c3   :  { %v1189_v33 = vpop.f32.mrf.mxu0  ;;  %v1218_v45 = vpop.f32.mrf.mxu1 }
 0x1c4   :  { %v10747_v48 = vadd.f32 %v1218_v45, %v1189_v33  ;;  %v9027_v33 = vld [vmem:[%s13747_s3 + $0x4e4] sm:$0xf]  ;;  %v7138_v45 = vor.u32 %v9011_v42, %v7135_v4  ;;  %v7183_v4 = vld [vmem:[%s13747_s3 + $0x4c8] sm:$0xf0] }
 0x1c5   :  { %1723 = vmatmul.bf16.gmra.mxu2 %v10305_v29  ;;  %1752 = vmatmul.bf16.gmra.mxu3 %v10307_v30  ;;  %v7202_v13 = vor.u32 %v9027_v33, %v7199_v5 }
 0x1c6   :  { %1781 = vmatmul.bf16.gmra.mxu0 %v10305_v29  ;;  %1810 = vmatmul.bf16.gmra.mxu1 %v10307_v30 }
 0x1c7   :  { %2488 = vmatpush.bf16.msrb.mxu0 %v7138_v45  ;;  %2517 = vmatpush.bf16.msrb.mxu1 %v7202_v13 }
 0x1c8   :  { %v1131_v55 = vpop.f32.mrf.mxu2  ;;  %v1160_v63 = vpop.f32.mrf.mxu3  ;;  %2432 = vmatpush.bf16.msrb.mxu2 %v7118_v59  ;;  %v7165_v59 = vld [vmem:[%s13747_s3 + $0x4a0] sm:$0xf] }
 0x1c9   :  { %v10777_v23 = vadd.f32 %v1160_v63, %v1131_v55 }
 0x1cb   :  { %v1191_v3 = vpop.f32.mrf.mxu0  ;;  %v1220_v19 = vpop.f32.mrf.mxu1 }
 0x1cc   :  { %v10779_v61 = vadd.f32 %v1220_v19, %v1191_v3  ;;  %v9025_v3 = vld [vmem:[%s13747_s3 + $0x4d4] sm:$0xf]  ;;  %v7130_v19 = vor.u32 %v9009_v51, %v7127_v24 }
 0x1cd   :  { %v7194_v8 = vor.u32 %v9025_v3, %v7191_v7  ;;  %v9021_v51 = vld [vmem:[%s13747_s3 + $0x4b4] sm:$0xf]  ;;  %v7175_v3 = vld [vmem:[%s13747_s3 + $0x4b8] sm:$0xf0] }
 0x1ce   :  { %2489 = vmatpush.bf16.msrb.mxu0 %v7130_v19  ;;  %v9004_v19 = vld [vmem:[%s13747_s3 + $0x424] sm:$0xf0]  ;;  %v7178_v35 = vor.u32 %v9021_v51, %v7175_v3  ;;  %v7149_v51 = vld [vmem:[%s13747_s3 + $0x480] sm:$0xf] }
 0x1cf   :  { %2518 = vmatpush.bf16.msrb.mxu1 %v7194_v8 }
 0x1d0   :  { %v1133_v37 = vpop.f32.mrf.mxu2  ;;  %v1162_v16 = vpop.f32.mrf.mxu3 }
 0x1d1   :  { %v10805_v41 = vadd.f32 %v1162_v16, %v1133_v37  ;;  %v7182_v37 = vor.u32 %v9024_v49, %v7181_v43  ;;  %v9020_v43 = vld [vmem:[%s13747_s3 + $0x4a4] sm:$0xf0] }
 0x1d3   :  { %v1194_v34 = vpop.f32.mrf.mxu0  ;;  %v1223_v18 = vpop.f32.mrf.mxu1  ;;  %2461 = vmatpush.bf16.msrb.mxu3 %v7182_v37  ;;  %v7166_v37 = vor.u32 %v9020_v43, %v7165_v59  ;;  %v8999_v59 = vld [vmem:[%s13747_s3 + $0x404] sm:$0xf]  ;;  %v7087_v43 = vld [vmem:[%s13747_s3 + $0x408] sm:$0xf0] }
 0x1d4   :  { %v9007_v34 = vld [vmem:[%s13747_s3 + $0x444] sm:$0xf]  ;;  %v7119_v18 = vld [vmem:[%s13747_s3 + $0x448] sm:$0xf0] }
 0x1d5   :  { %1728 = vmatmul.bf16.gmra.mxu2 %v9901_v38  ;;  %1757 = vmatmul.bf16.gmra.mxu3 %v9903_v40  ;;  %v7122_v42 = vor.u32 %v9007_v34, %v7119_v18  ;;  %v7167_v18 = vld [vmem:[%s13747_s3 + $0x4a8] sm:$0xf0] }
 0x1d6   :  { %1786 = vmatmul.bf16.gmra.mxu0 %v9901_v38  ;;  %1815 = vmatmul.bf16.gmra.mxu1 %v9903_v40 }
 0x1d7   :  { %2490 = vmatpush.bf16.msrb.mxu0 %v7122_v42  ;;  %2462 = vmatpush.bf16.msrb.mxu3 %v7174_v39  ;;  %v7093_v42 = vld [vmem:[%s13747_s3 + $0x410] sm:$0xf]  ;;  %v7098_v39 = vor.u32 %v9001_v52, %v7095_v53  ;;  %v2209_v52 = vrot.slane %v10026_v46, 1  ;;  %v2210_v53 = vrot.slane %v10011_v44, 1 }
 0x1d8   :  { %v1136_v55 = vpop.f32.mrf.mxu2  ;;  %v1165_v63 = vpop.f32.mrf.mxu3 }
 0x1db   :  { %v1196_v10 = vpop.f32.mrf.mxu0  ;;  %v1225_v58 = vpop.f32.mrf.mxu1  ;;  %2463 = vmatpush.bf16.msrb.mxu3 %v7166_v37  ;;  %v7151_v37 = vld [vmem:[%s13747_s3 + $0x488] sm:$0xf0] }
 0x1dc   :  { %v9005_v58 = vld [vmem:[%s13747_s3 + $0x434] sm:$0xf] }
 0x1e0   :  { %v1138_v16 = vpop.f32.mrf.mxu2  ;;  %v1167_v28 = vpop.f32.mrf.mxu3 }
 0x1e3   :  { %v1455_v17 = vpop.f32.mrf.mxu0  ;;  %v1484_v20 = vpop.f32.mrf.mxu1 }
 0x1e4   :  { %v1456_v22 = vadd.f32 %v1455_v17, %v10635_v1  ;;  %v9023_v1 = vld [vmem:[%s13747_s3 + $0x4c4] sm:$0xf] }
 0x1e5   :  { %2082 = vmatmul.bf16.vlgmr.msra.gmra.mxu2 %v10129_v9  ;;  %2111 = vmatmul.bf16.vlgmr.msra.gmra.mxu3 %v10142_v27  ;;  %v7186_v5 = vor.u32 %v9023_v1, %v7183_v4  ;;  %v9002_v4 = vld [vmem:[%s13747_s3 + $0x414] sm:$0xf0] }
 0x1e6   :  { %v10862_v25 = vadd.f32 %v1484_v20, %v1456_v22  ;;  %2140 = vmatmul.bf16.vlgmr.msra.gmra.mxu0 %v10129_v9  ;;  %2169 = vmatmul.bf16.vlgmr.msra.gmra.mxu1 %v10142_v27  ;;  %v7109_v9 = vld [vmem:[%s13747_s3 + $0x430] sm:$0xf]  ;;  %v9006_v27 = vld [vmem:[%s13747_s3 + $0x434] sm:$0xf0]  ;;  %v9003_v20 = vld [vmem:[%s13747_s3 + $0x424] sm:$0xf] }
 0x1e7   :  { %v7110_v13 = vor.u32 %v9006_v27, %v7109_v9  ;;  %2519 = vmatpush.bf16.msrb.mxu1 %v7186_v5  ;;  %v7103_v22 = vld [vmem:[%s13747_s3 + $0x428] sm:$0xf0]  ;;  %v7157_v9 = vld [vmem:[%s13747_s3 + $0x490] sm:$0xf]  ;;  %v7094_v27 = vor.u32 %v9002_v4, %v7093_v42 }
 0x1e8   :  { %v1397_v33 = vpop.f32.mrf.mxu2  ;;  %v1426_v45 = vpop.f32.mrf.mxu3  ;;  %v7106_v34 = vor.u32 %v9003_v20, %v7103_v22 }
 0x1e9   :  { %v1398_v36 = vadd.f32 %v1397_v33, %v10637_v54  ;;  %2433 = vmatpush.bf16.msrb.mxu2 %v7110_v13  ;;  %v7111_v54 = vld [vmem:[%s13747_s3 + $0x438] sm:$0xf0] }
 0x1ea   :  { %v7114_v24 = vor.u32 %v9005_v58, %v7111_v54 }
 0x1eb   :  { %v10891_v6 = vadd.f32 %v1426_v45, %v1398_v36  ;;  %v1457_v55 = vpop.f32.mrf.mxu0  ;;  %v1486_v63 = vpop.f32.mrf.mxu1  ;;  %2520 = vmatpush.bf16.msrb.mxu1 %v7178_v35  ;;  %v9017_v36 = vld [vmem:[%s13747_s3 + $0x494] sm:$0xf] }
 0x1ec   :  { %v1458_v50 = vadd.f32 %v1457_v55, %v10655_v2  ;;  %v7101_v2 = vld [vmem:[%s13747_s3 + $0x420] sm:$0xf]  ;;  %2491 = vmatpush.bf16.msrb.mxu0 %v7114_v24  ;;  %v7159_v55 = vld [vmem:[%s13747_s3 + $0x498] sm:$0xf0]  ;;  %v9016_v24 = vld [vmem:[%s13747_s3 + $0x484] sm:$0xf0] }
 0x1ed   :  { %v7102_v8 = vor.u32 %v9004_v19, %v7101_v2  ;;  %v7162_v58 = vor.u32 %v9017_v36, %v7159_v55  ;;  %v7150_v3 = vor.u32 %v9016_v24, %v7149_v51  ;;  %v2212_v24 = vrot.slane %v10305_v29, 1 }
 0x1ee   :  { %v10894_v10 = vadd.f32 %v1486_v63, %v1458_v50  ;;  %v7085_v63 = vld [vmem:[%s13747_s3 + $0x400] sm:$0xf]  ;;  %v9000_v50 = vld [vmem:[%s13747_s3 + $0x404] sm:$0xf0]  ;;  %v2216_v29 = vrot.slane %v9901_v38, 1 }
 0x1ef   :  { %2434 = vmatpush.bf16.msrb.mxu2 %v7102_v8  ;;  %v7086_v54 = vor.u32 %v9000_v50, %v7085_v63 }
 0x1f0   :  { %v1399_v7 = vpop.f32.mrf.mxu2  ;;  %v1428_v21 = vpop.f32.mrf.mxu3  ;;  %2492 = vmatpush.bf16.msrb.mxu0 %v7106_v34 }
 0x1f1   :  { %v1400_v49 = vadd.f32 %v1399_v7, %v10669_v0  ;;  %v9019_v0 = vld [vmem:[%s13747_s3 + $0x4a4] sm:$0xf] }
 0x1f2   :  { %v7170_v1 = vor.u32 %v9019_v0, %v7167_v18 }
 0x1f3   :  { %v10921_v16 = vadd.f32 %v1428_v21, %v1400_v49  ;;  %v1460_v28 = vpop.f32.mrf.mxu0  ;;  %v1489_v17 = vpop.f32.mrf.mxu1  ;;  %2435 = vmatpush.bf16.msrb.mxu2 %v7094_v27  ;;  %v7090_v49 = vor.u32 %v8999_v59, %v7087_v43 }
 0x1f4   :  { %2521 = vmatpush.bf16.msrb.mxu1 %v7170_v1  ;;  %2493 = vmatpush.bf16.msrb.mxu0 %v7098_v39 }
 0x1f5   :  { %2087 = vmatmul.bf16.gmra.mxu2 %v10315_v47  ;;  %2116 = vmatmul.bf16.gmra.mxu3 %v10319_v32 }
 0x1f6   :  { %2145 = vmatmul.bf16.gmra.mxu0 %v10315_v47  ;;  %2174 = vmatmul.bf16.gmra.mxu1 %v10319_v32  ;;  %v9018_v47 = vld [vmem:[%s13747_s3 + $0x494] sm:$0xf0] }
 0x1f7   :  { %v7158_v45 = vor.u32 %v9018_v47, %v7157_v9  ;;  %2436 = vmatpush.bf16.msrb.mxu2 %v7086_v54 }
 0x1f8   :  { %v1402_v32 = vpop.f32.mrf.mxu2  ;;  %v1431_v33 = vpop.f32.mrf.mxu3  ;;  %2522 = vmatpush.bf16.msrb.mxu1 %v7162_v58  ;;  %2494 = vmatpush.bf16.msrb.mxu0 %v7090_v49 }
 0x1f9   :  { %2464 = vmatpush.bf16.msrb.mxu3 %v7158_v45 }
 0x1fb   :  { %v1462_v5 = vpop.f32.mrf.mxu0  ;;  %v1491_v13 = vpop.f32.mrf.mxu1 }
 0x1fc   :  { %v2207_v13 = vrot.slane %v10008_v31, 1 }
 0x1fd   :  { %2465 = vmatpush.bf16.msrb.mxu3 %v7150_v3 }
 0x200   :  { %v1404_v2 = vpop.f32.mrf.mxu2  ;;  %v1433_v19 = vpop.f32.mrf.mxu3 }
 0x201   :  { %v2213_v19 = vsel %vm552_vm6, %v2207_v13, %v2212_v24 }
 0x203   :  { %v1465_v7 = vpop.f32.mrf.mxu0  ;;  %v1494_v21 = vpop.f32.mrf.mxu1 }
 0x204   :  { %v1466_v35 = vadd.f32 %v1465_v7, %v10747_v48  ;;  %v9015_v48 = vld [vmem:[%s13747_s3 + $0x484] sm:$0xf] }
 0x205   :  { %2092 = vmatmul.bf16.gmra.mxu2 %v10327_v62  ;;  %2121 = vmatmul.bf16.gmra.mxu3 %v10331_v12 }
 0x206   :  { %v10978_v8 = vadd.f32 %v1494_v21, %v1466_v35  ;;  %2150 = vmatmul.bf16.gmra.mxu0 %v10327_v62  ;;  %2179 = vmatmul.bf16.gmra.mxu1 %v10331_v12  ;;  %v7154_v12 = vor.u32 %v9015_v48, %v7151_v37 }
 0x208   :  { %v1407_v62 = vpop.f32.mrf.mxu2  ;;  %v1436_v28 = vpop.f32.mrf.mxu3  ;;  %2523 = vmatpush.bf16.msrb.mxu1 %v7154_v12 }
 0x209   :  { %v1408_v17 = vadd.f32 %v1407_v62, %v10777_v23 }
 0x20b   :  { %v10995_v20 = vadd.f32 %v1436_v28, %v1408_v17  ;;  %v1467_v22 = vpop.f32.mrf.mxu0  ;;  %v1496_v0 = vpop.f32.mrf.mxu1  ;;  %v2217_v28 = vsel %vm552_vm6, %v2212_v24, %v2216_v29 }
 0x20c   :  { %v1468_v34 = vadd.f32 %v1467_v22, %v10779_v61 }
 0x20e   :  { %v10998_v18 = vadd.f32 %v1496_v0, %v1468_v34 }
 0x210   :  { %v1409_v1 = vpop.f32.mrf.mxu2  ;;  %v1438_v42 = vpop.f32.mrf.mxu3 }
 0x211   :  { %v1410_v4 = vadd.f32 %v1409_v1, %v10805_v41  ;;  %v2206_v41 = vrot.slane %v10023_v11, 1 }
 0x213   :  { %v11001_v9 = vadd.f32 %v1438_v42, %v1410_v4  ;;  %v1470_v27 = vpop.f32.mrf.mxu0  ;;  %v1499_v47 = vpop.f32.mrf.mxu1 }
 0x214   :  { %v2226_v27 = vrot.slane %v10000_v15, 1 }
 0x215   :  { %2097 = vmatmul.bf16.gmra.mxu2 %v10015_v56  ;;  %2126 = vmatmul.bf16.gmra.mxu3 %v10019_v60 }
 0x216   :  { %2155 = vmatmul.bf16.gmra.mxu0 %v10015_v56  ;;  %2184 = vmatmul.bf16.gmra.mxu1 %v10019_v60  ;;  %v2208_v56 = vsel %vm552_vm6, %v2206_v41, %v2207_v13  ;;  %v2211_v60 = vsel %vm552_vm6, %v2209_v52, %v2210_v53 }
 0x218   :  { %v1412_v23 = vpop.f32.mrf.mxu2  ;;  %v1441_v61 = vpop.f32.mrf.mxu3 }
 0x219   :  { %v2230_v61 = vsel %vm552_vm6, %v2216_v29, %v2226_v27  ;;  %v9098_v27 = vld [vmem:[%s13747_s3 + $0x6f4] sm:$0xf0] }
 0x21b   :  { %v1472_v32 = vpop.f32.mrf.mxu0  ;;  %v1501_v33 = vpop.f32.mrf.mxu1 }
 0x220   :  { %v1414_v45 = vpop.f32.mrf.mxu2  ;;  %v1443_v5 = vpop.f32.mrf.mxu3 }
 0x223   :  { %v1772_v36 = vpop.f32.mrf.mxu0  ;;  %v1801_v39 = vpop.f32.mrf.mxu1 }
 0x224   :  { %v1802_v55 = vadd.f32 %v1801_v39, %v1772_v36 }
 0x225   :  { %2437 = vmatmul.bf16.vlgmr.msrb.gmra.mxu2 %v2208_v56  ;;  %2466 = vmatmul.bf16.vlgmr.msrb.gmra.mxu3 %v2211_v60 }
 0x226   :  { %v11014_v63 = vadd.f32 %v1802_v55, %v10862_v25  ;;  %2495 = vmatmul.bf16.vlgmr.msrb.gmra.mxu0 %v2208_v56  ;;  %2524 = vmatmul.bf16.vlgmr.msrb.gmra.mxu1 %v2211_v60  ;;  %v2214_v25 = vrot.slane %v10307_v30, 1  ;;  %v2218_v30 = vrot.slane %v9903_v40, 1 }
 0x228   :  { %v1714_v11 = vpop.f32.mrf.mxu2  ;;  %v1743_v31 = vpop.f32.mrf.mxu3  ;;  %v2215_v7 = vsel %vm552_vm6, %v2210_v53, %v2214_v25  ;;  %v2219_v12 = vsel %vm552_vm6, %v2214_v25, %v2218_v30 }
 0x229   :  { %v1744_v50 = vadd.f32 %v1743_v31, %v1714_v11 }
 0x22b   :  { %v11017_v46 = vadd.f32 %v1744_v50, %v10891_v6  ;;  %v11019_v44 = vpop.f32.mrf.mxu0  ;;  %v11021_v58 = vpop.f32.mrf.mxu1 }
 0x230   :  { %v11023_v54 = vpop.f32.mrf.mxu2  ;;  %v11025_v51 = vpop.f32.mrf.mxu3 }
 0x233   :  { %v1777_v3 = vpop.f32.mrf.mxu0  ;;  %v1806_v2 = vpop.f32.mrf.mxu1 }
 0x235   :  { %2442 = vmatmul.bf16.gmra.mxu2 %v2213_v19  ;;  %2471 = vmatmul.bf16.gmra.mxu3 %v2215_v7 }
 0x236   :  { %2500 = vmatmul.bf16.gmra.mxu0 %v2213_v19  ;;  %2529 = vmatmul.bf16.gmra.mxu1 %v2215_v7 }
 0x238   :  { %v1719_v6 = vpop.f32.mrf.mxu2  ;;  %v1748_v21 = vpop.f32.mrf.mxu3 }
 0x23b   :  { %v1779_v35 = vpop.f32.mrf.mxu0  ;;  %v1808_v59 = vpop.f32.mrf.mxu1 }
 0x240   :  { %v1721_v43 = vpop.f32.mrf.mxu2  ;;  %v1750_v48 = vpop.f32.mrf.mxu3 }
 0x243   :  { %v1782_v49 = vpop.f32.mrf.mxu0  ;;  %v1811_v37 = vpop.f32.mrf.mxu1 }
 0x244   :  { %v1812_v62 = vadd.f32 %v1811_v37, %v1782_v49 }
 0x245   :  { %2447 = vmatmul.bf16.gmra.mxu2 %v2217_v28  ;;  %2476 = vmatmul.bf16.gmra.mxu3 %v2219_v12 }
 0x246   :  { %v1830_v17 = vadd.f32 %v1812_v62, %v10978_v8  ;;  %2505 = vmatmul.bf16.gmra.mxu0 %v2217_v28  ;;  %2534 = vmatmul.bf16.gmra.mxu1 %v2219_v12  ;;  %v2227_v8 = vrot.slane %v10002_v26, 1 }
 0x248   :  { %v1724_v22 = vpop.f32.mrf.mxu2  ;;  %v1753_v0 = vpop.f32.mrf.mxu3  ;;  %v2234_v32 = vsel %vm552_vm6, %v2218_v30, %v2227_v8  ;;  %v9081_v8 = vld [vmem:[%s13747_s3 + $0x674] sm:$0xf] }
 0x249   :  { %v1754_v34 = vadd.f32 %v1753_v0, %v1724_v22  ;;  %v9082_v22 = vld [vmem:[%s13747_s3 + $0x674] sm:$0xf0]  ;;  %v7414_v0 = vld [vmem:[%s13747_s3 + $0x6f0] sm:$0xf] }
 0x24b   :  { %v11037_v38 = vadd.f32 %v1754_v34, %v10995_v20  ;;  %v11039_v40 = vpop.f32.mrf.mxu0  ;;  %v11041_v1 = vpop.f32.mrf.mxu1 }
 0x250   :  { %v11043_v42 = vpop.f32.mrf.mxu2  ;;  %v11045_v4 = vpop.f32.mrf.mxu3 }
 0x253   :  { %v1787_v47 = vpop.f32.mrf.mxu0  ;;  %v1816_v23 = vpop.f32.mrf.mxu1 }
 0x254   :  { %v7352_v47 = vld [vmem:[%s13747_s3 + $0x678] sm:$0xf0]  ;;  %v7415_v23 = vor.u32 %v9098_v27, %v7414_v0 }
 0x255   :  { %2452 = vmatmul.bf16.gmra.mxu2 %v2230_v61  ;;  %2481 = vmatmul.bf16.gmra.mxu3 %v2234_v32  ;;  %v7400_v27 = vld [vmem:[%s13747_s3 + $0x6d8] sm:$0xf0] }
 0x256   :  { %2510 = vmatmul.bf16.gmra.mxu0 %v2230_v61  ;;  %2539 = vmatmul.bf16.gmra.mxu1 %v2234_v32  ;;  %v7355_v61 = vor.u32 %v9081_v8, %v7352_v47  ;;  %v9097_v32 = vld [vmem:[%s13747_s3 + $0x6f4] sm:$0xf]  ;;  %v740_v47 = vld [vmem:[%s13748_s4] sm:$0x3] }
 0x257   :  { %3029 = vmatpush.bf16.msra.mxu3 %v7415_v23 }
 0x258   :  { %v1729_v20 = vpop.f32.mrf.mxu2  ;;  %v1758_v33 = vpop.f32.mrf.mxu3  ;;  %3058 = vmatpush.bf16.msra.mxu0 %v7355_v61 }
 0x259   :  { %v7416_v20 = vld [vmem:[%s13747_s3 + $0x6f8] sm:$0xf0] }
 0x25b   :  { %v1789_v45 = vpop.f32.mrf.mxu0  ;;  %v1818_v5 = vpop.f32.mrf.mxu1 }
 0x25c   :  { %v7419_v5 = vor.u32 %v9097_v32, %v7416_v20  ;;  %v7326_v20 = vld [vmem:[%s13747_s3 + $0x640] sm:$0xf] }
 0x25e   :  { %3087 = vmatpush.bf16.msra.mxu1 %v7419_v5 }
 0x260   :  { %v1731_v41 = vpop.f32.mrf.mxu2  ;;  %v1760_v13 = vpop.f32.mrf.mxu3 }
 0x261   :  { %v7342_v41 = vld [vmem:[%s13747_s3 + $0x660] sm:$0xf]  ;;  %v9080_v13 = vld [vmem:[%s13747_s3 + $0x664] sm:$0xf0] }
 0x263   :  { %v2141_v52 = vpop.f32.mrf.mxu0  ;;  %v2170_v15 = vpop.f32.mrf.mxu1 }
 0x264   :  { %v2171_v53 = vadd.f32 %v2170_v15, %v2141_v52  ;;  %v7406_v52 = vld [vmem:[%s13747_s3 + $0x6e0] sm:$0xf]  ;;  %v7343_v15 = vor.u32 %v9080_v13, %v7342_v41  ;;  %v9092_v13 = vld [vmem:[%s13747_s3 + $0x6c4] sm:$0xf0] }
 0x266   :  { %v11052_v26 = vadd.f32 %v2171_v53, %v11014_v63  ;;  %v9096_v53 = vld [vmem:[%s13747_s3 + $0x6e4] sm:$0xf0] }
 0x268   :  { %v11054_v36 = vpop.f32.mrf.mxu2  ;;  %v11056_v39 = vpop.f32.mrf.mxu3 }
 0x269   :  { %v2113_v5 = vadd.f32 %v11056_v39, %v11054_v36  ;;  %v9091_v36 = vld [vmem:[%s13747_s3 + $0x6c4] sm:$0xf]  ;;  %v7392_v39 = vld [vmem:[%s13747_s3 + $0x6c8] sm:$0xf0] }
 0x26b   :  { %v11058_v55 = vpop.f32.mrf.mxu0  ;;  %v11060_v56 = vpop.f32.mrf.mxu1 }
 0x270   :  { %v11062_v60 = vpop.f32.mrf.mxu2  ;;  %v11064_v11 = vpop.f32.mrf.mxu3 }
 0x273   :  { %v2146_v31 = vpop.f32.mrf.mxu0  ;;  %v2175_v50 = vpop.f32.mrf.mxu1 }
 0x274   :  { %v9079_v31 = vld [vmem:[%s13747_s3 + $0x664] sm:$0xf]  ;;  %v7344_v50 = vld [vmem:[%s13747_s3 + $0x668] sm:$0xf0] }
 0x278   :  { %v2088_v24 = vpop.f32.mrf.mxu2  ;;  %v2117_v25 = vpop.f32.mrf.mxu3 }
 0x279   :  { %v7407_v24 = vor.u32 %v9096_v53, %v7406_v52  ;;  %v7347_v25 = vor.u32 %v9079_v31, %v7344_v50  ;;  %v9075_v52 = vld [vmem:[%s13747_s3 + $0x644] sm:$0xf]  ;;  %v1804_v53 = vadd.f32 %v11021_v58, %v11019_v44  ;;  %v7318_v58 = vld [vmem:[%s13747_s3 + $0x630] sm:$0xf] }
 0x27b   :  { %v2148_v3 = vpop.f32.mrf.mxu0  ;;  %v2177_v2 = vpop.f32.mrf.mxu1  ;;  %3030 = vmatpush.bf16.msra.mxu3 %v7407_v24  ;;  %3059 = vmatpush.bf16.msra.mxu0 %v7347_v25  ;;  %v11184_v25 = vperm.slane %v740_v47, 1 }
 0x27c   :  { %v9095_v3 = vld [vmem:[%s13747_s3 + $0x6e4] sm:$0xf]  ;;  %v7408_v2 = vld [vmem:[%s13747_s3 + $0x6e8] sm:$0xf0] }
 0x280   :  { %v2090_v63 = vpop.f32.mrf.mxu2  ;;  %v2119_v19 = vpop.f32.mrf.mxu3 }
 0x281   :  { %v7411_v63 = vor.u32 %v9095_v3, %v7408_v2  ;;  %v11186_v3 = vperm.slane %v740_v47, 0  ;;  %v7395_v2 = vor.u32 %v9091_v36, %v7392_v39  ;;  %v7376_v36 = vld [vmem:[%s13747_s3 + $0x6a8] sm:$0xf0] }
 0x283   :  { %v2151_v7 = vpop.f32.mrf.mxu0  ;;  %v2180_v6 = vpop.f32.mrf.mxu1  ;;  %3088 = vmatpush.bf16.msra.mxu1 %v7411_v63 }
 0x284   :  { %v2181_v21 = vadd.f32 %v2180_v6, %v2151_v7  ;;  %v7334_v6 = vld [vmem:[%s13747_s3 + $0x650] sm:$0xf] }
 0x286   :  { %v11066_v35 = vadd.f32 %v2181_v21, %v1830_v17  ;;  %v7350_v17 = vld [vmem:[%s13747_s3 + $0x670] sm:$0xf]  ;;  %v9078_v21 = vld [vmem:[%s13747_s3 + $0x654] sm:$0xf0] }
 0x287   :  { %v7351_v34 = vor.u32 %v9082_v22, %v7350_v17  ;;  %v7336_v17 = vld [vmem:[%s13747_s3 + $0x658] sm:$0xf0] }
 0x288   :  { %v11068_v59 = vpop.f32.mrf.mxu2  ;;  %v11070_v43 = vpop.f32.mrf.mxu3 }
 0x289   :  { %3000 = vmatpush.bf16.msra.mxu2 %v7351_v34  ;;  %v9093_v34 = vld [vmem:[%s13747_s3 + $0x6d4] sm:$0xf] }
 0x28a   :  { %v7403_v61 = vor.u32 %v9093_v34, %v7400_v27  ;;  %v1824_v27 = vadd.f32 %v1804_v53, %v10894_v10  ;;  %v9072_v10 = vld [vmem:[%s13747_s3 + $0x624] sm:$0xf0] }
 0x28b   :  { %v11072_v48 = vpop.f32.mrf.mxu0  ;;  %v11074_v29 = vpop.f32.mrf.mxu1 }
 0x28c   :  { %3089 = vmatpush.bf16.msra.mxu1 %v7403_v61 }
 0x28d   :  { %3001 = vmatpush.bf16.msra.mxu2 %v7343_v15  ;;  %v7328_v15 = vld [vmem:[%s13747_s3 + $0x648] sm:$0xf0] }
 0x28e   :  { %v7331_v50 = vor.u32 %v9075_v52, %v7328_v15 }
 0x290   :  { %v11076_v30 = vpop.f32.mrf.mxu2  ;;  %v11078_v49 = vpop.f32.mrf.mxu3  ;;  %3090 = vmatpush.bf16.msra.mxu1 %v7395_v2 }
 0x293   :  { %v2156_v37 = vpop.f32.mrf.mxu0  ;;  %v2185_v62 = vpop.f32.mrf.mxu1 }
 0x294   :  { %v7398_v37 = vld [vmem:[%s13747_s3 + $0x6d0] sm:$0xf]  ;;  %v7335_v62 = vor.u32 %v9078_v21, %v7334_v6  ;;  %v2173_v6 = vadd.f32 %v11060_v56, %v11058_v55  ;;  %v9089_v56 = vld [vmem:[%s13747_s3 + $0x6b4] sm:$0xf] }
 0x296   :  { %3002 = vmatpush.bf16.msra.mxu2 %v7335_v62  ;;  %v9090_v62 = vld [vmem:[%s13747_s3 + $0x6b4] sm:$0xf0] }
 0x298   :  { %v2098_v28 = vpop.f32.mrf.mxu2  ;;  %v2127_v12 = vpop.f32.mrf.mxu3 }
 0x299   :  { %v9094_v28 = vld [vmem:[%s13747_s3 + $0x6d4] sm:$0xf0]  ;;  %v9077_v12 = vld [vmem:[%s13747_s3 + $0x654] sm:$0xf] }
 0x29a   :  { %v7399_v22 = vor.u32 %v9094_v28, %v7398_v37  ;;  %v7339_v0 = vor.u32 %v9077_v12, %v7336_v17  ;;  %v9073_v28 = vld [vmem:[%s13747_s3 + $0x634] sm:$0xf]  ;;  %v7320_v12 = vld [vmem:[%s13747_s3 + $0x638] sm:$0xf0] }
 0x29b   :  { %v2158_v33 = vpop.f32.mrf.mxu0  ;;  %v2187_v45 = vpop.f32.mrf.mxu1  ;;  %v7323_v55 = vor.u32 %v9073_v28, %v7320_v12 }
 0x29c   :  { %3031 = vmatpush.bf16.msra.mxu3 %v7399_v22  ;;  %3060 = vmatpush.bf16.msra.mxu0 %v7339_v0  ;;  %v9076_v33 = vld [vmem:[%s13747_s3 + $0x644] sm:$0xf0]  ;;  %v7390_v45 = vld [vmem:[%s13747_s3 + $0x6c0] sm:$0xf]  ;;  %v7384_v22 = vld [vmem:[%s13747_s3 + $0x6b8] sm:$0xf0] }
 0x29d   :  { %v7327_v41 = vor.u32 %v9076_v33, %v7326_v20  ;;  %v7391_v31 = vor.u32 %v9092_v13, %v7390_v45  ;;  %v9376_v0 = vld [vmem:[#allocation4 + $0x10] sm:$0xff]  ;;  %v7310_v20 = vld [vmem:[%s13747_s3 + $0x620] sm:$0xf]  ;;  %v2193_v45 = vadd.f32 %v2173_v6, %v1824_v27  ;;  %v7312_v13 = vld [vmem:[%s13747_s3 + $0x628] sm:$0xf0] }
 0x29e   :  { %v2629_v34 = vunpack.c.l.b16 %v9376_v0  ;;  %v7374_v33 = vld [vmem:[%s13747_s3 + $0x6a0] sm:$0xf]  ;;  %v2630_v52 = vunpack.c.h.b16 %v9376_v0  ;;  %v7302_v6 = vld [vmem:[%s13747_s3 + $0x610] sm:$0xf]  ;;  %v7368_v27 = vld [vmem:[%s13747_s3 + $0x698] sm:$0xf0] }
 0x29f   :  { %3003 = vmatpush.bf16.msra.mxu2 %v7327_v41  ;;  %v9071_v41 = vld [vmem:[%s13747_s3 + $0x624] sm:$0xf] }
 0x2a0   :  { %v2100_v19 = vpop.f32.mrf.mxu2  ;;  %v2129_v7 = vpop.f32.mrf.mxu3  ;;  %3032 = vmatpush.bf16.msra.mxu3 %v7391_v31  ;;  %3061 = vmatpush.bf16.msra.mxu0 %v7331_v50  ;;  %v7315_v31 = vor.u32 %v9071_v41, %v7312_v13  ;;  %v9087_v50 = vld [vmem:[%s13747_s3 + $0x6a4] sm:$0xf]  ;;  %v11247_v39 = vpack.c.b16 %v2629_v34, %v2629_v34  ;;  %v9085_v34 = vld [vmem:[%s13747_s3 + $0x694] sm:$0xf]  ;;  %v9084_v41 = vld [vmem:[%s13747_s3 + $0x684] sm:$0xf0] }
 0x2a1   :  { %v9074_v19 = vld [vmem:[%s13747_s3 + $0x634] sm:$0xf0]  ;;  %v2190_v7 = vadd.f32 %v2113_v5, %v11017_v46  ;;  %v1746_v46 = vadd.f32 %v11025_v51, %v11023_v54  ;;  %v7387_v54 = vor.u32 %v9089_v56, %v7384_v22  ;;  %v2115_v51 = vadd.f32 %v11064_v11, %v11062_v60  ;;  %v9088_v11 = vld [vmem:[%s13747_s3 + $0x6a4] sm:$0xf0]  ;;  %v9067_v13 = vld [vmem:[%s13747_s3 + $0x604] sm:$0xf] }
 0x2a2   :  { %v7319_v37 = vor.u32 %v9074_v19, %v7318_v58  ;;  %v7311_v60 = vor.u32 %v9072_v10, %v7310_v20  ;;  %v7375_v53 = vor.u32 %v9088_v11, %v7374_v33  ;;  %v7214_v58 = vld [vmem:[#allocation4 + $0x10] sm:$0xf]  ;;  %v9032_v19 = vld [vmem:[#allocation4 + $0x14] sm:$0xf0]  ;;  %v11267_v56 = vpack.c.b16 %v2630_v52, %v2630_v52  ;;  %v7294_v10 = vld [vmem:[%s13747_s3 + $0x600] sm:$0xf] }
 0x2a3   :  { %v2496_v8 = vpop.f32.mrf.mxu0  ;;  %v2525_v23 = vpop.f32.mrf.mxu1  ;;  %3091 = vmatpush.bf16.msra.mxu1 %v7387_v54  ;;  %v1823_v15 = vadd.f32 %v1746_v46, %v10921_v16  ;;  %v9086_v46 = vld [vmem:[%s13747_s3 + $0x694] sm:$0xf0]  ;;  %v9068_v33 = vld [vmem:[%s13747_s3 + $0x604] sm:$0xf0]  ;;  %v7296_v52 = vld [vmem:[%s13747_s3 + $0x608] sm:$0xf0] }
 0x2a4   :  { %v2526_v32 = vadd.f32 %v2525_v23, %v2496_v8  ;;  %3004 = vmatpush.bf16.msra.mxu2 %v7319_v37  ;;  %3062 = vmatpush.bf16.msra.mxu0 %v7323_v55  ;;  %v7366_v37 = vld [vmem:[%s13747_s3 + $0x690] sm:$0xf]  ;;  %v7304_v55 = vld [vmem:[%s13747_s3 + $0x618] sm:$0xf0]  ;;  %v7295_v11 = vor.u32 %v9068_v33, %v7294_v10 }
 0x2a5   :  { %v2192_v16 = vadd.f32 %v2115_v51, %v1823_v15  ;;  %v7367_v22 = vor.u32 %v9086_v46, %v7366_v37 }
 0x2a6   :  { %v2546_v24 = vadd.f32 %v2526_v32, %v11052_v26  ;;  %v7382_v26 = vld [vmem:[%s13747_s3 + $0x6b0] sm:$0xf] }
 0x2a7   :  { %v7383_v17 = vor.u32 %v9090_v62, %v7382_v26 }
 0x2a8   :  { %v2438_v63 = vpop.f32.mrf.mxu2  ;;  %v2467_v44 = vpop.f32.mrf.mxu3  ;;  %v2567_v8 = vadd.f32 %v11184_v25, %v2546_v24  ;;  %3005 = vmatpush.bf16.msra.mxu2 %v7311_v60  ;;  %3063 = vmatpush.bf16.msra.mxu0 %v7315_v31  ;;  %v9083_v31 = vld [vmem:[%s13747_s3 + $0x684] sm:$0xf] }
 0x2a9   :  { %v2468_v21 = vadd.f32 %v2467_v44, %v2438_v63  ;;  %3033 = vmatpush.bf16.msra.mxu3 %v7383_v17  ;;  %v7379_v44 = vor.u32 %v9087_v50, %v7376_v36  ;;  %v9069_v17 = vld [vmem:[%s13747_s3 + $0x614] sm:$0xf]  ;;  %v7360_v50 = vld [vmem:[%s13747_s3 + $0x688] sm:$0xf0] }
 0x2aa   :  { %v2583_v24 = vmax.f32 %v2567_v8, 0.0  ;;  %v7307_v0 = vor.u32 %v9069_v17, %v7304_v55  ;;  %v11275_v8 = vor.u32 %v9032_v19, %v7214_v58  ;;  %v9031_v58 = vld [vmem:[#allocation4 + $0x14] sm:$0xf]  ;;  %v7216_v19 = vld [vmem:[#allocation4 + $0x18] sm:$0xf0] }
 0x2ab   :  { %v2545_v47 = vadd.f32 %v2468_v21, %v2190_v7  ;;  %v2498_v23 = vpop.f32.mrf.mxu0  ;;  %v2527_v61 = vpop.f32.mrf.mxu1  ;;  %v9070_v21 = vld [vmem:[%s13747_s3 + $0x614] sm:$0xf0]  ;;  %3092 = vmatpush.bf16.msra.mxu1 %v7379_v44  ;;  %v7363_v44 = vor.u32 %v9083_v31, %v7360_v50  ;;  %v7478_v50 = vld [vmem:[%s13747_s3 + $0x570] sm:$0xf] }
 0x2ac   :  { %v2528_v32 = vadd.f32 %v2527_v61, %v2498_v23  ;;  %v7303_v12 = vor.u32 %v9070_v21, %v7302_v6  ;;  %3064 = vmatpush.bf16.msra.mxu0 %v7307_v0  ;;  %v2750_v36 = vshrl.u32 %v11275_v8, 16  ;;  %v11309_v6 = vshrl.u32 %v11247_v39, 16 }
 0x2ad   :  { %v2566_v5 = vadd.f32 %v11186_v3, %v2545_v47  ;;  %3034 = vmatpush.bf16.msra.mxu3 %v7375_v53  ;;  %v2785_v47 = vshll.u32 %v11247_v39, 16  ;;  %v7299_v53 = vor.u32 %v9067_v13, %v7296_v52 }
 0x2ae   :  { %v2548_v63 = vadd.f32 %v2528_v32, %v2193_v45  ;;  %3006 = vmatpush.bf16.msra.mxu2 %v7303_v12  ;;  %v7371_v32 = vor.u32 %v9085_v34, %v7368_v27  ;;  %v7358_v45 = vld [vmem:[%s13747_s3 + $0x680] sm:$0xf]  ;;  %v11320_v12 = vor.u32 %v9031_v58, %v7216_v19 }
 0x2af   :  { %v2582_v2 = vmax.f32 %v2566_v5, 0.0  ;;  %v7359_v15 = vor.u32 %v9084_v41, %v7358_v45  ;;  %v11324_v46 = vrot.slane %v2785_v47, 1 }
 0x2b0   :  { %v2440_v26 = vpop.f32.mrf.mxu2  ;;  %v2469_v7 = vpop.f32.mrf.mxu3  ;;  %v2569_v23 = vadd.f32 %v11184_v25, %v2548_v63  ;;  %3093 = vmatpush.bf16.msra.mxu1 %v7371_v32  ;;  %3065 = vmatpush.bf16.msra.mxu0 %v7299_v53  ;;  %v2761_v41 = vshll.u32 %v11320_v12, 16 }
 0x2b1   :  { %v2598_v62 = vpack.c.bf16 %v2583_v24, %v2582_v2  ;;  %v2470_v28 = vadd.f32 %v2469_v7, %v2440_v26  ;;  %3035 = vmatpush.bf16.msra.mxu3 %v7367_v22  ;;  %v2793_v24 = vshll.u32 %v11267_v56, 16 }
 0x2b2   :  { %v2585_v2 = vmax.f32 %v2569_v23, 0.0  ;;  %3007 = vmatpush.bf16.msra.mxu2 %v7295_v11  ;;  %v2728_v23 = vrot.slane %v11309_v6, 3  ;;  %v2758_v11 = vshrl.u32 %v11320_v12, 16 }
 0x2b3   :  { %v2547_v61 = vadd.f32 %v2470_v28, %v2192_v16  ;;  %v2501_v54 = vpop.f32.mrf.mxu0  ;;  %v2530_v51 = vpop.f32.mrf.mxu1  ;;  %v2642_v20 = vunpack.c.l.b16 %v2598_v62  ;;  %v2643_v5 = vunpack.c.h.b16 %v2598_v62  ;;  %v11314_v62 = vshrl.u32 %v11267_v56, 16 }
 0x2b4   :  { %3094 = vmatpush.bf16.msra.mxu1 %v7363_v44  ;;  %v11318_v28 = vrot.slane %v2750_v36, 7  ;;  %v11328_v34 = vrot.slane %v2793_v24, 1  ;;  %v3745_v54 = vor.u32 %v11324_v46, %v11309_v6 }
 0x2b5   :  { %v2568_v60 = vadd.f32 %v11186_v3, %v2547_v61  ;;  %v11306_v16 = vpack.c.b16 %v2642_v20, %v2642_v20  ;;  %3036 = vmatpush.bf16.msra.mxu3 %v7359_v15  ;;  %v11311_v21 = vpack.c.b16 %v2643_v5, %v2643_v5  ;;  %v2753_v61 = vshll.u32 %v11275_v8, 16 }
 0x2b6   :  { %v3746_v45 = vor.u32 %v11328_v34, %v11314_v62 }
 0x2b7   :  { %v2584_v63 = vmax.f32 %v2568_v60, 0.0  ;;  %v3758_v27 = vshll.u32 %v11306_v16, 16  ;;  %v3762_v51 = vshll.u32 %v11311_v21, 16  ;;  %v2732_v60 = vrot.slane %v11314_v62, 3 }
 0x2b8   :  { %v2443_v26 = vpop.f32.mrf.mxu2  ;;  %v2472_v7 = vpop.f32.mrf.mxu3 }
 0x2b9   :  { %v2599_v37 = vpack.c.bf16 %v2585_v2, %v2584_v63  ;;  %v3760_v33 = vrot.slane %v3758_v27, 1  ;;  %v3764_v13 = vrot.slane %v3762_v51, 1  ;;  %v9050_v2 = vld [vmem:[%s13747_s3 + $0x574] sm:$0xf0]  ;;  %v7542_v63 = vld [vmem:[%s13747_s3 + $0x5f0] sm:$0xf] }
 0x2ba   :  { %v7479_v7 = vor.u32 %v9050_v2, %v7478_v50  ;;  %v7480_v27 = vld [vmem:[%s13747_s3 + $0x578] sm:$0xf0]  ;;  %v1756_v50 = vadd.f32 %v11045_v4, %v11043_v42  ;;  %v2183_v2 = vadd.f32 %v11074_v29, %v11072_v48  ;;  %v9063_v29 = vld [vmem:[%s13747_s3 + $0x5e4] sm:$0xf] }
 0x2bb   :  { %v2503_v17 = vpop.f32.mrf.mxu0  ;;  %v2532_v55 = vpop.f32.mrf.mxu1  ;;  %v2644_v22 = vunpack.c.l.b16 %v2599_v37  ;;  %v2645_v0 = vunpack.c.h.b16 %v2599_v37  ;;  %v11360_v44 = vsel %vm9714_vm8, %v3745_v54, %v3760_v33  ;;  %v11364_v58 = vsel %vm9714_vm8, %v3746_v45, %v3764_v13  ;;  %v9066_v37 = vld [vmem:[%s13747_s3 + $0x5f4] sm:$0xf0]  ;;  %v9065_v54 = vld [vmem:[%s13747_s3 + $0x5f4] sm:$0xf]  ;;  %v7544_v51 = vld [vmem:[%s13747_s3 + $0x5f8] sm:$0xf0] }
 0x2bc   :  { %v9049_v17 = vld [vmem:[%s13747_s3 + $0x574] sm:$0xf]  ;;  %v1814_v55 = vadd.f32 %v11041_v1, %v11039_v40  ;;  %3276 = vmatpush.bf16.msrb.mxu2 %v7479_v7  ;;  %v7470_v13 = vld [vmem:[%s13747_s3 + $0x560] sm:$0xf] }
 0x2bd   :  { %v11336_v32 = vpack.c.b16 %v2644_v22, %v2642_v20  ;;  %v11338_v10 = vpack.c.b16 %v2645_v0, %v2643_v5  ;;  %v2123_v22 = vadd.f32 %v11070_v43, %v11068_v59  ;;  %v7543_v0 = vor.u32 %v9066_v37, %v7542_v63  ;;  %v9064_v37 = vld [vmem:[%s13747_s3 + $0x5e4] sm:$0xf0] }
 0x2be   :  { %v7483_v59 = vor.u32 %v9049_v17, %v7480_v27  ;;  %v7547_v43 = vor.u32 %v9065_v54, %v7544_v51  ;;  %v9047_v17 = vld [vmem:[%s13747_s3 + $0x564] sm:$0xf]  ;;  %v7472_v27 = vld [vmem:[%s13747_s3 + $0x568] sm:$0xf0]  ;;  %v7462_v54 = vld [vmem:[%s13747_s3 + $0x550] sm:$0xf] }
 0x2bf   :  { %v2736_v52 = vshrl.u32 %v11336_v32, 16  ;;  %v2739_v15 = vshll.u32 %v11336_v32, 16  ;;  %v2743_v20 = vshrl.u32 %v11338_v10, 16  ;;  %v2746_v5 = vshll.u32 %v11338_v10, 16  ;;  %3305 = vmatpush.bf16.msrb.mxu3 %v7543_v0  ;;  %v7536_v0 = vld [vmem:[%s13747_s3 + $0x5e8] sm:$0xf0] }
 0x2c0   :  { %v2445_v53 = vpop.f32.mrf.mxu2  ;;  %v2474_v31 = vpop.f32.mrf.mxu3  ;;  %3334 = vmatpush.bf16.msrb.mxu0 %v7483_v59  ;;  %3363 = vmatpush.bf16.msrb.mxu1 %v7547_v43  ;;  %v7539_v51 = vor.u32 %v9063_v29, %v7536_v0  ;;  %v9045_v59 = vld [vmem:[%s13747_s3 + $0x554] sm:$0xf]  ;;  %v7464_v43 = vld [vmem:[%s13747_s3 + $0x558] sm:$0xf0]  ;;  %v1831_v29 = vadd.f32 %v1756_v50, %v11001_v9  ;;  %v7520_v9 = vld [vmem:[%s13747_s3 + $0x5c8] sm:$0xf0] }
 0x2c1   :  { %v11368_v19 = vrot.slane %v2736_v52, 7  ;;  %v11372_v26 = vrot.slane %v2743_v20, 7  ;;  %v9048_v53 = vld [vmem:[%s13747_s3 + $0x564] sm:$0xf0]  ;;  %v7534_v31 = vld [vmem:[%s13747_s3 + $0x5e0] sm:$0xf] }
 0x2c2   :  { %v7471_v7 = vor.u32 %v9048_v53, %v7470_v13  ;;  %v7535_v48 = vor.u32 %v9064_v37, %v7534_v31  ;;  %v9061_v13 = vld [vmem:[%s13747_s3 + $0x5d4] sm:$0xf]  ;;  %v7454_v37 = vld [vmem:[%s13747_s3 + $0x540] sm:$0xf]  ;;  %v11500_v50 = vrot.slane %v2761_v41, 1 }
 0x2c3   :  { %v2506_v33 = vpop.f32.mrf.mxu0  ;;  %v2535_v45 = vpop.f32.mrf.mxu1  ;;  %v2741_v40 = vor.u32 %v2739_v15, %v11368_v19  ;;  %v2748_v1 = vor.u32 %v2746_v5, %v11372_v26 }
 0x2c4   :  { %v2536_v63 = vadd.f32 %v2535_v45, %v2506_v33  ;;  %v9046_v33 = vld [vmem:[%s13747_s3 + $0x554] sm:$0xf0]  ;;  %v7526_v45 = vld [vmem:[%s13747_s3 + $0x5d0] sm:$0xf]  ;;  %3277 = vmatpush.bf16.msrb.mxu2 %v7471_v7  ;;  %3306 = vmatpush.bf16.msrb.mxu3 %v7535_v48  ;;  %v9060_v48 = vld [vmem:[%s13747_s3 + $0x5c4] sm:$0xf0] }
 0x2c5   :  { %v2805_v42 = vsel %vm9556_vm3, %v2728_v23, %v2741_v40  ;;  %v2806_v4 = vsel %vm9556_vm3, %v2732_v60, %v2748_v1  ;;  %v7475_v60 = vor.u32 %v9047_v17, %v7472_v27  ;;  %v9062_v40 = vld [vmem:[%s13747_s3 + $0x5d4] sm:$0xf0]  ;;  %v1832_v1 = vadd.f32 %v1814_v55, %v10998_v18  ;;  %3364 = vmatpush.bf16.msrb.mxu1 %v7539_v51  ;;  %v9059_v51 = vld [vmem:[%s13747_s3 + $0x5c4] sm:$0xf] }
 0x2c6   :  { %v2554_v23 = vadd.f32 %v2536_v63, %v11066_v35  ;;  %3008 = vmatmul.bf16.vlgmr.msra.gmra.mxu2 %v2805_v42  ;;  %3037 = vmatmul.bf16.vlgmr.msra.gmra.mxu3 %v2806_v4  ;;  %v2198_v35 = vadd.f32 %v2123_v22, %v11037_v38  ;;  %v11460_v38 = vrot.slane %v2758_v11, 7  ;;  %v7463_v22 = vor.u32 %v9046_v33, %v7462_v54  ;;  %v7528_v63 = vld [vmem:[%s13747_s3 + $0x5d8] sm:$0xf0] }
 0x2c7   :  { %3066 = vmatmul.bf16.vlgmr.msra.gmra.mxu0 %v2805_v42  ;;  %3095 = vmatmul.bf16.vlgmr.msra.gmra.mxu1 %v2806_v4  ;;  %v7527_v31 = vor.u32 %v9062_v40, %v7526_v45  ;;  %v7467_v27 = vor.u32 %v9045_v59, %v7464_v43  ;;  %v7531_v7 = vor.u32 %v9061_v13, %v7528_v63  ;;  %v9044_v42 = vld [vmem:[%s13747_s3 + $0x544] sm:$0xf0]  ;;  %v7518_v4 = vld [vmem:[%s13747_s3 + $0x5c0] sm:$0xf] }
 0x2c8   :  { %v11456_v53 = vadd.f32 %v11184_v25, %v2554_v23  ;;  %v2448_v18 = vpop.f32.mrf.mxu2  ;;  %v2477_v55 = vpop.f32.mrf.mxu3  ;;  %3335 = vmatpush.bf16.msrb.mxu0 %v7475_v60  ;;  %v2201_v0 = vadd.f32 %v2183_v2, %v1832_v1  ;;  %v2125_v54 = vadd.f32 %v11078_v49, %v11076_v30  ;;  %v9043_v23 = vld [vmem:[%s13747_s3 + $0x544] sm:$0xf]  ;;  %v7456_v60 = vld [vmem:[%s13747_s3 + $0x548] sm:$0xf0]  ;;  %v3725_v30 = vrot.slane %v2739_v15, 1  ;;  %3278 = vmatpush.bf16.msrb.mxu2 %v7463_v22 }
 0x2c9   :  { %v2478_v17 = vadd.f32 %v2477_v55, %v2448_v18  ;;  %v11496_v49 = vrot.slane %v2753_v61, 1  ;;  %3307 = vmatpush.bf16.msrb.mxu3 %v7527_v31  ;;  %v7519_v59 = vor.u32 %v9060_v48, %v7518_v4  ;;  %3365 = vmatpush.bf16.msrb.mxu1 %v7531_v7  ;;  %v7459_v15 = vor.u32 %v9043_v23, %v7456_v60  ;;  %v7446_v18 = vld [vmem:[%s13747_s3 + $0x530] sm:$0xf]  ;;  %v9042_v55 = vld [vmem:[%s13747_s3 + $0x534] sm:$0xf0] }
 0x2ca   :  { %v2591_v2 = vmax.f32 %v11456_v53, 0.0  ;;  %v7523_v13 = vor.u32 %v9059_v51, %v7520_v9  ;;  %v7510_v53 = vld [vmem:[%s13747_s3 + $0x5b0] sm:$0xf]  ;;  %v2200_v22 = vadd.f32 %v2125_v54, %v1831_v29  ;;  %v2755_v31 = vor.u32 %v2753_v61, %v11318_v28  ;;  %v7512_v48 = vld [vmem:[%s13747_s3 + $0x5b8] sm:$0xf0] }
 0x2cb   :  { %v2553_v33 = vadd.f32 %v2478_v17, %v2198_v35  ;;  %v2508_v45 = vpop.f32.mrf.mxu0  ;;  %v2537_v40 = vpop.f32.mrf.mxu1  ;;  %v7455_v35 = vor.u32 %v9044_v42, %v7454_v37  ;;  %v2763_v63 = vor.u32 %v2761_v41, %v11460_v38  ;;  %v9058_v37 = vld [vmem:[%s13747_s3 + $0x5b4] sm:$0xf0]  ;;  %v9041_v17 = vld [vmem:[%s13747_s3 + $0x534] sm:$0xf]  ;;  %v3726_v7 = vor.u32 %v3725_v30, %v2736_v52  ;;  %v9040_v51 = vld [vmem:[%s13747_s3 + $0x524] sm:$0xf0] }
 0x2cc   :  { %v2538_v1 = vadd.f32 %v2537_v40, %v2508_v45  ;;  %3336 = vmatpush.bf16.msrb.mxu0 %v7467_v27  ;;  %v7448_v27 = vld [vmem:[%s13747_s3 + $0x538] sm:$0xf0]  ;;  %v7447_v4 = vor.u32 %v9042_v55, %v7446_v18  ;;  %v9057_v41 = vld [vmem:[%s13747_s3 + $0x5b4] sm:$0xf]  ;;  %v3729_v29 = vrot.slane %v2746_v5, 1  ;;  %v7511_v60 = vor.u32 %v9058_v37, %v7510_v53 }
 0x2cd   :  { %v2574_v43 = vadd.f32 %v11186_v3, %v2553_v33  ;;  %3279 = vmatpush.bf16.msrb.mxu2 %v7455_v35  ;;  %3308 = vmatpush.bf16.msrb.mxu3 %v7519_v59  ;;  %v7451_v52 = vor.u32 %v9041_v17, %v7448_v27  ;;  %v7502_v33 = vld [vmem:[%s13747_s3 + $0x5a0] sm:$0xf]  ;;  %v11549_v5 = vsel %vm419_vm5, %v3726_v7, %v11496_v49  ;;  %v9056_v30 = vld [vmem:[%s13747_s3 + $0x5a4] sm:$0xf0]  ;;  %v7440_v35 = vld [vmem:[%s13747_s3 + $0x528] sm:$0xf0] }
 0x2ce   :  { %v2556_v42 = vadd.f32 %v2538_v1, %v2201_v0  ;;  %v7438_v0 = vld [vmem:[%s13747_s3 + $0x520] sm:$0xf]  ;;  %3366 = vmatpush.bf16.msrb.mxu1 %v7523_v13  ;;  %v7515_v9 = vor.u32 %v9057_v41, %v7512_v48  ;;  %v9039_v1 = vld [vmem:[%s13747_s3 + $0x524] sm:$0xf]  ;;  %v2756_v59 = vsel %vm92_vm2, %v11368_v19, %v2755_v31  ;;  %v2764_v53 = vsel %vm92_vm2, %v11372_v26, %v2763_v63  ;;  %v7430_v48 = vld [vmem:[%s13747_s3 + $0x510] sm:$0xf] }
 0x2cf   :  { %v2590_v61 = vmax.f32 %v2574_v43, 0.0  ;;  %v7504_v43 = vld [vmem:[%s13747_s3 + $0x5a8] sm:$0xf0]  ;;  %v3730_v19 = vor.u32 %v3729_v29, %v2743_v20  ;;  %v7439_v31 = vor.u32 %v9040_v51, %v7438_v0  ;;  %v7503_v37 = vor.u32 %v9056_v30, %v7502_v33  ;;  %v9038_v29 = vld [vmem:[%s13747_s3 + $0x514] sm:$0xf0] }
 0x2d0   :  { %v2450_v54 = vpop.f32.mrf.mxu2  ;;  %v2479_v23 = vpop.f32.mrf.mxu3  ;;  %3337 = vmatpush.bf16.msrb.mxu0 %v7459_v15  ;;  %v2577_v15 = vadd.f32 %v11184_v25, %v2556_v42  ;;  %v7443_v17 = vor.u32 %v9039_v1, %v7440_v35  ;;  %v3736_v41 = vor.u32 %v11500_v50, %v2758_v11  ;;  %v9037_v11 = vld [vmem:[%s13747_s3 + $0x514] sm:$0xf]  ;;  %v7496_v0 = vld [vmem:[%s13747_s3 + $0x598] sm:$0xf0]  ;;  %v7422_v51 = vld [vmem:[%s13747_s3 + $0x500] sm:$0xf] }
 0x2d1   :  { %v2602_v45 = vpack.c.bf16 %v2591_v2, %v2590_v61  ;;  %v2480_v40 = vadd.f32 %v2479_v23, %v2450_v54  ;;  %v9055_v2 = vld [vmem:[%s13747_s3 + $0x5a4] sm:$0xf]  ;;  %3280 = vmatpush.bf16.msrb.mxu2 %v7447_v4  ;;  %3309 = vmatpush.bf16.msrb.mxu3 %v7511_v60  ;;  %v11576_v25 = vsel %vm419_vm5, %v3730_v19, %v11500_v50  ;;  %v7494_v54 = vld [vmem:[%s13747_s3 + $0x590] sm:$0xf]  ;;  %v9036_v1 = vld [vmem:[%s13747_s3 + $0x504] sm:$0xf0] }
 0x2d2   :  { %3367 = vmatpush.bf16.msrb.mxu1 %v7515_v9  ;;  %v7507_v7 = vor.u32 %v9055_v2, %v7504_v43  ;;  %v2593_v26 = vmax.f32 %v2577_v15, 0.0  ;;  %v3733_v4 = vor.u32 %v11496_v49, %v2750_v36  ;;  %v7431_v23 = vor.u32 %v9038_v29, %v7430_v48  ;;  %v9054_v36 = vld [vmem:[%s13747_s3 + $0x594] sm:$0xf0]  ;;  %v7432_v49 = vld [vmem:[%s13747_s3 + $0x518] sm:$0xf0] }
 0x2d3   :  { %2610 = vst [vmem:[#allocation4 + $0x20] sm:$0xff] %v2602_v45  ;;  %v2555_v13 = vadd.f32 %v2480_v40, %v2200_v22  ;;  %v2511_v18 = vpop.f32.mrf.mxu0  ;;  %v2540_v55 = vpop.f32.mrf.mxu1  ;;  %v7495_v50 = vor.u32 %v9054_v36, %v7494_v54  ;;  %v7435_v60 = vor.u32 %v9037_v11, %v7432_v49  ;;  %v7486_v35 = vld [vmem:[%s13747_s3 + $0x580] sm:$0xf]  ;;  %v7423_v2 = vor.u32 %v9036_v1, %v7422_v51  ;;  %v9035_v15 = vld [vmem:[%s13747_s3 + $0x504] sm:$0xf] }
 0x2d4   :  { %3338 = vmatpush.bf16.msrb.mxu0 %v7451_v52  ;;  %v9053_v52 = vld [vmem:[%s13747_s3 + $0x594] sm:$0xf]  ;;  %v9051_v18 = vld [vmem:[%s13747_s3 + $0x584] sm:$0xf]  ;;  %v9112_v1 = vld [vmem:[%s13747_s3 + $0x764] sm:$0xf0] }
 0x2d5   :  { %v2576_v27 = vadd.f32 %v11186_v3, %v2555_v13  ;;  %3281 = vmatpush.bf16.msrb.mxu2 %v7439_v31  ;;  %3310 = vmatpush.bf16.msrb.mxu3 %v7503_v37  ;;  %v7499_v30 = vor.u32 %v9053_v52, %v7496_v0  ;;  %v7424_v13 = vld [vmem:[%s13747_s3 + $0x508] sm:$0xf0]  ;;  %v9113_v52 = vld [vmem:[%s13747_s3 + $0x774] sm:$0xf]  ;;  %v7640_v0 = vld [vmem:[%s13747_s3 + $0x778] sm:$0xf0] }
 0x2d6   :  { %3013 = vmatmul.bf16.gmra.mxu2 %v2756_v59  ;;  %3042 = vmatmul.bf16.gmra.mxu3 %v2764_v53  ;;  %v7427_v19 = vor.u32 %v9035_v15, %v7424_v13  ;;  %v7488_v31 = vld [vmem:[%s13747_s3 + $0x588] sm:$0xf0]  ;;  %v9111_v15 = vld [vmem:[%s13747_s3 + $0x764] sm:$0xf] }
 0x2d7   :  { %v2592_v22 = vmax.f32 %v2576_v27, 0.0  ;;  %3071 = vmatmul.bf16.gmra.mxu0 %v2756_v59  ;;  %3100 = vmatmul.bf16.gmra.mxu1 %v2764_v53  ;;  %v9052_v59 = vld [vmem:[%s13747_s3 + $0x584] sm:$0xf0]  ;;  %v7491_v27 = vor.u32 %v9051_v18, %v7488_v31  ;;  %v7632_v13 = vld [vmem:[%s13747_s3 + $0x768] sm:$0xf0]  ;;  %v2792_v31 = vrot.slane %v11314_v62, 7 }
 0x2d8   :  { %v2453_v20 = vpop.f32.mrf.mxu2  ;;  %v2482_v63 = vpop.f32.mrf.mxu3  ;;  %3339 = vmatpush.bf16.msrb.mxu0 %v7443_v17  ;;  %3368 = vmatpush.bf16.msrb.mxu1 %v7507_v7  ;;  %v7487_v43 = vor.u32 %v9052_v59, %v7486_v35  ;;  %v7694_v35 = vld [vmem:[%s13747_s3 + $0x7e0] sm:$0xf]  ;;  %v9128_v59 = vld [vmem:[%s13747_s3 + $0x7e4] sm:$0xf0]  ;;  %v9127_v18 = vld [vmem:[%s13747_s3 + $0x7e4] sm:$0xf] }
 0x2d9   :  { %v2603_v61 = vpack.c.bf16 %v2593_v26, %v2592_v22  ;;  %3282 = vmatpush.bf16.msrb.mxu2 %v7431_v23  ;;  %3311 = vmatpush.bf16.msrb.mxu3 %v7495_v50  ;;  %v9110_v62 = vld [vmem:[%s13747_s3 + $0x754] sm:$0xf0] }
 0x2da   :  { %v7222_v40 = vld [vmem:[#allocation4 + $0x20] sm:$0xf]  ;;  %v9033_v9 = vld [vmem:[#allocation4 + $0x24] sm:$0xf] }
 0x2db   :  { %2611 = vst [vmem:[#allocation4 + $0x28] sm:$0xff] %v2603_v61  ;;  %v2513_v3 = vpop.f32.mrf.mxu0  ;;  %v2542_v42 = vpop.f32.mrf.mxu1 }
 0x2dc   :  { %3340 = vmatpush.bf16.msrb.mxu0 %v7435_v60  ;;  %3369 = vmatpush.bf16.msrb.mxu1 %v7499_v30 }
 0x2dd   :  { %3283 = vmatpush.bf16.msrb.mxu2 %v7423_v2  ;;  %3312 = vmatpush.bf16.msrb.mxu3 %v7487_v43  ;;  %v7695_v43 = vor.u32 %v9128_v59, %v7694_v35 }
 0x2e0   :  { %v2455_v33 = vpop.f32.mrf.mxu2  ;;  %v2484_v45 = vpop.f32.mrf.mxu3  ;;  %3341 = vmatpush.bf16.msrb.mxu0 %v7427_v19  ;;  %3370 = vmatpush.bf16.msrb.mxu1 %v7491_v27  ;;  %v2784_v19 = vrot.slane %v11309_v6, 7  ;;  %v7622_v6 = vld [vmem:[%s13747_s3 + $0x750] sm:$0xf] }
 0x2e1   :  { %v7643_v33 = vor.u32 %v9113_v52, %v7640_v0  ;;  %v9129_v45 = vld [vmem:[%s13747_s3 + $0x7f4] sm:$0xf]  ;;  %v7616_v52 = vld [vmem:[%s13747_s3 + $0x748] sm:$0xf0]  ;;  %v9123_v0 = vld [vmem:[%s13747_s3 + $0x7c4] sm:$0xf] }
 0x2e2   :  { %v9034_v55 = vld [vmem:[#allocation4 + $0x24] sm:$0xf0]  ;;  %v7224_v53 = vld [vmem:[#allocation4 + $0x28] sm:$0xf0] }
 0x2e3   :  { %v11632_v37 = vor.u32 %v9034_v55, %v7222_v40  ;;  %v11634_v17 = vor.u32 %v9033_v9, %v7224_v53  ;;  %v7704_v40 = vld [vmem:[%s13747_s3 + $0x7f8] sm:$0xf0]  ;;  %v7630_v9 = vld [vmem:[%s13747_s3 + $0x760] sm:$0xf]  ;;  %v7635_v55 = vor.u32 %v9111_v15, %v7632_v13  ;;  %v7696_v53 = vld [vmem:[%s13747_s3 + $0x7e8] sm:$0xf0] }
 0x2e4   :  { %v7707_v30 = vor.u32 %v9129_v45, %v7704_v40  ;;  %3651 = vmatpush.bf16.msra.mxu0 %v7643_v33  ;;  %v7631_v2 = vor.u32 %v9112_v1, %v7630_v9  ;;  %v7699_v27 = vor.u32 %v9127_v18, %v7696_v53  ;;  %v7680_v33 = vld [vmem:[%s13747_s3 + $0x7c8] sm:$0xf0]  ;;  %v2633_v40 = vrot.slane %v11247_v39, 3  ;;  %v7670_v15 = vld [vmem:[%s13747_s3 + $0x7b0] sm:$0xf] }
 0x2e5   :  { %v2766_v7 = vshrl.u32 %v11632_v37, 16  ;;  %v2769_v26 = vshll.u32 %v11632_v37, 16  ;;  %v2774_v22 = vshrl.u32 %v11634_v17, 16  ;;  %v2777_v20 = vshll.u32 %v11634_v17, 16  ;;  %v9122_v18 = vld [vmem:[%s13747_s3 + $0x7b4] sm:$0xf0] }
 0x2e6   :  { %3680 = vmatpush.bf16.msra.mxu1 %v7707_v30  ;;  %v7683_v45 = vor.u32 %v9123_v0, %v7680_v33  ;;  %v2664_v9 = vrot.slane %v11336_v32, 7  ;;  %v2634_v30 = vrot.slane %v11267_v56, 3  ;;  %v2665_v1 = vrot.slane %v11338_v10, 7  ;;  %v7608_v53 = vld [vmem:[%s13747_s3 + $0x738] sm:$0xf0] }
 0x2e7   :  { %v2768_v63 = vrot.slane %v2766_v7, 7  ;;  %v2776_v61 = vrot.slane %v2774_v22, 7  ;;  %v3734_v3 = vrot.slane %v2769_v26, 1  ;;  %v3737_v42 = vrot.slane %v2777_v20, 1  ;;  %v7592_v0 = vld [vmem:[%s13747_s3 + $0x718] sm:$0xf0] }
 0x2e8   :  { %3652 = vmatpush.bf16.msra.mxu0 %v7635_v55  ;;  %v2686_v35 = vsel %vm71_vm1, %v2633_v40, %v2664_v9  ;;  %v2690_v59 = vsel %vm71_vm1, %v2634_v30, %v2665_v1  ;;  %v9105_v55 = vld [vmem:[%s13747_s3 + $0x734] sm:$0xf]  ;;  %v7656_v40 = vld [vmem:[%s13747_s3 + $0x798] sm:$0xf0] }
 0x2e9   :  { %v2771_v48 = vor.u32 %v2769_v26, %v2768_v63  ;;  %v2779_v29 = vor.u32 %v2777_v20, %v2776_v61  ;;  %v11641_v54 = vsel %vm419_vm5, %v3733_v4, %v3734_v3  ;;  %v11644_v23 = vsel %vm419_vm5, %v3736_v41, %v3737_v42  ;;  %v7638_v41 = vld [vmem:[%s13747_s3 + $0x770] sm:$0xf] }
 0x2ea   :  { %v3739_v36 = vor.u32 %v3734_v3, %v2766_v7  ;;  %v3742_v11 = vor.u32 %v3737_v42, %v2774_v22  ;;  %3681 = vmatpush.bf16.msra.mxu1 %v7699_v27  ;;  %v2787_v7 = vor.u32 %v2785_v47, %v2784_v19  ;;  %v2795_v26 = vor.u32 %v2793_v24, %v2792_v31  ;;  %v7686_v47 = vld [vmem:[%s13747_s3 + $0x7d0] sm:$0xf]  ;;  %v7624_v3 = vld [vmem:[%s13747_s3 + $0x758] sm:$0xf0]  ;;  %v9121_v27 = vld [vmem:[%s13747_s3 + $0x7b4] sm:$0xf] }
 0x2eb   :  { %v2772_v49 = vsel %vm92_vm2, %v11318_v28, %v2771_v48  ;;  %v2780_v50 = vsel %vm92_vm2, %v11460_v38, %v2779_v29  ;;  %v9114_v28 = vld [vmem:[%s13747_s3 + $0x774] sm:$0xf0]  ;;  %v7702_v38 = vld [vmem:[%s13747_s3 + $0x7f0] sm:$0xf]  ;;  %v7623_v24 = vor.u32 %v9110_v62, %v7622_v6  ;;  %v9125_v29 = vld [vmem:[%s13747_s3 + $0x7d4] sm:$0xf]  ;;  %v7671_v19 = vor.u32 %v9122_v18, %v7670_v15 }
 0x2ec   :  { %3018 = vmatmul.bf16.gmra.mxu2 %v2772_v49  ;;  %3047 = vmatmul.bf16.gmra.mxu3 %v2780_v50  ;;  %v11652_v60 = vsel %vm419_vm5, %v3739_v36, %v11324_v46  ;;  %v11656_v4 = vsel %vm419_vm5, %v3742_v11, %v11328_v34  ;;  %v7639_v46 = vor.u32 %v9114_v28, %v7638_v41  ;;  %v9130_v34 = vld [vmem:[%s13747_s3 + $0x7f4] sm:$0xf0]  ;;  %v7688_v36 = vld [vmem:[%s13747_s3 + $0x7d8] sm:$0xf0]  ;;  %v7614_v11 = vld [vmem:[%s13747_s3 + $0x740] sm:$0xf] }
 0x2ed   :  { %3076 = vmatmul.bf16.gmra.mxu0 %v2772_v49  ;;  %3105 = vmatmul.bf16.gmra.mxu1 %v2780_v50  ;;  %v7703_v51 = vor.u32 %v9130_v34, %v7702_v38  ;;  %v2788_v22 = vsel %vm92_vm2, %v2768_v63, %v2787_v7  ;;  %v2796_v20 = vsel %vm92_vm2, %v2776_v61, %v2795_v26  ;;  %v9126_v63 = vld [vmem:[%s13747_s3 + $0x7d4] sm:$0xf0]  ;;  %v9109_v61 = vld [vmem:[%s13747_s3 + $0x754] sm:$0xf]  ;;  %v9108_v50 = vld [vmem:[%s13747_s3 + $0x744] sm:$0xf0] }
 0x2ee   :  { %3593 = vmatpush.bf16.msra.mxu2 %v7639_v46  ;;  %v7687_v42 = vor.u32 %v9126_v63, %v7686_v47  ;;  %v7627_v48 = vor.u32 %v9109_v61, %v7624_v3  ;;  %v7691_v49 = vor.u32 %v9125_v29, %v7688_v36  ;;  %v7678_v41 = vld [vmem:[%s13747_s3 + $0x7c0] sm:$0xf]  ;;  %v9124_v28 = vld [vmem:[%s13747_s3 + $0x7c4] sm:$0xf0]  ;;  %v7615_v38 = vor.u32 %v9108_v50, %v7614_v11  ;;  %v9107_v34 = vld [vmem:[%s13747_s3 + $0x744] sm:$0xf] }
 0x2ef   :  { %3622 = vmatpush.bf16.msra.mxu3 %v7703_v51  ;;  %v7679_v46 = vor.u32 %v9124_v28, %v7678_v41  ;;  %v7619_v51 = vor.u32 %v9107_v34, %v7616_v52  ;;  %v7611_v31 = vor.u32 %v9105_v55, %v7608_v53  ;;  %v7672_v7 = vld [vmem:[%s13747_s3 + $0x7b8] sm:$0xf0]  ;;  %v7598_v26 = vld [vmem:[%s13747_s3 + $0x720] sm:$0xf]  ;;  %v9120_v62 = vld [vmem:[%s13747_s3 + $0x7a4] sm:$0xf0] }
 0x2f0   :  { %3653 = vmatpush.bf16.msra.mxu0 %v7627_v48  ;;  %3682 = vmatpush.bf16.msra.mxu1 %v7691_v49  ;;  %v7662_v6 = vld [vmem:[%s13747_s3 + $0x7a0] sm:$0xf]  ;;  %v9103_v63 = vld [vmem:[%s13747_s3 + $0x724] sm:$0xf]  ;;  %v7600_v61 = vld [vmem:[%s13747_s3 + $0x728] sm:$0xf0] }
 0x2f1   :  { %v9119_v3 = vld [vmem:[%s13747_s3 + $0x7a4] sm:$0xf]  ;;  %v7664_v48 = vld [vmem:[%s13747_s3 + $0x7a8] sm:$0xf0]  ;;  %v2666_v36 = vrot.slane %v11275_v8, 7  ;;  %v2668_v11 = vrot.slane %v11320_v12, 7 }
 0x2f2   :  { %3594 = vmatpush.bf16.msra.mxu2 %v7631_v2  ;;  %v7606_v2 = vld [vmem:[%s13747_s3 + $0x730] sm:$0xf]  ;;  %v7667_v29 = vor.u32 %v9119_v3, %v7664_v48  ;;  %v9102_v28 = vld [vmem:[%s13747_s3 + $0x714] sm:$0xf0]  ;;  %v9101_v52 = vld [vmem:[%s13747_s3 + $0x714] sm:$0xf] }
 0x2f3   :  { %3623 = vmatpush.bf16.msra.mxu3 %v7695_v43  ;;  %v9106_v43 = vld [vmem:[%s13747_s3 + $0x734] sm:$0xf0]  ;;  %v2667_v49 = vsel %vm71_vm1, %v2664_v9, %v2666_v36  ;;  %v2669_v50 = vsel %vm71_vm1, %v2665_v1, %v2668_v11  ;;  %v7590_v41 = vld [vmem:[%s13747_s3 + $0x710] sm:$0xf]  ;;  %v7595_v33 = vor.u32 %v9101_v52, %v7592_v0  ;;  %v7582_v9 = vld [vmem:[%s13747_s3 + $0x700] sm:$0xf] }
 0x2f4   :  { %3654 = vmatpush.bf16.msra.mxu0 %v7619_v51  ;;  %3683 = vmatpush.bf16.msra.mxu1 %v7683_v45  ;;  %v7607_v13 = vor.u32 %v9106_v43, %v7606_v2  ;;  %v9118_v34 = vld [vmem:[%s13747_s3 + $0x794] sm:$0xf0]  ;;  %v9117_v45 = vld [vmem:[%s13747_s3 + $0x794] sm:$0xf]  ;;  %v9100_v1 = vld [vmem:[%s13747_s3 + $0x704] sm:$0xf0] }
 0x2f5   :  { %v7659_v30 = vor.u32 %v9117_v45, %v7656_v40  ;;  %v7583_v2 = vor.u32 %v9100_v1, %v7582_v9  ;;  %v9099_v15 = vld [vmem:[%s13747_s3 + $0x704] sm:$0xf]  ;;  %v7648_v53 = vld [vmem:[%s13747_s3 + $0x788] sm:$0xf0]  ;;  %v7864_v48 = vld [vmem:[%s13747_s3 + $0x8f8] sm:$0xf0] }
 0x2f6   :  { %3595 = vmatpush.bf16.msra.mxu2 %v7623_v24  ;;  %v7663_v24 = vor.u32 %v9120_v62, %v7662_v6  ;;  %v9115_v18 = vld [vmem:[%s13747_s3 + $0x784] sm:$0xf]  ;;  %v7862_v6 = vld [vmem:[%s13747_s3 + $0x8f0] sm:$0xf]  ;;  %v7856_v0 = vld [vmem:[%s13747_s3 + $0x8e8] sm:$0xf0] }
 0x2f7   :  { %3624 = vmatpush.bf16.msra.mxu3 %v7687_v42  ;;  %v7603_v42 = vor.u32 %v9103_v63, %v7600_v61  ;;  %v7800_v63 = vld [vmem:[%s13747_s3 + $0x878] sm:$0xf0]  ;;  %v2676_v45 = vrot.slane %v11267_v56, 7  ;;  %v9142_v1 = vld [vmem:[%s13747_s3 + $0x854] sm:$0xf0] }
 0x2f8   :  { %3655 = vmatpush.bf16.msra.mxu0 %v7611_v31  ;;  %v2672_v31 = vrot.slane %v11634_v17, 7 }
 0x2fa   :  { %3596 = vmatpush.bf16.msra.mxu2 %v7615_v38  ;;  %v7654_v38 = vld [vmem:[%s13747_s3 + $0x790] sm:$0xf]  ;;  %v2677_v9 = vsel %vm71_vm1, %v2672_v31, %v2676_v45 }
 0x2fb   :  { %3625 = vmatpush.bf16.msra.mxu3 %v7679_v46  ;;  %v7591_v46 = vor.u32 %v9102_v28, %v7590_v41  ;;  %v7655_v51 = vor.u32 %v9118_v34, %v7654_v38  ;;  %v9143_v38 = vld [vmem:[%s13747_s3 + $0x864] sm:$0xf] }
 0x2fc   :  { %3023 = vmatmul.bf16.gmra.mxu2 %v2788_v22  ;;  %3052 = vmatmul.bf16.gmra.mxu3 %v2796_v20  ;;  %v9159_v34 = vld [vmem:[%s13747_s3 + $0x8e4] sm:$0xf] }
 0x2fd   :  { %3081 = vmatmul.bf16.gmra.mxu0 %v2788_v22  ;;  %3110 = vmatmul.bf16.gmra.mxu1 %v2796_v20  ;;  %v7675_v22 = vor.u32 %v9121_v27, %v7672_v7  ;;  %v9104_v20 = vld [vmem:[%s13747_s3 + $0x724] sm:$0xf0]  ;;  %v7651_v27 = vor.u32 %v9115_v18, %v7648_v53  ;;  %v7848_v53 = vld [vmem:[%s13747_s3 + $0x8d8] sm:$0xf0] }
 0x2fe   :  { %3597 = vmatpush.bf16.msra.mxu2 %v7607_v13  ;;  %v7599_v47 = vor.u32 %v9104_v20, %v7598_v26  ;;  %3656 = vmatpush.bf16.msra.mxu0 %v7603_v42  ;;  %v7584_v13 = vld [vmem:[%s13747_s3 + $0x708] sm:$0xf0]  ;;  %v2673_v26 = vsel %vm71_vm1, %v2668_v11, %v2672_v31  ;;  %v9146_v20 = vld [vmem:[%s13747_s3 + $0x874] sm:$0xf0]  ;;  %v9161_v42 = vld [vmem:[%s13747_s3 + $0x8f4] sm:$0xf] }
 0x2ff   :  { %3626 = vmatpush.bf16.msra.mxu3 %v7671_v19  ;;  %3684 = vmatpush.bf16.msra.mxu1 %v7675_v22  ;;  %v7587_v55 = vor.u32 %v9099_v15, %v7584_v13  ;;  %v2670_v19 = vrot.slane %v11632_v37, 7  ;;  %v7798_v22 = vld [vmem:[%s13747_s3 + $0x870] sm:$0xf]  ;;  %v9144_v11 = vld [vmem:[%s13747_s3 + $0x864] sm:$0xf0] }
 0x300   :  { %v7799_v62 = vor.u32 %v9146_v20, %v7798_v22  ;;  %v7784_v15 = vld [vmem:[%s13747_s3 + $0x858] sm:$0xf0] }
 0x301   :  { %v2671_v7 = vsel %vm71_vm1, %v2666_v36, %v2670_v19  ;;  %v7867_v36 = vor.u32 %v9161_v42, %v7864_v48  ;;  %v7776_v42 = vld [vmem:[%s13747_s3 + $0x848] sm:$0xf0]  ;;  %v9155_v48 = vld [vmem:[%s13747_s3 + $0x8c4] sm:$0xf] }
 0x302   :  { %3598 = vmatpush.bf16.msra.mxu2 %v7599_v47  ;;  %3657 = vmatpush.bf16.msra.mxu0 %v7595_v33  ;;  %v9162_v47 = vld [vmem:[%s13747_s3 + $0x8f4] sm:$0xf0]  ;;  %v2674_v33 = vrot.slane %v11247_v39, 7 }
 0x303   :  { %3627 = vmatpush.bf16.msra.mxu3 %v7663_v24  ;;  %3685 = vmatpush.bf16.msra.mxu1 %v7667_v29  ;;  %v9145_v24 = vld [vmem:[%s13747_s3 + $0x874] sm:$0xf]  ;;  %v7863_v61 = vor.u32 %v9162_v47, %v7862_v6  ;;  %v7790_v29 = vld [vmem:[%s13747_s3 + $0x860] sm:$0xf] }
 0x304   :  { %v7803_v3 = vor.u32 %v9145_v24, %v7800_v63  ;;  %v7791_v41 = vor.u32 %v9144_v11, %v7790_v29  ;;  %v2675_v40 = vsel %vm71_vm1, %v2670_v19, %v2674_v33  ;;  %v7774_v19 = vld [vmem:[%s13747_s3 + $0x840] sm:$0xf] }
 0x306   :  { %3599 = vmatpush.bf16.msra.mxu2 %v7591_v46  ;;  %3658 = vmatpush.bf16.msra.mxu0 %v7587_v55  ;;  %v7792_v46 = vld [vmem:[%s13747_s3 + $0x868] sm:$0xf0]  ;;  %v9157_v55 = vld [vmem:[%s13747_s3 + $0x8d4] sm:$0xf] }
 0x307   :  { %3628 = vmatpush.bf16.msra.mxu3 %v7655_v51  ;;  %3686 = vmatpush.bf16.msra.mxu1 %v7659_v30  ;;  %v7795_v52 = vor.u32 %v9143_v38, %v7792_v46  ;;  %v7859_v51 = vor.u32 %v9159_v34, %v7856_v0  ;;  %v7782_v30 = vld [vmem:[%s13747_s3 + $0x850] sm:$0xf]  ;;  %v7851_v31 = vor.u32 %v9157_v55, %v7848_v53  ;;  %v9138_v38 = vld [vmem:[%s13747_s3 + $0x834] sm:$0xf0]  ;;  %v7822_v55 = vld [vmem:[%s13747_s3 + $0x8a0] sm:$0xf] }
 0x308   :  { %v7830_v46 = vld [vmem:[%s13747_s3 + $0x8b0] sm:$0xf]  ;;  %v9152_v53 = vld [vmem:[%s13747_s3 + $0x8a4] sm:$0xf0] }
 0x30a   :  { %3600 = vmatpush.bf16.msra.mxu2 %v7583_v2  ;;  %v9158_v2 = vld [vmem:[%s13747_s3 + $0x8d4] sm:$0xf0] }
 0x30b   :  { %3687 = vmatpush.bf16.msra.mxu1 %v7651_v27  ;;  %v9140_v27 = vld [vmem:[%s13747_s3 + $0x844] sm:$0xf0] }
 0x30c   :  { %3284 = vmatmul.bf16.vlgmr.msrb.gmra.mxu2 %v2686_v35  ;;  %3313 = vmatmul.bf16.vlgmr.msrb.gmra.mxu3 %v2690_v59  ;;  %v7775_v22 = vor.u32 %v9140_v27, %v7774_v19  ;;  %v7823_v19 = vor.u32 %v9152_v53, %v7822_v55  ;;  %v7808_v55 = vld [vmem:[%s13747_s3 + $0x888] sm:$0xf0]  ;;  %v7958_v53 = vld [vmem:[%s13747_s3 + $0x970] sm:$0xf] }
 0x30d   :  { %3342 = vmatmul.bf16.vlgmr.msrb.gmra.mxu0 %v2686_v35  ;;  %3371 = vmatmul.bf16.vlgmr.msrb.gmra.mxu1 %v2690_v59  ;;  %v7646_v35 = vld [vmem:[%s13747_s3 + $0x780] sm:$0xf]  ;;  %v9116_v59 = vld [vmem:[%s13747_s3 + $0x784] sm:$0xf0] }
 0x30e   :  { %v7647_v43 = vor.u32 %v9116_v59, %v7646_v35  ;;  %3962 = vmatpush.bf16.msrb.mxu2 %v7799_v62  ;;  %4020 = vmatpush.bf16.msrb.mxu0 %v7803_v3  ;;  %v7846_v35 = vld [vmem:[%s13747_s3 + $0x8d0] sm:$0xf]  ;;  %v7783_v59 = vor.u32 %v9142_v1, %v7782_v30  ;;  %v9139_v3 = vld [vmem:[%s13747_s3 + $0x844] sm:$0xf]  ;;  %v9153_v30 = vld [vmem:[%s13747_s3 + $0x8b4] sm:$0xf] }
 0x30f   :  { %4049 = vmatpush.bf16.msrb.mxu1 %v7867_v36  ;;  %v7847_v13 = vor.u32 %v9158_v2, %v7846_v35  ;;  %v7779_v11 = vor.u32 %v9139_v3, %v7776_v42  ;;  %v7832_v2 = vld [vmem:[%s13747_s3 + $0x8b8] sm:$0xf0]  ;;  %v7750_v3 = vld [vmem:[%s13747_s3 + $0x810] sm:$0xf]  ;;  %v9134_v42 = vld [vmem:[%s13747_s3 + $0x814] sm:$0xf0] }
 0x310   :  { %3629 = vmatpush.bf16.msra.mxu3 %v7647_v43  ;;  %v9141_v43 = vld [vmem:[%s13747_s3 + $0x854] sm:$0xf] }
 0x311   :  { %v7787_v18 = vor.u32 %v9141_v43, %v7784_v15  ;;  %v7758_v43 = vld [vmem:[%s13747_s3 + $0x820] sm:$0xf]  ;;  %v9136_v15 = vld [vmem:[%s13747_s3 + $0x824] sm:$0xf0] }
 0x312   :  { %3963 = vmatpush.bf16.msrb.mxu2 %v7791_v41  ;;  %4021 = vmatpush.bf16.msrb.mxu0 %v7795_v52  ;;  %v9154_v52 = vld [vmem:[%s13747_s3 + $0x8b4] sm:$0xf0] }
 0x313   :  { %4050 = vmatpush.bf16.msrb.mxu1 %v7859_v51  ;;  %v7831_v0 = vor.u32 %v9154_v52, %v7830_v46  ;;  %v9149_v46 = vld [vmem:[%s13747_s3 + $0x894] sm:$0xf]  ;;  %v7816_v52 = vld [vmem:[%s13747_s3 + $0x898] sm:$0xf0] }
 0x314   :  { %3991 = vmatpush.bf16.msrb.mxu3 %v7863_v61 }
 0x316   :  { %3964 = vmatpush.bf16.msrb.mxu2 %v7783_v59  ;;  %4022 = vmatpush.bf16.msrb.mxu0 %v7787_v18  ;;  %v7759_v18 = vor.u32 %v9136_v15, %v7758_v43  ;;  %v9131_v43 = vld [vmem:[%s13747_s3 + $0x804] sm:$0xf]  ;;  %v7744_v15 = vld [vmem:[%s13747_s3 + $0x808] sm:$0xf0] }
 0x317   :  { %4051 = vmatpush.bf16.msrb.mxu1 %v7851_v31 }
 0x31a   :  { %3965 = vmatpush.bf16.msrb.mxu2 %v7775_v22  ;;  %4023 = vmatpush.bf16.msrb.mxu0 %v7779_v11  ;;  %v9151_v22 = vld [vmem:[%s13747_s3 + $0x8a4] sm:$0xf] }
 0x31c   :  { %3289 = vmatmul.bf16.gmra.mxu2 %v2667_v49  ;;  %3318 = vmatmul.bf16.gmra.mxu3 %v2669_v50 }
 0x31d   :  { %3347 = vmatmul.bf16.gmra.mxu0 %v2667_v49  ;;  %3376 = vmatmul.bf16.gmra.mxu1 %v2669_v50  ;;  %v7854_v49 = vld [vmem:[%s13747_s3 + $0x8e0] sm:$0xf]  ;;  %v9160_v50 = vld [vmem:[%s13747_s3 + $0x8e4] sm:$0xf0] }
 0x31e   :  { %v7855_v28 = vor.u32 %v9160_v50, %v7854_v49  ;;  %v7840_v49 = vld [vmem:[%s13747_s3 + $0x8c8] sm:$0xf0] }
 0x31f   :  { %v7843_v41 = vor.u32 %v9155_v48, %v7840_v49  ;;  %v7814_v48 = vld [vmem:[%s13747_s3 + $0x890] sm:$0xf] }
 0x320   :  { %3992 = vmatpush.bf16.msrb.mxu3 %v7855_v28  ;;  %v7766_v28 = vld [vmem:[%s13747_s3 + $0x830] sm:$0xf] }
 0x321   :  { %v7767_v34 = vor.u32 %v9138_v38, %v7766_v28  ;;  %4052 = vmatpush.bf16.msrb.mxu1 %v7843_v41  ;;  %v9133_v28 = vld [vmem:[%s13747_s3 + $0x814] sm:$0xf]  ;;  %v7752_v38 = vld [vmem:[%s13747_s3 + $0x818] sm:$0xf0] }
 0x323   :  { %3966 = vmatpush.bf16.msrb.mxu2 %v7767_v34  ;;  %v7755_v34 = vor.u32 %v9133_v28, %v7752_v38 }
 0x324   :  { %3993 = vmatpush.bf16.msrb.mxu3 %v7847_v13  ;;  %v7835_v13 = vor.u32 %v9153_v30, %v7832_v2  ;;  %v9148_v30 = vld [vmem:[%s13747_s3 + $0x884] sm:$0xf0] }
 0x326   :  { %4053 = vmatpush.bf16.msrb.mxu1 %v7835_v13  ;;  %v9147_v13 = vld [vmem:[%s13747_s3 + $0x884] sm:$0xf] }
 0x327   :  { %3967 = vmatpush.bf16.msrb.mxu2 %v7759_v18  ;;  %v7747_v18 = vor.u32 %v9131_v43, %v7744_v15  ;;  %v8016_v43 = vld [vmem:[%s13747_s3 + $0x9e8] sm:$0xf0] }
 0x32c   :  { %3294 = vmatmul.bf16.gmra.mxu2 %v2671_v7  ;;  %3323 = vmatmul.bf16.gmra.mxu3 %v2673_v26 }
 0x32d   :  { %3352 = vmatmul.bf16.gmra.mxu0 %v2671_v7  ;;  %3381 = vmatmul.bf16.gmra.mxu1 %v2673_v26  ;;  %v7838_v7 = vld [vmem:[%s13747_s3 + $0x8c0] sm:$0xf]  ;;  %v9156_v26 = vld [vmem:[%s13747_s3 + $0x8c4] sm:$0xf0] }
 0x32e   :  { %v7839_v20 = vor.u32 %v9156_v26, %v7838_v7  ;;  %v9135_v7 = vld [vmem:[%s13747_s3 + $0x824] sm:$0xf]  ;;  %v7760_v26 = vld [vmem:[%s13747_s3 + $0x828] sm:$0xf0] }
 0x330   :  { %3994 = vmatpush.bf16.msrb.mxu3 %v7839_v20  ;;  %v7763_v20 = vor.u32 %v9135_v7, %v7760_v26  ;;  %v7811_v7 = vor.u32 %v9147_v13, %v7808_v55  ;;  %v7942_v13 = vld [vmem:[%s13747_s3 + $0x950] sm:$0xf] }
 0x331   :  { %v8006_v55 = vld [vmem:[%s13747_s3 + $0x9d0] sm:$0xf] }
 0x334   :  { %3995 = vmatpush.bf16.msrb.mxu3 %v7831_v0  ;;  %v7742_v0 = vld [vmem:[%s13747_s3 + $0x800] sm:$0xf] }
 0x338   :  { %3996 = vmatpush.bf16.msrb.mxu3 %v7823_v19  ;;  %v9178_v19 = vld [vmem:[%s13747_s3 + $0x974] sm:$0xf0] }
 0x339   :  { %v7959_v26 = vor.u32 %v9178_v19, %v7958_v53  ;;  %v9190_v19 = vld [vmem:[%s13747_s3 + $0x9d4] sm:$0xf0] }
 0x33c   :  { %3299 = vmatmul.bf16.gmra.mxu2 %v2675_v40  ;;  %3328 = vmatmul.bf16.gmra.mxu3 %v2677_v9 }
 0x33d   :  { %3357 = vmatmul.bf16.gmra.mxu0 %v2675_v40  ;;  %3386 = vmatmul.bf16.gmra.mxu1 %v2677_v9  ;;  %v9137_v40 = vld [vmem:[%s13747_s3 + $0x834] sm:$0xf]  ;;  %v7768_v9 = vld [vmem:[%s13747_s3 + $0x838] sm:$0xf0] }
 0x33e   :  { %v7771_v59 = vor.u32 %v9137_v40, %v7768_v9  ;;  %v7806_v9 = vld [vmem:[%s13747_s3 + $0x880] sm:$0xf] }
 0x340   :  { %4024 = vmatpush.bf16.msrb.mxu0 %v7771_v59 }
 0x344   :  { %v3067_v6 = vpop.f32.mrf.mxu0  ;;  %v3096_v62 = vpop.f32.mrf.mxu1  ;;  %4025 = vmatpush.bf16.msrb.mxu0 %v7763_v20  ;;  %v9194_v20 = vld [vmem:[%s13747_s3 + $0x9f4] sm:$0xf0] }
 0x345   :  { %v11960_v47 = vadd.f32 %v3096_v62, %v3067_v6  ;;  %v7824_v6 = vld [vmem:[%s13747_s3 + $0x8a8] sm:$0xf0] }
 0x348   :  { %4026 = vmatpush.bf16.msrb.mxu0 %v7755_v34 }
 0x349   :  { %v3009_v24 = vpop.f32.mrf.mxu2  ;;  %v3038_v63 = vpop.f32.mrf.mxu3 }
 0x34a   :  { %v11962_v61 = vadd.f32 %v3038_v63, %v3009_v24  ;;  %v7827_v63 = vor.u32 %v9151_v22, %v7824_v6  ;;  %v8022_v22 = vld [vmem:[%s13747_s3 + $0x9f0] sm:$0xf] }
 0x34c   :  { %3601 = vmatmul.bf16.vlgmr.msra.gmra.mxu2 %v11336_v32  ;;  %3630 = vmatmul.bf16.vlgmr.msra.gmra.mxu3 %v11338_v10  ;;  %v3069_v29 = vpop.f32.mrf.mxu0  ;;  %v3098_v36 = vpop.f32.mrf.mxu1 }
 0x34d   :  { %3659 = vmatmul.bf16.vlgmr.msra.gmra.mxu0 %v11336_v32  ;;  %3688 = vmatmul.bf16.vlgmr.msra.gmra.mxu1 %v11338_v10  ;;  %v11980_v50 = vadd.f32 %v3098_v36, %v3069_v29  ;;  %v7751_v29 = vor.u32 %v9134_v42, %v7750_v3  ;;  %v9150_v36 = vld [vmem:[%s13747_s3 + $0x894] sm:$0xf0]  ;;  %v9177_v42 = vld [vmem:[%s13747_s3 + $0x974] sm:$0xf] }
 0x34e   :  { %4054 = vmatpush.bf16.msrb.mxu1 %v7827_v63  ;;  %v7815_v11 = vor.u32 %v9150_v36, %v7814_v48  ;;  %4027 = vmatpush.bf16.msrb.mxu0 %v7747_v18  ;;  %v7960_v48 = vld [vmem:[%s13747_s3 + $0x978] sm:$0xf0]  ;;  %v9174_v18 = vld [vmem:[%s13747_s3 + $0x954] sm:$0xf0] }
 0x34f   :  { %3968 = vmatpush.bf16.msrb.mxu2 %v7751_v29  ;;  %v9193_v29 = vld [vmem:[%s13747_s3 + $0x9f4] sm:$0xf]  ;;  %v7963_v36 = vor.u32 %v9177_v42, %v7960_v48  ;;  %v7943_v53 = vor.u32 %v9174_v18, %v7942_v13  ;;  %v8008_v42 = vld [vmem:[%s13747_s3 + $0x9d8] sm:$0xf0]  ;;  %v7934_v48 = vld [vmem:[%s13747_s3 + $0x940] sm:$0xf] }
 0x350   :  { %3997 = vmatpush.bf16.msrb.mxu3 %v7815_v11  ;;  %v8024_v11 = vld [vmem:[%s13747_s3 + $0x9f8] sm:$0xf0]  ;;  %v7990_v13 = vld [vmem:[%s13747_s3 + $0x9b0] sm:$0xf]  ;;  %v9186_v18 = vld [vmem:[%s13747_s3 + $0x9b4] sm:$0xf0] }
 0x351   :  { %v3011_v51 = vpop.f32.mrf.mxu2  ;;  %v3040_v33 = vpop.f32.mrf.mxu3 }
 0x352   :  { %v11994_v45 = vadd.f32 %v3040_v33, %v3011_v51  ;;  %v9132_v51 = vld [vmem:[%s13747_s3 + $0x804] sm:$0xf0]  ;;  %v7819_v33 = vor.u32 %v9149_v46, %v7816_v52  ;;  %v8027_v46 = vor.u32 %v9193_v29, %v8024_v11  ;;  %v8014_v52 = vld [vmem:[%s13747_s3 + $0x9e0] sm:$0xf]  ;;  %4375 = vmatpush.bf16.msra.mxu0 %v7963_v36 }
 0x353   :  { %v7743_v40 = vor.u32 %v9132_v51, %v7742_v0  ;;  %v9192_v0 = vld [vmem:[%s13747_s3 + $0x9e4] sm:$0xf0] }
 0x354   :  { %v3072_v1 = vpop.f32.mrf.mxu0  ;;  %v3101_v35 = vpop.f32.mrf.mxu1  ;;  %4055 = vmatpush.bf16.msrb.mxu1 %v7819_v33  ;;  %v8015_v33 = vor.u32 %v9192_v0, %v8014_v52  ;;  %v9172_v29 = vld [vmem:[%s13747_s3 + $0x944] sm:$0xf0] }
 0x355   :  { %v7807_v1 = vor.u32 %v9148_v30, %v7806_v9  ;;  %3969 = vmatpush.bf16.msrb.mxu2 %v7743_v40  ;;  %v9175_v30 = vld [vmem:[%s13747_s3 + $0x964] sm:$0xf]  ;;  %v7935_v11 = vor.u32 %v9172_v29, %v7934_v48 }
 0x357   :  { %3998 = vmatpush.bf16.msrb.mxu3 %v7807_v1  ;;  %v7952_v1 = vld [vmem:[%s13747_s3 + $0x968] sm:$0xf0] }
 0x358   :  { %4056 = vmatpush.bf16.msrb.mxu1 %v7811_v7  ;;  %v8007_v7 = vor.u32 %v9190_v19, %v8006_v55 }
 0x359   :  { %v3014_v31 = vpop.f32.mrf.mxu2  ;;  %v3043_v27 = vpop.f32.mrf.mxu3  ;;  %4317 = vmatpush.bf16.msra.mxu2 %v7959_v26 }
 0x35c   :  { %3606 = vmatmul.bf16.gmra.mxu2 %v11275_v8  ;;  %3635 = vmatmul.bf16.gmra.mxu3 %v11320_v12  ;;  %v3074_v62 = vpop.f32.mrf.mxu0  ;;  %v3103_v24 = vpop.f32.mrf.mxu1 }
 0x35d   :  { %3664 = vmatmul.bf16.gmra.mxu0 %v11275_v8  ;;  %3693 = vmatmul.bf16.gmra.mxu1 %v11320_v12  ;;  %v8023_v62 = vor.u32 %v9194_v20, %v8022_v22  ;;  %v9173_v20 = vld [vmem:[%s13747_s3 + $0x954] sm:$0xf] }
 0x35e   :  { %4404 = vmatpush.bf16.msra.mxu1 %v8027_v46 }
 0x35f   :  { %4346 = vmatpush.bf16.msra.mxu3 %v8023_v62  ;;  %v7944_v62 = vld [vmem:[%s13747_s3 + $0x958] sm:$0xf0] }
 0x361   :  { %v3016_v49 = vpop.f32.mrf.mxu2  ;;  %v3045_v41 = vpop.f32.mrf.mxu3 }
 0x362   :  { %v7950_v49 = vld [vmem:[%s13747_s3 + $0x960] sm:$0xf]  ;;  %v9176_v41 = vld [vmem:[%s13747_s3 + $0x964] sm:$0xf0] }
 0x363   :  { %v7951_v34 = vor.u32 %v9176_v41, %v7950_v49  ;;  %4347 = vmatpush.bf16.msra.mxu3 %v8015_v33  ;;  %v7998_v49 = vld [vmem:[%s13747_s3 + $0x9c0] sm:$0xf]  ;;  %v9188_v41 = vld [vmem:[%s13747_s3 + $0x9c4] sm:$0xf0] }
 0x365   :  { %4318 = vmatpush.bf16.msra.mxu2 %v7951_v34 }
 0x367   :  { %4348 = vmatpush.bf16.msra.mxu3 %v8007_v7 }
 0x369   :  { %4319 = vmatpush.bf16.msra.mxu2 %v7943_v53  ;;  %v7991_v53 = vor.u32 %v9186_v18, %v7990_v13  ;;  %v9165_v13 = vld [vmem:[%s13747_s3 + $0x914] sm:$0xf]  ;;  %v7912_v18 = vld [vmem:[%s13747_s3 + $0x918] sm:$0xf0] }
 0x36a   :  { %v3077_v35 = vpop.f32.mrf.mxu0  ;;  %v3106_v59 = vpop.f32.mrf.mxu1 }
 0x36b   :  { %v12072_v2 = vadd.f32 %v3106_v59, %v3077_v35  ;;  %v9191_v35 = vld [vmem:[%s13747_s3 + $0x9e4] sm:$0xf]  ;;  %v7955_v59 = vor.u32 %v9175_v30, %v7952_v1  ;;  %v8000_v1 = vld [vmem:[%s13747_s3 + $0x9c8] sm:$0xf0] }
 0x36c   :  { %3611 = vmatmul.bf16.gmra.mxu2 %v11632_v37  ;;  %3640 = vmatmul.bf16.gmra.mxu3 %v11634_v17  ;;  %v8019_v15 = vor.u32 %v9191_v35, %v8016_v43 }
 0x36d   :  { %3669 = vmatmul.bf16.gmra.mxu0 %v11632_v37  ;;  %3698 = vmatmul.bf16.gmra.mxu1 %v11634_v17 }
 0x36e   :  { %4376 = vmatpush.bf16.msra.mxu0 %v7955_v59  ;;  %4405 = vmatpush.bf16.msra.mxu1 %v8019_v15 }
 0x36f   :  { %v3019_v31 = vpop.f32.mrf.mxu2  ;;  %v3048_v27 = vpop.f32.mrf.mxu3  ;;  %4320 = vmatpush.bf16.msra.mxu2 %v7935_v11  ;;  %v7982_v11 = vld [vmem:[%s13747_s3 + $0x9a0] sm:$0xf] }
 0x370   :  { %v12102_v6 = vadd.f32 %v3048_v27, %v3019_v31 }
 0x372   :  { %v3079_v24 = vpop.f32.mrf.mxu0  ;;  %v3108_v63 = vpop.f32.mrf.mxu1 }
 0x373   :  { %v12104_v3 = vadd.f32 %v3108_v63, %v3079_v24  ;;  %v9189_v24 = vld [vmem:[%s13747_s3 + $0x9d4] sm:$0xf]  ;;  %v7947_v63 = vor.u32 %v9173_v20, %v7944_v62 }
 0x374   :  { %v8011_v36 = vor.u32 %v9189_v24, %v8008_v42  ;;  %v9185_v20 = vld [vmem:[%s13747_s3 + $0x9b4] sm:$0xf]  ;;  %v7992_v24 = vld [vmem:[%s13747_s3 + $0x9b8] sm:$0xf0] }
 0x375   :  { %4377 = vmatpush.bf16.msra.mxu0 %v7947_v63  ;;  %v9168_v63 = vld [vmem:[%s13747_s3 + $0x924] sm:$0xf0]  ;;  %v7995_v29 = vor.u32 %v9185_v20, %v7992_v24  ;;  %v7966_v20 = vld [vmem:[%s13747_s3 + $0x980] sm:$0xf] }
 0x376   :  { %4406 = vmatpush.bf16.msra.mxu1 %v8011_v36 }
 0x377   :  { %v3021_v28 = vpop.f32.mrf.mxu2  ;;  %v3050_v38 = vpop.f32.mrf.mxu3 }
 0x378   :  { %v12130_v51 = vadd.f32 %v3050_v38, %v3021_v28  ;;  %v7999_v28 = vor.u32 %v9188_v41, %v7998_v49  ;;  %v9184_v49 = vld [vmem:[%s13747_s3 + $0x9a4] sm:$0xf0] }
 0x37a   :  { %v3082_v40 = vpop.f32.mrf.mxu0  ;;  %v3111_v9 = vpop.f32.mrf.mxu1  ;;  %4349 = vmatpush.bf16.msra.mxu3 %v7999_v28  ;;  %v7983_v28 = vor.u32 %v9184_v49, %v7982_v11  ;;  %v9163_v11 = vld [vmem:[%s13747_s3 + $0x904] sm:$0xf]  ;;  %v7904_v49 = vld [vmem:[%s13747_s3 + $0x908] sm:$0xf0] }
 0x37b   :  { %v9171_v40 = vld [vmem:[%s13747_s3 + $0x944] sm:$0xf]  ;;  %v7936_v9 = vld [vmem:[%s13747_s3 + $0x948] sm:$0xf0] }
 0x37c   :  { %3616 = vmatmul.bf16.gmra.mxu2 %v11247_v39  ;;  %3645 = vmatmul.bf16.gmra.mxu3 %v11267_v56  ;;  %v7939_v30 = vor.u32 %v9171_v40, %v7936_v9  ;;  %v7984_v9 = vld [vmem:[%s13747_s3 + $0x9a8] sm:$0xf0] }
 0x37d   :  { %3674 = vmatmul.bf16.gmra.mxu0 %v11247_v39  ;;  %3703 = vmatmul.bf16.gmra.mxu1 %v11267_v56 }
 0x37e   :  { %4378 = vmatpush.bf16.msra.mxu0 %v7939_v30  ;;  %4350 = vmatpush.bf16.msra.mxu3 %v7991_v53  ;;  %v7910_v30 = vld [vmem:[%s13747_s3 + $0x910] sm:$0xf]  ;;  %v7915_v53 = vor.u32 %v9165_v13, %v7912_v18  ;;  %v4097_v13 = vrot.slane %v11338_v10, 1  ;;  %v4098_v18 = vrot.slane %v11320_v12, 1 }
 0x37f   :  { %v3024_v31 = vpop.f32.mrf.mxu2  ;;  %v3053_v27 = vpop.f32.mrf.mxu3 }
 0x382   :  { %v3084_v26 = vpop.f32.mrf.mxu0  ;;  %v3113_v22 = vpop.f32.mrf.mxu1  ;;  %4351 = vmatpush.bf16.msra.mxu3 %v7983_v28  ;;  %v7968_v28 = vld [vmem:[%s13747_s3 + $0x988] sm:$0xf0] }
 0x383   :  { %v9169_v22 = vld [vmem:[%s13747_s3 + $0x934] sm:$0xf] }
 0x387   :  { %v3026_v38 = vpop.f32.mrf.mxu2  ;;  %v3055_v46 = vpop.f32.mrf.mxu3 }
 0x38a   :  { %v3343_v34 = vpop.f32.mrf.mxu0  ;;  %v3372_v52 = vpop.f32.mrf.mxu1 }
 0x38b   :  { %v3344_v0 = vadd.f32 %v3343_v34, %v11960_v47  ;;  %v9187_v47 = vld [vmem:[%s13747_s3 + $0x9c4] sm:$0xf] }
 0x38c   :  { %3970 = vmatmul.bf16.vlgmr.msrb.gmra.mxu2 %v11549_v5  ;;  %3999 = vmatmul.bf16.vlgmr.msrb.gmra.mxu3 %v11576_v25  ;;  %v8003_v43 = vor.u32 %v9187_v47, %v8000_v1  ;;  %v9166_v1 = vld [vmem:[%s13747_s3 + $0x914] sm:$0xf0] }
 0x38d   :  { %v12187_v33 = vadd.f32 %v3372_v52, %v3344_v0  ;;  %4028 = vmatmul.bf16.vlgmr.msrb.gmra.mxu0 %v11549_v5  ;;  %4057 = vmatmul.bf16.vlgmr.msrb.gmra.mxu1 %v11576_v25  ;;  %v7926_v5 = vld [vmem:[%s13747_s3 + $0x930] sm:$0xf]  ;;  %v9170_v25 = vld [vmem:[%s13747_s3 + $0x934] sm:$0xf0]  ;;  %v9167_v52 = vld [vmem:[%s13747_s3 + $0x924] sm:$0xf] }
 0x38e   :  { %v7927_v15 = vor.u32 %v9170_v25, %v7926_v5  ;;  %4407 = vmatpush.bf16.msra.mxu1 %v8003_v43  ;;  %v7920_v0 = vld [vmem:[%s13747_s3 + $0x928] sm:$0xf0]  ;;  %v7974_v5 = vld [vmem:[%s13747_s3 + $0x990] sm:$0xf]  ;;  %v7911_v25 = vor.u32 %v9166_v1, %v7910_v30 }
 0x38f   :  { %v3285_v35 = vpop.f32.mrf.mxu2  ;;  %v3314_v59 = vpop.f32.mrf.mxu3  ;;  %v7923_v40 = vor.u32 %v9167_v52, %v7920_v0 }
 0x390   :  { %v3286_v55 = vadd.f32 %v3285_v35, %v11962_v61  ;;  %4321 = vmatpush.bf16.msra.mxu2 %v7927_v15  ;;  %v7928_v61 = vld [vmem:[%s13747_s3 + $0x938] sm:$0xf0] }
 0x391   :  { %v7931_v62 = vor.u32 %v9169_v22, %v7928_v61 }
 0x392   :  { %v12216_v19 = vadd.f32 %v3314_v59, %v3286_v55  ;;  %v3345_v31 = vpop.f32.mrf.mxu0  ;;  %v3374_v27 = vpop.f32.mrf.mxu1  ;;  %4408 = vmatpush.bf16.msra.mxu1 %v7995_v29  ;;  %v9181_v55 = vld [vmem:[%s13747_s3 + $0x994] sm:$0xf] }
 0x393   :  { %v3346_v7 = vadd.f32 %v3345_v31, %v11980_v50  ;;  %v7918_v50 = vld [vmem:[%s13747_s3 + $0x920] sm:$0xf]  ;;  %4379 = vmatpush.bf16.msra.mxu0 %v7931_v62  ;;  %v7976_v31 = vld [vmem:[%s13747_s3 + $0x998] sm:$0xf0]  ;;  %v9180_v62 = vld [vmem:[%s13747_s3 + $0x984] sm:$0xf0] }
 0x394   :  { %v7919_v36 = vor.u32 %v9168_v63, %v7918_v50  ;;  %v7979_v22 = vor.u32 %v9181_v55, %v7976_v31  ;;  %v7967_v24 = vor.u32 %v9180_v62, %v7966_v20  ;;  %v4100_v62 = vrot.slane %v11632_v37, 1 }
 0x395   :  { %v12219_v26 = vadd.f32 %v3374_v27, %v3346_v7  ;;  %v7902_v27 = vld [vmem:[%s13747_s3 + $0x900] sm:$0xf]  ;;  %v9164_v7 = vld [vmem:[%s13747_s3 + $0x904] sm:$0xf0]  ;;  %v4104_v37 = vrot.slane %v11247_v39, 1 }
 0x396   :  { %4322 = vmatpush.bf16.msra.mxu2 %v7919_v36  ;;  %v7903_v61 = vor.u32 %v9164_v7, %v7902_v27 }
 0x397   :  { %v3287_v42 = vpop.f32.mrf.mxu2  ;;  %v3316_v48 = vpop.f32.mrf.mxu3  ;;  %4380 = vmatpush.bf16.msra.mxu0 %v7923_v40 }
 0x398   :  { %v3288_v41 = vadd.f32 %v3287_v42, %v11994_v45  ;;  %v9183_v45 = vld [vmem:[%s13747_s3 + $0x9a4] sm:$0xf] }
 0x399   :  { %v7987_v47 = vor.u32 %v9183_v45, %v7984_v9 }
 0x39a   :  { %v12246_v38 = vadd.f32 %v3316_v48, %v3288_v41  ;;  %v3348_v46 = vpop.f32.mrf.mxu0  ;;  %v3377_v34 = vpop.f32.mrf.mxu1  ;;  %4323 = vmatpush.bf16.msra.mxu2 %v7911_v25  ;;  %v7907_v41 = vor.u32 %v9163_v11, %v7904_v49 }
 0x39b   :  { %4409 = vmatpush.bf16.msra.mxu1 %v7987_v47  ;;  %4381 = vmatpush.bf16.msra.mxu0 %v7915_v53 }
 0x39c   :  { %3975 = vmatmul.bf16.gmra.mxu2 %v11641_v54  ;;  %4004 = vmatmul.bf16.gmra.mxu3 %v11644_v23 }
 0x39d   :  { %4033 = vmatmul.bf16.gmra.mxu0 %v11641_v54  ;;  %4062 = vmatmul.bf16.gmra.mxu1 %v11644_v23  ;;  %v9182_v54 = vld [vmem:[%s13747_s3 + $0x994] sm:$0xf0] }
 0x39e   :  { %v7975_v59 = vor.u32 %v9182_v54, %v7974_v5  ;;  %4324 = vmatpush.bf16.msra.mxu2 %v7903_v61 }
 0x39f   :  { %v3290_v23 = vpop.f32.mrf.mxu2  ;;  %v3319_v35 = vpop.f32.mrf.mxu3  ;;  %4410 = vmatpush.bf16.msra.mxu1 %v7979_v22  ;;  %4382 = vmatpush.bf16.msra.mxu0 %v7907_v41 }
 0x3a0   :  { %4352 = vmatpush.bf16.msra.mxu3 %v7975_v59 }
 0x3a2   :  { %v3350_v43 = vpop.f32.mrf.mxu0  ;;  %v3379_v15 = vpop.f32.mrf.mxu1 }
 0x3a3   :  { %v4095_v15 = vrot.slane %v11275_v8, 1 }
 0x3a4   :  { %4353 = vmatpush.bf16.msra.mxu3 %v7967_v24 }
 0x3a7   :  { %v3292_v50 = vpop.f32.mrf.mxu2  ;;  %v3321_v63 = vpop.f32.mrf.mxu3 }
 0x3a8   :  { %v4101_v63 = vsel %vm552_vm6, %v4095_v15, %v4100_v62 }
 0x3aa   :  { %v3353_v42 = vpop.f32.mrf.mxu0  ;;  %v3382_v48 = vpop.f32.mrf.mxu1 }
 0x3ab   :  { %v3354_v29 = vadd.f32 %v3353_v42, %v12072_v2  ;;  %v9179_v2 = vld [vmem:[%s13747_s3 + $0x984] sm:$0xf] }
 0x3ac   :  { %3980 = vmatmul.bf16.gmra.mxu2 %v11652_v60  ;;  %4009 = vmatmul.bf16.gmra.mxu3 %v11656_v4 }
 0x3ad   :  { %v12303_v36 = vadd.f32 %v3382_v48, %v3354_v29  ;;  %4038 = vmatmul.bf16.gmra.mxu0 %v11652_v60  ;;  %4067 = vmatmul.bf16.gmra.mxu1 %v11656_v4  ;;  %v7971_v4 = vor.u32 %v9179_v2, %v7968_v28 }
 0x3af   :  { %v3295_v60 = vpop.f32.mrf.mxu2  ;;  %v3324_v46 = vpop.f32.mrf.mxu3  ;;  %4411 = vmatpush.bf16.msra.mxu1 %v7971_v4 }
 0x3b0   :  { %v3296_v34 = vadd.f32 %v3295_v60, %v12102_v6 }
 0x3b2   :  { %v12320_v52 = vadd.f32 %v3324_v46, %v3296_v34  ;;  %v3355_v0 = vpop.f32.mrf.mxu0  ;;  %v3384_v45 = vpop.f32.mrf.mxu1  ;;  %v4105_v46 = vsel %vm552_vm6, %v4100_v62, %v4104_v37 }
 0x3b3   :  { %v3356_v40 = vadd.f32 %v3355_v0, %v12104_v3 }
 0x3b5   :  { %v12323_v9 = vadd.f32 %v3384_v45, %v3356_v40 }
 0x3b7   :  { %v3297_v47 = vpop.f32.mrf.mxu2  ;;  %v3326_v30 = vpop.f32.mrf.mxu3 }
 0x3b8   :  { %v3298_v1 = vadd.f32 %v3297_v47, %v12130_v51  ;;  %v4094_v51 = vrot.slane %v11336_v32, 1 }
 0x3ba   :  { %v12326_v5 = vadd.f32 %v3326_v30, %v3298_v1  ;;  %v3358_v25 = vpop.f32.mrf.mxu0  ;;  %v3387_v54 = vpop.f32.mrf.mxu1 }
 0x3bb   :  { %v4114_v25 = vrot.slane %v11306_v16, 1 }
 0x3bc   :  { %3985 = vmatmul.bf16.gmra.mxu2 %v11360_v44  ;;  %4014 = vmatmul.bf16.gmra.mxu3 %v11364_v58 }
 0x3bd   :  { %4043 = vmatmul.bf16.gmra.mxu0 %v11360_v44  ;;  %4072 = vmatmul.bf16.gmra.mxu1 %v11364_v58  ;;  %v4096_v44 = vsel %vm552_vm6, %v4094_v51, %v4095_v15  ;;  %v4099_v58 = vsel %vm552_vm6, %v4097_v13, %v4098_v18 }
 0x3bf   :  { %v3300_v6 = vpop.f32.mrf.mxu2  ;;  %v3329_v3 = vpop.f32.mrf.mxu3 }
 0x3c0   :  { %v4118_v3 = vsel %vm552_vm6, %v4104_v37, %v4114_v25  ;;  %v8231_v25 = vld [vmem:[%s13747_s3 + $0xbf0] sm:$0xf] }
 0x3c2   :  { %v3360_v23 = vpop.f32.mrf.mxu0  ;;  %v3389_v35 = vpop.f32.mrf.mxu1 }
 0x3c7   :  { %v3302_v59 = vpop.f32.mrf.mxu2  ;;  %v3331_v43 = vpop.f32.mrf.mxu3 }
 0x3ca   :  { %v3660_v55 = vpop.f32.mrf.mxu0  ;;  %v3689_v53 = vpop.f32.mrf.mxu1 }
 0x3cb   :  { %v3690_v31 = vadd.f32 %v3689_v53, %v3660_v55 }
 0x3cc   :  { %4325 = vmatmul.bf16.vlgmr.msra.gmra.mxu2 %v4096_v44  ;;  %4354 = vmatmul.bf16.vlgmr.msra.gmra.mxu3 %v4099_v58 }
 0x3cd   :  { %v12339_v27 = vadd.f32 %v3690_v31, %v12187_v33  ;;  %4383 = vmatmul.bf16.vlgmr.msra.gmra.mxu0 %v4096_v44  ;;  %4412 = vmatmul.bf16.vlgmr.msra.gmra.mxu1 %v4099_v58  ;;  %v4102_v33 = vrot.slane %v11634_v17, 1  ;;  %v4106_v17 = vrot.slane %v11267_v56, 1 }
 0x3cf   :  { %v3602_v32 = vpop.f32.mrf.mxu2  ;;  %v3631_v8 = vpop.f32.mrf.mxu3  ;;  %v4103_v42 = vsel %vm552_vm6, %v4098_v18, %v4102_v33  ;;  %v4107_v4 = vsel %vm552_vm6, %v4102_v33, %v4106_v17 }
 0x3d0   :  { %v3632_v7 = vadd.f32 %v3631_v8, %v3602_v32 }
 0x3d2   :  { %v12342_v10 = vadd.f32 %v3632_v7, %v12216_v19  ;;  %v12344_v12 = vpop.f32.mrf.mxu0  ;;  %v12346_v22 = vpop.f32.mrf.mxu1 }
 0x3d7   :  { %v12348_v61 = vpop.f32.mrf.mxu2  ;;  %v12350_v20 = vpop.f32.mrf.mxu3 }
 0x3da   :  { %v3665_v24 = vpop.f32.mrf.mxu0  ;;  %v3694_v50 = vpop.f32.mrf.mxu1 }
 0x3dc   :  { %4330 = vmatmul.bf16.gmra.mxu2 %v4101_v63  ;;  %4359 = vmatmul.bf16.gmra.mxu3 %v4103_v42 }
 0x3dd   :  { %4388 = vmatmul.bf16.gmra.mxu0 %v4101_v63  ;;  %4417 = vmatmul.bf16.gmra.mxu1 %v4103_v42 }
 0x3df   :  { %v3607_v19 = vpop.f32.mrf.mxu2  ;;  %v3636_v48 = vpop.f32.mrf.mxu3 }
 0x3e2   :  { %v3667_v29 = vpop.f32.mrf.mxu0  ;;  %v3696_v11 = vpop.f32.mrf.mxu1 }
 0x3e7   :  { %v3609_v49 = vpop.f32.mrf.mxu2  ;;  %v3638_v2 = vpop.f32.mrf.mxu3 }
 0x3ea   :  { %v3670_v41 = vpop.f32.mrf.mxu0  ;;  %v3699_v28 = vpop.f32.mrf.mxu1 }
 0x3eb   :  { %v3700_v60 = vadd.f32 %v3699_v28, %v3670_v41 }
 0x3ec   :  { %4335 = vmatmul.bf16.gmra.mxu2 %v4105_v46  ;;  %4364 = vmatmul.bf16.gmra.mxu3 %v4107_v4 }
 0x3ed   :  { %v3718_v34 = vadd.f32 %v3700_v60, %v12303_v36  ;;  %4393 = vmatmul.bf16.gmra.mxu0 %v4105_v46  ;;  %4422 = vmatmul.bf16.gmra.mxu1 %v4107_v4  ;;  %v4115_v36 = vrot.slane %v11311_v21, 1 }
 0x3ef   :  { %v3612_v0 = vpop.f32.mrf.mxu2  ;;  %v3641_v45 = vpop.f32.mrf.mxu3  ;;  %v4122_v23 = vsel %vm552_vm6, %v4106_v17, %v4115_v36 }
 0x3f0   :  { %v3642_v40 = vadd.f32 %v3641_v45, %v3612_v0 }
 0x3f2   :  { %v12362_v39 = vadd.f32 %v3642_v40, %v12320_v52  ;;  %v12364_v56 = vpop.f32.mrf.mxu0  ;;  %v12366_v47 = vpop.f32.mrf.mxu1  ;;  %v9246_v40 = vld [vmem:[%s13747_s3 + $0xb74] sm:$0xf0] }
 0x3f7   :  { %v12368_v30 = vpop.f32.mrf.mxu2  ;;  %v12370_v1 = vpop.f32.mrf.mxu3 }
 0x3fa   :  { %v3675_v54 = vpop.f32.mrf.mxu0  ;;  %v3704_v6 = vpop.f32.mrf.mxu1 }
 0x3fb   :  { %v9262_v54 = vld [vmem:[%s13747_s3 + $0xbf4] sm:$0xf0] }
 0x3fc   :  { %4340 = vmatmul.bf16.gmra.mxu2 %v4118_v3  ;;  %4369 = vmatmul.bf16.gmra.mxu3 %v4122_v23  ;;  %v8232_v6 = vor.u32 %v9262_v54, %v8231_v25  ;;  %v9242_v25 = vld [vmem:[%s13747_s3 + $0xb54] sm:$0xf0] }
 0x3fd   :  { %4398 = vmatmul.bf16.gmra.mxu0 %v4118_v3  ;;  %4427 = vmatmul.bf16.gmra.mxu1 %v4122_v23  ;;  %v9258_v54 = vld [vmem:[%s13747_s3 + $0xbd4] sm:$0xf0] }
 0x3fe   :  { %4913 = vmatpush.bf16.msrb.mxu3 %v8232_v6  ;;  %v9241_v6 = vld [vmem:[%s13747_s3 + $0xb54] sm:$0xf] }
 0x3ff   :  { %v3617_v52 = vpop.f32.mrf.mxu2  ;;  %v3646_v35 = vpop.f32.mrf.mxu3 }
 0x400   :  { %v9245_v52 = vld [vmem:[%s13747_s3 + $0xb74] sm:$0xf]  ;;  %v8169_v35 = vld [vmem:[%s13747_s3 + $0xb78] sm:$0xf0] }
 0x402   :  { %v3677_v59 = vpop.f32.mrf.mxu0  ;;  %v3706_v43 = vpop.f32.mrf.mxu1 }
 0x403   :  { %v9261_v59 = vld [vmem:[%s13747_s3 + $0xbf4] sm:$0xf]  ;;  %v8172_v43 = vor.u32 %v9245_v52, %v8169_v35 }
 0x405   :  { %4938 = vmatpush.bf16.msrb.mxu0 %v8172_v43 }
 0x407   :  { %v3619_v51 = vpop.f32.mrf.mxu2  ;;  %v3648_v15 = vpop.f32.mrf.mxu3 }
 0x408   :  { %v8233_v51 = vld [vmem:[%s13747_s3 + $0xbf8] sm:$0xf0] }
 0x40a   :  { %v4029_v13 = vpop.f32.mrf.mxu0  ;;  %v4058_v16 = vpop.f32.mrf.mxu1 }
 0x40b   :  { %v4059_v18 = vadd.f32 %v4058_v16, %v4029_v13  ;;  %v8236_v16 = vor.u32 %v9261_v59, %v8233_v51 }
 0x40d   :  { %v4079_v21 = vadd.f32 %v4059_v18, %v12339_v27  ;;  %v7211_v18 = vld [vmem:[%s13748_s4 + $0x2] sm:$0x3]  ;;  %4963 = vmatpush.bf16.msrb.mxu1 %v8236_v16 }
 0x40f   :  { %v3971_v55 = vpop.f32.mrf.mxu2  ;;  %v4000_v53 = vpop.f32.mrf.mxu3 }
 0x412   :  { %v12377_v31 = vpop.f32.mrf.mxu0  ;;  %v12379_v44 = vpop.f32.mrf.mxu1 }
 0x417   :  { %v12381_v58 = vpop.f32.mrf.mxu2  ;;  %v12383_v32 = vpop.f32.mrf.mxu3 }
 0x418   :  { %v4003_v16 = vadd.f32 %v12383_v32, %v12381_v58  ;;  %v9256_v32 = vld [vmem:[%s13747_s3 + $0xbc4] sm:$0xf0] }
 0x41a   :  { %v4034_v8 = vpop.f32.mrf.mxu0  ;;  %v4063_v7 = vpop.f32.mrf.mxu1 }
 0x41b   :  { %v4001_v7 = vadd.f32 %v4000_v53, %v3971_v55  ;;  %v9260_v55 = vld [vmem:[%s13747_s3 + $0xbe4] sm:$0xf0]  ;;  %v9243_v53 = vld [vmem:[%s13747_s3 + $0xb64] sm:$0xf] }
 0x41f   :  { %v3976_v62 = vpop.f32.mrf.mxu2  ;;  %v4005_v33 = vpop.f32.mrf.mxu3 }
 0x420   :  { %v8159_v62 = vld [vmem:[%s13747_s3 + $0xb60] sm:$0xf]  ;;  %v9244_v33 = vld [vmem:[%s13747_s3 + $0xb64] sm:$0xf0] }
 0x422   :  { %v4036_v24 = vpop.f32.mrf.mxu0  ;;  %v4065_v50 = vpop.f32.mrf.mxu1 }
 0x423   :  { %v8223_v24 = vld [vmem:[%s13747_s3 + $0xbe0] sm:$0xf]  ;;  %v3692_v50 = vadd.f32 %v12346_v22, %v12344_v12  ;;  %v9259_v12 = vld [vmem:[%s13747_s3 + $0xbe4] sm:$0xf]  ;;  %v8225_v22 = vld [vmem:[%s13747_s3 + $0xbe8] sm:$0xf0] }
 0x427   :  { %v3978_v63 = vpop.f32.mrf.mxu2  ;;  %v4007_v42 = vpop.f32.mrf.mxu3 }
 0x428   :  { %v8160_v63 = vor.u32 %v9244_v33, %v8159_v62  ;;  %v8161_v42 = vld [vmem:[%s13747_s3 + $0xb68] sm:$0xf0]  ;;  %v8207_v62 = vld [vmem:[%s13747_s3 + $0xbc0] sm:$0xf] }
 0x42a   :  { %v4039_v19 = vpop.f32.mrf.mxu0  ;;  %v4068_v27 = vpop.f32.mrf.mxu1 }
 0x42b   :  { %v4069_v48 = vadd.f32 %v4068_v27, %v4039_v19  ;;  %v12446_v27 = vperm.slane %v7211_v18, 1 }
 0x42d   :  { %v12385_v29 = vadd.f32 %v4069_v48, %v3718_v34  ;;  %v8167_v34 = vld [vmem:[%s13747_s3 + $0xb70] sm:$0xf]  ;;  %v8224_v48 = vor.u32 %v9260_v55, %v8223_v24 }
 0x42e   :  { %v8168_v36 = vor.u32 %v9246_v40, %v8167_v34  ;;  %v8151_v40 = vld [vmem:[%s13747_s3 + $0xb50] sm:$0xf] }
 0x42f   :  { %v12387_v11 = vpop.f32.mrf.mxu2  ;;  %v12389_v49 = vpop.f32.mrf.mxu3  ;;  %4914 = vmatpush.bf16.msrb.mxu3 %v8224_v48  ;;  %v12509_v55 = vld [vmem:[#allocation4 + $0x10] sm:$0xff] }
 0x430   :  { %4888 = vmatpush.bf16.msrb.mxu2 %v8168_v36  ;;  %v8152_v36 = vor.u32 %v9242_v25, %v8151_v40  ;;  %v8135_v25 = vld [vmem:[%s13747_s3 + $0xb30] sm:$0xf] }
 0x432   :  { %v12391_v2 = vpop.f32.mrf.mxu0  ;;  %v12393_v37 = vpop.f32.mrf.mxu1 }
 0x433   :  { %v4071_v57 = vadd.f32 %v12393_v37, %v12391_v2  ;;  %v8343_v37 = vld [vmem:[%s13747_s3 + $0xad0] sm:$0xf] }
 0x434   :  { %4889 = vmatpush.bf16.msrb.mxu2 %v8160_v63  ;;  %v8145_v63 = vld [vmem:[%s13747_s3 + $0xb48] sm:$0xf0] }
 0x437   :  { %v12395_v17 = vpop.f32.mrf.mxu2  ;;  %v12397_v41 = vpop.f32.mrf.mxu3 }
 0x438   :  { %4890 = vmatpush.bf16.msrb.mxu2 %v8152_v36  ;;  %v9254_v36 = vld [vmem:[%s13747_s3 + $0xbb4] sm:$0xf0] }
 0x43a   :  { %v4044_v28 = vpop.f32.mrf.mxu0  ;;  %v4073_v60 = vpop.f32.mrf.mxu1 }
 0x43b   :  { %v8164_v28 = vor.u32 %v9243_v53, %v8161_v42  ;;  %v4061_v60 = vadd.f32 %v12379_v44, %v12377_v31  ;;  %v8215_v31 = vld [vmem:[%s13747_s3 + $0xbd0] sm:$0xf]  ;;  %v3712_v44 = vadd.f32 %v3692_v50, %v12219_v26  ;;  %v8153_v26 = vld [vmem:[%s13747_s3 + $0xb58] sm:$0xf0]  ;;  %v9239_v50 = vld [vmem:[%s13747_s3 + $0xb44] sm:$0xf] }
 0x43c   :  { %v8216_v59 = vor.u32 %v9258_v54, %v8215_v31  ;;  %v8148_v48 = vor.u32 %v9239_v50, %v8145_v63  ;;  %v9238_v31 = vld [vmem:[%s13747_s3 + $0xb34] sm:$0xf0]  ;;  %v9237_v54 = vld [vmem:[%s13747_s3 + $0xb34] sm:$0xf]  ;;  %v9251_v63 = vld [vmem:[%s13747_s3 + $0xba4] sm:$0xf] }
 0x43d   :  { %4939 = vmatpush.bf16.msrb.mxu0 %v8164_v28  ;;  %v4081_v43 = vadd.f32 %v4061_v60, %v3712_v44  ;;  %v9255_v28 = vld [vmem:[%s13747_s3 + $0xbc4] sm:$0xf]  ;;  %v8199_v44 = vld [vmem:[%s13747_s3 + $0xbb0] sm:$0xf] }
 0x43e   :  { %4915 = vmatpush.bf16.msrb.mxu3 %v8216_v59  ;;  %v9253_v59 = vld [vmem:[%s13747_s3 + $0xbb4] sm:$0xf] }
 0x43f   :  { %v3986_v46 = vpop.f32.mrf.mxu2  ;;  %v4015_v4 = vpop.f32.mrf.mxu3 }
 0x442   :  { %v4046_v0 = vpop.f32.mrf.mxu0  ;;  %v4075_v45 = vpop.f32.mrf.mxu1 }
 0x443   :  { %v12456_v0 = vperm.slane %v7211_v18, 0  ;;  %v4078_v45 = vadd.f32 %v4001_v7, %v12342_v10  ;;  %v3634_v10 = vadd.f32 %v12350_v20, %v12348_v61  ;;  %v9257_v61 = vld [vmem:[%s13747_s3 + $0xbd4] sm:$0xf]  ;;  %v8217_v20 = vld [vmem:[%s13747_s3 + $0xbd8] sm:$0xf0] }
 0x444   :  { %v9240_v7 = vld [vmem:[%s13747_s3 + $0xb44] sm:$0xf0] }
 0x445   :  { %v3711_v33 = vadd.f32 %v3634_v10, %v12246_v38  ;;  %v4517_v38 = vunpack.c.l.b16 %v12509_v55  ;;  %v8136_v10 = vor.u32 %v9238_v31, %v8135_v25  ;;  %v9233_v25 = vld [vmem:[%s13747_s3 + $0xb14] sm:$0xf]  ;;  %v8121_v31 = vld [vmem:[%s13747_s3 + $0xb18] sm:$0xf0] }
 0x447   :  { %v3988_v3 = vpop.f32.mrf.mxu2  ;;  %v4017_v23 = vpop.f32.mrf.mxu3 }
 0x44a   :  { %v4384_v15 = vpop.f32.mrf.mxu0  ;;  %v4413_v13 = vpop.f32.mrf.mxu1 }
 0x44b   :  { %v4414_v8 = vadd.f32 %v4413_v13, %v4384_v15  ;;  %v8156_v15 = vor.u32 %v9241_v6, %v8153_v26  ;;  %v8220_v13 = vor.u32 %v9257_v61, %v8217_v20 }
 0x44d   :  { %v4434_v19 = vadd.f32 %v4414_v8, %v4079_v21  ;;  %v8228_v21 = vor.u32 %v9259_v12, %v8225_v22  ;;  %v8143_v8 = vld [vmem:[%s13747_s3 + $0xb40] sm:$0xf]  ;;  %4940 = vmatpush.bf16.msrb.mxu0 %v8156_v15  ;;  %v8209_v12 = vld [vmem:[%s13747_s3 + $0xbc8] sm:$0xf0] }
 0x44e   :  { %v8144_v58 = vor.u32 %v9240_v7, %v8143_v8  ;;  %v8191_v8 = vld [vmem:[%s13747_s3 + $0xba0] sm:$0xf] }
 0x44f   :  { %v4326_v46 = vpop.f32.mrf.mxu2  ;;  %v4355_v4 = vpop.f32.mrf.mxu3  ;;  %4964 = vmatpush.bf16.msrb.mxu1 %v8228_v21  ;;  %v4455_v3 = vadd.f32 %v12446_v27, %v4434_v19  ;;  %v8208_v19 = vor.u32 %v9256_v32, %v8207_v62  ;;  %v12519_v21 = vpack.c.b16 %v4517_v38, %v4517_v38  ;;  %v9252_v62 = vld [vmem:[%s13747_s3 + $0xba4] sm:$0xf0]  ;;  %v8193_v38 = vld [vmem:[%s13747_s3 + $0xba8] sm:$0xf0] }
 0x450   :  { %v4356_v34 = vadd.f32 %v4355_v4, %v4326_v46  ;;  %4891 = vmatpush.bf16.msrb.mxu2 %v8144_v58  ;;  %v8212_v4 = vor.u32 %v9255_v28, %v8209_v12  ;;  %v8192_v32 = vor.u32 %v9252_v62, %v8191_v8  ;;  %v8119_v12 = vld [vmem:[%s13747_s3 + $0xb10] sm:$0xf]  ;;  %v9231_v62 = vld [vmem:[%s13747_s3 + $0xb04] sm:$0xf] }
 0x451   :  { %v4471_v53 = vmax.f32 %v4455_v3, 0.0  ;;  %4916 = vmatpush.bf16.msrb.mxu3 %v8208_v19  ;;  %4941 = vmatpush.bf16.msrb.mxu0 %v8148_v48  ;;  %v4673_v26 = vshll.u32 %v12519_v21, 16  ;;  %v8196_v48 = vor.u32 %v9251_v63, %v8193_v38 }
 0x452   :  { %v4433_v23 = vadd.f32 %v4356_v34, %v4078_v45  ;;  %v4386_v52 = vpop.f32.mrf.mxu0  ;;  %v4415_v35 = vpop.f32.mrf.mxu1  ;;  %v4080_v45 = vadd.f32 %v4003_v16, %v3711_v33  ;;  %v8127_v16 = vld [vmem:[%s13747_s3 + $0xb20] sm:$0xf]  ;;  %v9235_v33 = vld [vmem:[%s13747_s3 + $0xb24] sm:$0xf] }
 0x453   :  { %v4416_v51 = vadd.f32 %v4415_v35, %v4386_v52  ;;  %4965 = vmatpush.bf16.msrb.mxu1 %v8220_v13  ;;  %v8200_v52 = vor.u32 %v9254_v36, %v8199_v44  ;;  %v8137_v35 = vld [vmem:[%s13747_s3 + $0xb38] sm:$0xf0] }
 0x454   :  { %v4454_v18 = vadd.f32 %v12456_v0, %v4433_v23  ;;  %4892 = vmatpush.bf16.msrb.mxu2 %v8136_v10  ;;  %v8140_v20 = vor.u32 %v9237_v54, %v8137_v35 }
 0x455   :  { %v4436_v24 = vadd.f32 %v4416_v51, %v4081_v43  ;;  %v8201_v43 = vld [vmem:[%s13747_s3 + $0xbb8] sm:$0xf0]  ;;  %v12547_v51 = vshrl.u32 %v12519_v21, 16  ;;  %4917 = vmatpush.bf16.msrb.mxu3 %v8200_v52 }
 0x456   :  { %v4470_v42 = vmax.f32 %v4454_v18, 0.0  ;;  %v8204_v13 = vor.u32 %v9253_v59, %v8201_v43  ;;  %v9236_v18 = vld [vmem:[%s13747_s3 + $0xb24] sm:$0xf0]  ;;  %4942 = vmatpush.bf16.msrb.mxu0 %v8140_v20  ;;  %v8175_v20 = vld [vmem:[%s13747_s3 + $0xb80] sm:$0xf] }
 0x457   :  { %v4457_v22 = vadd.f32 %v12446_v27, %v4436_v24  ;;  %v4328_v60 = vpop.f32.mrf.mxu2  ;;  %v4357_v46 = vpop.f32.mrf.mxu3  ;;  %4966 = vmatpush.bf16.msrb.mxu1 %v8212_v4  ;;  %v8128_v7 = vor.u32 %v9236_v18, %v8127_v16  ;;  %v8129_v24 = vld [vmem:[%s13747_s3 + $0xb28] sm:$0xf0]  ;;  %v8031_v16 = vld [vmem:[#allocation3 + $0x10] sm:$0xf]  ;;  %v9196_v18 = vld [vmem:[#allocation3 + $0x14] sm:$0xf0] }
 0x458   :  { %v4486_v34 = vpack.c.bf16 %v4471_v53, %v4470_v42  ;;  %v4358_v40 = vadd.f32 %v4357_v46, %v4328_v60  ;;  %v8132_v50 = vor.u32 %v9235_v33, %v8129_v24  ;;  %v12576_v53 = vrot.slane %v4673_v26, 1  ;;  %v8183_v60 = vld [vmem:[%s13747_s3 + $0xb90] sm:$0xf]  ;;  %v8113_v33 = vld [vmem:[%s13747_s3 + $0xb08] sm:$0xf0] }
 0x459   :  { %v4473_v61 = vmax.f32 %v4457_v22, 0.0  ;;  %4893 = vmatpush.bf16.msrb.mxu2 %v8128_v7  ;;  %4918 = vmatpush.bf16.msrb.mxu3 %v8192_v32  ;;  %v9234_v22 = vld [vmem:[%s13747_s3 + $0xb14] sm:$0xf0]  ;;  %v4518_v46 = vunpack.c.h.b16 %v12509_v55  ;;  %v9248_v7 = vld [vmem:[%s13747_s3 + $0xb84] sm:$0xf0] }
 0x45a   :  { %v4435_v6 = vadd.f32 %v4358_v40, %v4080_v45  ;;  %v4389_v3 = vpop.f32.mrf.mxu0  ;;  %v4418_v23 = vpop.f32.mrf.mxu1  ;;  %v5577_v4 = vor.u32 %v12576_v53, %v12547_v51  ;;  %4943 = vmatpush.bf16.msrb.mxu0 %v8132_v50  ;;  %v8120_v45 = vor.u32 %v9234_v22, %v8119_v12  ;;  %v9250_v40 = vld [vmem:[%s13747_s3 + $0xb94] sm:$0xf0]  ;;  %v12599_v44 = vunpack.c.l.b16 %v4486_v34  ;;  %v9247_v32 = vld [vmem:[%s13747_s3 + $0xb84] sm:$0xf]  ;;  %v8177_v50 = vld [vmem:[%s13747_s3 + $0xb88] sm:$0xf0] }
 0x45b   :  { %4967 = vmatpush.bf16.msrb.mxu1 %v8204_v13  ;;  %v12601_v55 = vunpack.c.h.b16 %v4486_v34  ;;  %v8184_v54 = vor.u32 %v9250_v40, %v8183_v60  ;;  %v9249_v3 = vld [vmem:[%s13747_s3 + $0xb94] sm:$0xf]  ;;  %v8185_v23 = vld [vmem:[%s13747_s3 + $0xb98] sm:$0xf0]  ;;  %v8111_v34 = vld [vmem:[%s13747_s3 + $0xb00] sm:$0xf]  ;;  %v8176_v24 = vor.u32 %v9248_v7, %v8175_v20 }
 0x45c   :  { %v4456_v15 = vadd.f32 %v12456_v0, %v4435_v6  ;;  %v8124_v6 = vor.u32 %v9233_v25, %v8121_v31  ;;  %v8188_v59 = vor.u32 %v9249_v3, %v8185_v23  ;;  %v8295_v60 = vld [vmem:[%s13747_s3 + $0xa70] sm:$0xf]  ;;  %v9214_v40 = vld [vmem:[%s13747_s3 + $0xa74] sm:$0xf0]  ;;  %v9195_v31 = vld [vmem:[#allocation3 + $0x14] sm:$0xf] }
 0x45d   :  { %4894 = vmatpush.bf16.msrb.mxu2 %v8120_v45  ;;  %4919 = vmatpush.bf16.msrb.mxu3 %v8184_v54  ;;  %v8359_v25 = vld [vmem:[%s13747_s3 + $0xaf0] sm:$0xf]  ;;  %v9230_v3 = vld [vmem:[%s13747_s3 + $0xaf4] sm:$0xf0]  ;;  %v9213_v23 = vld [vmem:[%s13747_s3 + $0xa74] sm:$0xf] }
 0x45e   :  { %v4472_v58 = vmax.f32 %v4456_v15, 0.0  ;;  %v12621_v15 = vpack.c.b16 %v4518_v46, %v4518_v46  ;;  %4944 = vmatpush.bf16.msrb.mxu0 %v8124_v6  ;;  %v8296_v6 = vor.u32 %v9214_v40, %v8295_v60  ;;  %v8297_v7 = vld [vmem:[%s13747_s3 + $0xa78] sm:$0xf0]  ;;  %v8353_v60 = vld [vmem:[%s13747_s3 + $0xae8] sm:$0xf0] }
 0x45f   :  { %v4331_v42 = vpop.f32.mrf.mxu2  ;;  %v4360_v19 = vpop.f32.mrf.mxu3  ;;  %4968 = vmatpush.bf16.msrb.mxu1 %v8196_v48  ;;  %v8180_v48 = vor.u32 %v9247_v32, %v8177_v50 }
 0x460   :  { %v4487_v28 = vpack.c.bf16 %v4473_v61, %v4472_v58  ;;  %v9232_v61 = vld [vmem:[%s13747_s3 + $0xb04] sm:$0xf0]  ;;  %v8116_v58 = vor.u32 %v9231_v62, %v8113_v33  ;;  %v12643_v38 = vshrl.u32 %v12621_v15, 16  ;;  %v8287_v62 = vld [vmem:[%s13747_s3 + $0xa60] sm:$0xf] }
 0x461   :  { %v8112_v8 = vor.u32 %v9232_v61, %v8111_v34  ;;  %4920 = vmatpush.bf16.msrb.mxu3 %v8176_v24  ;;  %v9212_v33 = vld [vmem:[%s13747_s3 + $0xa64] sm:$0xf0]  ;;  %v8351_v24 = vld [vmem:[%s13747_s3 + $0xae0] sm:$0xf] }
 0x462   :  { %v4391_v10 = vpop.f32.mrf.mxu0  ;;  %v4420_v36 = vpop.f32.mrf.mxu1  ;;  %v4532_v52 = vunpack.c.l.b16 %v4487_v28  ;;  %v4533_v35 = vunpack.c.h.b16 %v4487_v28  ;;  %v4616_v28 = vrot.slane %v12547_v51, 3  ;;  %v4620_v45 = vrot.slane %v12643_v38, 3  ;;  %4945 = vmatpush.bf16.msrb.mxu0 %v8116_v58 }
 0x463   :  { %4969 = vmatpush.bf16.msrb.mxu1 %v8188_v59  ;;  %4895 = vmatpush.bf16.msrb.mxu2 %v8112_v8  ;;  %v8033_v10 = vld [vmem:[#allocation3 + $0x18] sm:$0xf0]  ;;  %v4011_v59 = vadd.f32 %v12389_v49, %v12387_v11  ;;  %v8360_v8 = vor.u32 %v9230_v3, %v8359_v25  ;;  %v8300_v49 = vor.u32 %v9213_v23, %v8297_v7  ;;  %v8279_v3 = vld [vmem:[%s13747_s3 + $0xa50] sm:$0xf]  ;;  %v9210_v23 = vld [vmem:[%s13747_s3 + $0xa54] sm:$0xf0] }
 0x464   :  { %v12619_v43 = vpack.c.b16 %v4532_v52, %v12599_v44  ;;  %v12624_v13 = vpack.c.b16 %v4533_v35, %v12601_v55  ;;  %v12673_v52 = vor.u32 %v9196_v18, %v8031_v16  ;;  %v3702_v35 = vadd.f32 %v12366_v47, %v12364_v56  ;;  %v9229_v16 = vld [vmem:[%s13747_s3 + $0xaf4] sm:$0xf]  ;;  %v8361_v56 = vld [vmem:[%s13747_s3 + $0xaf8] sm:$0xf0] }
 0x465   :  { %v8364_v18 = vor.u32 %v9229_v16, %v8361_v56  ;;  %v3644_v58 = vadd.f32 %v12370_v1, %v12368_v30  ;;  %5173 = vmatpush.bf16.msra.mxu3 %v8360_v8  ;;  %v8288_v50 = vor.u32 %v9212_v33, %v8287_v62  ;;  %v12725_v25 = vor.u32 %v9195_v31, %v8033_v10  ;;  %v8281_v8 = vld [vmem:[%s13747_s3 + $0xa58] sm:$0xf0]  ;;  %v9225_v7 = vld [vmem:[%s13747_s3 + $0xad4] sm:$0xf] }
 0x466   :  { %v4624_v63 = vshrl.u32 %v12619_v43, 16  ;;  %v4627_v12 = vshll.u32 %v12619_v43, 16  ;;  %v4631_v22 = vshrl.u32 %v12624_v13, 16  ;;  %v4634_v54 = vshll.u32 %v12624_v13, 16  ;;  %5198 = vmatpush.bf16.msra.mxu0 %v8300_v49  ;;  %v8271_v49 = vld [vmem:[%s13747_s3 + $0xa40] sm:$0xf] }
 0x467   :  { %v4333_v42 = vpop.f32.mrf.mxu2  ;;  %v4362_v19 = vpop.f32.mrf.mxu3  ;;  %4970 = vmatpush.bf16.msrb.mxu1 %v8180_v48  ;;  %5148 = vmatpush.bf16.msra.mxu2 %v8296_v6  ;;  %v8289_v48 = vld [vmem:[%s13747_s3 + $0xa68] sm:$0xf0]  ;;  %v4638_v40 = vshrl.u32 %v12673_v52, 16  ;;  %v3720_v6 = vadd.f32 %v3702_v35, %v12323_v9  ;;  %v4086_v31 = vadd.f32 %v4011_v59, %v12362_v39  ;;  %v9226_v35 = vld [vmem:[%s13747_s3 + $0xad4] sm:$0xf0]  ;;  %v8280_v39 = vor.u32 %v9210_v23, %v8279_v3 }
 0x468   :  { %v12653_v46 = vrot.slane %v4624_v63, 7  ;;  %v12664_v36 = vrot.slane %v4631_v22, 7  ;;  %v9228_v42 = vld [vmem:[%s13747_s3 + $0xae4] sm:$0xf0]  ;;  %v9211_v19 = vld [vmem:[%s13747_s3 + $0xa64] sm:$0xf]  ;;  %v8344_v59 = vor.u32 %v9226_v35, %v8343_v37  ;;  %v3719_v16 = vadd.f32 %v3644_v58, %v12326_v5 }
 0x469   :  { %v8352_v1 = vor.u32 %v9228_v42, %v8351_v24  ;;  %v8292_v9 = vor.u32 %v9211_v19, %v8289_v48  ;;  %v12757_v56 = vrot.slane %v4638_v40, 7  ;;  %v4013_v62 = vadd.f32 %v12397_v41, %v12395_v17  ;;  %v9224_v42 = vld [vmem:[%s13747_s3 + $0xac4] sm:$0xf0]  ;;  %v9207_v48 = vld [vmem:[%s13747_s3 + $0xa44] sm:$0xf] }
 0x46a   :  { %v4394_v34 = vpop.f32.mrf.mxu0  ;;  %v4423_v61 = vpop.f32.mrf.mxu1  ;;  %v4629_v20 = vor.u32 %v4627_v12, %v12653_v46  ;;  %v4636_v11 = vor.u32 %v4634_v54, %v12664_v36  ;;  %v9206_v3 = vld [vmem:[%s13747_s3 + $0xa34] sm:$0xf0] }
 0x46b   :  { %v4424_v47 = vadd.f32 %v4423_v61, %v4394_v34  ;;  %5223 = vmatpush.bf16.msra.mxu1 %v8364_v18  ;;  %5149 = vmatpush.bf16.msra.mxu2 %v8288_v50  ;;  %v4089_v18 = vadd.f32 %v4071_v57, %v3720_v6  ;;  %v8335_v50 = vld [vmem:[%s13747_s3 + $0xac0] sm:$0xf]  ;;  %v8337_v57 = vld [vmem:[%s13747_s3 + $0xac8] sm:$0xf0] }
 0x46c   :  { %v4693_v32 = vsel %vm9556_vm3, %v4616_v28, %v4629_v20  ;;  %v4694_v30 = vsel %vm9556_vm3, %v4620_v45, %v4636_v11  ;;  %v9227_v28 = vld [vmem:[%s13747_s3 + $0xae4] sm:$0xf]  ;;  %5174 = vmatpush.bf16.msra.mxu3 %v8352_v1  ;;  %v9209_v20 = vld [vmem:[%s13747_s3 + $0xa54] sm:$0xf]  ;;  %v8345_v11 = vld [vmem:[%s13747_s3 + $0xad8] sm:$0xf0]  ;;  %5199 = vmatpush.bf16.msra.mxu0 %v8292_v9  ;;  %v8336_v6 = vor.u32 %v9224_v42, %v8335_v50 }
 0x46d   :  { %4896 = vmatmul.bf16.vlgmr.msrb.gmra.mxu2 %v4693_v32  ;;  %4946 = vmatmul.bf16.vlgmr.msrb.gmra.mxu0 %v4693_v32  ;;  %v4442_v45 = vadd.f32 %v4424_v47, %v12385_v29  ;;  %v8356_v2 = vor.u32 %v9227_v28, %v8353_v60  ;;  %v4641_v29 = vshll.u32 %v12673_v52, 16  ;;  %v4646_v47 = vshrl.u32 %v12725_v25, 16  ;;  %v9208_v32 = vld [vmem:[%s13747_s3 + $0xa44] sm:$0xf0]  ;;  %v9223_v1 = vld [vmem:[%s13747_s3 + $0xac4] sm:$0xf] }
 0x46e   :  { %4921 = vmatmul.bf16.vlgmr.msrb.gmra.mxu3 %v4694_v30  ;;  %4971 = vmatmul.bf16.vlgmr.msrb.gmra.mxu1 %v4694_v30  ;;  %v8284_v17 = vor.u32 %v9209_v20, %v8281_v8  ;;  %v8348_v41 = vor.u32 %v9225_v7, %v8345_v11  ;;  %v8273_v30 = vld [vmem:[%s13747_s3 + $0xa48] sm:$0xf0]  ;;  %v8272_v60 = vor.u32 %v9208_v32, %v8271_v49  ;;  %v9222_v9 = vld [vmem:[%s13747_s3 + $0xab4] sm:$0xf0]  ;;  %v9205_v11 = vld [vmem:[%s13747_s3 + $0xa34] sm:$0xf] }
 0x46f   :  { %v4336_v10 = vpop.f32.mrf.mxu2  ;;  %v4365_v34 = vpop.f32.mrf.mxu3  ;;  %v4463_v5 = vadd.f32 %v12446_v27, %v4442_v45  ;;  %5224 = vmatpush.bf16.msra.mxu1 %v8356_v2  ;;  %5150 = vmatpush.bf16.msra.mxu2 %v8280_v39  ;;  %v8263_v45 = vld [vmem:[%s13747_s3 + $0xa30] sm:$0xf]  ;;  %v4088_v2 = vadd.f32 %v4013_v62, %v3719_v16  ;;  %v8276_v20 = vor.u32 %v9207_v48, %v8273_v30  ;;  %v8265_v16 = vld [vmem:[%s13747_s3 + $0xa38] sm:$0xf0]  ;;  %v9221_v49 = vld [vmem:[%s13747_s3 + $0xab4] sm:$0xf] }
 0x470   :  { %v4366_v61 = vadd.f32 %v4365_v34, %v4336_v10  ;;  %5175 = vmatpush.bf16.msra.mxu3 %v8344_v59  ;;  %v4649_v10 = vshll.u32 %v12725_v25, 16  ;;  %v8327_v34 = vld [vmem:[%s13747_s3 + $0xab0] sm:$0xf]  ;;  %5200 = vmatpush.bf16.msra.mxu0 %v8284_v17  ;;  %v8340_v8 = vor.u32 %v9223_v1, %v8337_v57  ;;  %v8264_v7 = vor.u32 %v9206_v3, %v8263_v45  ;;  %v8319_v42 = vld [vmem:[%s13747_s3 + $0xaa0] sm:$0xf] }
 0x471   :  { %v4479_v37 = vmax.f32 %v4463_v5, 0.0  ;;  %v8328_v5 = vor.u32 %v9222_v9, %v8327_v34  ;;  %v4681_v17 = vshll.u32 %v12621_v15, 16  ;;  %v9203_v45 = vld [vmem:[%s13747_s3 + $0xa24] sm:$0xf]  ;;  %v8321_v34 = vld [vmem:[%s13747_s3 + $0xaa8] sm:$0xf0] }
 0x472   :  { %v4441_v33 = vadd.f32 %v4366_v61, %v4086_v31  ;;  %v4396_v24 = vpop.f32.mrf.mxu0  ;;  %v4425_v58 = vpop.f32.mrf.mxu1  ;;  %v12799_v31 = vrot.slane %v4646_v47, 7  ;;  %v4643_v61 = vor.u32 %v4641_v29, %v12757_v56  ;;  %v12865_v9 = vrot.slane %v4641_v29, 1 }
 0x473   :  { %v4426_v19 = vadd.f32 %v4425_v58, %v4396_v24  ;;  %5225 = vmatpush.bf16.msra.mxu1 %v8348_v41  ;;  %5151 = vmatpush.bf16.msra.mxu2 %v8272_v60  ;;  %v8255_v24 = vld [vmem:[%s13747_s3 + $0xa20] sm:$0xf]  ;;  %v9204_v58 = vld [vmem:[%s13747_s3 + $0xa24] sm:$0xf0]  ;;  %v8268_v60 = vor.u32 %v9205_v11, %v8265_v16 }
 0x474   :  { %v4462_v28 = vadd.f32 %v12456_v0, %v4441_v33  ;;  %5176 = vmatpush.bf16.msra.mxu3 %v8336_v6  ;;  %v8329_v33 = vld [vmem:[%s13747_s3 + $0xab8] sm:$0xf0]  ;;  %v4651_v50 = vor.u32 %v4649_v10, %v12799_v31  ;;  %v4644_v1 = vsel %vm92_vm2, %v12653_v46, %v4643_v61  ;;  %5201 = vmatpush.bf16.msra.mxu0 %v8276_v20  ;;  %v8257_v46 = vld [vmem:[%s13747_s3 + $0xa28] sm:$0xf0] }
 0x475   :  { %v4444_v23 = vadd.f32 %v4426_v19, %v4089_v18  ;;  %v9220_v19 = vld [vmem:[%s13747_s3 + $0xaa4] sm:$0xf0]  ;;  %v8332_v6 = vor.u32 %v9221_v49, %v8329_v33  ;;  %v8256_v57 = vor.u32 %v9204_v58, %v8255_v24  ;;  %v8260_v20 = vor.u32 %v9203_v45, %v8257_v46  ;;  %v8247_v24 = vld [vmem:[%s13747_s3 + $0xa10] sm:$0xf]  ;;  %v9202_v58 = vld [vmem:[%s13747_s3 + $0xa14] sm:$0xf0] }
 0x476   :  { %v4478_v35 = vmax.f32 %v4462_v28, 0.0  ;;  %v12846_v28 = vpack.c.b16 %v12601_v55, %v12601_v55  ;;  %v8320_v55 = vor.u32 %v9220_v19, %v8319_v42  ;;  %v8249_v42 = vld [vmem:[%s13747_s3 + $0xa18] sm:$0xf0] }
 0x477   :  { %v4338_v39 = vpop.f32.mrf.mxu2  ;;  %v4367_v59 = vpop.f32.mrf.mxu3  ;;  %v4465_v32 = vadd.f32 %v12446_v27, %v4444_v23  ;;  %v12842_v27 = vpack.c.b16 %v12599_v44, %v12599_v44  ;;  %5226 = vmatpush.bf16.msra.mxu1 %v8340_v8  ;;  %v5557_v44 = vrot.slane %v4627_v12, 1  ;;  %5152 = vmatpush.bf16.msra.mxu2 %v8264_v7  ;;  %v9219_v23 = vld [vmem:[%s13747_s3 + $0xaa4] sm:$0xf]  ;;  %v5561_v12 = vrot.slane %v4634_v54, 1 }
 0x478   :  { %v4490_v18 = vpack.c.bf16 %v4479_v37, %v4478_v35  ;;  %v4368_v62 = vadd.f32 %v4367_v59, %v4338_v39  ;;  %5177 = vmatpush.bf16.msra.mxu3 %v8328_v5  ;;  %v12873_v35 = vrot.slane %v4649_v10, 1  ;;  %v12879_v54 = vrot.slane %v4681_v17, 1  ;;  %5202 = vmatpush.bf16.msra.mxu0 %v8268_v60 }
 0x479   :  { %v5558_v37 = vor.u32 %v5557_v44, %v4624_v63  ;;  %v5562_v29 = vor.u32 %v5561_v12, %v4631_v22  ;;  %v5590_v39 = vshll.u32 %v12842_v27, 16  ;;  %v8324_v63 = vor.u32 %v9219_v23, %v8321_v34  ;;  %v9200_v44 = vld [vmem:[%s13747_s3 + $0xa04] sm:$0xf0]  ;;  %v9199_v12 = vld [vmem:[%s13747_s3 + $0xa04] sm:$0xf] }
 0x47a   :  { %4498 = vst [vmem:[#allocation3 + $0x20] sm:$0xff] %v4490_v18  ;;  %v4443_v41 = vadd.f32 %v4368_v62, %v4088_v2  ;;  %v4399_v48 = vpop.f32.mrf.mxu0  ;;  %v4428_v30 = vpop.f32.mrf.mxu1  ;;  %v4481_v2 = vmax.f32 %v4465_v32, 0.0  ;;  %v5594_v8 = vshll.u32 %v12846_v28, 16  ;;  %v5578_v16 = vor.u32 %v12879_v54, %v12643_v38  ;;  %v8311_v32 = vld [vmem:[%s13747_s3 + $0xa90] sm:$0xf] }
 0x47b   :  { %5227 = vmatpush.bf16.msra.mxu1 %v8332_v6  ;;  %v12884_v10 = vsel %vm419_vm5, %v5558_v37, %v12865_v9  ;;  %5153 = vmatpush.bf16.msra.mxu2 %v8256_v57  ;;  %v12889_v22 = vsel %vm419_vm5, %v5562_v29, %v12873_v35  ;;  %v5592_v11 = vrot.slane %v5590_v39, 1  ;;  %v9217_v48 = vld [vmem:[%s13747_s3 + $0xa94] sm:$0xf]  ;;  %v8313_v30 = vld [vmem:[%s13747_s3 + $0xa98] sm:$0xf0] }
 0x47c   :  { %v4464_v3 = vadd.f32 %v12456_v0, %v4443_v41  ;;  %v4652_v0 = vsel %vm92_vm2, %v12664_v36, %v4651_v50  ;;  %5178 = vmatpush.bf16.msra.mxu3 %v8320_v55  ;;  %v5596_v49 = vrot.slane %v5594_v8, 1  ;;  %5203 = vmatpush.bf16.msra.mxu0 %v8260_v20  ;;  %v9218_v50 = vld [vmem:[%s13747_s3 + $0xa94] sm:$0xf0]  ;;  %v8252_v41 = vor.u32 %v9201_v14, %v8249_v42  ;;  %v9216_v55 = vld [vmem:[%s13747_s3 + $0xa84] sm:$0xf0] }
 0x47d   :  { %4901 = vmatmul.bf16.gmra.mxu2 %v4644_v1  ;;  %4951 = vmatmul.bf16.gmra.mxu0 %v4644_v1  ;;  %v12898_v5 = vsel %vm9714_vm8, %v5577_v4, %v5592_v11  ;;  %v8248_v4 = vor.u32 %v9202_v58, %v8247_v24  ;;  %v8312_v19 = vor.u32 %v9218_v50, %v8311_v32  ;;  %v8239_v1 = vld [vmem:[%s13747_s3 + $0xa00] sm:$0xf]  ;;  %v8305_v39 = vld [vmem:[%s13747_s3 + $0xa88] sm:$0xf0] }
 0x47e   :  { %v4480_v61 = vmax.f32 %v4464_v3, 0.0  ;;  %4926 = vmatmul.bf16.gmra.mxu3 %v4652_v0  ;;  %4976 = vmatmul.bf16.gmra.mxu1 %v4652_v0  ;;  %v12902_v33 = vsel %vm9714_vm8, %v5578_v16, %v5596_v49  ;;  %v8316_v46 = vor.u32 %v9217_v48, %v8313_v30  ;;  %v8303_v3 = vld [vmem:[%s13747_s3 + $0xa80] sm:$0xf]  ;;  %v8240_v23 = vor.u32 %v9200_v44, %v8239_v1  ;;  %v9215_v0 = vld [vmem:[%s13747_s3 + $0xa84] sm:$0xf] }
 0x47f   :  { %v4341_v59 = vpop.f32.mrf.mxu2  ;;  %v4370_v36 = vpop.f32.mrf.mxu3  ;;  %5228 = vmatpush.bf16.msra.mxu1 %v8324_v63  ;;  %5154 = vmatpush.bf16.msra.mxu2 %v8248_v4  ;;  %v8304_v34 = vor.u32 %v9216_v55, %v8303_v3  ;;  %v8308_v20 = vor.u32 %v9215_v0, %v8305_v39  ;;  %v5565_v63 = vor.u32 %v12865_v9, %v4638_v40  ;;  %v9277_v48 = vld [vmem:[%s13747_s3 + $0xc74] sm:$0xf]  ;;  %v8457_v30 = vld [vmem:[%s13747_s3 + $0xc78] sm:$0xf0]  ;;  %v9276_v44 = vld [vmem:[%s13747_s3 + $0xc64] sm:$0xf0] }
 0x480   :  { %v4491_v7 = vpack.c.bf16 %v4481_v2, %v4480_v61  ;;  %5179 = vmatpush.bf16.msra.mxu3 %v8312_v19  ;;  %5204 = vmatpush.bf16.msra.mxu0 %v8252_v41  ;;  %v8241_v2 = vld [vmem:[%s13747_s3 + $0xa08] sm:$0xf0]  ;;  %v5568_v8 = vor.u32 %v12873_v35, %v4646_v47  ;;  %v8455_v41 = vld [vmem:[%s13747_s3 + $0xc70] sm:$0xf]  ;;  %v8511_v3 = vld [vmem:[%s13747_s3 + $0xce0] sm:$0xf] }
 0x481   :  { %v8039_v57 = vld [vmem:[#allocation3 + $0x20] sm:$0xf]  ;;  %v9197_v45 = vld [vmem:[#allocation3 + $0x24] sm:$0xf]  ;;  %v8244_v29 = vor.u32 %v9199_v12, %v8241_v2  ;;  %v9292_v55 = vld [vmem:[%s13747_s3 + $0xce4] sm:$0xf0] }
 0x482   :  { %4499 = vst [vmem:[#allocation3 + $0x28] sm:$0xff] %v4491_v7  ;;  %v4401_v18 = vpop.f32.mrf.mxu0  ;;  %v4430_v62 = vpop.f32.mrf.mxu1  ;;  %v9275_v12 = vld [vmem:[%s13747_s3 + $0xc64] sm:$0xf]  ;;  %v8449_v2 = vld [vmem:[%s13747_s3 + $0xc68] sm:$0xf0]  ;;  %v4680_v39 = vrot.slane %v12643_v38, 7 }
 0x483   :  { %5229 = vmatpush.bf16.msra.mxu1 %v8316_v46  ;;  %5155 = vmatpush.bf16.msra.mxu2 %v8240_v23  ;;  %v9291_v0 = vld [vmem:[%s13747_s3 + $0xce4] sm:$0xf]  ;;  %v9274_v38 = vld [vmem:[%s13747_s3 + $0xc54] sm:$0xf0] }
 0x484   :  { %5180 = vmatpush.bf16.msra.mxu3 %v8304_v34  ;;  %5205 = vmatpush.bf16.msra.mxu0 %v8244_v29  ;;  %v8512_v34 = vor.u32 %v9292_v55, %v8511_v3  ;;  %v4672_v29 = vrot.slane %v12547_v51, 7  ;;  %v8439_v51 = vld [vmem:[%s13747_s3 + $0xc50] sm:$0xf]  ;;  %v9270_v55 = vld [vmem:[%s13747_s3 + $0xc34] sm:$0xf0] }
 0x485   :  { %v8423_v3 = vld [vmem:[%s13747_s3 + $0xc30] sm:$0xf] }
 0x487   :  { %v4343_v60 = vpop.f32.mrf.mxu2  ;;  %v4372_v6 = vpop.f32.mrf.mxu3  ;;  %5230 = vmatpush.bf16.msra.mxu1 %v8308_v20 }
 0x488   :  { %v8460_v60 = vor.u32 %v9277_v48, %v8457_v30  ;;  %v9293_v6 = vld [vmem:[%s13747_s3 + $0xcf4] sm:$0xf]  ;;  %v8497_v30 = vld [vmem:[%s13747_s3 + $0xcc8] sm:$0xf0] }
 0x489   :  { %v9198_v37 = vld [vmem:[#allocation3 + $0x24] sm:$0xf0]  ;;  %v8041_v61 = vld [vmem:[#allocation3 + $0x28] sm:$0xf0] }
 0x48a   :  { %v12952_v59 = vor.u32 %v9198_v37, %v8039_v57  ;;  %v12954_v36 = vor.u32 %v9197_v45, %v8041_v61  ;;  %v8521_v57 = vld [vmem:[%s13747_s3 + $0xcf8] sm:$0xf0]  ;;  %v8447_v45 = vld [vmem:[%s13747_s3 + $0xc60] sm:$0xf]  ;;  %5499 = vmatpush.bf16.msrb.mxu0 %v8460_v60  ;;  %v8452_v37 = vor.u32 %v9275_v12, %v8449_v2  ;;  %v8513_v61 = vld [vmem:[%s13747_s3 + $0xce8] sm:$0xf0] }
 0x48b   :  { %v8524_v46 = vor.u32 %v9293_v6, %v8521_v57  ;;  %v8448_v23 = vor.u32 %v9276_v44, %v8447_v45  ;;  %v8516_v20 = vor.u32 %v9291_v0, %v8513_v61  ;;  %v4521_v60 = vrot.slane %v12519_v21, 3  ;;  %v9286_v12 = vld [vmem:[%s13747_s3 + $0xcb4] sm:$0xf0]  ;;  %v9269_v2 = vld [vmem:[%s13747_s3 + $0xc34] sm:$0xf] }
 0x48c   :  { %v4654_v7 = vshrl.u32 %v12952_v59, 16  ;;  %v4657_v11 = vshll.u32 %v12952_v59, 16  ;;  %v4662_v16 = vshrl.u32 %v12954_v36, 16  ;;  %v4665_v49 = vshll.u32 %v12954_v36, 16  ;;  %v8425_v0 = vld [vmem:[%s13747_s3 + $0xc38] sm:$0xf0] }
 0x48d   :  { %5524 = vmatpush.bf16.msrb.mxu1 %v8524_v46  ;;  %v4552_v6 = vrot.slane %v12619_v43, 7  ;;  %v4522_v57 = vrot.slane %v12621_v15, 3  ;;  %v4553_v45 = vrot.slane %v12624_v13, 7  ;;  %v8428_v61 = vor.u32 %v9269_v2, %v8425_v0 }
 0x48e   :  { %v4656_v18 = vrot.slane %v4654_v7, 7  ;;  %v4664_v62 = vrot.slane %v4662_v16, 7  ;;  %v5566_v24 = vrot.slane %v4657_v11, 1  ;;  %v5569_v58 = vrot.slane %v4665_v49, 1  ;;  %5500 = vmatpush.bf16.msrb.mxu0 %v8452_v37 }
 0x48f   :  { %v4574_v46 = vsel %vm71_vm1, %v4521_v60, %v4552_v6  ;;  %v4578_v44 = vsel %vm71_vm1, %v4522_v57, %v4553_v45  ;;  %v8463_v57 = vld [vmem:[%s13747_s3 + $0xc80] sm:$0xf]  ;;  %v4558_v2 = vrot.slane %v12952_v59, 7  ;;  %v4560_v0 = vrot.slane %v12954_v36, 7 }
 0x490   :  { %v4659_v40 = vor.u32 %v4657_v11, %v4656_v18  ;;  %v4667_v9 = vor.u32 %v4665_v49, %v4664_v62  ;;  %v12967_v32 = vsel %vm419_vm5, %v5565_v63, %v5566_v24  ;;  %v12970_v47 = vsel %vm419_vm5, %v5568_v8, %v5569_v58  ;;  %v9273_v49 = vld [vmem:[%s13747_s3 + $0xc54] sm:$0xf] }
 0x491   :  { %v5571_v35 = vor.u32 %v5566_v24, %v4654_v7  ;;  %v5574_v4 = vor.u32 %v5569_v58, %v4662_v16  ;;  %5525 = vmatpush.bf16.msrb.mxu1 %v8516_v20  ;;  %v4675_v63 = vor.u32 %v4673_v26, %v4672_v29  ;;  %v4683_v8 = vor.u32 %v4681_v17, %v4680_v39  ;;  %v8503_v26 = vld [vmem:[%s13747_s3 + $0xcd0] sm:$0xf]  ;;  %v9290_v16 = vld [vmem:[%s13747_s3 + $0xcd4] sm:$0xf0]  ;;  %v9289_v58 = vld [vmem:[%s13747_s3 + $0xcd4] sm:$0xf] }
 0x492   :  { %v4660_v50 = vsel %vm92_vm2, %v12757_v56, %v4659_v40  ;;  %v4668_v14 = vsel %vm92_vm2, %v12799_v31, %v4667_v9  ;;  %v9278_v56 = vld [vmem:[%s13747_s3 + $0xc74] sm:$0xf0]  ;;  %v8519_v31 = vld [vmem:[%s13747_s3 + $0xcf0] sm:$0xf]  ;;  %v8440_v17 = vor.u32 %v9274_v38, %v8439_v51  ;;  %v8505_v40 = vld [vmem:[%s13747_s3 + $0xcd8] sm:$0xf0] }
 0x493   :  { %4904 = vmatmul.bf16.gmra.mxu2 %v4660_v50  ;;  %4929 = vmatmul.bf16.gmra.mxu3 %v4668_v14  ;;  %v12978_v42 = vsel %vm419_vm5, %v5571_v35, %v12576_v53  ;;  %v12982_v19 = vsel %vm419_vm5, %v5574_v4, %v12879_v54  ;;  %v8456_v53 = vor.u32 %v9278_v56, %v8455_v41  ;;  %v9294_v54 = vld [vmem:[%s13747_s3 + $0xcf4] sm:$0xf0]  ;;  %v8431_v9 = vld [vmem:[%s13747_s3 + $0xc40] sm:$0xf]  ;;  %v9272_v4 = vld [vmem:[%s13747_s3 + $0xc44] sm:$0xf0] }
 0x494   :  { %4954 = vmatmul.bf16.gmra.mxu0 %v4660_v50  ;;  %4979 = vmatmul.bf16.gmra.mxu1 %v4668_v14  ;;  %v8520_v1 = vor.u32 %v9294_v54, %v8519_v31  ;;  %v4676_v7 = vsel %vm92_vm2, %v4656_v18, %v4675_v63  ;;  %v4684_v11 = vsel %vm92_vm2, %v4664_v62, %v4683_v8  ;;  %v8441_v18 = vld [vmem:[%s13747_s3 + $0xc58] sm:$0xf0]  ;;  %v8495_v50 = vld [vmem:[%s13747_s3 + $0xcc0] sm:$0xf]  ;;  %v9288_v14 = vld [vmem:[%s13747_s3 + $0xcc4] sm:$0xf0] }
 0x495   :  { %5449 = vmatpush.bf16.msrb.mxu2 %v8456_v53  ;;  %v8504_v62 = vor.u32 %v9290_v16, %v8503_v26  ;;  %v8444_v24 = vor.u32 %v9273_v49, %v8441_v18  ;;  %v8508_v35 = vor.u32 %v9289_v58, %v8505_v40  ;;  %v8432_v41 = vor.u32 %v9272_v4, %v8431_v9  ;;  %v9271_v31 = vld [vmem:[%s13747_s3 + $0xc44] sm:$0xf]  ;;  %v8433_v53 = vld [vmem:[%s13747_s3 + $0xc48] sm:$0xf0]  ;;  %v9285_v29 = vld [vmem:[%s13747_s3 + $0xcb4] sm:$0xf] }
 0x496   :  { %5474 = vmatpush.bf16.msrb.mxu3 %v8520_v1  ;;  %v8496_v56 = vor.u32 %v9288_v14, %v8495_v50  ;;  %v9287_v54 = vld [vmem:[%s13747_s3 + $0xcc4] sm:$0xf]  ;;  %v8436_v48 = vor.u32 %v9271_v31, %v8433_v53  ;;  %v8489_v39 = vld [vmem:[%s13747_s3 + $0xcb8] sm:$0xf0]  ;;  %v8415_v20 = vld [vmem:[%s13747_s3 + $0xc20] sm:$0xf] }
 0x497   :  { %5501 = vmatpush.bf16.msrb.mxu0 %v8444_v24  ;;  %5526 = vmatpush.bf16.msrb.mxu1 %v8508_v35  ;;  %v8500_v1 = vor.u32 %v9287_v54, %v8497_v30  ;;  %v8492_v63 = vor.u32 %v9285_v29, %v8489_v39  ;;  %v9268_v8 = vld [vmem:[%s13747_s3 + $0xc24] sm:$0xf0]  ;;  %v9267_v26 = vld [vmem:[%s13747_s3 + $0xc24] sm:$0xf]  ;;  %v8481_v18 = vld [vmem:[%s13747_s3 + $0xca8] sm:$0xf0] }
 0x498   :  { %v8416_v51 = vor.u32 %v9268_v8, %v8415_v20  ;;  %v9283_v16 = vld [vmem:[%s13747_s3 + $0xca4] sm:$0xf]  ;;  %v4554_v24 = vrot.slane %v12673_v52, 7  ;;  %v4556_v58 = vrot.slane %v12725_v25, 7  ;;  %v8407_v35 = vld [vmem:[%s13747_s3 + $0xc10] sm:$0xf] }
 0x499   :  { %5450 = vmatpush.bf16.msrb.mxu2 %v8448_v23  ;;  %v8487_v23 = vld [vmem:[%s13747_s3 + $0xcb0] sm:$0xf]  ;;  %v9266_v4 = vld [vmem:[%s13747_s3 + $0xc14] sm:$0xf0]  ;;  %v8409_v31 = vld [vmem:[%s13747_s3 + $0xc18] sm:$0xf0] }
 0x49a   :  { %5475 = vmatpush.bf16.msrb.mxu3 %v8512_v34  ;;  %v8424_v34 = vor.u32 %v9270_v55, %v8423_v3  ;;  %v8488_v37 = vor.u32 %v9286_v12, %v8487_v23  ;;  %v4555_v40 = vsel %vm71_vm1, %v4552_v6, %v4554_v24  ;;  %v4557_v9 = vsel %vm71_vm1, %v4553_v45, %v4556_v58  ;;  %v8471_v50 = vld [vmem:[%s13747_s3 + $0xc90] sm:$0xf]  ;;  %v8473_v30 = vld [vmem:[%s13747_s3 + $0xc98] sm:$0xf0]  ;;  %v9264_v6 = vld [vmem:[%s13747_s3 + $0xc04] sm:$0xf0] }
 0x49b   :  { %5502 = vmatpush.bf16.msrb.mxu0 %v8436_v48  ;;  %5527 = vmatpush.bf16.msrb.mxu1 %v8500_v1  ;;  %v8408_v14 = vor.u32 %v9266_v4, %v8407_v35  ;;  %v9281_v48 = vld [vmem:[%s13747_s3 + $0xc94] sm:$0xf]  ;;  %v8399_v1 = vld [vmem:[%s13747_s3 + $0xc00] sm:$0xf]  ;;  %v9280_v45 = vld [vmem:[%s13747_s3 + $0xc84] sm:$0xf0]  ;;  %v4561_v29 = vsel %vm71_vm1, %v4556_v58, %v4560_v0 }
 0x49c   :  { %v8476_v60 = vor.u32 %v9281_v48, %v8473_v30  ;;  %v9263_v3 = vld [vmem:[%s13747_s3 + $0xc04] sm:$0xf]  ;;  %v8401_v55 = vld [vmem:[%s13747_s3 + $0xc08] sm:$0xf0]  ;;  %v8615_v39 = vld [vmem:[%s13747_s3 + $0xd70] sm:$0xf] }
 0x49d   :  { %5451 = vmatpush.bf16.msrb.mxu2 %v8440_v17  ;;  %v8417_v17 = vld [vmem:[%s13747_s3 + $0xc28] sm:$0xf0]  ;;  %v9279_v23 = vld [vmem:[%s13747_s3 + $0xc84] sm:$0xf]  ;;  %v9310_v20 = vld [vmem:[%s13747_s3 + $0xd74] sm:$0xf0] }
 0x49e   :  { %5476 = vmatpush.bf16.msrb.mxu3 %v8504_v62  ;;  %v8420_v49 = vor.u32 %v9267_v26, %v8417_v17  ;;  %v8484_v62 = vor.u32 %v9283_v16, %v8481_v18  ;;  %v8465_v12 = vld [vmem:[%s13747_s3 + $0xc88] sm:$0xf0]  ;;  %v8616_v8 = vor.u32 %v9310_v20, %v8615_v39  ;;  %v9325_v17 = vld [vmem:[%s13747_s3 + $0xdf4] sm:$0xf]  ;;  %v8681_v16 = vld [vmem:[%s13747_s3 + $0xdf8] sm:$0xf0] }
 0x49f   :  { %5503 = vmatpush.bf16.msrb.mxu0 %v8428_v61  ;;  %5528 = vmatpush.bf16.msrb.mxu1 %v8492_v63  ;;  %v4559_v61 = vsel %vm71_vm1, %v4554_v24, %v4558_v2  ;;  %v8679_v63 = vld [vmem:[%s13747_s3 + $0xdf0] sm:$0xf]  ;;  %v8684_v18 = vor.u32 %v9325_v17, %v8681_v16  ;;  %v8671_v24 = vld [vmem:[%s13747_s3 + $0xde0] sm:$0xf]  ;;  %v9324_v58 = vld [vmem:[%s13747_s3 + $0xde4] sm:$0xf0] }
 0x4a0   :  { %v9307_v35 = vld [vmem:[%s13747_s3 + $0xd64] sm:$0xf]  ;;  %v8609_v4 = vld [vmem:[%s13747_s3 + $0xd68] sm:$0xf0]  ;;  %v8599_v30 = vld [vmem:[%s13747_s3 + $0xd50] sm:$0xf] }
 0x4a1   :  { %5452 = vmatpush.bf16.msrb.mxu2 %v8432_v41  ;;  %v9282_v41 = vld [vmem:[%s13747_s3 + $0xc94] sm:$0xf0]  ;;  %v9319_v17 = vld [vmem:[%s13747_s3 + $0xdc4] sm:$0xf] }
 0x4a2   :  { %5477 = vmatpush.bf16.msrb.mxu3 %v8496_v56  ;;  %v9265_v56 = vld [vmem:[%s13747_s3 + $0xc14] sm:$0xf]  ;;  %v8472_v53 = vor.u32 %v9282_v41, %v8471_v50  ;;  %v9323_v50 = vld [vmem:[%s13747_s3 + $0xde4] sm:$0xf]  ;;  %v8673_v41 = vld [vmem:[%s13747_s3 + $0xde8] sm:$0xf0] }
 0x4a3   :  { %4909 = vmatmul.bf16.gmra.mxu2 %v4676_v7  ;;  %4934 = vmatmul.bf16.gmra.mxu3 %v4684_v11  ;;  %v8412_v54 = vor.u32 %v9265_v56, %v8409_v31  ;;  %v8676_v56 = vor.u32 %v9323_v50, %v8673_v41  ;;  %v4562_v31 = vrot.slane %v12519_v21, 7 }
 0x4a4   :  { %4959 = vmatmul.bf16.gmra.mxu0 %v4676_v7  ;;  %4984 = vmatmul.bf16.gmra.mxu1 %v4684_v11  ;;  %v8479_v7 = vld [vmem:[%s13747_s3 + $0xca0] sm:$0xf]  ;;  %v9284_v11 = vld [vmem:[%s13747_s3 + $0xca4] sm:$0xf0] }
 0x4a5   :  { %5453 = vmatpush.bf16.msrb.mxu2 %v8424_v34  ;;  %v8480_v38 = vor.u32 %v9284_v11, %v8479_v7  ;;  %5504 = vmatpush.bf16.msrb.mxu0 %v8420_v49  ;;  %v8404_v34 = vor.u32 %v9263_v3, %v8401_v55  ;;  %v9326_v7 = vld [vmem:[%s13747_s3 + $0xdf4] sm:$0xf0]  ;;  %v9309_v11 = vld [vmem:[%s13747_s3 + $0xd74] sm:$0xf]  ;;  %v8607_v49 = vld [vmem:[%s13747_s3 + $0xd60] sm:$0xf] }
 0x4a6   :  { %5478 = vmatpush.bf16.msrb.mxu3 %v8488_v37  ;;  %5529 = vmatpush.bf16.msrb.mxu1 %v8484_v62  ;;  %v8468_v37 = vor.u32 %v9279_v23, %v8465_v12  ;;  %v9308_v62 = vld [vmem:[%s13747_s3 + $0xd64] sm:$0xf0]  ;;  %v9321_v55 = vld [vmem:[%s13747_s3 + $0xdd4] sm:$0xf]  ;;  %v8665_v23 = vld [vmem:[%s13747_s3 + $0xdd8] sm:$0xf0] }
 0x4a7   :  { %v8668_v12 = vor.u32 %v9321_v55, %v8665_v23 }
 0x4a9   :  { %5454 = vmatpush.bf16.msrb.mxu2 %v8416_v51  ;;  %5505 = vmatpush.bf16.msrb.mxu0 %v8412_v54  ;;  %v8617_v51 = vld [vmem:[%s13747_s3 + $0xd78] sm:$0xf0]  ;;  %v4563_v54 = vsel %vm71_vm1, %v4558_v2, %v4562_v31  ;;  %v9304_v2 = vld [vmem:[%s13747_s3 + $0xd44] sm:$0xf0] }
 0x4aa   :  { %5479 = vmatpush.bf16.msrb.mxu3 %v8480_v38  ;;  %5530 = vmatpush.bf16.msrb.mxu1 %v8476_v60  ;;  %v8680_v38 = vor.u32 %v9326_v7, %v8679_v63  ;;  %v8620_v26 = vor.u32 %v9309_v11, %v8617_v51  ;;  %v8663_v60 = vld [vmem:[%s13747_s3 + $0xdd0] sm:$0xf] }
 0x4ad   :  { %5455 = vmatpush.bf16.msrb.mxu2 %v8408_v14  ;;  %5506 = vmatpush.bf16.msrb.mxu0 %v8404_v34  ;;  %v8612_v14 = vor.u32 %v9307_v35, %v8609_v4  ;;  %v8591_v34 = vld [vmem:[%s13747_s3 + $0xd40] sm:$0xf]  ;;  %v9318_v4 = vld [vmem:[%s13747_s3 + $0xdb4] sm:$0xf0] }
 0x4ae   :  { %5480 = vmatpush.bf16.msrb.mxu3 %v8472_v53  ;;  %5531 = vmatpush.bf16.msrb.mxu1 %v8468_v37  ;;  %v4564_v53 = vrot.slane %v12621_v15, 7  ;;  %v9320_v37 = vld [vmem:[%s13747_s3 + $0xdc4] sm:$0xf0] }
 0x4b0   :  { %v4565_v48 = vsel %vm71_vm1, %v4560_v0, %v4564_v53  ;;  %v8655_v0 = vld [vmem:[%s13747_s3 + $0xdc0] sm:$0xf]  ;;  %v9301_v53 = vld [vmem:[%s13747_s3 + $0xd34] sm:$0xf] }
 0x4b3   :  { %5156 = vmatmul.bf16.vlgmr.msra.gmra.mxu2 %v4574_v46  ;;  %5181 = vmatmul.bf16.vlgmr.msra.gmra.mxu3 %v4578_v44 }
 0x4b4   :  { %5206 = vmatmul.bf16.vlgmr.msra.gmra.mxu0 %v4574_v46  ;;  %5231 = vmatmul.bf16.vlgmr.msra.gmra.mxu1 %v4578_v44  ;;  %v8400_v46 = vor.u32 %v9264_v6, %v8399_v1  ;;  %v8464_v44 = vor.u32 %v9280_v45, %v8463_v57  ;;  %v9306_v1 = vld [vmem:[%s13747_s3 + $0xd54] sm:$0xf0]  ;;  %v9305_v45 = vld [vmem:[%s13747_s3 + $0xd54] sm:$0xf] }
 0x4b5   :  { %5844 = vmatpush.bf16.msra.mxu0 %v8620_v26  ;;  %5869 = vmatpush.bf16.msra.mxu1 %v8684_v18  ;;  %v8600_v6 = vor.u32 %v9306_v1, %v8599_v30  ;;  %v9322_v57 = vld [vmem:[%s13747_s3 + $0xdd4] sm:$0xf0]  ;;  %v8593_v26 = vld [vmem:[%s13747_s3 + $0xd48] sm:$0xf0] }
 0x4b6   :  { %5456 = vmatpush.bf16.msrb.mxu2 %v8400_v46  ;;  %5481 = vmatpush.bf16.msrb.mxu3 %v8464_v44  ;;  %v8601_v46 = vld [vmem:[%s13747_s3 + $0xd58] sm:$0xf0]  ;;  %v8664_v44 = vor.u32 %v9322_v57, %v8663_v60  ;;  %v8657_v18 = vld [vmem:[%s13747_s3 + $0xdc8] sm:$0xf0]  ;;  %v9300_v57 = vld [vmem:[%s13747_s3 + $0xd24] sm:$0xf0] }
 0x4b7   :  { %v8604_v3 = vor.u32 %v9305_v45, %v8601_v46  ;;  %v8649_v60 = vld [vmem:[%s13747_s3 + $0xdb8] sm:$0xf0] }
 0x4b9   :  { %5845 = vmatpush.bf16.msra.mxu0 %v8612_v14  ;;  %5870 = vmatpush.bf16.msra.mxu1 %v8676_v56 }
 0x4ba   :  { %5794 = vmatpush.bf16.msra.mxu2 %v8616_v8  ;;  %5819 = vmatpush.bf16.msra.mxu3 %v8680_v38  ;;  %v9303_v38 = vld [vmem:[%s13747_s3 + $0xd44] sm:$0xf] }
 0x4bd   :  { %5846 = vmatpush.bf16.msra.mxu0 %v8604_v3  ;;  %5871 = vmatpush.bf16.msra.mxu1 %v8668_v12  ;;  %v9316_v3 = vld [vmem:[%s13747_s3 + $0xda4] sm:$0xf0]  ;;  %v9299_v12 = vld [vmem:[%s13747_s3 + $0xd24] sm:$0xf] }
 0x4c3   :  { %5161 = vmatmul.bf16.gmra.mxu2 %v4555_v40  ;;  %5186 = vmatmul.bf16.gmra.mxu3 %v4557_v9 }
 0x4c4   :  { %5211 = vmatmul.bf16.gmra.mxu0 %v4555_v40  ;;  %5236 = vmatmul.bf16.gmra.mxu1 %v4557_v9  ;;  %v8608_v40 = vor.u32 %v9308_v62, %v8607_v49  ;;  %v8672_v9 = vor.u32 %v9324_v58, %v8671_v24  ;;  %v8596_v49 = vor.u32 %v9303_v38, %v8593_v26  ;;  %v8583_v58 = vld [vmem:[%s13747_s3 + $0xd30] sm:$0xf]  ;;  %v9314_v26 = vld [vmem:[%s13747_s3 + $0xd94] sm:$0xf0] }
 0x4c5   :  { %v8660_v24 = vor.u32 %v9319_v17, %v8657_v18  ;;  %v9297_v18 = vld [vmem:[%s13747_s3 + $0xd14] sm:$0xf] }
 0x4c6   :  { %5795 = vmatpush.bf16.msra.mxu2 %v8608_v40  ;;  %5820 = vmatpush.bf16.msra.mxu3 %v8672_v9  ;;  %v9302_v40 = vld [vmem:[%s13747_s3 + $0xd34] sm:$0xf0]  ;;  %v8647_v9 = vld [vmem:[%s13747_s3 + $0xdb0] sm:$0xf] }
 0x4c7   :  { %5847 = vmatpush.bf16.msra.mxu0 %v8596_v49  ;;  %v8584_v35 = vor.u32 %v9302_v40, %v8583_v58  ;;  %5872 = vmatpush.bf16.msra.mxu1 %v8660_v24  ;;  %v8648_v50 = vor.u32 %v9318_v4, %v8647_v9  ;;  %v8569_v24 = vld [vmem:[%s13747_s3 + $0xd18] sm:$0xf0]  ;;  %v9313_v58 = vld [vmem:[%s13747_s3 + $0xd94] sm:$0xf]  ;;  %v9296_v4 = vld [vmem:[%s13747_s3 + $0xd04] sm:$0xf0] }
 0x4c8   :  { %v8572_v40 = vor.u32 %v9297_v18, %v8569_v24  ;;  %v8633_v9 = vld [vmem:[%s13747_s3 + $0xd98] sm:$0xf0] }
 0x4ca   :  { %5796 = vmatpush.bf16.msra.mxu2 %v8600_v6  ;;  %5821 = vmatpush.bf16.msra.mxu3 %v8664_v44  ;;  %v8575_v6 = vld [vmem:[%s13747_s3 + $0xd20] sm:$0xf] }
 0x4cb   :  { %v8576_v46 = vor.u32 %v9300_v57, %v8575_v6  ;;  %v8639_v44 = vld [vmem:[%s13747_s3 + $0xda0] sm:$0xf]  ;;  %v9311_v6 = vld [vmem:[%s13747_s3 + $0xd84] sm:$0xf] }
 0x4cc   :  { %v8640_v55 = vor.u32 %v9316_v3, %v8639_v44  ;;  %v9342_v44 = vld [vmem:[%s13747_s3 + $0xe74] sm:$0xf0] }
 0x4d3   :  { %5164 = vmatmul.bf16.gmra.mxu2 %v4559_v61  ;;  %5189 = vmatmul.bf16.gmra.mxu3 %v4561_v29 }
 0x4d4   :  { %5214 = vmatmul.bf16.gmra.mxu0 %v4559_v61  ;;  %5239 = vmatmul.bf16.gmra.mxu1 %v4561_v29  ;;  %v8592_v61 = vor.u32 %v9304_v2, %v8591_v34  ;;  %v8656_v29 = vor.u32 %v9320_v37, %v8655_v0  ;;  %v8577_v2 = vld [vmem:[%s13747_s3 + $0xd28] sm:$0xf0]  ;;  %v9315_v0 = vld [vmem:[%s13747_s3 + $0xda4] sm:$0xf] }
 0x4d6   :  { %5797 = vmatpush.bf16.msra.mxu2 %v8592_v61  ;;  %5822 = vmatpush.bf16.msra.mxu3 %v8656_v29  ;;  %v8580_v61 = vor.u32 %v9299_v12, %v8577_v2  ;;  %v8641_v29 = vld [vmem:[%s13747_s3 + $0xda8] sm:$0xf0]  ;;  %v8839_v12 = vld [vmem:[%s13747_s3 + $0xef0] sm:$0xf]  ;;  %v9358_v2 = vld [vmem:[%s13747_s3 + $0xef4] sm:$0xf0] }
 0x4da   :  { %5798 = vmatpush.bf16.msra.mxu2 %v8584_v35  ;;  %5823 = vmatpush.bf16.msra.mxu3 %v8648_v50  ;;  %v8559_v35 = vld [vmem:[%s13747_s3 + $0xd00] sm:$0xf]  ;;  %v8636_v50 = vor.u32 %v9313_v58, %v8633_v9 }
 0x4db   :  { %v8831_v58 = vld [vmem:[%s13747_s3 + $0xee0] sm:$0xf] }
 0x4de   :  { %5799 = vmatpush.bf16.msra.mxu2 %v8576_v46  ;;  %5824 = vmatpush.bf16.msra.mxu3 %v8640_v55  ;;  %v8775_v46 = vld [vmem:[%s13747_s3 + $0xe70] sm:$0xf] }
 0x4e3   :  { %5169 = vmatmul.bf16.gmra.mxu2 %v4563_v54  ;;  %5194 = vmatmul.bf16.gmra.mxu3 %v4565_v48 }
 0x4e4   :  { %5219 = vmatmul.bf16.gmra.mxu0 %v4563_v54  ;;  %5244 = vmatmul.bf16.gmra.mxu1 %v4565_v48  ;;  %v8585_v54 = vld [vmem:[%s13747_s3 + $0xd38] sm:$0xf0]  ;;  %v9317_v48 = vld [vmem:[%s13747_s3 + $0xdb4] sm:$0xf] }
 0x4e5   :  { %v8588_v1 = vor.u32 %v9301_v53, %v8585_v54  ;;  %v8652_v45 = vor.u32 %v9317_v48, %v8649_v60  ;;  %v8561_v60 = vld [vmem:[%s13747_s3 + $0xd08] sm:$0xf0] }
 0x4e7   :  { %5848 = vmatpush.bf16.msra.mxu0 %v8588_v1  ;;  %5873 = vmatpush.bf16.msra.mxu1 %v8652_v45  ;;  %v9295_v1 = vld [vmem:[%s13747_s3 + $0xd04] sm:$0xf]  ;;  %v8625_v45 = vld [vmem:[%s13747_s3 + $0xd88] sm:$0xf0] }
 0x4e8   :  { %v8564_v57 = vor.u32 %v9295_v1, %v8561_v60  ;;  %v8759_v1 = vld [vmem:[%s13747_s3 + $0xe50] sm:$0xf]  ;;  %v9338_v60 = vld [vmem:[%s13747_s3 + $0xe54] sm:$0xf0] }
 0x4ea   :  { %v4947_v39 = vpop.f32.mrf.mxu0 }
 0x4eb   :  { %v4972_v20 = vpop.f32.mrf.mxu1  ;;  %5849 = vmatpush.bf16.msra.mxu0 %v8580_v61 }
 0x4ec   :  { %v13286_v63 = vadd.f32 %v4972_v20, %v4947_v39  ;;  %v8644_v20 = vor.u32 %v9315_v0, %v8641_v29 }
 0x4ee   :  { %5874 = vmatpush.bf16.msra.mxu1 %v8644_v20  ;;  %v9341_v20 = vld [vmem:[%s13747_s3 + $0xe74] sm:$0xf] }
 0x4ef   :  { %5850 = vmatpush.bf16.msra.mxu0 %v8572_v40  ;;  %v9356_v40 = vld [vmem:[%s13747_s3 + $0xee4] sm:$0xf0] }
 0x4f0   :  { %v4897_v8 = vpop.f32.mrf.mxu2 }
 0x4f1   :  { %v4922_v7 = vpop.f32.mrf.mxu3 }
 0x4f2   :  { %v13288_v11 = vadd.f32 %v4922_v7, %v4897_v8  ;;  %v4949_v51 = vpop.f32.mrf.mxu0  ;;  %v8567_v8 = vld [vmem:[%s13747_s3 + $0xd10] sm:$0xf]  ;;  %v9298_v7 = vld [vmem:[%s13747_s3 + $0xd14] sm:$0xf0]  ;;  %5875 = vmatpush.bf16.msra.mxu1 %v8636_v50 }
 0x4f3   :  { %5457 = vmatmul.bf16.vlgmr.msrb.gmra.mxu2 %v12619_v43  ;;  %5482 = vmatmul.bf16.vlgmr.msrb.gmra.mxu3 %v12624_v13  ;;  %v4974_v16 = vpop.f32.mrf.mxu1  ;;  %v8568_v38 = vor.u32 %v9298_v7, %v8567_v8  ;;  %v8777_v8 = vld [vmem:[%s13747_s3 + $0xe78] sm:$0xf0]  ;;  %v9357_v7 = vld [vmem:[%s13747_s3 + $0xef4] sm:$0xf] }
 0x4f4   :  { %5507 = vmatmul.bf16.vlgmr.msrb.gmra.mxu0 %v12619_v43  ;;  %5532 = vmatmul.bf16.vlgmr.msrb.gmra.mxu1 %v12624_v13  ;;  %v13306_v62 = vadd.f32 %v4974_v16, %v4949_v51  ;;  %v8631_v51 = vld [vmem:[%s13747_s3 + $0xd90] sm:$0xf] }
 0x4f5   :  { %v8632_v17 = vor.u32 %v9314_v26, %v8631_v51  ;;  %5800 = vmatpush.bf16.msra.mxu2 %v8568_v38  ;;  %5851 = vmatpush.bf16.msra.mxu0 %v8564_v57  ;;  %v8780_v51 = vor.u32 %v9341_v20, %v8777_v8  ;;  %v8841_v38 = vld [vmem:[%s13747_s3 + $0xef8] sm:$0xf0]  ;;  %v8767_v26 = vld [vmem:[%s13747_s3 + $0xe60] sm:$0xf]  ;;  %v8760_v57 = vor.u32 %v9338_v60, %v8759_v1  ;;  %v9336_v20 = vld [vmem:[%s13747_s3 + $0xe44] sm:$0xf0] }
 0x4f6   :  { %v8844_v18 = vor.u32 %v9357_v7, %v8841_v38  ;;  %v9352_v38 = vld [vmem:[%s13747_s3 + $0xec4] sm:$0xf0] }
 0x4f7   :  { %5825 = vmatpush.bf16.msra.mxu3 %v8632_v17  ;;  %v9340_v17 = vld [vmem:[%s13747_s3 + $0xe64] sm:$0xf0] }
 0x4f8   :  { %v4899_v14 = vpop.f32.mrf.mxu2  ;;  %v8768_v24 = vor.u32 %v9340_v17, %v8767_v26 }
 0x4f9   :  { %v4924_v41 = vpop.f32.mrf.mxu3  ;;  %6175 = vmatpush.bf16.msrb.mxu0 %v8780_v51  ;;  %v8815_v51 = vld [vmem:[%s13747_s3 + $0xec0] sm:$0xf] }
 0x4fa   :  { %v13320_v56 = vadd.f32 %v4924_v41, %v4899_v14  ;;  %v4952_v31 = vpop.f32.mrf.mxu0  ;;  %v8560_v14 = vor.u32 %v9296_v4, %v8559_v35  ;;  %v8623_v41 = vld [vmem:[%s13747_s3 + $0xd80] sm:$0xf]  ;;  %v8832_v35 = vor.u32 %v9356_v40, %v8831_v58  ;;  %v8816_v26 = vor.u32 %v9352_v38, %v8815_v51  ;;  %v9335_v40 = vld [vmem:[%s13747_s3 + $0xe44] sm:$0xf] }
 0x4fb   :  { %v4977_v30 = vpop.f32.mrf.mxu1  ;;  %v9312_v31 = vld [vmem:[%s13747_s3 + $0xd84] sm:$0xf0] }
 0x4fc   :  { %v8624_v53 = vor.u32 %v9312_v31, %v8623_v41  ;;  %5801 = vmatpush.bf16.msra.mxu2 %v8560_v14  ;;  %v9339_v14 = vld [vmem:[%s13747_s3 + $0xe64] sm:$0xf]  ;;  %v8769_v41 = vld [vmem:[%s13747_s3 + $0xe68] sm:$0xf0] }
 0x4fd   :  { %v9355_v31 = vld [vmem:[%s13747_s3 + $0xee4] sm:$0xf] }
 0x4fe   :  { %5826 = vmatpush.bf16.msra.mxu3 %v8624_v53  ;;  %v8772_v53 = vor.u32 %v9339_v14, %v8769_v41 }
 0x500   :  { %v4902_v23 = vpop.f32.mrf.mxu2  ;;  %6176 = vmatpush.bf16.msrb.mxu0 %v8772_v53 }
 0x501   :  { %v4927_v34 = vpop.f32.mrf.mxu3  ;;  %v8628_v23 = vor.u32 %v9311_v6, %v8625_v45  ;;  %v8823_v6 = vld [vmem:[%s13747_s3 + $0xed0] sm:$0xf]  ;;  %v9354_v45 = vld [vmem:[%s13747_s3 + $0xed4] sm:$0xf0] }
 0x502   :  { %v4953_v37 = vpop.f32.mrf.mxu0  ;;  %v8776_v34 = vor.u32 %v9342_v44, %v8775_v46 }
 0x503   :  { %5462 = vmatmul.bf16.gmra.mxu2 %v12673_v52  ;;  %5487 = vmatmul.bf16.gmra.mxu3 %v12725_v25  ;;  %v4978_v39 = vpop.f32.mrf.mxu1  ;;  %v8840_v37 = vor.u32 %v9358_v2, %v8839_v12  ;;  %v8761_v12 = vld [vmem:[%s13747_s3 + $0xe58] sm:$0xf0]  ;;  %v9353_v2 = vld [vmem:[%s13747_s3 + $0xed4] sm:$0xf] }
 0x504   :  { %5512 = vmatmul.bf16.gmra.mxu0 %v12673_v52  ;;  %5537 = vmatmul.bf16.gmra.mxu1 %v12725_v25 }
 0x505   :  { %5876 = vmatpush.bf16.msra.mxu1 %v8628_v23  ;;  %6125 = vmatpush.bf16.msrb.mxu2 %v8776_v34  ;;  %v9337_v34 = vld [vmem:[%s13747_s3 + $0xe54] sm:$0xf] }
 0x506   :  { %6150 = vmatpush.bf16.msrb.mxu3 %v8840_v37  ;;  %v8764_v37 = vor.u32 %v9337_v34, %v8761_v12  ;;  %v8809_v34 = vld [vmem:[%s13747_s3 + $0xeb8] sm:$0xf0]  ;;  %v9332_v12 = vld [vmem:[%s13747_s3 + $0xe24] sm:$0xf0] }
 0x508   :  { %v4903_v16 = vpop.f32.mrf.mxu2  ;;  %6177 = vmatpush.bf16.msrb.mxu0 %v8764_v37 }
 0x509   :  { %v4928_v49 = vpop.f32.mrf.mxu3  ;;  %6200 = vmatpush.bf16.msrb.mxu1 %v8844_v18  ;;  %6126 = vmatpush.bf16.msrb.mxu2 %v8768_v24 }
 0x50a   :  { %6151 = vmatpush.bf16.msrb.mxu3 %v8832_v35  ;;  %v8753_v35 = vld [vmem:[%s13747_s3 + $0xe48] sm:$0xf0] }
 0x50d   :  { %6127 = vmatpush.bf16.msrb.mxu2 %v8760_v57 }
 0x511   :  { %v4955_v54 = vpop.f32.mrf.mxu0  ;;  %v4980_v48 = vpop.f32.mrf.mxu1 }
 0x512   :  { %v13398_v30 = vadd.f32 %v4980_v48, %v4955_v54  ;;  %v8833_v54 = vld [vmem:[%s13747_s3 + $0xee8] sm:$0xf0] }
 0x513   :  { %5465 = vmatmul.bf16.gmra.mxu2 %v12952_v59  ;;  %5490 = vmatmul.bf16.gmra.mxu3 %v12954_v36  ;;  %v8836_v48 = vor.u32 %v9355_v31, %v8833_v54  ;;  %v8807_v54 = vld [vmem:[%s13747_s3 + $0xeb0] sm:$0xf] }
 0x514   :  { %5515 = vmatmul.bf16.gmra.mxu0 %v12952_v59  ;;  %5540 = vmatmul.bf16.gmra.mxu1 %v12954_v36 }
 0x515   :  { %6201 = vmatpush.bf16.msrb.mxu1 %v8836_v48  ;;  %v9350_v48 = vld [vmem:[%s13747_s3 + $0xeb4] sm:$0xf0] }
 0x516   :  { %v4905_v3 = vpop.f32.mrf.mxu2  ;;  %v4930_v55 = vpop.f32.mrf.mxu3  ;;  %v8808_v60 = vor.u32 %v9350_v48, %v8807_v54  ;;  %v9345_v54 = vld [vmem:[%s13747_s3 + $0xe94] sm:$0xf] }
 0x517   :  { %v13428_v0 = vadd.f32 %v4930_v55, %v4905_v3  ;;  %v8824_v3 = vor.u32 %v9354_v45, %v8823_v6 }
 0x519   :  { %v4957_v61 = vpop.f32.mrf.mxu0  ;;  %v4982_v29 = vpop.f32.mrf.mxu1  ;;  %6152 = vmatpush.bf16.msrb.mxu3 %v8824_v3  ;;  %v9333_v3 = vld [vmem:[%s13747_s3 + $0xe34] sm:$0xf] }
 0x51a   :  { %v13430_v39 = vadd.f32 %v4982_v29, %v4957_v61  ;;  %v8825_v61 = vld [vmem:[%s13747_s3 + $0xed8] sm:$0xf0]  ;;  %v8751_v29 = vld [vmem:[%s13747_s3 + $0xe40] sm:$0xf] }
 0x51b   :  { %v8828_v8 = vor.u32 %v9353_v2, %v8825_v61  ;;  %v8752_v7 = vor.u32 %v9336_v20, %v8751_v29  ;;  %v8799_v20 = vld [vmem:[%s13747_s3 + $0xea0] sm:$0xf] }
 0x51d   :  { %6202 = vmatpush.bf16.msrb.mxu1 %v8828_v8  ;;  %6128 = vmatpush.bf16.msrb.mxu2 %v8752_v7  ;;  %v9348_v8 = vld [vmem:[%s13747_s3 + $0xea4] sm:$0xf0] }
 0x51e   :  { %v4907_v16 = vpop.f32.mrf.mxu2  ;;  %v4932_v49 = vpop.f32.mrf.mxu3  ;;  %6153 = vmatpush.bf16.msrb.mxu3 %v8816_v26  ;;  %v8800_v51 = vor.u32 %v9348_v8, %v8799_v20  ;;  %v8785_v8 = vld [vmem:[%s13747_s3 + $0xe88] sm:$0xf0] }
 0x51f   :  { %v13456_v9 = vadd.f32 %v4932_v49, %v4907_v16 }
 0x521   :  { %v4960_v4 = vpop.f32.mrf.mxu0  ;;  %v4985_v50 = vpop.f32.mrf.mxu1 }
 0x522   :  { %v8756_v4 = vor.u32 %v9335_v40, %v8753_v35  ;;  %v8817_v50 = vld [vmem:[%s13747_s3 + $0xec8] sm:$0xf0]  ;;  %6154 = vmatpush.bf16.msrb.mxu3 %v8808_v60  ;;  %v8727_v35 = vld [vmem:[%s13747_s3 + $0xe10] sm:$0xf]  ;;  %v8719_v60 = vld [vmem:[%s13747_s3 + $0xe00] sm:$0xf] }
 0x523   :  { %5470 = vmatmul.bf16.gmra.mxu2 %v12519_v21  ;;  %5495 = vmatmul.bf16.gmra.mxu3 %v12621_v15 }
 0x524   :  { %5520 = vmatmul.bf16.gmra.mxu0 %v12519_v21  ;;  %5545 = vmatmul.bf16.gmra.mxu1 %v12621_v15 }
 0x525   :  { %6178 = vmatpush.bf16.msrb.mxu0 %v8756_v4  ;;  %v8791_v4 = vld [vmem:[%s13747_s3 + $0xe90] sm:$0xf] }
 0x526   :  { %v4910_v46 = vpop.f32.mrf.mxu2  ;;  %v4935_v44 = vpop.f32.mrf.mxu3  ;;  %6155 = vmatpush.bf16.msrb.mxu3 %v8800_v51 }
 0x529   :  { %v4961_v55 = vpop.f32.mrf.mxu0  ;;  %v4986_v23 = vpop.f32.mrf.mxu1 }
 0x52a   :  { %v9349_v55 = vld [vmem:[%s13747_s3 + $0xeb4] sm:$0xf] }
 0x52b   :  { %v8812_v61 = vor.u32 %v9349_v55, %v8809_v34 }
 0x52e   :  { %v4911_v17 = vpop.f32.mrf.mxu2  ;;  %v4936_v16 = vpop.f32.mrf.mxu3 }
 0x52f   :  { %v9331_v16 = vld [vmem:[%s13747_s3 + $0xe24] sm:$0xf] }
 0x531   :  { %v5207_v49 = vpop.f32.mrf.mxu0  ;;  %v5232_v18 = vpop.f32.mrf.mxu1 }
 0x532   :  { %v5208_v24 = vadd.f32 %v5207_v49, %v13286_v63  ;;  %v9351_v63 = vld [vmem:[%s13747_s3 + $0xec4] sm:$0xf]  ;;  %v8737_v49 = vld [vmem:[%s13747_s3 + $0xe28] sm:$0xf0] }
 0x533   :  { %5802 = vmatmul.bf16.vlgmr.msra.gmra.mxu2 %v12884_v10  ;;  %5827 = vmatmul.bf16.vlgmr.msra.gmra.mxu3 %v12889_v22  ;;  %v8820_v31 = vor.u32 %v9351_v63, %v8817_v50  ;;  %v9330_v63 = vld [vmem:[%s13747_s3 + $0xe14] sm:$0xf0] }
 0x534   :  { %v13513_v58 = vadd.f32 %v5232_v18, %v5208_v24  ;;  %5852 = vmatmul.bf16.vlgmr.msra.gmra.mxu0 %v12884_v10  ;;  %5877 = vmatmul.bf16.vlgmr.msra.gmra.mxu1 %v12889_v22  ;;  %v8743_v10 = vld [vmem:[%s13747_s3 + $0xe30] sm:$0xf]  ;;  %v9334_v22 = vld [vmem:[%s13747_s3 + $0xe34] sm:$0xf0]  ;;  %v8740_v18 = vor.u32 %v9331_v16, %v8737_v49  ;;  %v8801_v24 = vld [vmem:[%s13747_s3 + $0xea8] sm:$0xf0]  ;;  %v8728_v50 = vor.u32 %v9330_v63, %v8727_v35 }
 0x535   :  { %v8744_v53 = vor.u32 %v9334_v22, %v8743_v10  ;;  %6203 = vmatpush.bf16.msrb.mxu1 %v8820_v31  ;;  %v9329_v31 = vld [vmem:[%s13747_s3 + $0xe14] sm:$0xf] }
 0x536   :  { %v5157_v14 = vpop.f32.mrf.mxu2  ;;  %v5182_v41 = vpop.f32.mrf.mxu3 }
 0x537   :  { %v5158_v1 = vadd.f32 %v5157_v14, %v13288_v11  ;;  %6129 = vmatpush.bf16.msrb.mxu2 %v8744_v53  ;;  %v8745_v11 = vld [vmem:[%s13747_s3 + $0xe38] sm:$0xf0] }
 0x538   :  { %v8748_v23 = vor.u32 %v9333_v3, %v8745_v11  ;;  %v8729_v53 = vld [vmem:[%s13747_s3 + $0xe18] sm:$0xf0]  ;;  %v8783_v3 = vld [vmem:[%s13747_s3 + $0xe80] sm:$0xf]  ;;  %v9344_v11 = vld [vmem:[%s13747_s3 + $0xe84] sm:$0xf0] }
 0x539   :  { %v13542_v6 = vadd.f32 %v5182_v41, %v5158_v1  ;;  %v5209_v57 = vpop.f32.mrf.mxu0  ;;  %v5234_v45 = vpop.f32.mrf.mxu1  ;;  %6204 = vmatpush.bf16.msrb.mxu1 %v8812_v61  ;;  %v8732_v48 = vor.u32 %v9329_v31, %v8729_v53  ;;  %v8793_v1 = vld [vmem:[%s13747_s3 + $0xe98] sm:$0xf0]  ;;  %v8784_v55 = vor.u32 %v9344_v11, %v8783_v3  ;;  %v9327_v61 = vld [vmem:[%s13747_s3 + $0xe04] sm:$0xf]  ;;  %v5908_v11 = vrot.slane %v12952_v59, 1 }
 0x53a   :  { %v5210_v46 = vadd.f32 %v5209_v57, %v13306_v62  ;;  %v8735_v62 = vld [vmem:[%s13747_s3 + $0xe20] sm:$0xf]  ;;  %6179 = vmatpush.bf16.msrb.mxu0 %v8748_v23  ;;  %v9328_v57 = vld [vmem:[%s13747_s3 + $0xe04] sm:$0xf0] }
 0x53b   :  { %v8736_v29 = vor.u32 %v9332_v12, %v8735_v62 }
 0x53c   :  { %v13545_v44 = vadd.f32 %v5234_v45, %v5210_v46  ;;  %v8796_v45 = vor.u32 %v9345_v54, %v8793_v1  ;;  %v8720_v46 = vor.u32 %v9328_v57, %v8719_v60 }
 0x53d   :  { %6130 = vmatpush.bf16.msrb.mxu2 %v8736_v29  ;;  %v8721_v29 = vld [vmem:[%s13747_s3 + $0xe08] sm:$0xf0] }
 0x53e   :  { %v5159_v2 = vpop.f32.mrf.mxu2  ;;  %v5184_v37 = vpop.f32.mrf.mxu3  ;;  %6180 = vmatpush.bf16.msrb.mxu0 %v8740_v18  ;;  %v8724_v20 = vor.u32 %v9327_v61, %v8721_v29 }
 0x53f   :  { %v5160_v7 = vadd.f32 %v5159_v2, %v13320_v56  ;;  %v9347_v56 = vld [vmem:[%s13747_s3 + $0xea4] sm:$0xf] }
 0x540   :  { %v8804_v40 = vor.u32 %v9347_v56, %v8801_v24 }
 0x541   :  { %v13572_v38 = vadd.f32 %v5184_v37, %v5160_v7  ;;  %v5212_v26 = vpop.f32.mrf.mxu0  ;;  %v5237_v17 = vpop.f32.mrf.mxu1  ;;  %6131 = vmatpush.bf16.msrb.mxu2 %v8728_v50 }
 0x542   :  { %6205 = vmatpush.bf16.msrb.mxu1 %v8804_v40  ;;  %6181 = vmatpush.bf16.msrb.mxu0 %v8732_v48 }
 0x543   :  { %5807 = vmatmul.bf16.gmra.mxu2 %v12967_v32  ;;  %5832 = vmatmul.bf16.gmra.mxu3 %v12970_v47 }
 0x544   :  { %5857 = vmatmul.bf16.gmra.mxu0 %v12967_v32  ;;  %5882 = vmatmul.bf16.gmra.mxu1 %v12970_v47  ;;  %v9346_v32 = vld [vmem:[%s13747_s3 + $0xe94] sm:$0xf0] }
 0x545   :  { %v8792_v22 = vor.u32 %v9346_v32, %v8791_v4  ;;  %6132 = vmatpush.bf16.msrb.mxu2 %v8720_v46 }
 0x546   :  { %v5162_v47 = vpop.f32.mrf.mxu2  ;;  %v5187_v10 = vpop.f32.mrf.mxu3  ;;  %6206 = vmatpush.bf16.msrb.mxu1 %v8796_v45  ;;  %6182 = vmatpush.bf16.msrb.mxu0 %v8724_v20 }
 0x547   :  { %6156 = vmatpush.bf16.msrb.mxu3 %v8792_v22  ;;  %v5903_v22 = vrot.slane %v12673_v52, 1 }
 0x549   :  { %v5213_v14 = vpop.f32.mrf.mxu0  ;;  %v5238_v41 = vpop.f32.mrf.mxu1 }
 0x54a   :  { %v5905_v14 = vrot.slane %v12624_v13, 1  ;;  %v5906_v41 = vrot.slane %v12725_v25, 1 }
 0x54b   :  { %6157 = vmatpush.bf16.msrb.mxu3 %v8784_v55 }
 0x54e   :  { %v5163_v23 = vpop.f32.mrf.mxu2  ;;  %v5188_v34 = vpop.f32.mrf.mxu3 }
 0x551   :  { %v5215_v62 = vpop.f32.mrf.mxu0  ;;  %v5240_v12 = vpop.f32.mrf.mxu1 }
 0x552   :  { %v5216_v2 = vadd.f32 %v5215_v62, %v13398_v30  ;;  %v9343_v30 = vld [vmem:[%s13747_s3 + $0xe84] sm:$0xf] }
 0x553   :  { %5810 = vmatmul.bf16.gmra.mxu2 %v12978_v42  ;;  %5835 = vmatmul.bf16.gmra.mxu3 %v12982_v19 }
 0x554   :  { %v13629_v37 = vadd.f32 %v5240_v12, %v5216_v2  ;;  %5860 = vmatmul.bf16.gmra.mxu0 %v12978_v42  ;;  %5885 = vmatmul.bf16.gmra.mxu1 %v12982_v19  ;;  %v8788_v19 = vor.u32 %v9343_v30, %v8785_v8  ;;  %v5912_v30 = vrot.slane %v12519_v21, 1 }
 0x556   :  { %v5165_v42 = vpop.f32.mrf.mxu2  ;;  %v5190_v7 = vpop.f32.mrf.mxu3  ;;  %6207 = vmatpush.bf16.msrb.mxu1 %v8788_v19 }
 0x557   :  { %v5166_v51 = vadd.f32 %v5165_v42, %v13428_v0 }
 0x559   :  { %v13646_v26 = vadd.f32 %v5190_v7, %v5166_v51  ;;  %v5217_v17 = vpop.f32.mrf.mxu0  ;;  %v5242_v16 = vpop.f32.mrf.mxu1  ;;  %v5913_v7 = vsel %vm552_vm6, %v5908_v11, %v5912_v30 }
 0x55a   :  { %v5218_v49 = vadd.f32 %v5217_v17, %v13430_v39 }
 0x55c   :  { %v13649_v56 = vadd.f32 %v5242_v16, %v5218_v49 }
 0x55e   :  { %v5167_v18 = vpop.f32.mrf.mxu2  ;;  %v5192_v24 = vpop.f32.mrf.mxu3 }
 0x55f   :  { %v5168_v40 = vadd.f32 %v5167_v18, %v13456_v9  ;;  %v5902_v9 = vrot.slane %v12619_v43, 1 }
 0x561   :  { %v13652_v35 = vadd.f32 %v5192_v24, %v5168_v40  ;;  %v5220_v63 = vpop.f32.mrf.mxu0  ;;  %v5245_v4 = vpop.f32.mrf.mxu1 }
 0x563   :  { %5815 = vmatmul.bf16.gmra.mxu2 %v12898_v5  ;;  %5840 = vmatmul.bf16.gmra.mxu3 %v12902_v33 }
 0x564   :  { %5865 = vmatmul.bf16.gmra.mxu0 %v12898_v5  ;;  %5890 = vmatmul.bf16.gmra.mxu1 %v12902_v33  ;;  %v5904_v5 = vsel %vm552_vm6, %v5902_v9, %v5903_v22  ;;  %v5907_v33 = vsel %vm552_vm6, %v5905_v14, %v5906_v41 }
 0x566   :  { %v5170_v0 = vpop.f32.mrf.mxu2  ;;  %v5195_v39 = vpop.f32.mrf.mxu3 }
 0x567   :  { %v5922_v0 = vrot.slane %v12842_v27, 1 }
 0x569   :  { %v5221_v50 = vpop.f32.mrf.mxu0  ;;  %v5246_v32 = vpop.f32.mrf.mxu1 }
 0x56e   :  { %v5171_v47 = vpop.f32.mrf.mxu2  ;;  %v5196_v10 = vpop.f32.mrf.mxu3 }
 0x571   :  { %v5508_v31 = vpop.f32.mrf.mxu0  ;;  %v5533_v53 = vpop.f32.mrf.mxu1 }
 0x572   :  { %v5534_v54 = vadd.f32 %v5533_v53, %v5508_v31 }
 0x573   :  { %6133 = vmatmul.bf16.vlgmr.msrb.gmra.mxu2 %v5904_v5  ;;  %6158 = vmatmul.bf16.vlgmr.msrb.gmra.mxu3 %v5907_v33 }
 0x574   :  { %v13665_v48 = vadd.f32 %v5534_v54, %v13513_v58  ;;  %6183 = vmatmul.bf16.vlgmr.msrb.gmra.mxu0 %v5904_v5  ;;  %6208 = vmatmul.bf16.vlgmr.msrb.gmra.mxu1 %v5907_v33  ;;  %v5910_v58 = vrot.slane %v12954_v36, 1 }
 0x576   :  { %v5458_v43 = vpop.f32.mrf.mxu2  ;;  %v5483_v52 = vpop.f32.mrf.mxu3  ;;  %v5911_v12 = vsel %vm552_vm6, %v5906_v41, %v5910_v58 }
 0x577   :  { %v5484_v1 = vadd.f32 %v5483_v52, %v5458_v43 }
 0x579   :  { %v13668_v13 = vadd.f32 %v5484_v1, %v13542_v6  ;;  %v5510_v25 = vpop.f32.mrf.mxu0  ;;  %v5535_v60 = vpop.f32.mrf.mxu1  ;;  %v5909_v6 = vsel %vm552_vm6, %v5903_v22, %v5908_v11 }
 0x57a   :  { %v5536_v57 = vadd.f32 %v5535_v60, %v5510_v25 }
 0x57c   :  { %v13671_v45 = vadd.f32 %v5536_v57, %v13545_v44 }
 0x57e   :  { %v5460_v46 = vpop.f32.mrf.mxu2  ;;  %v5485_v3 = vpop.f32.mrf.mxu3 }
 0x57f   :  { %v5486_v55 = vadd.f32 %v5485_v3, %v5460_v46 }
 0x581   :  { %v13676_v23 = vadd.f32 %v5486_v55, %v13572_v38  ;;  %v5513_v34 = vpop.f32.mrf.mxu0  ;;  %v5538_v62 = vpop.f32.mrf.mxu1  ;;  %v5914_v38 = vrot.slane %v12621_v15, 1 }
 0x583   :  { %6138 = vmatmul.bf16.gmra.mxu2 %v5909_v6  ;;  %6163 = vmatmul.bf16.gmra.mxu3 %v5911_v12  ;;  %v5915_v19 = vsel %vm552_vm6, %v5910_v58, %v5914_v38 }
 0x584   :  { %6188 = vmatmul.bf16.gmra.mxu0 %v5909_v6  ;;  %6213 = vmatmul.bf16.gmra.mxu1 %v5911_v12 }
 0x586   :  { %v5463_v44 = vpop.f32.mrf.mxu2  ;;  %v5488_v2 = vpop.f32.mrf.mxu3 }
 0x589   :  { %v5514_v61 = vpop.f32.mrf.mxu0  ;;  %v5539_v59 = vpop.f32.mrf.mxu1 }
 0x58e   :  { %v5464_v29 = vpop.f32.mrf.mxu2  ;;  %v5489_v36 = vpop.f32.mrf.mxu3 }
 0x591   :  { %v5516_v20 = vpop.f32.mrf.mxu0  ;;  %v5541_v8 = vpop.f32.mrf.mxu1 }
 0x592   :  { %v5542_v42 = vadd.f32 %v5541_v8, %v5516_v20 }
 0x593   :  { %6141 = vmatmul.bf16.gmra.mxu2 %v5913_v7  ;;  %6166 = vmatmul.bf16.gmra.mxu3 %v5915_v19 }
 0x594   :  { %v13685_v51 = vadd.f32 %v5542_v42, %v13629_v37  ;;  %6191 = vmatmul.bf16.gmra.mxu0 %v5913_v7  ;;  %6216 = vmatmul.bf16.gmra.mxu1 %v5915_v19  ;;  %v5923_v37 = vrot.slane %v12846_v28, 1  ;;  %v8028_v7 = vld [vmem:[%s13748_s4 + $0x4] sm:$0x3]  ;;  %s9405_s4 = smov [#allocation5]  }
 0x595   :  { %s6267_s27 = sshll.u32 %s9405_s4, 4  ;;  %s6268_s27 = int_to_ptr.vmem [resolvable:$true] %s6267_s27 }
 0x596   :  { %v5466_v17 = vpop.f32.mrf.mxu2  ;;  %v5491_v16 = vpop.f32.mrf.mxu3  ;;  %v5930_v10 = vsel %vm552_vm6, %v5914_v38, %v5923_v37 }
 0x597   :  { %v5492_v49 = vadd.f32 %v5491_v16, %v5466_v17 }
 0x599   :  { %v13688_v21 = vadd.f32 %v5492_v49, %v13646_v26  ;;  %v5518_v15 = vpop.f32.mrf.mxu0  ;;  %v5543_v18 = vpop.f32.mrf.mxu1  ;;  %v5926_v26 = vsel %vm552_vm6, %v5912_v30, %v5922_v0 }
 0x59a   :  { %v5544_v24 = vadd.f32 %v5543_v18, %v5518_v15  ;;  %v13716_v15 = vperm.slane %v8028_v7, 1 }
 0x59c   :  { %v13691_v40 = vadd.f32 %v5544_v24, %v13649_v56 }
 0x59e   :  { %v5468_v63 = vpop.f32.mrf.mxu2  ;;  %v5493_v4 = vpop.f32.mrf.mxu3 }
 0x59f   :  { %v5494_v39 = vadd.f32 %v5493_v4, %v5468_v63 }
 0x5a1   :  { %v13696_v50 = vadd.f32 %v5494_v39, %v13652_v35  ;;  %v5521_v32 = vpop.f32.mrf.mxu0  ;;  %v5546_v47 = vpop.f32.mrf.mxu1 }
 0x5a2   :  { %v13720_v47 = vperm.slane %v8028_v7, 0 }
 0x5a3   :  { %6146 = vmatmul.bf16.gmra.mxu2 %v5926_v26  ;;  %6171 = vmatmul.bf16.gmra.mxu3 %v5930_v10 }
 0x5a4   :  { %6196 = vmatmul.bf16.gmra.mxu0 %v5926_v26  ;;  %6221 = vmatmul.bf16.gmra.mxu1 %v5930_v10 }
 0x5a6   :  { %v5471_v56 = vpop.f32.mrf.mxu2  ;;  %v5496_v9 = vpop.f32.mrf.mxu3 }
 0x5a9   :  { %v5522_v22 = vpop.f32.mrf.mxu0  ;;  %v5547_v27 = vpop.f32.mrf.mxu1 }
 0x5ae   :  { %v5472_v14 = vpop.f32.mrf.mxu2  ;;  %v5497_v28 = vpop.f32.mrf.mxu3 }
 0x5b1   :  { %v5853_v41 = vpop.f32.mrf.mxu0  ;;  %v5878_v31 = vpop.f32.mrf.mxu1 }
 0x5b2   :  { %v5879_v20 = vadd.f32 %v5878_v31, %v5853_v41 }
 0x5b4   :  { %v5895_v16 = vadd.f32 %v5879_v20, %v13665_v48 }
 0x5b6   :  { %v5803_v35 = vpop.f32.mrf.mxu2  ;;  %v5828_v53 = vpop.f32.mrf.mxu3 }
 0x5b7   :  { %v5829_v18 = vadd.f32 %v5828_v53, %v5803_v35 }
 0x5b9   :  { %v5855_v54 = vpop.f32.mrf.mxu0  ;;  %v5880_v5 = vpop.f32.mrf.mxu1  ;;  %v5894_v39 = vadd.f32 %v5829_v18, %v13668_v13 }
 0x5ba   :  { %v5881_v63 = vadd.f32 %v5880_v5, %v5855_v54 }
 0x5bc   :  { %v5897_v48 = vadd.f32 %v5881_v63, %v13671_v45 }
 0x5be   :  { %v5805_v33 = vpop.f32.mrf.mxu2  ;;  %v5830_v43 = vpop.f32.mrf.mxu3 }
 0x5bf   :  { %v5831_v27 = vadd.f32 %v5830_v43, %v5805_v33 }
 0x5c1   :  { %v5858_v52 = vpop.f32.mrf.mxu0  ;;  %v5883_v1 = vpop.f32.mrf.mxu1  ;;  %v5896_v53 = vadd.f32 %v5831_v27, %v13676_v23 }
 0x5c6   :  { %v5808_v25 = vpop.f32.mrf.mxu2  ;;  %v5833_v60 = vpop.f32.mrf.mxu3 }
 0x5c9   :  { %v5859_v57 = vpop.f32.mrf.mxu0  ;;  %v5884_v46 = vpop.f32.mrf.mxu1 }
 0x5ce   :  { %v5809_v3 = vpop.f32.mrf.mxu2  ;;  %v5834_v11 = vpop.f32.mrf.mxu3 }
 0x5d1   :  { %v5861_v58 = vpop.f32.mrf.mxu0  ;;  %v5886_v55 = vpop.f32.mrf.mxu1 }
 0x5d2   :  { %v5887_v3 = vadd.f32 %v5886_v55, %v5861_v58 }
 0x5d6   :  { %v13700_v34 = vpop.f32.mrf.mxu2  ;;  %v13702_v62 = vpop.f32.mrf.mxu3 }
 0x5d9   :  { %v13704_v6 = vpop.f32.mrf.mxu0  ;;  %v13706_v12 = vpop.f32.mrf.mxu1 }
 0x5da   :  { %v5889_v20 = vadd.f32 %v13706_v12, %v13704_v6 }
 0x5de   :  { %v13708_v44 = vpop.f32.mrf.mxu2  ;;  %v13710_v2 = vpop.f32.mrf.mxu3 }
 0x5e1   :  { %v5866_v61 = vpop.f32.mrf.mxu0  ;;  %v5891_v59 = vpop.f32.mrf.mxu1 }
 0x5e6   :  { %v5816_v29 = vpop.f32.mrf.mxu2  ;;  %v5841_v36 = vpop.f32.mrf.mxu3 }
 0x5e7   :  { %v5899_v29 = vadd.f32 %v5887_v3, %v13685_v51  ;;  %v5901_v51 = vadd.f32 %v5889_v20, %v13691_v40 }
 0x5e9   :  { %v5867_v30 = vpop.f32.mrf.mxu0  ;;  %v5892_v38 = vpop.f32.mrf.mxu1 }
 0x5ea   :  { %v5837_v30 = vadd.f32 %v13702_v62, %v13700_v34  ;;  %v5839_v34 = vadd.f32 %v13710_v2, %v13708_v44 }
 0x5ec   :  { %v5898_v58 = vadd.f32 %v5837_v30, %v13688_v21 }
 0x5ee   :  { %v5817_v8 = vpop.f32.mrf.mxu2  ;;  %v5842_v42 = vpop.f32.mrf.mxu3 }
 0x5f1   :  { %v6184_v19 = vpop.f32.mrf.mxu0  ;;  %v6209_v17 = vpop.f32.mrf.mxu1 }
 0x5f2   :  { %v6210_v49 = vadd.f32 %v6209_v17, %v6184_v19 }
 0x5f4   :  { %v6226_v24 = vadd.f32 %v6210_v49, %v5895_v16 }
 0x5f6   :  { %v6239_v4 = vadd.f32 %v13716_v15, %v6226_v24  ;;  %v6134_v0 = vpop.f32.mrf.mxu2  ;;  %v6159_v37 = vpop.f32.mrf.mxu3 }
 0x5f7   :  { %v6160_v32 = vadd.f32 %v6159_v37, %v6134_v0 }
 0x5f8   :  { %v6247_v26 = vmax.f32 %v6239_v4, 0.0  ;;  %v5900_v4 = vadd.f32 %v5839_v34, %v13696_v50 }
 0x5f9   :  { %v6225_v10 = vadd.f32 %v6160_v32, %v5894_v39  ;;  %v6186_v56 = vpop.f32.mrf.mxu0  ;;  %v6211_v9 = vpop.f32.mrf.mxu1 }
 0x5fa   :  { %6255 = vst [vmem:[#allocation5 + $0x8] sm:$0xff] %v6247_v26  ;;  %v6212_v22 = vadd.f32 %v6211_v9, %v6186_v56 }
 0x5fb   :  { %v6238_v14 = vadd.f32 %v13720_v47, %v6225_v10 }
 0x5fc   :  { %v6228_v28 = vadd.f32 %v6212_v22, %v5897_v48 }
 0x5fd   :  { %v6246_v41 = vmax.f32 %v6238_v14, 0.0 }
 0x5fe   :  { %v6241_v31 = vadd.f32 %v13716_v15, %v6228_v28  ;;  %v6136_v35 = vpop.f32.mrf.mxu2  ;;  %v6161_v13 = vpop.f32.mrf.mxu3 }
 0x5ff   :  { %6254 = vst [vmem:[#allocation5] sm:$0xff] %v6246_v41  ;;  %v6162_v54 = vadd.f32 %v6161_v13, %v6136_v35 }
 0x600   :  { %v6249_v5 = vmax.f32 %v6241_v31, 0.0 }
 0x601   :  { %v6227_v52 = vadd.f32 %v6162_v54, %v5896_v53  ;;  %v6189_v1 = vpop.f32.mrf.mxu0  ;;  %v6214_v25 = vpop.f32.mrf.mxu1 }
 0x602   :  { %6257 = vst [vmem:[#allocation5 + $0x18] sm:$0xff] %v6249_v5 }
 0x603   :  { %v6240_v45 = vadd.f32 %v13720_v47, %v6227_v52 }
 0x605   :  { %v6248_v33 = vmax.f32 %v6240_v45, 0.0 }
 0x606   :  { %v6139_v43 = vpop.f32.mrf.mxu2  ;;  %v6164_v60 = vpop.f32.mrf.mxu3 }
 0x607   :  { %6256 = vst [vmem:[#allocation5 + $0x10] sm:$0xff] %v6248_v33 }
 0x609   :  { %v6190_v57 = vpop.f32.mrf.mxu0  ;;  %v6215_v46 = vpop.f32.mrf.mxu1 }
 0x60e   :  { %v6140_v11 = vpop.f32.mrf.mxu2  ;;  %v6165_v61 = vpop.f32.mrf.mxu3 }
 0x611   :  { %v6192_v59 = vpop.f32.mrf.mxu0  ;;  %v6217_v23 = vpop.f32.mrf.mxu1 }
 0x612   :  { %v6218_v36 = vadd.f32 %v6217_v23, %v6192_v59 }
 0x614   :  { %v6230_v38 = vadd.f32 %v6218_v36, %v5899_v29 }
 0x616   :  { %v6243_v8 = vadd.f32 %v13716_v15, %v6230_v38  ;;  %v6142_v42 = vpop.f32.mrf.mxu2  ;;  %v6167_v7 = vpop.f32.mrf.mxu3 }
 0x617   :  { %v6168_v55 = vadd.f32 %v6167_v7, %v6142_v42 }
 0x618   :  { %v6251_v19 = vmax.f32 %v6243_v8, 0.0 }
 0x619   :  { %v6229_v17 = vadd.f32 %v6168_v55, %v5898_v58  ;;  %v6194_v16 = vpop.f32.mrf.mxu0  ;;  %v6219_v49 = vpop.f32.mrf.mxu1 }
 0x61a   :  { %6260 = vst [vmem:[#allocation5 + $0x28] sm:$0xff] %v6251_v19  ;;  %v6220_v18 = vadd.f32 %v6219_v49, %v6194_v16 }
 0x61b   :  { %v6242_v62 = vadd.f32 %v13720_v47, %v6229_v17 }
 0x61c   :  { %v6232_v6 = vadd.f32 %v6220_v18, %v5901_v51 }
 0x61d   :  { %v6250_v12 = vmax.f32 %v6242_v62, 0.0 }
 0x61e   :  { %v6245_v24 = vadd.f32 %v13716_v15, %v6232_v6  ;;  %v6144_v63 = vpop.f32.mrf.mxu2  ;;  %v6169_v21 = vpop.f32.mrf.mxu3 }
 0x61f   :  { %6259 = vst [vmem:[#allocation5 + $0x20] sm:$0xff] %v6250_v12  ;;  %v6170_v0 = vadd.f32 %v6169_v21, %v6144_v63 }
 0x620   :  { %v6253_v37 = vmax.f32 %v6245_v24, 0.0 }
 0x621   :  { %v6231_v39 = vadd.f32 %v6170_v0, %v5900_v4  ;;  %v6197_v40 = vpop.f32.mrf.mxu0  ;;  %v6222_v32 = vpop.f32.mrf.mxu1 }
 0x622   :  { %6262 = vst [vmem:[#allocation5 + $0x38] sm:$0xff] %v6253_v37 }
 0x623   :  { %v6244_v44 = vadd.f32 %v13720_v47, %v6231_v39 }
 0x625   :  { %v6252_v2 = vmax.f32 %v6244_v44, 0.0 }
 0x626   :  { %v6147_v15 = vpop.f32.mrf.mxu2  ;;  %v6172_v50 = vpop.f32.mrf.mxu3 }
 0x627   :  { %6261 = vst [vmem:[#allocation5 + $0x30] sm:$0xff] %v6252_v2 }
 0x628   :  { %6275 = dma.vmem_to_hbm [thread:$0]  %s6268_s27, 1024, %s6270_s29, [#allocation6], %s9406_s30, %s9406_s30, %s9407_s6  }
 0x629   :  { %v6198_v26 = vpop.f32.mrf.mxu0  ;;  %v6223_v10 = vpop.f32.mrf.mxu1 }
 0x62e   :  { %v6148_v56 = vpop.f32.mrf.mxu2  ;;  %v6173_v9 = vpop.f32.mrf.mxu3 }
 0x62f   :  { %9402 = dma.done.wait [#allocation6], 1024  }
 0x630   :  { %9403 = vsyncadd [#allocation6], 4294966272 }
 0x631   :  { %6280 = vsyncpa [#allocation6], 1 }

</bundles_post_ra>
